<compile_context>
chip_gen: v7x
topology: tpu7x:2x2x1
jax: 0.10.0
libtpu: 0.0.40
codegen_flags: <defaults>
</compile_context>

<pallas_src>
import functools

import jax
import jax.numpy as jnp
from jax import lax
from jax.experimental import pallas as pl
from jax.experimental.pallas import tpu as pltpu


KSIZE = 3                       # Conv1d kernel size (all encoder layers)
PADS = (1, 1, 1, 2)             # Conv1d paddings of the 4 encoder layers
CHANNELS = (1, 8, 16, 32, 64)   # channel progression of the encoder
NUM_HEADS = 4


def _layer_geometry(L):
    """Static (L_in, pad, L_pad, L_conv, L_out) per encoder stage."""
    geo = []
    Lc = L
    for pad in PADS:
        L_pad = Lc + 2 * pad
        L_conv = L_pad - (KSIZE - 1)
        L_out = L_conv // 2
        geo.append((Lc, pad, L_pad, L_conv, L_out))
        Lc = L_out
    return tuple(geo)


# --------------------------- fused forward kernel ---------------------------

def _fused_kernel(xT_ref,
                  c0w_ref, c0b_ref, c1w_ref, c1b_ref,
                  c2w_ref, c2b_ref, c3w_ref, c3b_ref,
                  wqk_ref, bqk_ref, wv_ref, bv_ref, wo_ref, bo_ref,
                  w1p_ref, b1_ref, w2_ref, b2_ref, w3_ref, b3_ref,
                  o_ref,
                  xp0, yc0, xp1, yc1, xp2, yc2, xp3, yc3, ct_ref,
                  *, geo, num_heads):
    """xT_ref: (B, L, 1) input signal, length on sublanes.
       c*w_ref: (K, C_in, C_out) conv weights (layer 0 f32, rest bf16), c*b_ref: (1, C_out) f32.
       wqk_ref: (E, 2E) bf16, wv_ref/wo_ref: (E, E) bf16, biases f32.
       w1p_ref: (E, S, H2) bf16 (clf W1 pre-permuted), w2/w3: bf16, biases f32.
       o_ref: (B, n_classes) softmax probabilities.
       xp*/yc*: batch-stacked padded conv input / conv+ReLU output scratch per layer.
       ct_ref: (B*E, S) per-head attention contexts / attention output."""
    B = xT_ref.shape[0]
    E = wo_ref.shape[0]                   # latent (embed) dim
    S = ct_ref.shape[1]                   # tokens = final conv channels
    Dh = E // num_heads
    scale = 1.0 / float(Dh) ** 0.5
    f32, bf16 = jnp.float32, jnp.bfloat16

    # ---------------- CNN encoder: 4 x (Conv1d + ReLU + MaxPool1d(2,2)), batch-folded ----------------
    # Activations keep length on SUBLANES and channels on LANES; both batch elements
    # are stacked along sublanes so each conv tap is one matmul (or one VPU
    # multiply-add for the C_in=1 first layer) shared by the whole batch.
    layers = ((c0w_ref, c0b_ref, xp0, yc0),
              (c1w_ref, c1b_ref, xp1, yc1),
              (c2w_ref, c2b_ref, xp2, yc2),
              (c3w_ref, c3b_ref, xp3, yc3))

    pooled = [xT_ref[b] for b in range(B)]          # per-batch (L_in, C_in) activations

    for li, (w_ref, b_ref, xp_ref, yc_ref) in enumerate(layers):
        L_in, pad, L_pad, L_conv, L_out = geo[li]
        c_in = xp_ref.shape[1]
        R_conv = B * L_pad - (KSIZE - 1)            # rows produced by the shifted-dot accumulation

        # Zero only the pad rows; interior rows are fully overwritten right after.
        for b in range(B):
            base = b * L_pad
            xp_ref[pl.ds(base, pad), :] = jnp.zeros((pad, c_in), f32)
            xp_ref[pl.ds(base + pad + L_in, pad), :] = jnp.zeros((pad, c_in), f32)
            xp_ref[pl.ds(base + pad, L_in), :] = pooled[b]

        if li == 0:
            # C_in == 1: conv as a VPU broadcast multiply-add -- no MXU passes.
            acc = xp_ref[pl.ds(0, R_conv), :] * w_ref[0]
            for k in range(1, KSIZE):
                acc = acc + xp_ref[pl.ds(k, R_conv), :] * w_ref[k]
        else:
            # One (B*L_conv-ish, C_in) @ (C_in, C_out) MXU dot per tap, same accumulator.
            acc = jnp.dot(xp_ref[pl.ds(0, R_conv), :].astype(bf16), w_ref[0],
                          preferred_element_type=f32)
            for k in range(1, KSIZE):
                acc = acc + jnp.dot(xp_ref[pl.ds(k, R_conv), :].astype(bf16), w_ref[k],
                                    preferred_element_type=f32)

        # bias + ReLU staged through VMEM so MaxPool1d(2,2) is two sublane-strided
        # loads + an elementwise max.  Batch-seam rows are junk and never read.
        yc_ref[...] = jnp.maximum(acc + b_ref[...], 0.0)
        nxt = []
        for b in range(B):
            base = b * L_pad
            even = yc_ref[pl.ds(base, L_out, stride=2), :]
            odd = yc_ref[pl.ds(base + 1, L_out, stride=2), :]
            nxt.append(jnp.maximum(even, odd))      # (L_out, C_out)
        pooled = nxt

    # After layer 3: pooled[b] = (E, S) = encoder output transposed (features x tokens).

    # ---------------- Multi-head self-attention (feature-major / transposed form) ----------------
    XT = jnp.concatenate(pooled, axis=1)             # (E, B*S)
    X = XT.T                                         # (B*S, E) -- single in-kernel transpose
    qk = (jnp.dot(X.astype(bf16), wqk_ref[...], preferred_element_type=f32)
          + bqk_ref[...])                            # (B*S, 2E)  [q | k], token-major
    vT = (jnp.dot(wv_ref[...], XT.astype(bf16), preferred_element_type=f32)
          + bv_ref[...])                             # (E, B*S)   values, feature-major

    # TODO(synk): attention dropout (p=0.3) is a train-time stochastic op; eval path implemented.
    for h in range(num_heads):
        c0 = h * Dh
        qh = (qk[:, c0:c0 + Dh] * scale).astype(bf16)            # (B*S, Dh)
        kh = qk[:, E + c0:E + c0 + Dh].astype(bf16)              # (B*S, Dh)
        vTh = vT[c0:c0 + Dh, :]                                  # (Dh, B*S)
        for b in range(B):
            r0 = b * S
            qhb = qh[r0:r0 + S, :]
            khb = kh[r0:r0 + S, :]
            vThb = vTh[:, r0:r0 + S].astype(bf16)                # (Dh, S)
            s = lax.dot_general(qhb, khb, (((1,), (1,)), ((), ())),
                                preferred_element_type=f32)      # (S, S) = q @ k^T
            s = s - jnp.max(s, axis=-1, keepdims=True)
            p = jnp.exp(s)
            p = p * pl.reciprocal(jnp.sum(p, axis=-1, keepdims=True), approx=True)
            ctxT = lax.dot_general(vThb, p.astype(bf16), (((1,), (1,)), ((), ())),
                                   preferred_element_type=f32)   # (Dh, S) = v^T @ p^T
            ct_ref[pl.ds(b * E + c0, Dh), :] = ctxT              # contiguous per-head store

    # attention out-projection, per batch, in place in the (B*E, S) ctx scratch
    for b in range(B):
        ctxT_b = ct_ref[pl.ds(b * E, E), :]                      # (E, S)
        ct_ref[pl.ds(b * E, E), :] = (
            jnp.dot(wo_ref[...], ctxT_b.astype(bf16), preferred_element_type=f32)
            + bo_ref[...])

    # ---------------- classifier: Linear -> ReLU -> Linear -> ReLU -> Linear -> softmax ----------------
    # First Linear (in_features = S*E) is a contraction over (token, feature) done as
    # E accumulating dots over the token axis -- the (B, S*E) flatten is never built.
    acc = jnp.dot(ct_ref[pl.ds(0, B, stride=E), :].astype(bf16), w1p_ref[0],
                  preferred_element_type=f32)                    # (B, H2)
    for e in range(1, E):
        rows = ct_ref[pl.ds(e, B, stride=E), :]                  # (B, S): feature e, both batches
        acc = acc + jnp.dot(rows.astype(bf16), w1p_ref[e], preferred_element_type=f32)
    h1 = jnp.maximum(acc + b1_ref[...], 0.0)
    h2 = jnp.maximum(jnp.dot(h1.astype(bf16), w2_ref[...], preferred_element_type=f32)
                     + b2_ref[...], 0.0)
    logits = (jnp.dot(h2.astype(bf16), w3_ref[...], preferred_element_type=f32)
              + b3_ref[...])
    logits = logits - jnp.max(logits, axis=-1, keepdims=True)
    ex = jnp.exp(logits)
    # exact normalization for the final probabilities (approx reciprocal only in attention)
    o_ref[...] = ex / jnp.sum(ex, axis=-1, keepdims=True)


# --------------------- Parameter construction (deterministic, PyTorch layouts) ---------------------

def init_params(key, latent_dim, hidden_shape, output_clf_shape):
    ks = iter(jax.random.split(key, 32))

    def nrm(shape, s):
        return s * jax.random.normal(next(ks), shape, jnp.float32)

    p = {}
    conv_shapes = [(8, 1, 3), (16, 8, 3), (32, 16, 3), (64, 32, 3)]   # (C_out, C_in, K)
    for i, shp in enumerate(conv_shapes):
        p[f"conv{i}_w"] = nrm(shp, 0.3)
        p[f"conv{i}_b"] = nrm((shp[0],), 0.05)
    E = latent_dim
    p["attn_in_proj_w"] = nrm((3 * E, E), 0.3)       # nn.MultiheadAttention.in_proj_weight
    p["attn_in_proj_b"] = nrm((3 * E,), 0.05)
    p["attn_out_proj_w"] = nrm((E, E), 0.3)
    p["attn_out_proj_b"] = nrm((E,), 0.05)
    F = CHANNELS[-1] * E
    H2, H1 = hidden_shape * 2, hidden_shape
    p["clf_w1"] = nrm((H2, F), 0.05)                 # nn.Linear weights are (out, in)
    p["clf_b1"] = nrm((H2,), 0.05)
    p["clf_w2"] = nrm((H1, H2), 0.1)
    p["clf_b2"] = nrm((H1,), 0.05)
    p["clf_w3"] = nrm((output_clf_shape, H1), 0.1)
    p["clf_b3"] = nrm((output_clf_shape,), 0.05)
    return p


# --------------------- Full forward pass (single pallas_call) ---------------------

def cnn_attention_classifier(x, params, num_heads=NUM_HEADS):
    """x: (B, 1, L) -> (B, n_classes) softmax probabilities, one fused Pallas kernel."""
    x = x.astype(jnp.float32)
    B, _, L = x.shape
    E = params["attn_out_proj_w"].shape[0]
    S = CHANNELS[-1]
    geo = _layer_geometry(L)
    assert geo[-1][-1] == E, (geo, E)

    bf16 = jnp.bfloat16
    xT = jnp.transpose(x, (0, 2, 1))                              # (B, L, 1): length -> sublanes

    args = [xT]
    # conv weights: (C_out, C_in, K) -> (K, C_in, C_out); layer 0 stays f32 (VPU path)
    for i in range(4):
        w = jnp.transpose(params[f"conv{i}_w"], (2, 1, 0))
        args.append(w if i == 0 else w.astype(bf16))
        args.append(params[f"conv{i}_b"].reshape(1, -1))

    wi, bi = params["attn_in_proj_w"], params["attn_in_proj_b"]   # (3E, E), (3E,)
    wqk = jnp.concatenate([wi[0:E].T, wi[E:2 * E].T], axis=1).astype(bf16)   # (E, 2E)
    bqk = bi[0:2 * E].reshape(1, -1)                              # (1, 2E)
    wv = wi[2 * E:3 * E].astype(bf16)                             # (E, E), used as vT = Wv @ XT
    bv = bi[2 * E:3 * E].reshape(-1, 1)                           # (E, 1)
    wo = params["attn_out_proj_w"].astype(bf16)                   # (E, E): attn_outT = Wo @ ctxT
    bo = params["attn_out_proj_b"].reshape(-1, 1)                 # (E, 1)
    args += [wqk, bqk, wv, bv, wo, bo]

    H2 = params["clf_w1"].shape[0]
    # Flatten(start_dim=1) index is s*E + e  ->  pre-permute clf_w1 into per-feature
    # (E, S, H2) blocks so the kernel never materializes the (B, S*E) flatten.
    w1p = jnp.transpose(params["clf_w1"].reshape(H2, S, E), (2, 1, 0)).astype(bf16)
    args += [w1p, params["clf_b1"].reshape(1, -1),
             params["clf_w2"].T.astype(bf16), params["clf_b2"].reshape(1, -1),
             params["clf_w3"].T.astype(bf16), params["clf_b3"].reshape(1, -1)]

    # per-layer VMEM scratch: batch-stacked padded conv input + conv/ReLU output,
    # plus the (B*E, S) attention context / attention output scratch.
    scratch = []
    for (L_in, pad, L_pad, L_conv, L_out), c_in, c_out in zip(geo, CHANNELS[:-1], CHANNELS[1:]):
        scratch.append(pltpu.VMEM((B * L_pad, c_in), jnp.float32))
        scratch.append(pltpu.VMEM((B * L_pad - (KSIZE - 1), c_out), jnp.float32))
    scratch.append(pltpu.VMEM((B * E, S), jnp.float32))

    n_out = params["clf_w3"].shape[0]
    return pl.pallas_call(
        functools.partial(_fused_kernel, geo=geo, num_heads=num_heads),
        out_shape=jax.ShapeDtypeStruct((B, n_out), jnp.float32),
        scratch_shapes=scratch,
    )(*args)


if __name__ == "__main__":
    key = jax.random.PRNGKey(0)
    k_x, k_p = jax.random.split(key)

    # small, consistent scale: batch=2, in_channels=1, length=240 -> latent 16,
    # hidden_shape=32, output_clf_shape=5
    latent_dim = 16
    hidden_shape = 32
    output_clf_shape = 5
    x = jax.random.normal(k_x, (2, 1, 240), jnp.float32)
    params = init_params(k_p, latent_dim, hidden_shape, output_clf_shape)

    fwd = jax.jit(functools.partial(cnn_attention_classifier, num_heads=NUM_HEADS))
    out = jax.block_until_ready(fwd(x, params))

    assert out.shape == (2, output_clf_shape), out.shape
    assert out.dtype == jnp.float32
    assert bool(jnp.all(jnp.isfinite(out)))
    assert bool(jnp.all(out >= 0.0))
    assert bool(jnp.all(jnp.abs(jnp.sum(out, axis=-1) - 1.0) < 1e-3))
    print("KERNEL_OK")
</pallas_src>

<mosaic_0001>
module attributes {stable_mosaic.version = 11 : i64} {
  func.func @_fused_kernel(%arg0: memref<2x240x1xf32, #tpu.memory_space<vmem>>, %arg1: memref<3x1x8xf32, #tpu.memory_space<vmem>>, %arg2: memref<1x8xf32, #tpu.memory_space<vmem>>, %arg3: memref<3x8x16xbf16, #tpu.memory_space<vmem>>, %arg4: memref<1x16xf32, #tpu.memory_space<vmem>>, %arg5: memref<3x16x32xbf16, #tpu.memory_space<vmem>>, %arg6: memref<1x32xf32, #tpu.memory_space<vmem>>, %arg7: memref<3x32x64xbf16, #tpu.memory_space<vmem>>, %arg8: memref<1x64xf32, #tpu.memory_space<vmem>>, %arg9: memref<16x32xbf16, #tpu.memory_space<vmem>>, %arg10: memref<1x32xf32, #tpu.memory_space<vmem>>, %arg11: memref<16x16xbf16, #tpu.memory_space<vmem>>, %arg12: memref<16x1xf32, #tpu.memory_space<vmem>>, %arg13: memref<16x16xbf16, #tpu.memory_space<vmem>>, %arg14: memref<16x1xf32, #tpu.memory_space<vmem>>, %arg15: memref<16x64x64xbf16, #tpu.memory_space<vmem>>, %arg16: memref<1x64xf32, #tpu.memory_space<vmem>>, %arg17: memref<64x32xbf16, #tpu.memory_space<vmem>>, %arg18: memref<1x32xf32, #tpu.memory_space<vmem>>, %arg19: memref<32x5xbf16, #tpu.memory_space<vmem>>, %arg20: memref<1x5xf32, #tpu.memory_space<vmem>>, %arg21: memref<2x5xf32, #tpu.memory_space<vmem>>, %arg22: memref<484x1xf32, #tpu.memory_space<vmem>>, %arg23: memref<482x8xf32, #tpu.memory_space<vmem>>, %arg24: memref<244x8xf32, #tpu.memory_space<vmem>>, %arg25: memref<242x16xf32, #tpu.memory_space<vmem>>, %arg26: memref<124x16xf32, #tpu.memory_space<vmem>>, %arg27: memref<122x32xf32, #tpu.memory_space<vmem>>, %arg28: memref<68x32xf32, #tpu.memory_space<vmem>>, %arg29: memref<66x64xf32, #tpu.memory_space<vmem>>, %arg30: memref<32x64xf32, #tpu.memory_space<vmem>>) attributes {dimension_semantics = [], scalar_prefetch = 0 : i64, scratch_operands = 9 : i64, tpu.core_type = #tpu.core_type<tc>} {
    %c0 = arith.constant 0 : index
    %c0_0 = arith.constant 0 : index
    %c0_1 = arith.constant 0 : index
    %0 = vector.load %arg0[%c0, %c0_0, %c0_1] : memref<2x240x1xf32, #tpu.memory_space<vmem>>, vector<1x240x1xf32>
    %1 = vector.shape_cast %0 : vector<1x240x1xf32> to vector<240x1xf32>
    %c1 = arith.constant 1 : index
    %c0_2 = arith.constant 0 : index
    %c0_3 = arith.constant 0 : index
    %2 = vector.load %arg0[%c1, %c0_2, %c0_3] : memref<2x240x1xf32, #tpu.memory_space<vmem>>, vector<1x240x1xf32>
    %3 = vector.shape_cast %2 : vector<1x240x1xf32> to vector<240x1xf32>
    %cst = arith.constant 0.000000e+00 : f32
    %4 = vector.broadcast %cst : f32 to vector<1x1xf32>
    %c0_4 = arith.constant 0 : index
    %c0_5 = arith.constant 0 : index
    %5 = vector.load %arg22[%c0_4, %c0_5] : memref<484x1xf32, #tpu.memory_space<vmem>>, vector<1x1xf32>
    tpu.vector_store %arg22[%c0_4, %c0_5], %4 {strides = array<i32>} : memref<484x1xf32, #tpu.memory_space<vmem>>, vector<1x1xf32>,
    %cst_6 = arith.constant 0.000000e+00 : f32
    %6 = vector.broadcast %cst_6 : f32 to vector<1x1xf32>
    %c241 = arith.constant 241 : index
    %c0_7 = arith.constant 0 : index
    %7 = vector.load %arg22[%c241, %c0_7] : memref<484x1xf32, #tpu.memory_space<vmem>>, vector<1x1xf32>
    tpu.vector_store %arg22[%c241, %c0_7], %6 {strides = array<i32>} : memref<484x1xf32, #tpu.memory_space<vmem>>, vector<1x1xf32>,
    %c1_8 = arith.constant 1 : index
    %c0_9 = arith.constant 0 : index
    %8 = vector.load %arg22[%c1_8, %c0_9] : memref<484x1xf32, #tpu.memory_space<vmem>>, vector<240x1xf32>
    tpu.vector_store %arg22[%c1_8, %c0_9], %1 {strides = array<i32>} : memref<484x1xf32, #tpu.memory_space<vmem>>, vector<240x1xf32>,
    %cst_10 = arith.constant 0.000000e+00 : f32
    %9 = vector.broadcast %cst_10 : f32 to vector<1x1xf32>
    %c242 = arith.constant 242 : index
    %c0_11 = arith.constant 0 : index
    %10 = vector.load %arg22[%c242, %c0_11] : memref<484x1xf32, #tpu.memory_space<vmem>>, vector<1x1xf32>
    tpu.vector_store %arg22[%c242, %c0_11], %9 {strides = array<i32>} : memref<484x1xf32, #tpu.memory_space<vmem>>, vector<1x1xf32>,
    %cst_12 = arith.constant 0.000000e+00 : f32
    %11 = vector.broadcast %cst_12 : f32 to vector<1x1xf32>
    %c483 = arith.constant 483 : index
    %c0_13 = arith.constant 0 : index
    %12 = vector.load %arg22[%c483, %c0_13] : memref<484x1xf32, #tpu.memory_space<vmem>>, vector<1x1xf32>
    tpu.vector_store %arg22[%c483, %c0_13], %11 {strides = array<i32>} : memref<484x1xf32, #tpu.memory_space<vmem>>, vector<1x1xf32>,
    %c243 = arith.constant 243 : index
    %c0_14 = arith.constant 0 : index
    %13 = vector.load %arg22[%c243, %c0_14] : memref<484x1xf32, #tpu.memory_space<vmem>>, vector<240x1xf32>
    tpu.vector_store %arg22[%c243, %c0_14], %3 {strides = array<i32>} : memref<484x1xf32, #tpu.memory_space<vmem>>, vector<240x1xf32>,
    %c0_15 = arith.constant 0 : index
    %c0_16 = arith.constant 0 : index
    %14 = vector.load %arg22[%c0_15, %c0_16] : memref<484x1xf32, #tpu.memory_space<vmem>>, vector<482x1xf32>
    %c0_17 = arith.constant 0 : index
    %c0_18 = arith.constant 0 : index
    %c0_19 = arith.constant 0 : index
    %15 = vector.load %arg1[%c0_17, %c0_18, %c0_19] : memref<3x1x8xf32, #tpu.memory_space<vmem>>, vector<1x1x8xf32>
    %16 = vector.shape_cast %15 : vector<1x1x8xf32> to vector<1x8xf32>
    %17 = vector.broadcast %14 : vector<482x1xf32> to vector<482x8xf32>
    %18 = vector.broadcast %16 : vector<1x8xf32> to vector<482x8xf32>
    %19 = arith.mulf %17, %18 : vector<482x8xf32>
    %c1_20 = arith.constant 1 : index
    %c0_21 = arith.constant 0 : index
    %20 = vector.load %arg22[%c1_20, %c0_21] : memref<484x1xf32, #tpu.memory_space<vmem>>, vector<482x1xf32>
    %c1_22 = arith.constant 1 : index
    %c0_23 = arith.constant 0 : index
    %c0_24 = arith.constant 0 : index
    %21 = vector.load %arg1[%c1_22, %c0_23, %c0_24] : memref<3x1x8xf32, #tpu.memory_space<vmem>>, vector<1x1x8xf32>
    %22 = vector.shape_cast %21 : vector<1x1x8xf32> to vector<1x8xf32>
    %23 = vector.broadcast %20 : vector<482x1xf32> to vector<482x8xf32>
    %24 = vector.broadcast %22 : vector<1x8xf32> to vector<482x8xf32>
    %25 = arith.mulf %23, %24 : vector<482x8xf32>
    %26 = arith.addf %19, %25 : vector<482x8xf32>
    %c2 = arith.constant 2 : index
    %c0_25 = arith.constant 0 : index
    %27 = vector.load %arg22[%c2, %c0_25] : memref<484x1xf32, #tpu.memory_space<vmem>>, vector<482x1xf32>
    %c2_26 = arith.constant 2 : index
    %c0_27 = arith.constant 0 : index
    %c0_28 = arith.constant 0 : index
    %28 = vector.load %arg1[%c2_26, %c0_27, %c0_28] : memref<3x1x8xf32, #tpu.memory_space<vmem>>, vector<1x1x8xf32>
    %29 = vector.shape_cast %28 : vector<1x1x8xf32> to vector<1x8xf32>
    %30 = vector.broadcast %27 : vector<482x1xf32> to vector<482x8xf32>
    %31 = vector.broadcast %29 : vector<1x8xf32> to vector<482x8xf32>
    %32 = arith.mulf %30, %31 : vector<482x8xf32>
    %33 = arith.addf %26, %32 : vector<482x8xf32>
    %c0_29 = arith.constant 0 : index
    %c0_30 = arith.constant 0 : index
    %34 = vector.load %arg2[%c0_29, %c0_30] : memref<1x8xf32, #tpu.memory_space<vmem>>, vector<1x8xf32>
    %35 = vector.broadcast %34 : vector<1x8xf32> to vector<482x8xf32>
    %36 = arith.addf %33, %35 : vector<482x8xf32>
    %cst_31 = arith.constant 0.000000e+00 : f32
    %37 = vector.broadcast %cst_31 : f32 to vector<482x8xf32>
    %38 = arith.maximumf %36, %37 : vector<482x8xf32>
    %c0_32 = arith.constant 0 : index
    %c0_33 = arith.constant 0 : index
    %39 = vector.load %arg23[%c0_32, %c0_33] : memref<482x8xf32, #tpu.memory_space<vmem>>, vector<482x8xf32>
    tpu.vector_store %arg23[%c0_32, %c0_33], %38 {strides = array<i32>} : memref<482x8xf32, #tpu.memory_space<vmem>>, vector<482x8xf32>,
    %c0_34 = arith.constant 0 : index
    %c0_35 = arith.constant 0 : index
    %40 = tpu.strided_load %arg23[%c0_34, %c0_35] {strides = array<i32: 2, 1>} : memref<482x8xf32, #tpu.memory_space<vmem>>, vector<120x8xf32>
    %c1_36 = arith.constant 1 : index
    %c0_37 = arith.constant 0 : index
    %41 = tpu.strided_load %arg23[%c1_36, %c0_37] {strides = array<i32: 2, 1>} : memref<482x8xf32, #tpu.memory_space<vmem>>, vector<120x8xf32>
    %42 = arith.maximumf %40, %41 : vector<120x8xf32>
    %c242_38 = arith.constant 242 : index
    %c0_39 = arith.constant 0 : index
    %43 = tpu.strided_load %arg23[%c242_38, %c0_39] {strides = array<i32: 2, 1>} : memref<482x8xf32, #tpu.memory_space<vmem>>, vector<120x8xf32>
    %c243_40 = arith.constant 243 : index
    %c0_41 = arith.constant 0 : index
    %44 = tpu.strided_load %arg23[%c243_40, %c0_41] {strides = array<i32: 2, 1>} : memref<482x8xf32, #tpu.memory_space<vmem>>, vector<120x8xf32>
    %45 = arith.maximumf %43, %44 : vector<120x8xf32>
    %cst_42 = arith.constant 0.000000e+00 : f32
    %46 = vector.broadcast %cst_42 : f32 to vector<1x8xf32>
    %c0_43 = arith.constant 0 : index
    %c0_44 = arith.constant 0 : index
    %47 = vector.load %arg24[%c0_43, %c0_44] : memref<244x8xf32, #tpu.memory_space<vmem>>, vector<1x8xf32>
    tpu.vector_store %arg24[%c0_43, %c0_44], %46 {strides = array<i32>} : memref<244x8xf32, #tpu.memory_space<vmem>>, vector<1x8xf32>,
    %cst_45 = arith.constant 0.000000e+00 : f32
    %48 = vector.broadcast %cst_45 : f32 to vector<1x8xf32>
    %c121 = arith.constant 121 : index
    %c0_46 = arith.constant 0 : index
    %49 = vector.load %arg24[%c121, %c0_46] : memref<244x8xf32, #tpu.memory_space<vmem>>, vector<1x8xf32>
    tpu.vector_store %arg24[%c121, %c0_46], %48 {strides = array<i32>} : memref<244x8xf32, #tpu.memory_space<vmem>>, vector<1x8xf32>,
    %c1_47 = arith.constant 1 : index
    %c0_48 = arith.constant 0 : index
    %50 = vector.load %arg24[%c1_47, %c0_48] : memref<244x8xf32, #tpu.memory_space<vmem>>, vector<120x8xf32>
    tpu.vector_store %arg24[%c1_47, %c0_48], %42 {strides = array<i32>} : memref<244x8xf32, #tpu.memory_space<vmem>>, vector<120x8xf32>,
    %cst_49 = arith.constant 0.000000e+00 : f32
    %51 = vector.broadcast %cst_49 : f32 to vector<1x8xf32>
    %c122 = arith.constant 122 : index
    %c0_50 = arith.constant 0 : index
    %52 = vector.load %arg24[%c122, %c0_50] : memref<244x8xf32, #tpu.memory_space<vmem>>, vector<1x8xf32>
    tpu.vector_store %arg24[%c122, %c0_50], %51 {strides = array<i32>} : memref<244x8xf32, #tpu.memory_space<vmem>>, vector<1x8xf32>,
    %cst_51 = arith.constant 0.000000e+00 : f32
    %53 = vector.broadcast %cst_51 : f32 to vector<1x8xf32>
    %c243_52 = arith.constant 243 : index
    %c0_53 = arith.constant 0 : index
    %54 = vector.load %arg24[%c243_52, %c0_53] : memref<244x8xf32, #tpu.memory_space<vmem>>, vector<1x8xf32>
    tpu.vector_store %arg24[%c243_52, %c0_53], %53 {strides = array<i32>} : memref<244x8xf32, #tpu.memory_space<vmem>>, vector<1x8xf32>,
    %c123 = arith.constant 123 : index
    %c0_54 = arith.constant 0 : index
    %55 = vector.load %arg24[%c123, %c0_54] : memref<244x8xf32, #tpu.memory_space<vmem>>, vector<120x8xf32>
    tpu.vector_store %arg24[%c123, %c0_54], %45 {strides = array<i32>} : memref<244x8xf32, #tpu.memory_space<vmem>>, vector<120x8xf32>,
    %c0_55 = arith.constant 0 : index
    %c0_56 = arith.constant 0 : index
    %56 = vector.load %arg24[%c0_55, %c0_56] : memref<244x8xf32, #tpu.memory_space<vmem>>, vector<242x8xf32>
    %57 = arith.truncf %56 : vector<242x8xf32> to vector<242x8xbf16>
    %c0_57 = arith.constant 0 : index
    %c0_58 = arith.constant 0 : index
    %c0_59 = arith.constant 0 : index
    %58 = vector.load %arg3[%c0_57, %c0_58, %c0_59] : memref<3x8x16xbf16, #tpu.memory_space<vmem>>, vector<1x8x16xbf16>
    %59 = vector.shape_cast %58 : vector<1x8x16xbf16> to vector<8x16xbf16>
    %cst_60 = arith.constant dense<0.000000e+00> : vector<242x16xf32>
    %60 = tpu.matmul %57, %59, %cst_60 {dimension_numbers = #tpu.dot_dimension_numbers<[1], [0], [0], [1], [0, 0, 1, 1], [], []>} : vector<242x8xbf16>, vector<8x16xbf16>, vector<242x16xf32> -> vector<242x16xf32>
    %c1_61 = arith.constant 1 : index
    %c0_62 = arith.constant 0 : index
    %61 = vector.load %arg24[%c1_61, %c0_62] : memref<244x8xf32, #tpu.memory_space<vmem>>, vector<242x8xf32>
    %62 = arith.truncf %61 : vector<242x8xf32> to vector<242x8xbf16>
    %c1_63 = arith.constant 1 : index
    %c0_64 = arith.constant 0 : index
    %c0_65 = arith.constant 0 : index
    %63 = vector.load %arg3[%c1_63, %c0_64, %c0_65] : memref<3x8x16xbf16, #tpu.memory_space<vmem>>, vector<1x8x16xbf16>
    %64 = vector.shape_cast %63 : vector<1x8x16xbf16> to vector<8x16xbf16>
    %cst_66 = arith.constant dense<0.000000e+00> : vector<242x16xf32>
    %65 = tpu.matmul %62, %64, %cst_66 {dimension_numbers = #tpu.dot_dimension_numbers<[1], [0], [0], [1], [0, 0, 1, 1], [], []>} : vector<242x8xbf16>, vector<8x16xbf16>, vector<242x16xf32> -> vector<242x16xf32>
    %66 = arith.addf %60, %65 : vector<242x16xf32>
    %c2_67 = arith.constant 2 : index
    %c0_68 = arith.constant 0 : index
    %67 = vector.load %arg24[%c2_67, %c0_68] : memref<244x8xf32, #tpu.memory_space<vmem>>, vector<242x8xf32>
    %68 = arith.truncf %67 : vector<242x8xf32> to vector<242x8xbf16>
    %c2_69 = arith.constant 2 : index
    %c0_70 = arith.constant 0 : index
    %c0_71 = arith.constant 0 : index
    %69 = vector.load %arg3[%c2_69, %c0_70, %c0_71] : memref<3x8x16xbf16, #tpu.memory_space<vmem>>, vector<1x8x16xbf16>
    %70 = vector.shape_cast %69 : vector<1x8x16xbf16> to vector<8x16xbf16>
    %cst_72 = arith.constant dense<0.000000e+00> : vector<242x16xf32>
    %71 = tpu.matmul %68, %70, %cst_72 {dimension_numbers = #tpu.dot_dimension_numbers<[1], [0], [0], [1], [0, 0, 1, 1], [], []>} : vector<242x8xbf16>, vector<8x16xbf16>, vector<242x16xf32> -> vector<242x16xf32>
    %72 = arith.addf %66, %71 : vector<242x16xf32>
    %c0_73 = arith.constant 0 : index
    %c0_74 = arith.constant 0 : index
    %73 = vector.load %arg4[%c0_73, %c0_74] : memref<1x16xf32, #tpu.memory_space<vmem>>, vector<1x16xf32>
    %74 = vector.broadcast %73 : vector<1x16xf32> to vector<242x16xf32>
    %75 = arith.addf %72, %74 : vector<242x16xf32>
    %cst_75 = arith.constant 0.000000e+00 : f32
    %76 = vector.broadcast %cst_75 : f32 to vector<242x16xf32>
    %77 = arith.maximumf %75, %76 : vector<242x16xf32>
    %c0_76 = arith.constant 0 : index
    %c0_77 = arith.constant 0 : index
    %78 = vector.load %arg25[%c0_76, %c0_77] : memref<242x16xf32, #tpu.memory_space<vmem>>, vector<242x16xf32>
    tpu.vector_store %arg25[%c0_76, %c0_77], %77 {strides = array<i32>} : memref<242x16xf32, #tpu.memory_space<vmem>>, vector<242x16xf32>,
    %c0_78 = arith.constant 0 : index
    %c0_79 = arith.constant 0 : index
    %79 = tpu.strided_load %arg25[%c0_78, %c0_79] {strides = array<i32: 2, 1>} : memref<242x16xf32, #tpu.memory_space<vmem>>, vector<60x16xf32>
    %c1_80 = arith.constant 1 : index
    %c0_81 = arith.constant 0 : index
    %80 = tpu.strided_load %arg25[%c1_80, %c0_81] {strides = array<i32: 2, 1>} : memref<242x16xf32, #tpu.memory_space<vmem>>, vector<60x16xf32>
    %81 = arith.maximumf %79, %80 : vector<60x16xf32>
    %c122_82 = arith.constant 122 : index
    %c0_83 = arith.constant 0 : index
    %82 = tpu.strided_load %arg25[%c122_82, %c0_83] {strides = array<i32: 2, 1>} : memref<242x16xf32, #tpu.memory_space<vmem>>, vector<60x16xf32>
    %c123_84 = arith.constant 123 : index
    %c0_85 = arith.constant 0 : index
    %83 = tpu.strided_load %arg25[%c123_84, %c0_85] {strides = array<i32: 2, 1>} : memref<242x16xf32, #tpu.memory_space<vmem>>, vector<60x16xf32>
    %84 = arith.maximumf %82, %83 : vector<60x16xf32>
    %cst_86 = arith.constant 0.000000e+00 : f32
    %85 = vector.broadcast %cst_86 : f32 to vector<1x16xf32>
    %c0_87 = arith.constant 0 : index
    %c0_88 = arith.constant 0 : index
    %86 = vector.load %arg26[%c0_87, %c0_88] : memref<124x16xf32, #tpu.memory_space<vmem>>, vector<1x16xf32>
    tpu.vector_store %arg26[%c0_87, %c0_88], %85 {strides = array<i32>} : memref<124x16xf32, #tpu.memory_space<vmem>>, vector<1x16xf32>,
    %cst_89 = arith.constant 0.000000e+00 : f32
    %87 = vector.broadcast %cst_89 : f32 to vector<1x16xf32>
    %c61 = arith.constant 61 : index
    %c0_90 = arith.constant 0 : index
    %88 = vector.load %arg26[%c61, %c0_90] : memref<124x16xf32, #tpu.memory_space<vmem>>, vector<1x16xf32>
    tpu.vector_store %arg26[%c61, %c0_90], %87 {strides = array<i32>} : memref<124x16xf32, #tpu.memory_space<vmem>>, vector<1x16xf32>,
    %c1_91 = arith.constant 1 : index
    %c0_92 = arith.constant 0 : index
    %89 = vector.load %arg26[%c1_91, %c0_92] : memref<124x16xf32, #tpu.memory_space<vmem>>, vector<60x16xf32>
    tpu.vector_store %arg26[%c1_91, %c0_92], %81 {strides = array<i32>} : memref<124x16xf32, #tpu.memory_space<vmem>>, vector<60x16xf32>,
    %cst_93 = arith.constant 0.000000e+00 : f32
    %90 = vector.broadcast %cst_93 : f32 to vector<1x16xf32>
    %c62 = arith.constant 62 : index
    %c0_94 = arith.constant 0 : index
    %91 = vector.load %arg26[%c62, %c0_94] : memref<124x16xf32, #tpu.memory_space<vmem>>, vector<1x16xf32>
    tpu.vector_store %arg26[%c62, %c0_94], %90 {strides = array<i32>} : memref<124x16xf32, #tpu.memory_space<vmem>>, vector<1x16xf32>,
    %cst_95 = arith.constant 0.000000e+00 : f32
    %92 = vector.broadcast %cst_95 : f32 to vector<1x16xf32>
    %c123_96 = arith.constant 123 : index
    %c0_97 = arith.constant 0 : index
    %93 = vector.load %arg26[%c123_96, %c0_97] : memref<124x16xf32, #tpu.memory_space<vmem>>, vector<1x16xf32>
    tpu.vector_store %arg26[%c123_96, %c0_97], %92 {strides = array<i32>} : memref<124x16xf32, #tpu.memory_space<vmem>>, vector<1x16xf32>,
    %c63 = arith.constant 63 : index
    %c0_98 = arith.constant 0 : index
    %94 = vector.load %arg26[%c63, %c0_98] : memref<124x16xf32, #tpu.memory_space<vmem>>, vector<60x16xf32>
    tpu.vector_store %arg26[%c63, %c0_98], %84 {strides = array<i32>} : memref<124x16xf32, #tpu.memory_space<vmem>>, vector<60x16xf32>,
    %c0_99 = arith.constant 0 : index
    %c0_100 = arith.constant 0 : index
    %95 = vector.load %arg26[%c0_99, %c0_100] : memref<124x16xf32, #tpu.memory_space<vmem>>, vector<122x16xf32>
    %96 = arith.truncf %95 : vector<122x16xf32> to vector<122x16xbf16>
    %c0_101 = arith.constant 0 : index
    %c0_102 = arith.constant 0 : index
    %c0_103 = arith.constant 0 : index
    %97 = vector.load %arg5[%c0_101, %c0_102, %c0_103] : memref<3x16x32xbf16, #tpu.memory_space<vmem>>, vector<1x16x32xbf16>
    %98 = vector.shape_cast %97 : vector<1x16x32xbf16> to vector<16x32xbf16>
    %cst_104 = arith.constant dense<0.000000e+00> : vector<122x32xf32>
    %99 = tpu.matmul %96, %98, %cst_104 {dimension_numbers = #tpu.dot_dimension_numbers<[1], [0], [0], [1], [0, 0, 1, 1], [], []>} : vector<122x16xbf16>, vector<16x32xbf16>, vector<122x32xf32> -> vector<122x32xf32>
    %c1_105 = arith.constant 1 : index
    %c0_106 = arith.constant 0 : index
    %100 = vector.load %arg26[%c1_105, %c0_106] : memref<124x16xf32, #tpu.memory_space<vmem>>, vector<122x16xf32>
    %101 = arith.truncf %100 : vector<122x16xf32> to vector<122x16xbf16>
    %c1_107 = arith.constant 1 : index
    %c0_108 = arith.constant 0 : index
    %c0_109 = arith.constant 0 : index
    %102 = vector.load %arg5[%c1_107, %c0_108, %c0_109] : memref<3x16x32xbf16, #tpu.memory_space<vmem>>, vector<1x16x32xbf16>
    %103 = vector.shape_cast %102 : vector<1x16x32xbf16> to vector<16x32xbf16>
    %cst_110 = arith.constant dense<0.000000e+00> : vector<122x32xf32>
    %104 = tpu.matmul %101, %103, %cst_110 {dimension_numbers = #tpu.dot_dimension_numbers<[1], [0], [0], [1], [0, 0, 1, 1], [], []>} : vector<122x16xbf16>, vector<16x32xbf16>, vector<122x32xf32> -> vector<122x32xf32>
    %105 = arith.addf %99, %104 : vector<122x32xf32>
    %c2_111 = arith.constant 2 : index
    %c0_112 = arith.constant 0 : index
    %106 = vector.load %arg26[%c2_111, %c0_112] : memref<124x16xf32, #tpu.memory_space<vmem>>, vector<122x16xf32>
    %107 = arith.truncf %106 : vector<122x16xf32> to vector<122x16xbf16>
    %c2_113 = arith.constant 2 : index
    %c0_114 = arith.constant 0 : index
    %c0_115 = arith.constant 0 : index
    %108 = vector.load %arg5[%c2_113, %c0_114, %c0_115] : memref<3x16x32xbf16, #tpu.memory_space<vmem>>, vector<1x16x32xbf16>
    %109 = vector.shape_cast %108 : vector<1x16x32xbf16> to vector<16x32xbf16>
    %cst_116 = arith.constant dense<0.000000e+00> : vector<122x32xf32>
    %110 = tpu.matmul %107, %109, %cst_116 {dimension_numbers = #tpu.dot_dimension_numbers<[1], [0], [0], [1], [0, 0, 1, 1], [], []>} : vector<122x16xbf16>, vector<16x32xbf16>, vector<122x32xf32> -> vector<122x32xf32>
    %111 = arith.addf %105, %110 : vector<122x32xf32>
    %c0_117 = arith.constant 0 : index
    %c0_118 = arith.constant 0 : index
    %112 = vector.load %arg6[%c0_117, %c0_118] : memref<1x32xf32, #tpu.memory_space<vmem>>, vector<1x32xf32>
    %113 = vector.broadcast %112 : vector<1x32xf32> to vector<122x32xf32>
    %114 = arith.addf %111, %113 : vector<122x32xf32>
    %cst_119 = arith.constant 0.000000e+00 : f32
    %115 = vector.broadcast %cst_119 : f32 to vector<122x32xf32>
    %116 = arith.maximumf %114, %115 : vector<122x32xf32>
    %c0_120 = arith.constant 0 : index
    %c0_121 = arith.constant 0 : index
    %117 = vector.load %arg27[%c0_120, %c0_121] : memref<122x32xf32, #tpu.memory_space<vmem>>, vector<122x32xf32>
    tpu.vector_store %arg27[%c0_120, %c0_121], %116 {strides = array<i32>} : memref<122x32xf32, #tpu.memory_space<vmem>>, vector<122x32xf32>,
    %c0_122 = arith.constant 0 : index
    %c0_123 = arith.constant 0 : index
    %118 = tpu.strided_load %arg27[%c0_122, %c0_123] {strides = array<i32: 2, 1>} : memref<122x32xf32, #tpu.memory_space<vmem>>, vector<30x32xf32>
    %c1_124 = arith.constant 1 : index
    %c0_125 = arith.constant 0 : index
    %119 = tpu.strided_load %arg27[%c1_124, %c0_125] {strides = array<i32: 2, 1>} : memref<122x32xf32, #tpu.memory_space<vmem>>, vector<30x32xf32>
    %120 = arith.maximumf %118, %119 : vector<30x32xf32>
    %c62_126 = arith.constant 62 : index
    %c0_127 = arith.constant 0 : index
    %121 = tpu.strided_load %arg27[%c62_126, %c0_127] {strides = array<i32: 2, 1>} : memref<122x32xf32, #tpu.memory_space<vmem>>, vector<30x32xf32>
    %c63_128 = arith.constant 63 : index
    %c0_129 = arith.constant 0 : index
    %122 = tpu.strided_load %arg27[%c63_128, %c0_129] {strides = array<i32: 2, 1>} : memref<122x32xf32, #tpu.memory_space<vmem>>, vector<30x32xf32>
    %123 = arith.maximumf %121, %122 : vector<30x32xf32>
    %cst_130 = arith.constant 0.000000e+00 : f32
    %124 = vector.broadcast %cst_130 : f32 to vector<2x32xf32>
    %c0_131 = arith.constant 0 : index
    %c0_132 = arith.constant 0 : index
    %125 = vector.load %arg28[%c0_131, %c0_132] : memref<68x32xf32, #tpu.memory_space<vmem>>, vector<2x32xf32>
    tpu.vector_store %arg28[%c0_131, %c0_132], %124 {strides = array<i32>} : memref<68x32xf32, #tpu.memory_space<vmem>>, vector<2x32xf32>,
    %cst_133 = arith.constant 0.000000e+00 : f32
    %126 = vector.broadcast %cst_133 : f32 to vector<2x32xf32>
    %c32 = arith.constant 32 : index
    %c0_134 = arith.constant 0 : index
    %127 = vector.load %arg28[%c32, %c0_134] : memref<68x32xf32, #tpu.memory_space<vmem>>, vector<2x32xf32>
    tpu.vector_store %arg28[%c32, %c0_134], %126 {strides = array<i32>} : memref<68x32xf32, #tpu.memory_space<vmem>>, vector<2x32xf32>,
    %c2_135 = arith.constant 2 : index
    %c0_136 = arith.constant 0 : index
    %128 = vector.load %arg28[%c2_135, %c0_136] : memref<68x32xf32, #tpu.memory_space<vmem>>, vector<30x32xf32>
    tpu.vector_store %arg28[%c2_135, %c0_136], %120 {strides = array<i32>} : memref<68x32xf32, #tpu.memory_space<vmem>>, vector<30x32xf32>,
    %cst_137 = arith.constant 0.000000e+00 : f32
    %129 = vector.broadcast %cst_137 : f32 to vector<2x32xf32>
    %c34 = arith.constant 34 : index
    %c0_138 = arith.constant 0 : index
    %130 = vector.load %arg28[%c34, %c0_138] : memref<68x32xf32, #tpu.memory_space<vmem>>, vector<2x32xf32>
    tpu.vector_store %arg28[%c34, %c0_138], %129 {strides = array<i32>} : memref<68x32xf32, #tpu.memory_space<vmem>>, vector<2x32xf32>,
    %cst_139 = arith.constant 0.000000e+00 : f32
    %131 = vector.broadcast %cst_139 : f32 to vector<2x32xf32>
    %c66 = arith.constant 66 : index
    %c0_140 = arith.constant 0 : index
    %132 = vector.load %arg28[%c66, %c0_140] : memref<68x32xf32, #tpu.memory_space<vmem>>, vector<2x32xf32>
    tpu.vector_store %arg28[%c66, %c0_140], %131 {strides = array<i32>} : memref<68x32xf32, #tpu.memory_space<vmem>>, vector<2x32xf32>,
    %c36 = arith.constant 36 : index
    %c0_141 = arith.constant 0 : index
    %133 = vector.load %arg28[%c36, %c0_141] : memref<68x32xf32, #tpu.memory_space<vmem>>, vector<30x32xf32>
    tpu.vector_store %arg28[%c36, %c0_141], %123 {strides = array<i32>} : memref<68x32xf32, #tpu.memory_space<vmem>>, vector<30x32xf32>,
    %c0_142 = arith.constant 0 : index
    %c0_143 = arith.constant 0 : index
    %134 = vector.load %arg28[%c0_142, %c0_143] : memref<68x32xf32, #tpu.memory_space<vmem>>, vector<66x32xf32>
    %135 = arith.truncf %134 : vector<66x32xf32> to vector<66x32xbf16>
    %c0_144 = arith.constant 0 : index
    %c0_145 = arith.constant 0 : index
    %c0_146 = arith.constant 0 : index
    %136 = vector.load %arg7[%c0_144, %c0_145, %c0_146] : memref<3x32x64xbf16, #tpu.memory_space<vmem>>, vector<1x32x64xbf16>
    %137 = vector.shape_cast %136 : vector<1x32x64xbf16> to vector<32x64xbf16>
    %cst_147 = arith.constant dense<0.000000e+00> : vector<66x64xf32>
    %138 = tpu.matmul %135, %137, %cst_147 {dimension_numbers = #tpu.dot_dimension_numbers<[1], [0], [0], [1], [0, 0, 1, 1], [], []>} : vector<66x32xbf16>, vector<32x64xbf16>, vector<66x64xf32> -> vector<66x64xf32>
    %c1_148 = arith.constant 1 : index
    %c0_149 = arith.constant 0 : index
    %139 = vector.load %arg28[%c1_148, %c0_149] : memref<68x32xf32, #tpu.memory_space<vmem>>, vector<66x32xf32>
    %140 = arith.truncf %139 : vector<66x32xf32> to vector<66x32xbf16>
    %c1_150 = arith.constant 1 : index
    %c0_151 = arith.constant 0 : index
    %c0_152 = arith.constant 0 : index
    %141 = vector.load %arg7[%c1_150, %c0_151, %c0_152] : memref<3x32x64xbf16, #tpu.memory_space<vmem>>, vector<1x32x64xbf16>
    %142 = vector.shape_cast %141 : vector<1x32x64xbf16> to vector<32x64xbf16>
    %cst_153 = arith.constant dense<0.000000e+00> : vector<66x64xf32>
    %143 = tpu.matmul %140, %142, %cst_153 {dimension_numbers = #tpu.dot_dimension_numbers<[1], [0], [0], [1], [0, 0, 1, 1], [], []>} : vector<66x32xbf16>, vector<32x64xbf16>, vector<66x64xf32> -> vector<66x64xf32>
    %144 = arith.addf %138, %143 : vector<66x64xf32>
    %c2_154 = arith.constant 2 : index
    %c0_155 = arith.constant 0 : index
    %145 = vector.load %arg28[%c2_154, %c0_155] : memref<68x32xf32, #tpu.memory_space<vmem>>, vector<66x32xf32>
    %146 = arith.truncf %145 : vector<66x32xf32> to vector<66x32xbf16>
    %c2_156 = arith.constant 2 : index
    %c0_157 = arith.constant 0 : index
    %c0_158 = arith.constant 0 : index
    %147 = vector.load %arg7[%c2_156, %c0_157, %c0_158] : memref<3x32x64xbf16, #tpu.memory_space<vmem>>, vector<1x32x64xbf16>
    %148 = vector.shape_cast %147 : vector<1x32x64xbf16> to vector<32x64xbf16>
    %cst_159 = arith.constant dense<0.000000e+00> : vector<66x64xf32>
    %149 = tpu.matmul %146, %148, %cst_159 {dimension_numbers = #tpu.dot_dimension_numbers<[1], [0], [0], [1], [0, 0, 1, 1], [], []>} : vector<66x32xbf16>, vector<32x64xbf16>, vector<66x64xf32> -> vector<66x64xf32>
    %150 = arith.addf %144, %149 : vector<66x64xf32>
    %c0_160 = arith.constant 0 : index
    %c0_161 = arith.constant 0 : index
    %151 = vector.load %arg8[%c0_160, %c0_161] : memref<1x64xf32, #tpu.memory_space<vmem>>, vector<1x64xf32>
    %152 = vector.broadcast %151 : vector<1x64xf32> to vector<66x64xf32>
    %153 = arith.addf %150, %152 : vector<66x64xf32>
    %cst_162 = arith.constant 0.000000e+00 : f32
    %154 = vector.broadcast %cst_162 : f32 to vector<66x64xf32>
    %155 = arith.maximumf %153, %154 : vector<66x64xf32>
    %c0_163 = arith.constant 0 : index
    %c0_164 = arith.constant 0 : index
    %156 = vector.load %arg29[%c0_163, %c0_164] : memref<66x64xf32, #tpu.memory_space<vmem>>, vector<66x64xf32>
    tpu.vector_store %arg29[%c0_163, %c0_164], %155 {strides = array<i32>} : memref<66x64xf32, #tpu.memory_space<vmem>>, vector<66x64xf32>,
    %c0_165 = arith.constant 0 : index
    %c0_166 = arith.constant 0 : index
    %157 = tpu.strided_load %arg29[%c0_165, %c0_166] {strides = array<i32: 2, 1>} : memref<66x64xf32, #tpu.memory_space<vmem>>, vector<16x64xf32>
    %c1_167 = arith.constant 1 : index
    %c0_168 = arith.constant 0 : index
    %158 = tpu.strided_load %arg29[%c1_167, %c0_168] {strides = array<i32: 2, 1>} : memref<66x64xf32, #tpu.memory_space<vmem>>, vector<16x64xf32>
    %159 = arith.maximumf %157, %158 : vector<16x64xf32>
    %c34_169 = arith.constant 34 : index
    %c0_170 = arith.constant 0 : index
    %160 = tpu.strided_load %arg29[%c34_169, %c0_170] {strides = array<i32: 2, 1>} : memref<66x64xf32, #tpu.memory_space<vmem>>, vector<16x64xf32>
    %c35 = arith.constant 35 : index
    %c0_171 = arith.constant 0 : index
    %161 = tpu.strided_load %arg29[%c35, %c0_171] {strides = array<i32: 2, 1>} : memref<66x64xf32, #tpu.memory_space<vmem>>, vector<16x64xf32>
    %162 = arith.maximumf %160, %161 : vector<16x64xf32>
    %163 = tpu.concatenate %159, %162 in 1 : vector<16x64xf32>, vector<16x64xf32> -> vector<16x128xf32>
    %164 = tpu.transpose %163, [1, 0] : vector<16x128xf32> -> vector<128x16xf32>
    %165 = arith.truncf %164 : vector<128x16xf32> to vector<128x16xbf16>
    %c0_172 = arith.constant 0 : index
    %c0_173 = arith.constant 0 : index
    %166 = vector.load %arg9[%c0_172, %c0_173] : memref<16x32xbf16, #tpu.memory_space<vmem>>, vector<16x32xbf16>
    %cst_174 = arith.constant dense<0.000000e+00> : vector<128x32xf32>
    %167 = tpu.matmul %165, %166, %cst_174 {dimension_numbers = #tpu.dot_dimension_numbers<[1], [0], [0], [1], [0, 0, 1, 1], [], []>} : vector<128x16xbf16>, vector<16x32xbf16>, vector<128x32xf32> -> vector<128x32xf32>
    %c0_175 = arith.constant 0 : index
    %c0_176 = arith.constant 0 : index
    %168 = vector.load %arg10[%c0_175, %c0_176] : memref<1x32xf32, #tpu.memory_space<vmem>>, vector<1x32xf32>
    %169 = vector.broadcast %168 : vector<1x32xf32> to vector<128x32xf32>
    %170 = arith.addf %167, %169 : vector<128x32xf32>
    %c0_177 = arith.constant 0 : index
    %c0_178 = arith.constant 0 : index
    %171 = vector.load %arg11[%c0_177, %c0_178] : memref<16x16xbf16, #tpu.memory_space<vmem>>, vector<16x16xbf16>
    %172 = arith.truncf %163 : vector<16x128xf32> to vector<16x128xbf16>
    %cst_179 = arith.constant dense<0.000000e+00> : vector<16x128xf32>
    %173 = tpu.matmul %171, %172, %cst_179 {dimension_numbers = #tpu.dot_dimension_numbers<[1], [0], [0], [1], [0, 0, 1, 1], [], []>} : vector<16x16xbf16>, vector<16x128xbf16>, vector<16x128xf32> -> vector<16x128xf32>
    %c0_180 = arith.constant 0 : index
    %c0_181 = arith.constant 0 : index
    %174 = vector.load %arg12[%c0_180, %c0_181] : memref<16x1xf32, #tpu.memory_space<vmem>>, vector<16x1xf32>
    %175 = vector.broadcast %174 : vector<16x1xf32> to vector<16x128xf32>
    %176 = arith.addf %173, %175 : vector<16x128xf32>
    %177 = vector.extract_strided_slice %170 {offsets = [0, 0], sizes = [128, 4], strides = [1, 1]} : vector<128x32xf32> to vector<128x4xf32>
    %cst_182 = arith.constant 5.000000e-01 : f32
    %178 = vector.broadcast %cst_182 : f32 to vector<128x4xf32>
    %179 = arith.mulf %177, %178 : vector<128x4xf32>
    %180 = arith.truncf %179 : vector<128x4xf32> to vector<128x4xbf16>
    %181 = vector.extract_strided_slice %170 {offsets = [0, 16], sizes = [128, 4], strides = [1, 1]} : vector<128x32xf32> to vector<128x4xf32>
    %182 = arith.truncf %181 : vector<128x4xf32> to vector<128x4xbf16>
    %183 = vector.extract_strided_slice %176 {offsets = [0, 0], sizes = [4, 128], strides = [1, 1]} : vector<16x128xf32> to vector<4x128xf32>
    %184 = vector.extract_strided_slice %180 {offsets = [0, 0], sizes = [64, 4], strides = [1, 1]} : vector<128x4xbf16> to vector<64x4xbf16>
    %185 = vector.extract_strided_slice %182 {offsets = [0, 0], sizes = [64, 4], strides = [1, 1]} : vector<128x4xbf16> to vector<64x4xbf16>
    %186 = vector.extract_strided_slice %183 {offsets = [0, 0], sizes = [4, 64], strides = [1, 1]} : vector<4x128xf32> to vector<4x64xf32>
    %187 = arith.truncf %186 : vector<4x64xf32> to vector<4x64xbf16>
    %cst_183 = arith.constant dense<0.000000e+00> : vector<64x64xf32>
    %188 = tpu.matmul %184, %185, %cst_183 {dimension_numbers = #tpu.dot_dimension_numbers<[1], [1], [0], [0], [0, 0, 1, 0], [], []>} : vector<64x4xbf16>, vector<64x4xbf16>, vector<64x64xf32> -> vector<64x64xf32>
    %cst_184 = arith.constant dense<0xFF800000> : vector<64xf32>
    %189 = vector.multi_reduction <maximumf>, %188, %cst_184 [1] : vector<64x64xf32> to vector<64xf32>
    %190 = vector.shape_cast %189 : vector<64xf32> to vector<64x1xf32>
    %191 = vector.broadcast %190 : vector<64x1xf32> to vector<64x64xf32>
    %192 = arith.subf %188, %191 : vector<64x64xf32>
    %193 = math.exp %192 : vector<64x64xf32>
    %cst_185 = arith.constant dense<0.000000e+00> : vector<64xf32>
    %194 = vector.multi_reduction <add>, %193, %cst_185 [1] : vector<64x64xf32> to vector<64xf32>
    %195 = vector.shape_cast %194 : vector<64xf32> to vector<64x1xf32>
    %196 = tpu.reciprocal %195 {approx = true} : vector<64x1xf32> -> vector<64x1xf32>
    %197 = vector.broadcast %196 : vector<64x1xf32> to vector<64x64xf32>
    %198 = arith.mulf %193, %197 : vector<64x64xf32>
    %199 = arith.truncf %198 : vector<64x64xf32> to vector<64x64xbf16>
    %cst_186 = arith.constant dense<0.000000e+00> : vector<4x64xf32>
    %200 = tpu.matmul %187, %199, %cst_186 {dimension_numbers = #tpu.dot_dimension_numbers<[1], [1], [0], [0], [0, 0, 1, 0], [], []>} : vector<4x64xbf16>, vector<64x64xbf16>, vector<4x64xf32> -> vector<4x64xf32>
    %c0_187 = arith.constant 0 : index
    %c0_188 = arith.constant 0 : index
    %201 = vector.load %arg30[%c0_187, %c0_188] : memref<32x64xf32, #tpu.memory_space<vmem>>, vector<4x64xf32>
    tpu.vector_store %arg30[%c0_187, %c0_188], %200 {strides = array<i32>} : memref<32x64xf32, #tpu.memory_space<vmem>>, vector<4x64xf32>,
    %202 = vector.extract_strided_slice %180 {offsets = [64, 0], sizes = [64, 4], strides = [1, 1]} : vector<128x4xbf16> to vector<64x4xbf16>
    %203 = vector.extract_strided_slice %182 {offsets = [64, 0], sizes = [64, 4], strides = [1, 1]} : vector<128x4xbf16> to vector<64x4xbf16>
    %204 = vector.extract_strided_slice %183 {offsets = [0, 64], sizes = [4, 64], strides = [1, 1]} : vector<4x128xf32> to vector<4x64xf32>
    %205 = arith.truncf %204 : vector<4x64xf32> to vector<4x64xbf16>
    %cst_189 = arith.constant dense<0.000000e+00> : vector<64x64xf32>
    %206 = tpu.matmul %202, %203, %cst_189 {dimension_numbers = #tpu.dot_dimension_numbers<[1], [1], [0], [0], [0, 0, 1, 0], [], []>} : vector<64x4xbf16>, vector<64x4xbf16>, vector<64x64xf32> -> vector<64x64xf32>
    %cst_190 = arith.constant dense<0xFF800000> : vector<64xf32>
    %207 = vector.multi_reduction <maximumf>, %206, %cst_190 [1] : vector<64x64xf32> to vector<64xf32>
    %208 = vector.shape_cast %207 : vector<64xf32> to vector<64x1xf32>
    %209 = vector.broadcast %208 : vector<64x1xf32> to vector<64x64xf32>
    %210 = arith.subf %206, %209 : vector<64x64xf32>
    %211 = math.exp %210 : vector<64x64xf32>
    %cst_191 = arith.constant dense<0.000000e+00> : vector<64xf32>
    %212 = vector.multi_reduction <add>, %211, %cst_191 [1] : vector<64x64xf32> to vector<64xf32>
    %213 = vector.shape_cast %212 : vector<64xf32> to vector<64x1xf32>
    %214 = tpu.reciprocal %213 {approx = true} : vector<64x1xf32> -> vector<64x1xf32>
    %215 = vector.broadcast %214 : vector<64x1xf32> to vector<64x64xf32>
    %216 = arith.mulf %211, %215 : vector<64x64xf32>
    %217 = arith.truncf %216 : vector<64x64xf32> to vector<64x64xbf16>
    %cst_192 = arith.constant dense<0.000000e+00> : vector<4x64xf32>
    %218 = tpu.matmul %205, %217, %cst_192 {dimension_numbers = #tpu.dot_dimension_numbers<[1], [1], [0], [0], [0, 0, 1, 0], [], []>} : vector<4x64xbf16>, vector<64x64xbf16>, vector<4x64xf32> -> vector<4x64xf32>
    %c16 = arith.constant 16 : index
    %c0_193 = arith.constant 0 : index
    %219 = vector.load %arg30[%c16, %c0_193] : memref<32x64xf32, #tpu.memory_space<vmem>>, vector<4x64xf32>
    tpu.vector_store %arg30[%c16, %c0_193], %218 {strides = array<i32>} : memref<32x64xf32, #tpu.memory_space<vmem>>, vector<4x64xf32>,
    %220 = vector.extract_strided_slice %170 {offsets = [0, 4], sizes = [128, 4], strides = [1, 1]} : vector<128x32xf32> to vector<128x4xf32>
    %cst_194 = arith.constant 5.000000e-01 : f32
    %221 = vector.broadcast %cst_194 : f32 to vector<128x4xf32>
    %222 = arith.mulf %220, %221 : vector<128x4xf32>
    %223 = arith.truncf %222 : vector<128x4xf32> to vector<128x4xbf16>
    %224 = vector.extract_strided_slice %170 {offsets = [0, 20], sizes = [128, 4], strides = [1, 1]} : vector<128x32xf32> to vector<128x4xf32>
    %225 = arith.truncf %224 : vector<128x4xf32> to vector<128x4xbf16>
    %226 = vector.extract_strided_slice %176 {offsets = [4, 0], sizes = [4, 128], strides = [1, 1]} : vector<16x128xf32> to vector<4x128xf32>
    %227 = vector.extract_strided_slice %223 {offsets = [0, 0], sizes = [64, 4], strides = [1, 1]} : vector<128x4xbf16> to vector<64x4xbf16>
    %228 = vector.extract_strided_slice %225 {offsets = [0, 0], sizes = [64, 4], strides = [1, 1]} : vector<128x4xbf16> to vector<64x4xbf16>
    %229 = vector.extract_strided_slice %226 {offsets = [0, 0], sizes = [4, 64], strides = [1, 1]} : vector<4x128xf32> to vector<4x64xf32>
    %230 = arith.truncf %229 : vector<4x64xf32> to vector<4x64xbf16>
    %cst_195 = arith.constant dense<0.000000e+00> : vector<64x64xf32>
    %231 = tpu.matmul %227, %228, %cst_195 {dimension_numbers = #tpu.dot_dimension_numbers<[1], [1], [0], [0], [0, 0, 1, 0], [], []>} : vector<64x4xbf16>, vector<64x4xbf16>, vector<64x64xf32> -> vector<64x64xf32>
    %cst_196 = arith.constant dense<0xFF800000> : vector<64xf32>
    %232 = vector.multi_reduction <maximumf>, %231, %cst_196 [1] : vector<64x64xf32> to vector<64xf32>
    %233 = vector.shape_cast %232 : vector<64xf32> to vector<64x1xf32>
    %234 = vector.broadcast %233 : vector<64x1xf32> to vector<64x64xf32>
    %235 = arith.subf %231, %234 : vector<64x64xf32>
    %236 = math.exp %235 : vector<64x64xf32>
    %cst_197 = arith.constant dense<0.000000e+00> : vector<64xf32>
    %237 = vector.multi_reduction <add>, %236, %cst_197 [1] : vector<64x64xf32> to vector<64xf32>
    %238 = vector.shape_cast %237 : vector<64xf32> to vector<64x1xf32>
    %239 = tpu.reciprocal %238 {approx = true} : vector<64x1xf32> -> vector<64x1xf32>
    %240 = vector.broadcast %239 : vector<64x1xf32> to vector<64x64xf32>
    %241 = arith.mulf %236, %240 : vector<64x64xf32>
    %242 = arith.truncf %241 : vector<64x64xf32> to vector<64x64xbf16>
    %cst_198 = arith.constant dense<0.000000e+00> : vector<4x64xf32>
    %243 = tpu.matmul %230, %242, %cst_198 {dimension_numbers = #tpu.dot_dimension_numbers<[1], [1], [0], [0], [0, 0, 1, 0], [], []>} : vector<4x64xbf16>, vector<64x64xbf16>, vector<4x64xf32> -> vector<4x64xf32>
    %c4 = arith.constant 4 : index
    %c0_199 = arith.constant 0 : index
    %244 = vector.load %arg30[%c4, %c0_199] : memref<32x64xf32, #tpu.memory_space<vmem>>, vector<4x64xf32>
    tpu.vector_store %arg30[%c4, %c0_199], %243 {strides = array<i32>} : memref<32x64xf32, #tpu.memory_space<vmem>>, vector<4x64xf32>,
    %245 = vector.extract_strided_slice %223 {offsets = [64, 0], sizes = [64, 4], strides = [1, 1]} : vector<128x4xbf16> to vector<64x4xbf16>
    %246 = vector.extract_strided_slice %225 {offsets = [64, 0], sizes = [64, 4], strides = [1, 1]} : vector<128x4xbf16> to vector<64x4xbf16>
    %247 = vector.extract_strided_slice %226 {offsets = [0, 64], sizes = [4, 64], strides = [1, 1]} : vector<4x128xf32> to vector<4x64xf32>
    %248 = arith.truncf %247 : vector<4x64xf32> to vector<4x64xbf16>
    %cst_200 = arith.constant dense<0.000000e+00> : vector<64x64xf32>
    %249 = tpu.matmul %245, %246, %cst_200 {dimension_numbers = #tpu.dot_dimension_numbers<[1], [1], [0], [0], [0, 0, 1, 0], [], []>} : vector<64x4xbf16>, vector<64x4xbf16>, vector<64x64xf32> -> vector<64x64xf32>
    %cst_201 = arith.constant dense<0xFF800000> : vector<64xf32>
    %250 = vector.multi_reduction <maximumf>, %249, %cst_201 [1] : vector<64x64xf32> to vector<64xf32>
    %251 = vector.shape_cast %250 : vector<64xf32> to vector<64x1xf32>
    %252 = vector.broadcast %251 : vector<64x1xf32> to vector<64x64xf32>
    %253 = arith.subf %249, %252 : vector<64x64xf32>
    %254 = math.exp %253 : vector<64x64xf32>
    %cst_202 = arith.constant dense<0.000000e+00> : vector<64xf32>
    %255 = vector.multi_reduction <add>, %254, %cst_202 [1] : vector<64x64xf32> to vector<64xf32>
    %256 = vector.shape_cast %255 : vector<64xf32> to vector<64x1xf32>
    %257 = tpu.reciprocal %256 {approx = true} : vector<64x1xf32> -> vector<64x1xf32>
    %258 = vector.broadcast %257 : vector<64x1xf32> to vector<64x64xf32>
    %259 = arith.mulf %254, %258 : vector<64x64xf32>
    %260 = arith.truncf %259 : vector<64x64xf32> to vector<64x64xbf16>
    %cst_203 = arith.constant dense<0.000000e+00> : vector<4x64xf32>
    %261 = tpu.matmul %248, %260, %cst_203 {dimension_numbers = #tpu.dot_dimension_numbers<[1], [1], [0], [0], [0, 0, 1, 0], [], []>} : vector<4x64xbf16>, vector<64x64xbf16>, vector<4x64xf32> -> vector<4x64xf32>
    %c20 = arith.constant 20 : index
    %c0_204 = arith.constant 0 : index
    %262 = vector.load %arg30[%c20, %c0_204] : memref<32x64xf32, #tpu.memory_space<vmem>>, vector<4x64xf32>
    tpu.vector_store %arg30[%c20, %c0_204], %261 {strides = array<i32>} : memref<32x64xf32, #tpu.memory_space<vmem>>, vector<4x64xf32>,
    %263 = vector.extract_strided_slice %170 {offsets = [0, 8], sizes = [128, 4], strides = [1, 1]} : vector<128x32xf32> to vector<128x4xf32>
    %cst_205 = arith.constant 5.000000e-01 : f32
    %264 = vector.broadcast %cst_205 : f32 to vector<128x4xf32>
    %265 = arith.mulf %263, %264 : vector<128x4xf32>
    %266 = arith.truncf %265 : vector<128x4xf32> to vector<128x4xbf16>
    %267 = vector.extract_strided_slice %170 {offsets = [0, 24], sizes = [128, 4], strides = [1, 1]} : vector<128x32xf32> to vector<128x4xf32>
    %268 = arith.truncf %267 : vector<128x4xf32> to vector<128x4xbf16>
    %269 = vector.extract_strided_slice %176 {offsets = [8, 0], sizes = [4, 128], strides = [1, 1]} : vector<16x128xf32> to vector<4x128xf32>
    %270 = vector.extract_strided_slice %266 {offsets = [0, 0], sizes = [64, 4], strides = [1, 1]} : vector<128x4xbf16> to vector<64x4xbf16>
    %271 = vector.extract_strided_slice %268 {offsets = [0, 0], sizes = [64, 4], strides = [1, 1]} : vector<128x4xbf16> to vector<64x4xbf16>
    %272 = vector.extract_strided_slice %269 {offsets = [0, 0], sizes = [4, 64], strides = [1, 1]} : vector<4x128xf32> to vector<4x64xf32>
    %273 = arith.truncf %272 : vector<4x64xf32> to vector<4x64xbf16>
    %cst_206 = arith.constant dense<0.000000e+00> : vector<64x64xf32>
    %274 = tpu.matmul %270, %271, %cst_206 {dimension_numbers = #tpu.dot_dimension_numbers<[1], [1], [0], [0], [0, 0, 1, 0], [], []>} : vector<64x4xbf16>, vector<64x4xbf16>, vector<64x64xf32> -> vector<64x64xf32>
    %cst_207 = arith.constant dense<0xFF800000> : vector<64xf32>
    %275 = vector.multi_reduction <maximumf>, %274, %cst_207 [1] : vector<64x64xf32> to vector<64xf32>
    %276 = vector.shape_cast %275 : vector<64xf32> to vector<64x1xf32>
    %277 = vector.broadcast %276 : vector<64x1xf32> to vector<64x64xf32>
    %278 = arith.subf %274, %277 : vector<64x64xf32>
    %279 = math.exp %278 : vector<64x64xf32>
    %cst_208 = arith.constant dense<0.000000e+00> : vector<64xf32>
    %280 = vector.multi_reduction <add>, %279, %cst_208 [1] : vector<64x64xf32> to vector<64xf32>
    %281 = vector.shape_cast %280 : vector<64xf32> to vector<64x1xf32>
    %282 = tpu.reciprocal %281 {approx = true} : vector<64x1xf32> -> vector<64x1xf32>
    %283 = vector.broadcast %282 : vector<64x1xf32> to vector<64x64xf32>
    %284 = arith.mulf %279, %283 : vector<64x64xf32>
    %285 = arith.truncf %284 : vector<64x64xf32> to vector<64x64xbf16>
    %cst_209 = arith.constant dense<0.000000e+00> : vector<4x64xf32>
    %286 = tpu.matmul %273, %285, %cst_209 {dimension_numbers = #tpu.dot_dimension_numbers<[1], [1], [0], [0], [0, 0, 1, 0], [], []>} : vector<4x64xbf16>, vector<64x64xbf16>, vector<4x64xf32> -> vector<4x64xf32>
    %c8 = arith.constant 8 : index
    %c0_210 = arith.constant 0 : index
    %287 = vector.load %arg30[%c8, %c0_210] : memref<32x64xf32, #tpu.memory_space<vmem>>, vector<4x64xf32>
    tpu.vector_store %arg30[%c8, %c0_210], %286 {strides = array<i32>} : memref<32x64xf32, #tpu.memory_space<vmem>>, vector<4x64xf32>,
    %288 = vector.extract_strided_slice %266 {offsets = [64, 0], sizes = [64, 4], strides = [1, 1]} : vector<128x4xbf16> to vector<64x4xbf16>
    %289 = vector.extract_strided_slice %268 {offsets = [64, 0], sizes = [64, 4], strides = [1, 1]} : vector<128x4xbf16> to vector<64x4xbf16>
    %290 = vector.extract_strided_slice %269 {offsets = [0, 64], sizes = [4, 64], strides = [1, 1]} : vector<4x128xf32> to vector<4x64xf32>
    %291 = arith.truncf %290 : vector<4x64xf32> to vector<4x64xbf16>
    %cst_211 = arith.constant dense<0.000000e+00> : vector<64x64xf32>
    %292 = tpu.matmul %288, %289, %cst_211 {dimension_numbers = #tpu.dot_dimension_numbers<[1], [1], [0], [0], [0, 0, 1, 0], [], []>} : vector<64x4xbf16>, vector<64x4xbf16>, vector<64x64xf32> -> vector<64x64xf32>
    %cst_212 = arith.constant dense<0xFF800000> : vector<64xf32>
    %293 = vector.multi_reduction <maximumf>, %292, %cst_212 [1] : vector<64x64xf32> to vector<64xf32>
    %294 = vector.shape_cast %293 : vector<64xf32> to vector<64x1xf32>
    %295 = vector.broadcast %294 : vector<64x1xf32> to vector<64x64xf32>
    %296 = arith.subf %292, %295 : vector<64x64xf32>
    %297 = math.exp %296 : vector<64x64xf32>
    %cst_213 = arith.constant dense<0.000000e+00> : vector<64xf32>
    %298 = vector.multi_reduction <add>, %297, %cst_213 [1] : vector<64x64xf32> to vector<64xf32>
    %299 = vector.shape_cast %298 : vector<64xf32> to vector<64x1xf32>
    %300 = tpu.reciprocal %299 {approx = true} : vector<64x1xf32> -> vector<64x1xf32>
    %301 = vector.broadcast %300 : vector<64x1xf32> to vector<64x64xf32>
    %302 = arith.mulf %297, %301 : vector<64x64xf32>
    %303 = arith.truncf %302 : vector<64x64xf32> to vector<64x64xbf16>
    %cst_214 = arith.constant dense<0.000000e+00> : vector<4x64xf32>
    %304 = tpu.matmul %291, %303, %cst_214 {dimension_numbers = #tpu.dot_dimension_numbers<[1], [1], [0], [0], [0, 0, 1, 0], [], []>} : vector<4x64xbf16>, vector<64x64xbf16>, vector<4x64xf32> -> vector<4x64xf32>
    %c24 = arith.constant 24 : index
    %c0_215 = arith.constant 0 : index
    %305 = vector.load %arg30[%c24, %c0_215] : memref<32x64xf32, #tpu.memory_space<vmem>>, vector<4x64xf32>
    tpu.vector_store %arg30[%c24, %c0_215], %304 {strides = array<i32>} : memref<32x64xf32, #tpu.memory_space<vmem>>, vector<4x64xf32>,
    %306 = vector.extract_strided_slice %170 {offsets = [0, 12], sizes = [128, 4], strides = [1, 1]} : vector<128x32xf32> to vector<128x4xf32>
    %cst_216 = arith.constant 5.000000e-01 : f32
    %307 = vector.broadcast %cst_216 : f32 to vector<128x4xf32>
    %308 = arith.mulf %306, %307 : vector<128x4xf32>
    %309 = arith.truncf %308 : vector<128x4xf32> to vector<128x4xbf16>
    %310 = vector.extract_strided_slice %170 {offsets = [0, 28], sizes = [128, 4], strides = [1, 1]} : vector<128x32xf32> to vector<128x4xf32>
    %311 = arith.truncf %310 : vector<128x4xf32> to vector<128x4xbf16>
    %312 = vector.extract_strided_slice %176 {offsets = [12, 0], sizes = [4, 128], strides = [1, 1]} : vector<16x128xf32> to vector<4x128xf32>
    %313 = vector.extract_strided_slice %309 {offsets = [0, 0], sizes = [64, 4], strides = [1, 1]} : vector<128x4xbf16> to vector<64x4xbf16>
    %314 = vector.extract_strided_slice %311 {offsets = [0, 0], sizes = [64, 4], strides = [1, 1]} : vector<128x4xbf16> to vector<64x4xbf16>
    %315 = vector.extract_strided_slice %312 {offsets = [0, 0], sizes = [4, 64], strides = [1, 1]} : vector<4x128xf32> to vector<4x64xf32>
    %316 = arith.truncf %315 : vector<4x64xf32> to vector<4x64xbf16>
    %cst_217 = arith.constant dense<0.000000e+00> : vector<64x64xf32>
    %317 = tpu.matmul %313, %314, %cst_217 {dimension_numbers = #tpu.dot_dimension_numbers<[1], [1], [0], [0], [0, 0, 1, 0], [], []>} : vector<64x4xbf16>, vector<64x4xbf16>, vector<64x64xf32> -> vector<64x64xf32>
    %cst_218 = arith.constant dense<0xFF800000> : vector<64xf32>
    %318 = vector.multi_reduction <maximumf>, %317, %cst_218 [1] : vector<64x64xf32> to vector<64xf32>
    %319 = vector.shape_cast %318 : vector<64xf32> to vector<64x1xf32>
    %320 = vector.broadcast %319 : vector<64x1xf32> to vector<64x64xf32>
    %321 = arith.subf %317, %320 : vector<64x64xf32>
    %322 = math.exp %321 : vector<64x64xf32>
    %cst_219 = arith.constant dense<0.000000e+00> : vector<64xf32>
    %323 = vector.multi_reduction <add>, %322, %cst_219 [1] : vector<64x64xf32> to vector<64xf32>
    %324 = vector.shape_cast %323 : vector<64xf32> to vector<64x1xf32>
    %325 = tpu.reciprocal %324 {approx = true} : vector<64x1xf32> -> vector<64x1xf32>
    %326 = vector.broadcast %325 : vector<64x1xf32> to vector<64x64xf32>
    %327 = arith.mulf %322, %326 : vector<64x64xf32>
    %328 = arith.truncf %327 : vector<64x64xf32> to vector<64x64xbf16>
    %cst_220 = arith.constant dense<0.000000e+00> : vector<4x64xf32>
    %329 = tpu.matmul %316, %328, %cst_220 {dimension_numbers = #tpu.dot_dimension_numbers<[1], [1], [0], [0], [0, 0, 1, 0], [], []>} : vector<4x64xbf16>, vector<64x64xbf16>, vector<4x64xf32> -> vector<4x64xf32>
    %c12 = arith.constant 12 : index
    %c0_221 = arith.constant 0 : index
    %330 = vector.load %arg30[%c12, %c0_221] : memref<32x64xf32, #tpu.memory_space<vmem>>, vector<4x64xf32>
    tpu.vector_store %arg30[%c12, %c0_221], %329 {strides = array<i32>} : memref<32x64xf32, #tpu.memory_space<vmem>>, vector<4x64xf32>,
    %331 = vector.extract_strided_slice %309 {offsets = [64, 0], sizes = [64, 4], strides = [1, 1]} : vector<128x4xbf16> to vector<64x4xbf16>
    %332 = vector.extract_strided_slice %311 {offsets = [64, 0], sizes = [64, 4], strides = [1, 1]} : vector<128x4xbf16> to vector<64x4xbf16>
    %333 = vector.extract_strided_slice %312 {offsets = [0, 64], sizes = [4, 64], strides = [1, 1]} : vector<4x128xf32> to vector<4x64xf32>
    %334 = arith.truncf %333 : vector<4x64xf32> to vector<4x64xbf16>
    %cst_222 = arith.constant dense<0.000000e+00> : vector<64x64xf32>
    %335 = tpu.matmul %331, %332, %cst_222 {dimension_numbers = #tpu.dot_dimension_numbers<[1], [1], [0], [0], [0, 0, 1, 0], [], []>} : vector<64x4xbf16>, vector<64x4xbf16>, vector<64x64xf32> -> vector<64x64xf32>
    %cst_223 = arith.constant dense<0xFF800000> : vector<64xf32>
    %336 = vector.multi_reduction <maximumf>, %335, %cst_223 [1] : vector<64x64xf32> to vector<64xf32>
    %337 = vector.shape_cast %336 : vector<64xf32> to vector<64x1xf32>
    %338 = vector.broadcast %337 : vector<64x1xf32> to vector<64x64xf32>
    %339 = arith.subf %335, %338 : vector<64x64xf32>
    %340 = math.exp %339 : vector<64x64xf32>
    %cst_224 = arith.constant dense<0.000000e+00> : vector<64xf32>
    %341 = vector.multi_reduction <add>, %340, %cst_224 [1] : vector<64x64xf32> to vector<64xf32>
    %342 = vector.shape_cast %341 : vector<64xf32> to vector<64x1xf32>
    %343 = tpu.reciprocal %342 {approx = true} : vector<64x1xf32> -> vector<64x1xf32>
    %344 = vector.broadcast %343 : vector<64x1xf32> to vector<64x64xf32>
    %345 = arith.mulf %340, %344 : vector<64x64xf32>
    %346 = arith.truncf %345 : vector<64x64xf32> to vector<64x64xbf16>
    %cst_225 = arith.constant dense<0.000000e+00> : vector<4x64xf32>
    %347 = tpu.matmul %334, %346, %cst_225 {dimension_numbers = #tpu.dot_dimension_numbers<[1], [1], [0], [0], [0, 0, 1, 0], [], []>} : vector<4x64xbf16>, vector<64x64xbf16>, vector<4x64xf32> -> vector<4x64xf32>
    %c28 = arith.constant 28 : index
    %c0_226 = arith.constant 0 : index
    %348 = vector.load %arg30[%c28, %c0_226] : memref<32x64xf32, #tpu.memory_space<vmem>>, vector<4x64xf32>
    tpu.vector_store %arg30[%c28, %c0_226], %347 {strides = array<i32>} : memref<32x64xf32, #tpu.memory_space<vmem>>, vector<4x64xf32>,
    %c0_227 = arith.constant 0 : index
    %c0_228 = arith.constant 0 : index
    %349 = vector.load %arg30[%c0_227, %c0_228] : memref<32x64xf32, #tpu.memory_space<vmem>>, vector<16x64xf32>
    %c0_229 = arith.constant 0 : index
    %c0_230 = arith.constant 0 : index
    %350 = vector.load %arg13[%c0_229, %c0_230] : memref<16x16xbf16, #tpu.memory_space<vmem>>, vector<16x16xbf16>
    %351 = arith.truncf %349 : vector<16x64xf32> to vector<16x64xbf16>
    %cst_231 = arith.constant dense<0.000000e+00> : vector<16x64xf32>
    %352 = tpu.matmul %350, %351, %cst_231 {dimension_numbers = #tpu.dot_dimension_numbers<[1], [0], [0], [1], [0, 0, 1, 1], [], []>} : vector<16x16xbf16>, vector<16x64xbf16>, vector<16x64xf32> -> vector<16x64xf32>
    %c0_232 = arith.constant 0 : index
    %c0_233 = arith.constant 0 : index
    %353 = vector.load %arg14[%c0_232, %c0_233] : memref<16x1xf32, #tpu.memory_space<vmem>>, vector<16x1xf32>
    %354 = vector.broadcast %353 : vector<16x1xf32> to vector<16x64xf32>
    %355 = arith.addf %352, %354 : vector<16x64xf32>
    %c0_234 = arith.constant 0 : index
    %c0_235 = arith.constant 0 : index
    %356 = vector.load %arg30[%c0_234, %c0_235] : memref<32x64xf32, #tpu.memory_space<vmem>>, vector<16x64xf32>
    tpu.vector_store %arg30[%c0_234, %c0_235], %355 {strides = array<i32>} : memref<32x64xf32, #tpu.memory_space<vmem>>, vector<16x64xf32>,
    %c16_236 = arith.constant 16 : index
    %c0_237 = arith.constant 0 : index
    %357 = vector.load %arg30[%c16_236, %c0_237] : memref<32x64xf32, #tpu.memory_space<vmem>>, vector<16x64xf32>
    %c0_238 = arith.constant 0 : index
    %c0_239 = arith.constant 0 : index
    %358 = vector.load %arg13[%c0_238, %c0_239] : memref<16x16xbf16, #tpu.memory_space<vmem>>, vector<16x16xbf16>
    %359 = arith.truncf %357 : vector<16x64xf32> to vector<16x64xbf16>
    %cst_240 = arith.constant dense<0.000000e+00> : vector<16x64xf32>
    %360 = tpu.matmul %358, %359, %cst_240 {dimension_numbers = #tpu.dot_dimension_numbers<[1], [0], [0], [1], [0, 0, 1, 1], [], []>} : vector<16x16xbf16>, vector<16x64xbf16>, vector<16x64xf32> -> vector<16x64xf32>
    %c0_241 = arith.constant 0 : index
    %c0_242 = arith.constant 0 : index
    %361 = vector.load %arg14[%c0_241, %c0_242] : memref<16x1xf32, #tpu.memory_space<vmem>>, vector<16x1xf32>
    %362 = vector.broadcast %361 : vector<16x1xf32> to vector<16x64xf32>
    %363 = arith.addf %360, %362 : vector<16x64xf32>
    %c16_243 = arith.constant 16 : index
    %c0_244 = arith.constant 0 : index
    %364 = vector.load %arg30[%c16_243, %c0_244] : memref<32x64xf32, #tpu.memory_space<vmem>>, vector<16x64xf32>
    tpu.vector_store %arg30[%c16_243, %c0_244], %363 {strides = array<i32>} : memref<32x64xf32, #tpu.memory_space<vmem>>, vector<16x64xf32>,
    %c0_245 = arith.constant 0 : index
    %c0_246 = arith.constant 0 : index
    %365 = tpu.strided_load %arg30[%c0_245, %c0_246] {strides = array<i32: 16, 1>} : memref<32x64xf32, #tpu.memory_space<vmem>>, vector<2x64xf32>
    %366 = arith.truncf %365 : vector<2x64xf32> to vector<2x64xbf16>
    %c0_247 = arith.constant 0 : index
    %c0_248 = arith.constant 0 : index
    %c0_249 = arith.constant 0 : index
    %367 = vector.load %arg15[%c0_247, %c0_248, %c0_249] : memref<16x64x64xbf16, #tpu.memory_space<vmem>>, vector<1x64x64xbf16>
    %368 = vector.shape_cast %367 : vector<1x64x64xbf16> to vector<64x64xbf16>
    %cst_250 = arith.constant dense<0.000000e+00> : vector<2x64xf32>
    %369 = tpu.matmul %366, %368, %cst_250 {dimension_numbers = #tpu.dot_dimension_numbers<[1], [0], [0], [1], [0, 0, 1, 1], [], []>} : vector<2x64xbf16>, vector<64x64xbf16>, vector<2x64xf32> -> vector<2x64xf32>
    %c1_251 = arith.constant 1 : index
    %c0_252 = arith.constant 0 : index
    %370 = tpu.strided_load %arg30[%c1_251, %c0_252] {strides = array<i32: 16, 1>} : memref<32x64xf32, #tpu.memory_space<vmem>>, vector<2x64xf32>
    %371 = arith.truncf %370 : vector<2x64xf32> to vector<2x64xbf16>
    %c1_253 = arith.constant 1 : index
    %c0_254 = arith.constant 0 : index
    %c0_255 = arith.constant 0 : index
    %372 = vector.load %arg15[%c1_253, %c0_254, %c0_255] : memref<16x64x64xbf16, #tpu.memory_space<vmem>>, vector<1x64x64xbf16>
    %373 = vector.shape_cast %372 : vector<1x64x64xbf16> to vector<64x64xbf16>
    %cst_256 = arith.constant dense<0.000000e+00> : vector<2x64xf32>
    %374 = tpu.matmul %371, %373, %cst_256 {dimension_numbers = #tpu.dot_dimension_numbers<[1], [0], [0], [1], [0, 0, 1, 1], [], []>} : vector<2x64xbf16>, vector<64x64xbf16>, vector<2x64xf32> -> vector<2x64xf32>
    %375 = arith.addf %369, %374 : vector<2x64xf32>
    %c2_257 = arith.constant 2 : index
    %c0_258 = arith.constant 0 : index
    %376 = tpu.strided_load %arg30[%c2_257, %c0_258] {strides = array<i32: 16, 1>} : memref<32x64xf32, #tpu.memory_space<vmem>>, vector<2x64xf32>
    %377 = arith.truncf %376 : vector<2x64xf32> to vector<2x64xbf16>
    %c2_259 = arith.constant 2 : index
    %c0_260 = arith.constant 0 : index
    %c0_261 = arith.constant 0 : index
    %378 = vector.load %arg15[%c2_259, %c0_260, %c0_261] : memref<16x64x64xbf16, #tpu.memory_space<vmem>>, vector<1x64x64xbf16>
    %379 = vector.shape_cast %378 : vector<1x64x64xbf16> to vector<64x64xbf16>
    %cst_262 = arith.constant dense<0.000000e+00> : vector<2x64xf32>
    %380 = tpu.matmul %377, %379, %cst_262 {dimension_numbers = #tpu.dot_dimension_numbers<[1], [0], [0], [1], [0, 0, 1, 1], [], []>} : vector<2x64xbf16>, vector<64x64xbf16>, vector<2x64xf32> -> vector<2x64xf32>
    %381 = arith.addf %375, %380 : vector<2x64xf32>
    %c3 = arith.constant 3 : index
    %c0_263 = arith.constant 0 : index
    %382 = tpu.strided_load %arg30[%c3, %c0_263] {strides = array<i32: 16, 1>} : memref<32x64xf32, #tpu.memory_space<vmem>>, vector<2x64xf32>
    %383 = arith.truncf %382 : vector<2x64xf32> to vector<2x64xbf16>
    %c3_264 = arith.constant 3 : index
    %c0_265 = arith.constant 0 : index
    %c0_266 = arith.constant 0 : index
    %384 = vector.load %arg15[%c3_264, %c0_265, %c0_266] : memref<16x64x64xbf16, #tpu.memory_space<vmem>>, vector<1x64x64xbf16>
    %385 = vector.shape_cast %384 : vector<1x64x64xbf16> to vector<64x64xbf16>
    %cst_267 = arith.constant dense<0.000000e+00> : vector<2x64xf32>
    %386 = tpu.matmul %383, %385, %cst_267 {dimension_numbers = #tpu.dot_dimension_numbers<[1], [0], [0], [1], [0, 0, 1, 1], [], []>} : vector<2x64xbf16>, vector<64x64xbf16>, vector<2x64xf32> -> vector<2x64xf32>
    %387 = arith.addf %381, %386 : vector<2x64xf32>
    %c4_268 = arith.constant 4 : index
    %c0_269 = arith.constant 0 : index
    %388 = tpu.strided_load %arg30[%c4_268, %c0_269] {strides = array<i32: 16, 1>} : memref<32x64xf32, #tpu.memory_space<vmem>>, vector<2x64xf32>
    %389 = arith.truncf %388 : vector<2x64xf32> to vector<2x64xbf16>
    %c4_270 = arith.constant 4 : index
    %c0_271 = arith.constant 0 : index
    %c0_272 = arith.constant 0 : index
    %390 = vector.load %arg15[%c4_270, %c0_271, %c0_272] : memref<16x64x64xbf16, #tpu.memory_space<vmem>>, vector<1x64x64xbf16>
    %391 = vector.shape_cast %390 : vector<1x64x64xbf16> to vector<64x64xbf16>
    %cst_273 = arith.constant dense<0.000000e+00> : vector<2x64xf32>
    %392 = tpu.matmul %389, %391, %cst_273 {dimension_numbers = #tpu.dot_dimension_numbers<[1], [0], [0], [1], [0, 0, 1, 1], [], []>} : vector<2x64xbf16>, vector<64x64xbf16>, vector<2x64xf32> -> vector<2x64xf32>
    %393 = arith.addf %387, %392 : vector<2x64xf32>
    %c5 = arith.constant 5 : index
    %c0_274 = arith.constant 0 : index
    %394 = tpu.strided_load %arg30[%c5, %c0_274] {strides = array<i32: 16, 1>} : memref<32x64xf32, #tpu.memory_space<vmem>>, vector<2x64xf32>
    %395 = arith.truncf %394 : vector<2x64xf32> to vector<2x64xbf16>
    %c5_275 = arith.constant 5 : index
    %c0_276 = arith.constant 0 : index
    %c0_277 = arith.constant 0 : index
    %396 = vector.load %arg15[%c5_275, %c0_276, %c0_277] : memref<16x64x64xbf16, #tpu.memory_space<vmem>>, vector<1x64x64xbf16>
    %397 = vector.shape_cast %396 : vector<1x64x64xbf16> to vector<64x64xbf16>
    %cst_278 = arith.constant dense<0.000000e+00> : vector<2x64xf32>
    %398 = tpu.matmul %395, %397, %cst_278 {dimension_numbers = #tpu.dot_dimension_numbers<[1], [0], [0], [1], [0, 0, 1, 1], [], []>} : vector<2x64xbf16>, vector<64x64xbf16>, vector<2x64xf32> -> vector<2x64xf32>
    %399 = arith.addf %393, %398 : vector<2x64xf32>
    %c6 = arith.constant 6 : index
    %c0_279 = arith.constant 0 : index
    %400 = tpu.strided_load %arg30[%c6, %c0_279] {strides = array<i32: 16, 1>} : memref<32x64xf32, #tpu.memory_space<vmem>>, vector<2x64xf32>
    %401 = arith.truncf %400 : vector<2x64xf32> to vector<2x64xbf16>
    %c6_280 = arith.constant 6 : index
    %c0_281 = arith.constant 0 : index
    %c0_282 = arith.constant 0 : index
    %402 = vector.load %arg15[%c6_280, %c0_281, %c0_282] : memref<16x64x64xbf16, #tpu.memory_space<vmem>>, vector<1x64x64xbf16>
    %403 = vector.shape_cast %402 : vector<1x64x64xbf16> to vector<64x64xbf16>
    %cst_283 = arith.constant dense<0.000000e+00> : vector<2x64xf32>
    %404 = tpu.matmul %401, %403, %cst_283 {dimension_numbers = #tpu.dot_dimension_numbers<[1], [0], [0], [1], [0, 0, 1, 1], [], []>} : vector<2x64xbf16>, vector<64x64xbf16>, vector<2x64xf32> -> vector<2x64xf32>
    %405 = arith.addf %399, %404 : vector<2x64xf32>
    %c7 = arith.constant 7 : index
    %c0_284 = arith.constant 0 : index
    %406 = tpu.strided_load %arg30[%c7, %c0_284] {strides = array<i32: 16, 1>} : memref<32x64xf32, #tpu.memory_space<vmem>>, vector<2x64xf32>
    %407 = arith.truncf %406 : vector<2x64xf32> to vector<2x64xbf16>
    %c7_285 = arith.constant 7 : index
    %c0_286 = arith.constant 0 : index
    %c0_287 = arith.constant 0 : index
    %408 = vector.load %arg15[%c7_285, %c0_286, %c0_287] : memref<16x64x64xbf16, #tpu.memory_space<vmem>>, vector<1x64x64xbf16>
    %409 = vector.shape_cast %408 : vector<1x64x64xbf16> to vector<64x64xbf16>
    %cst_288 = arith.constant dense<0.000000e+00> : vector<2x64xf32>
    %410 = tpu.matmul %407, %409, %cst_288 {dimension_numbers = #tpu.dot_dimension_numbers<[1], [0], [0], [1], [0, 0, 1, 1], [], []>} : vector<2x64xbf16>, vector<64x64xbf16>, vector<2x64xf32> -> vector<2x64xf32>
    %411 = arith.addf %405, %410 : vector<2x64xf32>
    %c8_289 = arith.constant 8 : index
    %c0_290 = arith.constant 0 : index
    %412 = tpu.strided_load %arg30[%c8_289, %c0_290] {strides = array<i32: 16, 1>} : memref<32x64xf32, #tpu.memory_space<vmem>>, vector<2x64xf32>
    %413 = arith.truncf %412 : vector<2x64xf32> to vector<2x64xbf16>
    %c8_291 = arith.constant 8 : index
    %c0_292 = arith.constant 0 : index
    %c0_293 = arith.constant 0 : index
    %414 = vector.load %arg15[%c8_291, %c0_292, %c0_293] : memref<16x64x64xbf16, #tpu.memory_space<vmem>>, vector<1x64x64xbf16>
    %415 = vector.shape_cast %414 : vector<1x64x64xbf16> to vector<64x64xbf16>
    %cst_294 = arith.constant dense<0.000000e+00> : vector<2x64xf32>
    %416 = tpu.matmul %413, %415, %cst_294 {dimension_numbers = #tpu.dot_dimension_numbers<[1], [0], [0], [1], [0, 0, 1, 1], [], []>} : vector<2x64xbf16>, vector<64x64xbf16>, vector<2x64xf32> -> vector<2x64xf32>
    %417 = arith.addf %411, %416 : vector<2x64xf32>
    %c9 = arith.constant 9 : index
    %c0_295 = arith.constant 0 : index
    %418 = tpu.strided_load %arg30[%c9, %c0_295] {strides = array<i32: 16, 1>} : memref<32x64xf32, #tpu.memory_space<vmem>>, vector<2x64xf32>
    %419 = arith.truncf %418 : vector<2x64xf32> to vector<2x64xbf16>
    %c9_296 = arith.constant 9 : index
    %c0_297 = arith.constant 0 : index
    %c0_298 = arith.constant 0 : index
    %420 = vector.load %arg15[%c9_296, %c0_297, %c0_298] : memref<16x64x64xbf16, #tpu.memory_space<vmem>>, vector<1x64x64xbf16>
    %421 = vector.shape_cast %420 : vector<1x64x64xbf16> to vector<64x64xbf16>
    %cst_299 = arith.constant dense<0.000000e+00> : vector<2x64xf32>
    %422 = tpu.matmul %419, %421, %cst_299 {dimension_numbers = #tpu.dot_dimension_numbers<[1], [0], [0], [1], [0, 0, 1, 1], [], []>} : vector<2x64xbf16>, vector<64x64xbf16>, vector<2x64xf32> -> vector<2x64xf32>
    %423 = arith.addf %417, %422 : vector<2x64xf32>
    %c10 = arith.constant 10 : index
    %c0_300 = arith.constant 0 : index
    %424 = tpu.strided_load %arg30[%c10, %c0_300] {strides = array<i32: 16, 1>} : memref<32x64xf32, #tpu.memory_space<vmem>>, vector<2x64xf32>
    %425 = arith.truncf %424 : vector<2x64xf32> to vector<2x64xbf16>
    %c10_301 = arith.constant 10 : index
    %c0_302 = arith.constant 0 : index
    %c0_303 = arith.constant 0 : index
    %426 = vector.load %arg15[%c10_301, %c0_302, %c0_303] : memref<16x64x64xbf16, #tpu.memory_space<vmem>>, vector<1x64x64xbf16>
    %427 = vector.shape_cast %426 : vector<1x64x64xbf16> to vector<64x64xbf16>
    %cst_304 = arith.constant dense<0.000000e+00> : vector<2x64xf32>
    %428 = tpu.matmul %425, %427, %cst_304 {dimension_numbers = #tpu.dot_dimension_numbers<[1], [0], [0], [1], [0, 0, 1, 1], [], []>} : vector<2x64xbf16>, vector<64x64xbf16>, vector<2x64xf32> -> vector<2x64xf32>
    %429 = arith.addf %423, %428 : vector<2x64xf32>
    %c11 = arith.constant 11 : index
    %c0_305 = arith.constant 0 : index
    %430 = tpu.strided_load %arg30[%c11, %c0_305] {strides = array<i32: 16, 1>} : memref<32x64xf32, #tpu.memory_space<vmem>>, vector<2x64xf32>
    %431 = arith.truncf %430 : vector<2x64xf32> to vector<2x64xbf16>
    %c11_306 = arith.constant 11 : index
    %c0_307 = arith.constant 0 : index
    %c0_308 = arith.constant 0 : index
    %432 = vector.load %arg15[%c11_306, %c0_307, %c0_308] : memref<16x64x64xbf16, #tpu.memory_space<vmem>>, vector<1x64x64xbf16>
    %433 = vector.shape_cast %432 : vector<1x64x64xbf16> to vector<64x64xbf16>
    %cst_309 = arith.constant dense<0.000000e+00> : vector<2x64xf32>
    %434 = tpu.matmul %431, %433, %cst_309 {dimension_numbers = #tpu.dot_dimension_numbers<[1], [0], [0], [1], [0, 0, 1, 1], [], []>} : vector<2x64xbf16>, vector<64x64xbf16>, vector<2x64xf32> -> vector<2x64xf32>
    %435 = arith.addf %429, %434 : vector<2x64xf32>
    %c12_310 = arith.constant 12 : index
    %c0_311 = arith.constant 0 : index
    %436 = tpu.strided_load %arg30[%c12_310, %c0_311] {strides = array<i32: 16, 1>} : memref<32x64xf32, #tpu.memory_space<vmem>>, vector<2x64xf32>
    %437 = arith.truncf %436 : vector<2x64xf32> to vector<2x64xbf16>
    %c12_312 = arith.constant 12 : index
    %c0_313 = arith.constant 0 : index
    %c0_314 = arith.constant 0 : index
    %438 = vector.load %arg15[%c12_312, %c0_313, %c0_314] : memref<16x64x64xbf16, #tpu.memory_space<vmem>>, vector<1x64x64xbf16>
    %439 = vector.shape_cast %438 : vector<1x64x64xbf16> to vector<64x64xbf16>
    %cst_315 = arith.constant dense<0.000000e+00> : vector<2x64xf32>
    %440 = tpu.matmul %437, %439, %cst_315 {dimension_numbers = #tpu.dot_dimension_numbers<[1], [0], [0], [1], [0, 0, 1, 1], [], []>} : vector<2x64xbf16>, vector<64x64xbf16>, vector<2x64xf32> -> vector<2x64xf32>
    %441 = arith.addf %435, %440 : vector<2x64xf32>
    %c13 = arith.constant 13 : index
    %c0_316 = arith.constant 0 : index
    %442 = tpu.strided_load %arg30[%c13, %c0_316] {strides = array<i32: 16, 1>} : memref<32x64xf32, #tpu.memory_space<vmem>>, vector<2x64xf32>
    %443 = arith.truncf %442 : vector<2x64xf32> to vector<2x64xbf16>
    %c13_317 = arith.constant 13 : index
    %c0_318 = arith.constant 0 : index
    %c0_319 = arith.constant 0 : index
    %444 = vector.load %arg15[%c13_317, %c0_318, %c0_319] : memref<16x64x64xbf16, #tpu.memory_space<vmem>>, vector<1x64x64xbf16>
    %445 = vector.shape_cast %444 : vector<1x64x64xbf16> to vector<64x64xbf16>
    %cst_320 = arith.constant dense<0.000000e+00> : vector<2x64xf32>
    %446 = tpu.matmul %443, %445, %cst_320 {dimension_numbers = #tpu.dot_dimension_numbers<[1], [0], [0], [1], [0, 0, 1, 1], [], []>} : vector<2x64xbf16>, vector<64x64xbf16>, vector<2x64xf32> -> vector<2x64xf32>
    %447 = arith.addf %441, %446 : vector<2x64xf32>
    %c14 = arith.constant 14 : index
    %c0_321 = arith.constant 0 : index
    %448 = tpu.strided_load %arg30[%c14, %c0_321] {strides = array<i32: 16, 1>} : memref<32x64xf32, #tpu.memory_space<vmem>>, vector<2x64xf32>
    %449 = arith.truncf %448 : vector<2x64xf32> to vector<2x64xbf16>
    %c14_322 = arith.constant 14 : index
    %c0_323 = arith.constant 0 : index
    %c0_324 = arith.constant 0 : index
    %450 = vector.load %arg15[%c14_322, %c0_323, %c0_324] : memref<16x64x64xbf16, #tpu.memory_space<vmem>>, vector<1x64x64xbf16>
    %451 = vector.shape_cast %450 : vector<1x64x64xbf16> to vector<64x64xbf16>
    %cst_325 = arith.constant dense<0.000000e+00> : vector<2x64xf32>
    %452 = tpu.matmul %449, %451, %cst_325 {dimension_numbers = #tpu.dot_dimension_numbers<[1], [0], [0], [1], [0, 0, 1, 1], [], []>} : vector<2x64xbf16>, vector<64x64xbf16>, vector<2x64xf32> -> vector<2x64xf32>
    %453 = arith.addf %447, %452 : vector<2x64xf32>
    %c15 = arith.constant 15 : index
    %c0_326 = arith.constant 0 : index
    %454 = tpu.strided_load %arg30[%c15, %c0_326] {strides = array<i32: 16, 1>} : memref<32x64xf32, #tpu.memory_space<vmem>>, vector<2x64xf32>
    %455 = arith.truncf %454 : vector<2x64xf32> to vector<2x64xbf16>
    %c15_327 = arith.constant 15 : index
    %c0_328 = arith.constant 0 : index
    %c0_329 = arith.constant 0 : index
    %456 = vector.load %arg15[%c15_327, %c0_328, %c0_329] : memref<16x64x64xbf16, #tpu.memory_space<vmem>>, vector<1x64x64xbf16>
    %457 = vector.shape_cast %456 : vector<1x64x64xbf16> to vector<64x64xbf16>
    %cst_330 = arith.constant dense<0.000000e+00> : vector<2x64xf32>
    %458 = tpu.matmul %455, %457, %cst_330 {dimension_numbers = #tpu.dot_dimension_numbers<[1], [0], [0], [1], [0, 0, 1, 1], [], []>} : vector<2x64xbf16>, vector<64x64xbf16>, vector<2x64xf32> -> vector<2x64xf32>
    %459 = arith.addf %453, %458 : vector<2x64xf32>
    %c0_331 = arith.constant 0 : index
    %c0_332 = arith.constant 0 : index
    %460 = vector.load %arg16[%c0_331, %c0_332] : memref<1x64xf32, #tpu.memory_space<vmem>>, vector<1x64xf32>
    %461 = vector.broadcast %460 : vector<1x64xf32> to vector<2x64xf32>
    %462 = arith.addf %459, %461 : vector<2x64xf32>
    %cst_333 = arith.constant 0.000000e+00 : f32
    %463 = vector.broadcast %cst_333 : f32 to vector<2x64xf32>
    %464 = arith.maximumf %462, %463 : vector<2x64xf32>
    %465 = arith.truncf %464 : vector<2x64xf32> to vector<2x64xbf16>
    %c0_334 = arith.constant 0 : index
    %c0_335 = arith.constant 0 : index
    %466 = vector.load %arg17[%c0_334, %c0_335] : memref<64x32xbf16, #tpu.memory_space<vmem>>, vector<64x32xbf16>
    %cst_336 = arith.constant dense<0.000000e+00> : vector<2x32xf32>
    %467 = tpu.matmul %465, %466, %cst_336 {dimension_numbers = #tpu.dot_dimension_numbers<[1], [0], [0], [1], [0, 0, 1, 1], [], []>} : vector<2x64xbf16>, vector<64x32xbf16>, vector<2x32xf32> -> vector<2x32xf32>
    %c0_337 = arith.constant 0 : index
    %c0_338 = arith.constant 0 : index
    %468 = vector.load %arg18[%c0_337, %c0_338] : memref<1x32xf32, #tpu.memory_space<vmem>>, vector<1x32xf32>
    %469 = vector.broadcast %468 : vector<1x32xf32> to vector<2x32xf32>
    %470 = arith.addf %467, %469 : vector<2x32xf32>
    %cst_339 = arith.constant 0.000000e+00 : f32
    %471 = vector.broadcast %cst_339 : f32 to vector<2x32xf32>
    %472 = arith.maximumf %470, %471 : vector<2x32xf32>
    %473 = arith.truncf %472 : vector<2x32xf32> to vector<2x32xbf16>
    %c0_340 = arith.constant 0 : index
    %c0_341 = arith.constant 0 : index
    %474 = vector.load %arg19[%c0_340, %c0_341] : memref<32x5xbf16, #tpu.memory_space<vmem>>, vector<32x5xbf16>
    %cst_342 = arith.constant dense<0.000000e+00> : vector<2x5xf32>
    %475 = tpu.matmul %473, %474, %cst_342 {dimension_numbers = #tpu.dot_dimension_numbers<[1], [0], [0], [1], [0, 0, 1, 1], [], []>} : vector<2x32xbf16>, vector<32x5xbf16>, vector<2x5xf32> -> vector<2x5xf32>
    %c0_343 = arith.constant 0 : index
    %c0_344 = arith.constant 0 : index
    %476 = vector.load %arg20[%c0_343, %c0_344] : memref<1x5xf32, #tpu.memory_space<vmem>>, vector<1x5xf32>
    %477 = vector.broadcast %476 : vector<1x5xf32> to vector<2x5xf32>
    %478 = arith.addf %475, %477 : vector<2x5xf32>
    %cst_345 = arith.constant dense<0xFF800000> : vector<2xf32>
    %479 = vector.multi_reduction <maximumf>, %478, %cst_345 [1] : vector<2x5xf32> to vector<2xf32>
    %480 = vector.shape_cast %479 : vector<2xf32> to vector<2x1xf32>
    %481 = vector.broadcast %480 : vector<2x1xf32> to vector<2x5xf32>
    %482 = arith.subf %478, %481 : vector<2x5xf32>
    %483 = math.exp %482 : vector<2x5xf32>
    %cst_346 = arith.constant dense<0.000000e+00> : vector<2xf32>
    %484 = vector.multi_reduction <add>, %483, %cst_346 [1] : vector<2x5xf32> to vector<2xf32>
    %485 = vector.shape_cast %484 : vector<2xf32> to vector<2x1xf32>
    %486 = vector.broadcast %485 : vector<2x1xf32> to vector<2x5xf32>
    %487 = arith.divf %483, %486 : vector<2x5xf32>
    %c0_347 = arith.constant 0 : index
    %c0_348 = arith.constant 0 : index
    %488 = vector.load %arg21[%c0_347, %c0_348] : memref<2x5xf32, #tpu.memory_space<vmem>>, vector<2x5xf32>
    tpu.vector_store %arg21[%c0_347, %c0_348], %487 {strides = array<i32>} : memref<2x5xf32, #tpu.memory_space<vmem>>, vector<2x5xf32>,
    return
  }
}

</mosaic_0001>

<bundles_post_ra>
// kernel: cnn_attention_classifier.1
= control target key start
LH: loop header
LB: loop body
LE: loop exit
PB: predicated region body
PF: predicated region fallthrough
CT: control target
= control target key end

     0   :  { %s12543_s0 = inlined_call_operand.vmem [shape: f32[2,240,1], index: 0, kind: input, shape index: {}]   ;;  %s12544_s1 = inlined_call_operand.vmem [shape: f32[3,1,8], index: 1, kind: input, shape index: {}]   ;;  %s12545_s2 = inlined_call_operand.vmem [shape: f32[1,8], index: 2, kind: input, shape index: {}]   ;;  %s12546_s3 = inlined_call_operand.vmem [shape: bf16[3,8,16], index: 3, kind: input, shape index: {}]   ;;  %s12547_s4 = inlined_call_operand.vmem [shape: f32[1,16], index: 4, kind: input, shape index: {}]   ;;  %s12548_s5 = inlined_call_operand.vmem [shape: bf16[3,16,32], index: 5, kind: input, shape index: {}]   ;;  %s12549_s6 = inlined_call_operand.vmem [shape: f32[1,32], index: 6, kind: input, shape index: {}]   ;;  %s12550_s7 = inlined_call_operand.vmem [shape: bf16[3,32,64], index: 7, kind: input, shape index: {}]   ;;  %s12551_s8 = inlined_call_operand.vmem [shape: f32[1,64], index: 8, kind: input, shape index: {}]   ;;  %s12552_s9 = inlined_call_operand.vmem [shape: bf16[16,32], index: 9, kind: input, shape index: {}]   ;;  %s12553_s10 = inlined_call_operand.vmem [shape: f32[1,32], index: 10, kind: input, shape index: {}]   ;;  %s12554_s11 = inlined_call_operand.vmem [shape: bf16[16,16], index: 11, kind: input, shape index: {}]   ;;  %s12555_s12 = inlined_call_operand.vmem [shape: f32[16,1], index: 12, kind: input, shape index: {}]   ;;  %s12556_s13 = inlined_call_operand.vmem [shape: bf16[16,16], index: 13, kind: input, shape index: {}]   ;;  %s12557_s14 = inlined_call_operand.vmem [shape: f32[16,1], index: 14, kind: input, shape index: {}]   ;;  %s12558_s15 = inlined_call_operand.vmem [shape: bf16[16,64,64], index: 15, kind: input, shape index: {}]   ;;  %s12559_s16 = inlined_call_operand.vmem [shape: f32[1,64], index: 16, kind: input, shape index: {}]   ;;  %s12560_s17 = inlined_call_operand.vmem [shape: bf16[64,32], index: 17, kind: input, shape index: {}]   ;;  %s12561_s18 = inlined_call_operand.vmem [shape: f32[1,32], index: 18, kind: input, shape index: {}]   ;;  %s12562_s19 = inlined_call_operand.vmem [shape: bf16[32,5], index: 19, kind: input, shape index: {}]   ;;  %s12563_s20 = inlined_call_operand.vmem [shape: f32[1,5], index: 20, kind: input, shape index: {}]   ;;  %s12564_s21 = inlined_call_operand.hbm [shape: f32[2,5], index: 21, kind: output, shape index: {}]  }
   0x1   :  { %12597 = sst [smem:[#allocation40_spill]] %s12543_s0 }
   0x2   :  { %12598 = sst [smem:[#allocation41_spill]] %s12544_s1 }
   0x3   :  { %12599 = sst [smem:[#allocation42_spill]] %s12545_s2 }
   0x4   :  { %12600 = sst [smem:[#allocation43_spill]] %s12546_s3 }
   0x5   :  { %12601 = sst [smem:[#allocation44_spill]] %s12547_s4 }
   0x6   :  { %12602 = sst [smem:[#allocation45_spill]] %s12548_s5 }
   0x7   :  { %s12603_s26 = sld [smem:[#allocation40_spill]]  ;;  %vm134_vm0 = vcmask 7168   ;;  %vm131_vm1 = vcmask 0   ;;  %v9871_v3 = vmov 0   ;;  %v12570_v7 = vmov 0.0   ;;  %s12604_s28 = sld [smem:[#allocation43_spill]] }
   0x8   :  { %9495 = vset.pattern.permute.xlu1 %v9871_v3  ;;  %9494 = vset.pattern.permute.xlu0 %v9871_v3  ;;  %132 = vst.msk [vmem:[#allocation2] sm:$0x1] %vm131_vm1, %v12570_v7  ;;  %133 = vst.msk [vmem:[#allocation2 + $0xf1] sm:$0x1] %vm131_vm1, %v12570_v7  ;;  %vm1964_vm2 = vcmask 57344   ;;  %vm2144_vm3 = vcmask 1043456  }
   0x9   :  { %165 = vst.msk [vmem:[#allocation2 + $0xf2] sm:$0x1] %vm131_vm1, %v12570_v7  ;;  %166 = vst.msk [vmem:[#allocation2 + $0x1e3] sm:$0x1] %vm131_vm1, %v12570_v7 }
   0xa   :  { %1966 = vst.msk [vmem:[#allocation4 + $0x79] sm:$0x1] %vm1964_vm2, %v12570_v7  ;;  %1982 = vst.msk [vmem:[#allocation4 + $0x7a] sm:$0x1] %vm1964_vm2, %v12570_v7 }
   0xb   :  { %1965 = vst.msk [vmem:[#allocation4] sm:$0x1] %vm1964_vm2, %v12570_v7  ;;  %1983 = vst.msk [vmem:[#allocation4 + $0xf3] sm:$0x1] %vm1964_vm2, %v12570_v7 }
   0xd   :  { %v71_v0 = vld [vmem:[%s12603_s26 + $0x8] sm:$0xff]  ;;  %v72_v1 = vld [vmem:[%s12603_s26 + $0x10] sm:$0xff]  ;;  %v70_v2 = vld [vmem:[%s12603_s26] sm:$0xff] }
   0xe   :  { %136 = vst.msk [vmem:[#allocation2 + $0x9] sm:$0xff] %vm134_vm0, %v71_v0  ;;  %137 = vst.msk [vmem:[#allocation2 + $0x11] sm:$0xff] %vm134_vm0, %v72_v1  ;;  %v73_v4 = vld [vmem:[%s12603_s26 + $0x18] sm:$0xff]  ;;  %v74_v5 = vld [vmem:[%s12603_s26 + $0x20] sm:$0xff] }
   0xf   :  { %135 = vst.msk [vmem:[#allocation2 + $0x1] sm:$0xff] %vm134_vm0, %v70_v2  ;;  %v75_v6 = vld [vmem:[%s12603_s26 + $0x28] sm:$0xff]  ;;  %138 = vst.msk [vmem:[#allocation2 + $0x19] sm:$0xff] %vm134_vm0, %v73_v4  ;;  %v76_v8 = vld [vmem:[%s12603_s26 + $0x30] sm:$0xff] }
  0x10   :  { %139 = vst.msk [vmem:[#allocation2 + $0x21] sm:$0xff] %vm134_vm0, %v74_v5  ;;  %140 = vst.msk [vmem:[#allocation2 + $0x29] sm:$0xff] %vm134_vm0, %v75_v6  ;;  %v77_v9 = vld [vmem:[%s12603_s26 + $0x38] sm:$0xff]  ;;  %v78_v10 = vld [vmem:[%s12603_s26 + $0x40] sm:$0xff] }
  0x11   :  { %141 = vst.msk [vmem:[#allocation2 + $0x31] sm:$0xff] %vm134_vm0, %v76_v8  ;;  %142 = vst.msk [vmem:[#allocation2 + $0x39] sm:$0xff] %vm134_vm0, %v77_v9  ;;  %v79_v11 = vld [vmem:[%s12603_s26 + $0x48] sm:$0xff]  ;;  %v80_v12 = vld [vmem:[%s12603_s26 + $0x50] sm:$0xff] }
  0x12   :  { %143 = vst.msk [vmem:[#allocation2 + $0x41] sm:$0xff] %vm134_vm0, %v78_v10  ;;  %v81_v13 = vld [vmem:[%s12603_s26 + $0x58] sm:$0xff]  ;;  %144 = vst.msk [vmem:[#allocation2 + $0x49] sm:$0xff] %vm134_vm0, %v79_v11  ;;  %v82_v14 = vld [vmem:[%s12603_s26 + $0x60] sm:$0xff] }
  0x13   :  { %145 = vst.msk [vmem:[#allocation2 + $0x51] sm:$0xff] %vm134_vm0, %v80_v12  ;;  %146 = vst.msk [vmem:[#allocation2 + $0x59] sm:$0xff] %vm134_vm0, %v81_v13  ;;  %v83_v15 = vld [vmem:[%s12603_s26 + $0x68] sm:$0xff]  ;;  %v84_v16 = vld [vmem:[%s12603_s26 + $0x70] sm:$0xff] }
  0x14   :  { %147 = vst.msk [vmem:[#allocation2 + $0x61] sm:$0xff] %vm134_vm0, %v82_v14  ;;  %148 = vst.msk [vmem:[#allocation2 + $0x69] sm:$0xff] %vm134_vm0, %v83_v15  ;;  %v85_v17 = vld [vmem:[%s12603_s26 + $0x78] sm:$0xff]  ;;  %v86_v18 = vld [vmem:[%s12603_s26 + $0x80] sm:$0xff] }
  0x15   :  { %149 = vst.msk [vmem:[#allocation2 + $0x71] sm:$0xff] %vm134_vm0, %v84_v16  ;;  %v87_v19 = vld [vmem:[%s12603_s26 + $0x88] sm:$0xff]  ;;  %150 = vst.msk [vmem:[#allocation2 + $0x79] sm:$0xff] %vm134_vm0, %v85_v17  ;;  %v88_v20 = vld [vmem:[%s12603_s26 + $0x90] sm:$0xff] }
  0x16   :  { %151 = vst.msk [vmem:[#allocation2 + $0x81] sm:$0xff] %vm134_vm0, %v86_v18  ;;  %152 = vst.msk [vmem:[#allocation2 + $0x89] sm:$0xff] %vm134_vm0, %v87_v19  ;;  %v89_v21 = vld [vmem:[%s12603_s26 + $0x98] sm:$0xff]  ;;  %v90_v22 = vld [vmem:[%s12603_s26 + $0xa0] sm:$0xff] }
  0x17   :  { %153 = vst.msk [vmem:[#allocation2 + $0x91] sm:$0xff] %vm134_vm0, %v88_v20  ;;  %154 = vst.msk [vmem:[#allocation2 + $0x99] sm:$0xff] %vm134_vm0, %v89_v21  ;;  %v91_v23 = vld [vmem:[%s12603_s26 + $0xa8] sm:$0xff]  ;;  %v92_v24 = vld [vmem:[%s12603_s26 + $0xb0] sm:$0xff] }
  0x18   :  { %155 = vst.msk [vmem:[#allocation2 + $0xa1] sm:$0xff] %vm134_vm0, %v90_v22  ;;  %v93_v25 = vld [vmem:[%s12603_s26 + $0xb8] sm:$0xff]  ;;  %v199_v26 = vld [vmem:[#allocation2 + $0x10] sm:$0xff]  ;;  %156 = vst.msk [vmem:[#allocation2 + $0xa9] sm:$0xff] %vm134_vm0, %v91_v23 }
  0x19   :  { %157 = vst.msk [vmem:[#allocation2 + $0xb1] sm:$0xff] %vm134_vm0, %v92_v24  ;;  %158 = vst.msk [vmem:[#allocation2 + $0xb9] sm:$0xff] %vm134_vm0, %v93_v25  ;;  %271 = vperm.xlu1 %9495, %v199_v26   ;;  %v197_v27 = vld [vmem:[#allocation2] sm:$0xff]  ;;  %v200_v28 = vld [vmem:[#allocation2 + $0x18] sm:$0xff] }
  0x1a   :  { %261 = vperm.xlu0 %9494, %v197_v27   ;;  %v198_v29 = vld [vmem:[#allocation2 + $0x8] sm:$0xff]  ;;  %v634_v32 = vld [vmem:[#allocation2 + $0x19] sm:$0xff]  ;;  %v633_v33 = vld [vmem:[#allocation2 + $0x11] sm:$0xff] }
  0x1b   :  { %v632_v30 = vld [vmem:[#allocation2 + $0x9] sm:$0xff]  ;;  %v631_v31 = vld [vmem:[#allocation2 + $0x1] sm:$0xff]  ;;  %v204_v36 = vld [vmem:[#allocation2 + $0x38] sm:$0xff] }
  0x1c   :  { %v202_v34 = vld [vmem:[#allocation2 + $0x28] sm:$0xff]  ;;  %v201_v35 = vld [vmem:[#allocation2 + $0x20] sm:$0xff]  ;;  %v203_v37 = vld [vmem:[#allocation2 + $0x30] sm:$0xff] }
  0x1d   :  { %276 = vperm.xlu1 %9495, %v200_v28   ;;  %v636_v38 = vld [vmem:[#allocation2 + $0x29] sm:$0xff]  ;;  %v635_v39 = vld [vmem:[#allocation2 + $0x21] sm:$0xff]  ;;  %v638_v40 = vld [vmem:[#allocation2 + $0x39] sm:$0xff] }
  0x1e   :  { %266 = vperm.xlu0 %9494, %v198_v29   ;;  %v94_v41 = vld [vmem:[%s12603_s26 + $0xc0] sm:$0xff]  ;;  %v95_v42 = vld [vmem:[%s12603_s26 + $0xc8] sm:$0xff]  ;;  %v637_v43 = vld [vmem:[#allocation2 + $0x31] sm:$0xff] }
  0x1f   :  { %159 = vst.msk [vmem:[#allocation2 + $0xc1] sm:$0xff] %vm134_vm0, %v94_v41  ;;  %160 = vst.msk [vmem:[#allocation2 + $0xc9] sm:$0xff] %vm134_vm0, %v95_v42  ;;  %v96_v44 = vld [vmem:[%s12603_s26 + $0xd0] sm:$0xff]  ;;  %v97_v45 = vld [vmem:[%s12603_s26 + $0xd8] sm:$0xff] }
  0x20   :  { %v98_v46 = vld [vmem:[%s12603_s26 + $0xe0] sm:$0xff]  ;;  %161 = vst.msk [vmem:[#allocation2 + $0xd1] sm:$0xff] %vm134_vm0, %v96_v44  ;;  %162 = vst.msk [vmem:[#allocation2 + $0xd9] sm:$0xff] %vm134_vm0, %v97_v45  ;;  %v99_v47 = vld [vmem:[%s12603_s26 + $0xe8] sm:$0xff] }
  0x21   :  { %701 = vperm.xlu1 %9495, %v632_v30   ;;  %163 = vst.msk [vmem:[#allocation2 + $0xe1] sm:$0xff] %vm134_vm0, %v98_v46  ;;  %164 = vst.msk [vmem:[#allocation2 + $0xe9] sm:$0xff] %vm134_vm0, %v99_v47  ;;  %v1128_v48 = vld [vmem:[#allocation2 + $0xa] sm:$0xff]  ;;  %v1127_v49 = vld [vmem:[#allocation2 + $0x2] sm:$0xff] }
  0x22   :  { %696 = vperm.xlu0 %9494, %v631_v31   ;;  %v7937_v50 = vld [vmem:[%s12603_s26 + $0xf0] sm:$0xff]  ;;  %v7938_v51 = vld [vmem:[%s12603_s26 + $0xf8] sm:$0xff]  ;;  %v7939_v54 = vld [vmem:[%s12603_s26 + $0x100] sm:$0xff] }
  0x23   :  { %167 = vst.msk [vmem:[#allocation2 + $0xf3] sm:$0xff] %vm134_vm0, %v7937_v50  ;;  %168 = vst.msk [vmem:[#allocation2 + $0xfb] sm:$0xff] %vm134_vm0, %v7938_v51  ;;  %v1130_v52 = vld [vmem:[#allocation2 + $0x1a] sm:$0xff]  ;;  %v1129_v53 = vld [vmem:[#allocation2 + $0x12] sm:$0xff] }
  0x24   :  { %v1132_v55 = vld [vmem:[#allocation2 + $0x2a] sm:$0xff]  ;;  %v1131_v56 = vld [vmem:[#allocation2 + $0x22] sm:$0xff]  ;;  %169 = vst.msk [vmem:[#allocation2 + $0x103] sm:$0xff] %vm134_vm0, %v7939_v54  ;;  %v1134_v57 = vld [vmem:[#allocation2 + $0x3a] sm:$0xff] }
  0x25   :  { %711 = vperm.xlu1 %9495, %v634_v32   ;;  %v1133_v58 = vld [vmem:[#allocation2 + $0x32] sm:$0xff]  ;;  %v206_v59 = vld [vmem:[#allocation2 + $0x48] sm:$0xff]  ;;  %v205_v60 = vld [vmem:[#allocation2 + $0x40] sm:$0xff] }
  0x26   :  { %706 = vperm.xlu0 %9494, %v633_v33   ;;  %v208_v61 = vld [vmem:[#allocation2 + $0x58] sm:$0xff]  ;;  %v207_v62 = vld [vmem:[#allocation2 + $0x50] sm:$0xff]  ;;  %v639_v0 = vld [vmem:[#allocation2 + $0x41] sm:$0xff] }
  0x27   :  { %v640_v63 = vld [vmem:[#allocation2 + $0x49] sm:$0xff]  ;;  %v642_v1 = vld [vmem:[#allocation2 + $0x59] sm:$0xff]  ;;  %v641_v2 = vld [vmem:[#allocation2 + $0x51] sm:$0xff] }
  0x28   :  { %v210_v3 = vld [vmem:[#allocation2 + $0x68] sm:$0xff]  ;;  %v209_v4 = vld [vmem:[#allocation2 + $0x60] sm:$0xff]  ;;  %v212_v6 = vld [vmem:[#allocation2 + $0x78] sm:$0xff] }
  0x29   :  { %286 = vperm.xlu1 %9495, %v202_v34   ;;  %v7940_v5 = vld [vmem:[%s12603_s26 + $0x108] sm:$0xff]  ;;  %v211_v8 = vld [vmem:[#allocation2 + $0x70] sm:$0xff]  ;;  %v7942_v10 = vld [vmem:[%s12603_s26 + $0x118] sm:$0xff] }
  0x2a   :  { %281 = vperm.xlu0 %9494, %v201_v35   ;;  %170 = vst.msk [vmem:[#allocation2 + $0x10b] sm:$0xff] %vm134_vm0, %v7940_v5  ;;  %v7941_v9 = vld [vmem:[%s12603_s26 + $0x110] sm:$0xff]  ;;  %172 = vst.msk [vmem:[#allocation2 + $0x11b] sm:$0xff] %vm134_vm0, %v7942_v10  ;;  %v643_v12 = vld [vmem:[#allocation2 + $0x61] sm:$0xff] }
  0x2b   :  { %171 = vst.msk [vmem:[#allocation2 + $0x113] sm:$0xff] %vm134_vm0, %v7941_v9  ;;  %v644_v11 = vld [vmem:[#allocation2 + $0x69] sm:$0xff]  ;;  %v7973_v13 = vld [vmem:[%s12604_s28 + $0x4] sm:$0xf]  ;;  %v646_v16 = vld [vmem:[#allocation2 + $0x79] sm:$0xff] }
  0x2c   :  { %9447 = vmatprep.subr.msk.bf16.mxu0 %vm2144_vm3, %v7973_v13  ;;  %v2146_v14 = vsel %vm2144_vm3, %v7973_v13, 0  ;;  %v7943_v15 = vld [vmem:[%s12603_s26 + $0x120] sm:$0xff]  ;;  %v645_v17 = vld [vmem:[#allocation2 + $0x71] sm:$0xff]  ;;  %v7944_v19 = vld [vmem:[%s12603_s26 + $0x128] sm:$0xff] }
  0x2d   :  { %296 = vperm.xlu1 %9495, %v204_v36   ;;  %8660 = vmatpush3.bf16.msra.mxu0 %v2146_v14  ;;  %173 = vst.msk [vmem:[#allocation2 + $0x123] sm:$0xff] %vm134_vm0, %v7943_v15  ;;  %v1136_v18 = vld [vmem:[#allocation2 + $0x4a] sm:$0xff]  ;;  %v1135_v20 = vld [vmem:[#allocation2 + $0x42] sm:$0xff]  ;;  %174 = vst.msk [vmem:[#allocation2 + $0x12b] sm:$0xff] %vm134_vm0, %v7944_v19 }
  0x2e   :  { %291 = vperm.xlu0 %9494, %v203_v37   ;;  %v1138_v21 = vld [vmem:[#allocation2 + $0x5a] sm:$0xff]  ;;  %v1137_v22 = vld [vmem:[#allocation2 + $0x52] sm:$0xff]  ;;  %v1140_v25 = vld [vmem:[#allocation2 + $0x6a] sm:$0xff] }
  0x2f   :  { %v7945_v23 = vld [vmem:[%s12603_s26 + $0x130] sm:$0xff]  ;;  %v7946_v24 = vld [vmem:[%s12603_s26 + $0x138] sm:$0xff]  ;;  %v1139_v26 = vld [vmem:[#allocation2 + $0x62] sm:$0xff] }
  0x30   :  { %175 = vst.msk [vmem:[#allocation2 + $0x133] sm:$0xff] %vm134_vm0, %v7945_v23  ;;  %176 = vst.msk [vmem:[#allocation2 + $0x13b] sm:$0xff] %vm134_vm0, %v7946_v24  ;;  %v7947_v27 = vld [vmem:[%s12603_s26 + $0x140] sm:$0xff]  ;;  %v1141_v29 = vld [vmem:[#allocation2 + $0x72] sm:$0xff] }
  0x31   :  { %721 = vperm.xlu1 %9495, %v636_v38   ;;  %177 = vst.msk [vmem:[#allocation2 + $0x143] sm:$0xff] %vm134_vm0, %v7947_v27  ;;  %v1142_v28 = vld [vmem:[#allocation2 + $0x7a] sm:$0xff]  ;;  %v214_v30 = vld [vmem:[#allocation2 + $0x88] sm:$0xff]  ;;  %v215_v33 = vld [vmem:[#allocation2 + $0x90] sm:$0xff] }
  0x32   :  { %716 = vperm.xlu0 %9494, %v635_v39   ;;  %v213_v31 = vld [vmem:[#allocation2 + $0x80] sm:$0xff]  ;;  %v216_v32 = vld [vmem:[#allocation2 + $0x98] sm:$0xff] }
  0x35   :  { %731 = vperm.xlu1 %9495, %v638_v40  }
  0x36   :  { %726 = vperm.xlu0 %9494, %v637_v43  }
  0x39   :  { %1197 = vperm.xlu1 %9495, %v1128_v48  }
  0x3a   :  { %1192 = vperm.xlu0 %9494, %v1127_v49  }
  0x3d   :  { %1207 = vperm.xlu1 %9495, %v1130_v52  }
  0x3e   :  { %1202 = vperm.xlu0 %9494, %v1129_v53  }
  0x41   :  { %1217 = vperm.xlu1 %9495, %v1132_v55  }
  0x42   :  { %1212 = vperm.xlu0 %9494, %v1131_v56  }
  0x45   :  { %1227 = vperm.xlu1 %9495, %v1134_v57  }
  0x46   :  { %1222 = vperm.xlu0 %9494, %v1133_v58  }
  0x49   :  { %306 = vperm.xlu1 %9495, %v206_v59  }
  0x4a   :  { %301 = vperm.xlu0 %9494, %v205_v60  }
  0x4d   :  { %316 = vperm.xlu1 %9495, %v208_v61  }
  0x4e   :  { %311 = vperm.xlu0 %9494, %v207_v62  }
  0x51   :  { %741 = vperm.xlu1 %9495, %v640_v63  }
  0x52   :  { %736 = vperm.xlu0 %9494, %v639_v0  }
  0x55   :  { %751 = vperm.xlu1 %9495, %v642_v1  }
  0x56   :  { %746 = vperm.xlu0 %9494, %v641_v2  }
  0x59   :  { %326 = vperm.xlu1 %9495, %v210_v3  }
  0x5a   :  { %321 = vperm.xlu0 %9494, %v209_v4  }
  0x5d   :  { %336 = vperm.xlu1 %9495, %v212_v6  }
  0x5e   :  { %331 = vperm.xlu0 %9494, %v211_v8  }
  0x61   :  { %761 = vperm.xlu1 %9495, %v644_v11  }
  0x62   :  { %756 = vperm.xlu0 %9494, %v643_v12  }
  0x65   :  { %771 = vperm.xlu1 %9495, %v646_v16  }
  0x66   :  { %766 = vperm.xlu0 %9494, %v645_v17  }
  0x69   :  { %1237 = vperm.xlu1 %9495, %v1136_v18  }
  0x6a   :  { %1232 = vperm.xlu0 %9494, %v1135_v20  }
  0x6d   :  { %1247 = vperm.xlu1 %9495, %v1138_v21  }
  0x6e   :  { %1242 = vperm.xlu0 %9494, %v1137_v22  }
  0x71   :  { %1257 = vperm.xlu1 %9495, %v1140_v25  }
  0x72   :  { %1252 = vperm.xlu0 %9494, %v1139_v26  }
  0x75   :  { %1267 = vperm.xlu1 %9495, %v1142_v28  }
  0x76   :  { %1262 = vperm.xlu0 %9494, %v1141_v29  }
  0x79   :  { %346 = vperm.xlu1 %9495, %v214_v30  }
  0x7a   :  { %341 = vperm.xlu0 %9494, %v213_v31  }
  0x7d   :  { %356 = vperm.xlu1 %9495, %v216_v32  }
  0x7e   :  { %26 = vsyncpa [#allocation12], 0  ;;  %351 = vperm.xlu0 %9494, %v215_v33   ;;  %v648_v34 = vld [vmem:[#allocation2 + $0x89] sm:$0xff]  ;;  %v647_v35 = vld [vmem:[#allocation2 + $0x81] sm:$0xff]  ;;  %s12605_s4 = sld [smem:[#allocation41_spill]]  ;;  %s12606_s29 = sld [smem:[#allocation42_spill]] }
  0x7f   :  { %v650_v36 = vld [vmem:[#allocation2 + $0x99] sm:$0xff]  ;;  %v649_v37 = vld [vmem:[#allocation2 + $0x91] sm:$0xff]  ;;  %v7948_v38 = vld [vmem:[%s12603_s26 + $0x148] sm:$0xff]  ;;  %vm1752_vm4 = vcmask 64512   ;;  %vm1813_vm5 = vcmask 58368   ;;  %vm2991_vm6 = vcmask 122880  }
  0x80   :  { %v218_v39 = vld [vmem:[#allocation2 + $0xa8] sm:$0xff]  ;;  %178 = vst.msk [vmem:[#allocation2 + $0x14b] sm:$0xff] %vm134_vm0, %v7948_v38  ;;  %v217_v40 = vld [vmem:[#allocation2 + $0xa0] sm:$0xff]  ;;  %v7949_v41 = vld [vmem:[%s12603_s26 + $0x150] sm:$0xff]  ;;  %s12607_s5 = sld [smem:[#allocation45_spill]]  ;;  %vm2879_vm7 = vcmask 130048  }
  0x81   :  { %781 = vperm.xlu1 %9495, %v648_v34   ;;  %v220_v42 = vld [vmem:[#allocation2 + $0xb8] sm:$0xff]  ;;  %179 = vst.msk [vmem:[#allocation2 + $0x153] sm:$0xff] %vm134_vm0, %v7949_v41  ;;  %v219_v44 = vld [vmem:[#allocation2 + $0xb0] sm:$0xff]  ;;  %v7951_v45 = vld [vmem:[%s12603_s26 + $0x160] sm:$0xff]  ;;  %vm3001_vm8 = vcmask 125952   ;;  %vm2910_vm9 = vcmask 123904  }
  0x82   :  { %776 = vperm.xlu0 %9494, %v647_v35   ;;  %v7950_v43 = vld [vmem:[%s12603_s26 + $0x158] sm:$0xff]  ;;  %v652_v46 = vld [vmem:[#allocation2 + $0xa9] sm:$0xff]  ;;  %181 = vst.msk [vmem:[#allocation2 + $0x163] sm:$0xff] %vm134_vm0, %v7951_v45  ;;  %v651_v47 = vld [vmem:[#allocation2 + $0xa1] sm:$0xff]  ;;  %vm3545_vm10 = vcmask 254976   ;;  %vm9873_vm11 = vmmov 0  }
  0x83   :  { %180 = vst.msk [vmem:[#allocation2 + $0x15b] sm:$0xff] %vm134_vm0, %v7950_v43  ;;  %v654_v48 = vld [vmem:[#allocation2 + $0xb9] sm:$0xff]  ;;  %v653_v49 = vld [vmem:[#allocation2 + $0xb1] sm:$0xff]  ;;  %v7952_v50 = vld [vmem:[%s12603_s26 + $0x168] sm:$0xff]  ;;  %vm3529_vm12 = vcmask 261120   ;;  %vm3591_vm13 = vcmask 259072  }
  0x84   :  { %v1144_v51 = vld [vmem:[#allocation2 + $0x8a] sm:$0xff]  ;;  %182 = vst.msk [vmem:[#allocation2 + $0x16b] sm:$0xff] %vm134_vm0, %v7952_v50  ;;  %v1143_v52 = vld [vmem:[#allocation2 + $0x82] sm:$0xff]  ;;  %v1146_v56 = vld [vmem:[#allocation2 + $0x9a] sm:$0xff]  ;;  %vm3986_vm14 = vcmask 523264   ;;  %vm3995_vm15 = vcmask 517120  }
  0x85   :  { %791 = vperm.xlu1 %9495, %v650_v36   ;;  %v7953_v55 = vld [vmem:[%s12603_s26 + $0x170] sm:$0xff]  ;;  %v7954_v57 = vld [vmem:[%s12603_s26 + $0x178] sm:$0xff]  ;;  %v7955_v61 = vld [vmem:[%s12603_s26 + $0x180] sm:$0xff]  ;;  %2993 = vst.msk [vmem:[#allocation6 + $0x3d] sm:$0x1] %vm2991_vm6, %v12570_v7  ;;  %s9874_s25 = smov 64  }
  0x86   :  { %786 = vperm.xlu0 %9494, %v649_v37   ;;  %183 = vst.msk [vmem:[#allocation2 + $0x173] sm:$0xff] %vm134_vm0, %v7953_v55  ;;  %v1145_v58 = vld [vmem:[#allocation2 + $0x92] sm:$0xff]  ;;  %184 = vst.msk [vmem:[#allocation2 + $0x17b] sm:$0xff] %vm134_vm0, %v7954_v57  ;;  %v1148_v62 = vld [vmem:[#allocation2 + $0xaa] sm:$0xff]  ;;  %s9877_s0 = smov 120   ;;  %s9880_s30 = smov 116  }
  0x87   :  { %185 = vst.msk [vmem:[#allocation2 + $0x183] sm:$0xff] %vm134_vm0, %v7955_v61  ;;  %v1147_v63 = vld [vmem:[#allocation2 + $0xa2] sm:$0xff]  ;;  %v1150_v2 = vld [vmem:[#allocation2 + $0xba] sm:$0xff]  ;;  %v1149_v3 = vld [vmem:[#allocation2 + $0xb2] sm:$0xff]  ;;  %vm4548_vm1 = vcmask 519168   ;;  %vm7910_vm2 = vcmask 33792  }
  0x88   :  { %v222_v6 = vld [vmem:[#allocation2 + $0xc8] sm:$0xff]  ;;  %v221_v8 = vld [vmem:[#allocation2 + $0xc0] sm:$0xff]  ;;  %v224_v11 = vld [vmem:[#allocation2 + $0xd8] sm:$0xff]  ;;  %3003 = vst.msk [vmem:[#allocation6 + $0x3e] sm:$0x1] %vm2991_vm6, %v12570_v7 }
  0x89   :  { %366 = vperm.xlu1 %9495, %v218_v39   ;;  %v223_v12 = vld [vmem:[#allocation2 + $0xd0] sm:$0xff]  ;;  %v655_v16 = vld [vmem:[#allocation2 + $0xc1] sm:$0xff]  ;;  %v658_v20 = vld [vmem:[#allocation2 + $0xd9] sm:$0xff]  ;;  %2992 = vst.msk [vmem:[#allocation6] sm:$0x1] %vm2991_vm6, %v12570_v7 }
  0x8a   :  { %361 = vperm.xlu0 %9494, %v217_v40   ;;  %v656_v15 = vld [vmem:[#allocation2 + $0xc9] sm:$0xff]  ;;  %v10217_v19 = vld [vmem:[%s12605_s4 + $0x1] ss:$0 sm:$0xff]  ;;  %v657_v21 = vld [vmem:[#allocation2 + $0xd1] sm:$0xff]  ;;  %3004 = vst.msk [vmem:[#allocation6 + $0x7b] sm:$0x1] %vm2991_vm6, %v12570_v7 }
  0x8b   :  { %v10222_v23 = vld [vmem:[%s12605_s4] ss:$0 sm:$0xff]  ;;  %v7956_v26 = vld [vmem:[%s12603_s26 + $0x188] sm:$0xff]  ;;  %v10234_v28 = vld [vmem:[%s12605_s4 + $0x2] ss:$0 sm:$0xff] }
  0x8c   :  { %v226_v29 = vld [vmem:[#allocation2 + $0xe8] sm:$0xff]  ;;  %186 = vst.msk [vmem:[#allocation2 + $0x18b] sm:$0xff] %vm134_vm0, %v7956_v26  ;;  %v225_v31 = vld [vmem:[#allocation2 + $0xe0] sm:$0xff]  ;;  %v7957_v38 = vld [vmem:[%s12603_s26 + $0x190] sm:$0xff] }
  0x8d   :  { %376 = vperm.xlu1 %9495, %v220_v42   ;;  %v10248_v41 = vld [vmem:[%s12606_s29] ss:$0 sm:$0xff]  ;;  %v228_v43 = vld [vmem:[#allocation2 + $0xf8] sm:$0xff]  ;;  %187 = vst.msk [vmem:[#allocation2 + $0x193] sm:$0xff] %vm134_vm0, %v7957_v38  ;;  %v659_v61 = vld [vmem:[#allocation2 + $0xe1] sm:$0xff] }
  0x8e   :  { %371 = vperm.xlu0 %9494, %v219_v44   ;;  %v7958_v44 = vld [vmem:[%s12603_s26 + $0x198] sm:$0xff]  ;;  %v7959_v57 = vld [vmem:[%s12603_s26 + $0x1a0] sm:$0xff]  ;;  %3586 = vst.msk [vmem:[#allocation8] sm:$0x3] %vm3545_vm10, %v12570_v7  ;;  %3587 = vst.msk [vmem:[#allocation8 + $0x20] sm:$0x3] %vm3545_vm10, %v12570_v7 }
  0x8f   :  { %188 = vst.msk [vmem:[#allocation2 + $0x19b] sm:$0xff] %vm134_vm0, %v7958_v44  ;;  %189 = vst.msk [vmem:[#allocation2 + $0x1a3] sm:$0xff] %vm134_vm0, %v7959_v57 }
  0x90   :  { %3593 = vst.msk [vmem:[#allocation8 + $0x22] sm:$0x3] %vm3545_vm10, %v12570_v7  ;;  %3594 = vst.msk [vmem:[#allocation8 + $0x42] sm:$0x3] %vm3545_vm10, %v12570_v7 }
  0x91   :  { %801 = vperm.xlu1 %9495, %v652_v46  }
  0x92   :  { %796 = vperm.xlu0 %9494, %v651_v47   ;;  %v227_v47 = vld [vmem:[#allocation2 + $0xf0] sm:$0xff] }
  0x95   :  { %811 = vperm.xlu1 %9495, %v654_v48  }
  0x96   :  { %806 = vperm.xlu0 %9494, %v653_v49  }
  0x98   :  { %v10190_v53 = vpop.permute.xlu1 %271 }
  0x99   :  { %v262_v54 = vpop.permute.xlu0 %261  ;;  %1277 = vperm.xlu1 %9495, %v1144_v51   ;;  %v572_v48 = vmul.f32 %v10222_v23, %v10190_v53 }
  0x9a   :  { %1272 = vperm.xlu0 %9494, %v1143_v52   ;;  %v570_v32 = vmul.f32 %v10222_v23, %v262_v54 }
  0x9c   :  { %v10200_v59 = vpop.permute.xlu1 %276 }
  0x9d   :  { %v267_v60 = vpop.permute.xlu0 %266  ;;  %1287 = vperm.xlu1 %9495, %v1146_v56   ;;  %v573_v45 = vmul.f32 %v10222_v23, %v10200_v59 }
  0x9e   :  { %1282 = vperm.xlu0 %9494, %v1145_v58   ;;  %v571_v30 = vmul.f32 %v10222_v23, %v267_v60 }
  0xa0   :  { %v702_v0 = vpop.permute.xlu1 %701 }
  0xa1   :  { %v697_v1 = vpop.permute.xlu0 %696  ;;  %1297 = vperm.xlu1 %9495, %v1148_v62   ;;  %v1006_v24 = vmul.f32 %v10217_v19, %v702_v0 }
  0xa2   :  { %1292 = vperm.xlu0 %9494, %v1147_v63   ;;  %v1005_v27 = vmul.f32 %v10217_v19, %v697_v1  ;;  %v229_v1 = vld [vmem:[#allocation2 + $0x100] sm:$0xff] }
  0xa3   :  { %v1067_v34 = vadd.f32 %v1006_v24, %v571_v30  ;;  %v660_v24 = vld [vmem:[#allocation2 + $0xe9] sm:$0xff] }
  0xa4   :  { %v712_v4 = vpop.permute.xlu1 %711  ;;  %v1066_v39 = vadd.f32 %v1005_v27, %v570_v32 }
  0xa5   :  { %v707_v5 = vpop.permute.xlu0 %706  ;;  %1307 = vperm.xlu1 %9495, %v1150_v2   ;;  %v1008_v35 = vmul.f32 %v10217_v19, %v712_v4 }
  0xa6   :  { %1302 = vperm.xlu0 %9494, %v1149_v3   ;;  %v1007_v40 = vmul.f32 %v10217_v19, %v707_v5 }
  0xa7   :  { %v1069_v51 = vadd.f32 %v1008_v35, %v573_v45 }
  0xa8   :  { %v10206_v9 = vpop.permute.xlu1 %286  ;;  %v1068_v58 = vadd.f32 %v1007_v40, %v572_v48 }
  0xa9   :  { %v10208_v10 = vpop.permute.xlu0 %281  ;;  %386 = vperm.xlu1 %9495, %v222_v6   ;;  %v575_v62 = vmul.f32 %v10222_v23, %v10206_v9 }
  0xaa   :  { %381 = vperm.xlu0 %9494, %v221_v8   ;;  %v574_v2 = vmul.f32 %v10222_v23, %v10208_v10 }
  0xac   :  { %v10210_v13 = vpop.permute.xlu1 %296 }
  0xad   :  { %v10212_v14 = vpop.permute.xlu0 %291  ;;  %396 = vperm.xlu1 %9495, %v224_v11  }
  0xae   :  { %391 = vperm.xlu0 %9494, %v223_v12   ;;  %v576_v26 = vmul.f32 %v10222_v23, %v10212_v14 }
  0xb0   :  { %v722_v17 = vpop.permute.xlu1 %721 }
  0xb1   :  { %v717_v18 = vpop.permute.xlu0 %716  ;;  %821 = vperm.xlu1 %9495, %v656_v15   ;;  %v1010_v52 = vmul.f32 %v10217_v19, %v722_v17 }
  0xb2   :  { %816 = vperm.xlu0 %9494, %v655_v16   ;;  %v1009_v59 = vmul.f32 %v10217_v19, %v717_v18  ;;  %v661_v18 = vld [vmem:[#allocation2 + $0xf1] sm:$0xff] }
  0xb3   :  { %v1071_v6 = vadd.f32 %v1010_v52, %v575_v62  ;;  %v7962_v52 = vld [vmem:[%s12603_s26 + $0x1b8] sm:$0xff]  ;;  %v7963_v62 = vld [vmem:[%s12603_s26 + $0x1c0] sm:$0xff] }
  0xb4   :  { %v732_v22 = vpop.permute.xlu1 %731  ;;  %v1070_v9 = vadd.f32 %v1009_v59, %v574_v2  ;;  %192 = vst.msk [vmem:[#allocation2 + $0x1bb] sm:$0xff] %vm134_vm0, %v7962_v52  ;;  %193 = vst.msk [vmem:[#allocation2 + $0x1c3] sm:$0xff] %vm134_vm0, %v7963_v62 }
  0xb5   :  { %v10225_v25 = vpop.permute.xlu0 %726  ;;  %831 = vperm.xlu1 %9495, %v658_v20   ;;  %v1012_v8 = vmul.f32 %v10217_v19, %v732_v22  ;;  %v577_v20 = vmul.f32 %v10222_v23, %v10210_v13  ;;  %v7960_v13 = vld [vmem:[%s12603_s26 + $0x1a8] sm:$0xff] }
  0xb6   :  { %826 = vperm.xlu0 %9494, %v657_v21   ;;  %v1011_v16 = vmul.f32 %v10217_v19, %v10225_v25  ;;  %190 = vst.msk [vmem:[#allocation2 + $0x1ab] sm:$0xff] %vm134_vm0, %v7960_v13 }
  0xb7   :  { %v1073_v30 = vadd.f32 %v1012_v8, %v577_v20 }
  0xb8   :  { %v1198_v33 = vpop.permute.xlu1 %1197 }
  0xb9   :  { %v1502_v36 = vmul.f32 %v10234_v28, %v1198_v33  ;;  %v1193_v37 = vpop.permute.xlu0 %1192  ;;  %406 = vperm.xlu1 %9495, %v226_v29  }
  0xba   :  { %v1501_v42 = vmul.f32 %v10234_v28, %v1193_v37  ;;  %401 = vperm.xlu0 %9494, %v225_v31  }
  0xbb   :  { %v1563_v46 = vadd.f32 %v1502_v36, %v1067_v34  ;;  %v1072_v34 = vadd.f32 %v1011_v16, %v576_v26  ;;  %v663_v36 = vld [vmem:[#allocation2 + $0x101] sm:$0xff] }
  0xbc   :  { %v1562_v49 = vadd.f32 %v1501_v42, %v1066_v39  ;;  %v1208_v50 = vpop.permute.xlu1 %1207  ;;  %v662_v39 = vld [vmem:[#allocation2 + $0xf9] sm:$0xff]  ;;  %v1159_v26 = vld [vmem:[#allocation2 + $0x102] sm:$0xff] }
  0xbd   :  { %v1631_v54 = vadd.f32 %v10248_v41, %v1563_v46  ;;  %v1504_v55 = vmul.f32 %v10234_v28, %v1208_v50  ;;  %v1203_v56 = vpop.permute.xlu0 %1202  ;;  %416 = vperm.xlu1 %9495, %v228_v43   ;;  %v1158_v16 = vld [vmem:[#allocation2 + $0xfa] sm:$0xff] }
  0xbe   :  { %v1630_v53 = vadd.f32 %v10248_v41, %v1562_v49  ;;  %v1503_v60 = vmul.f32 %v10234_v28, %v1203_v56  ;;  %411 = vperm.xlu0 %9494, %v227_v47   ;;  %v1152_v49 = vld [vmem:[#allocation2 + $0xca] sm:$0xff] }
  0xbf   :  { %v1692_v63 = vmax.f32 %v1631_v54, 0.0  ;;  %v1565_v0 = vadd.f32 %v1504_v55, %v1069_v51  ;;  %v7961_v51 = vld [vmem:[%s12603_s26 + $0x1b0] sm:$0xff]  ;;  %v1151_v55 = vld [vmem:[#allocation2 + $0xc2] sm:$0xff] }
  0xc0   :  { %v1691_v3 = vmax.f32 %v1630_v53, 0.0  ;;  %v1564_v4 = vadd.f32 %v1503_v60, %v1068_v58  ;;  %v1218_v5 = vpop.permute.xlu1 %1217  ;;  %191 = vst.msk [vmem:[#allocation2 + $0x1b3] sm:$0xff] %vm134_vm0, %v7961_v51  ;;  %v1154_v60 = vld [vmem:[#allocation2 + $0xda] sm:$0xff] }
  0xc1   :  { %1754 = vst.msk [vmem:[#allocation3 + $0x8] sm:$0xff] %vm1752_vm4, %v1692_v63  ;;  %v1633_v11 = vadd.f32 %v10248_v41, %v1565_v0  ;;  %v1506_v12 = vmul.f32 %v10234_v28, %v1218_v5  ;;  %v1213_v15 = vpop.permute.xlu0 %1212  ;;  %836 = vperm.xlu1 %9495, %v659_v61   ;;  %v1153_v63 = vld [vmem:[#allocation2 + $0xd2] sm:$0xff]  ;;  %v1156_v5 = vld [vmem:[#allocation2 + $0xea] sm:$0xff] }
  0xc2   :  { %1753 = vst.msk [vmem:[#allocation3] sm:$0xff] %vm1752_vm4, %v1691_v3  ;;  %v1632_v10 = vadd.f32 %v10248_v41, %v1564_v4  ;;  %v1505_v17 = vmul.f32 %v10234_v28, %v1213_v15  ;;  %421 = vperm.xlu0 %9494, %v229_v1  }
  0xc3   :  { %v1694_v21 = vmax.f32 %v1633_v11, 0.0  ;;  %v1567_v22 = vadd.f32 %v1506_v12, %v1071_v6  ;;  %v1155_v6 = vld [vmem:[#allocation2 + $0xe2] sm:$0xff] }
  0xc4   :  { %v1693_v27 = vmax.f32 %v1632_v10, 0.0  ;;  %v1566_v29 = vadd.f32 %v1505_v17, %v1070_v9  ;;  %v1228_v25 = vpop.permute.xlu1 %1227  ;;  %v1157_v10 = vld [vmem:[#allocation2 + $0xf2] sm:$0xff] }
  0xc5   :  { %1756 = vst.msk [vmem:[#allocation3 + $0x18] sm:$0xff] %vm1752_vm4, %v1694_v21  ;;  %v1635_v31 = vadd.f32 %v10248_v41, %v1567_v22  ;;  %v1508_v32 = vmul.f32 %v10234_v28, %v1228_v25  ;;  %v1223_v33 = vpop.permute.xlu0 %1222  ;;  %846 = vperm.xlu1 %9495, %v661_v18   ;;  %v232_v25 = vld [vmem:[#allocation2 + $0x118] sm:$0xff] }
  0xc6   :  { %1755 = vst.msk [vmem:[#allocation3 + $0x10] sm:$0xff] %vm1752_vm4, %v1693_v27  ;;  %v1634_v14 = vadd.f32 %v10248_v41, %v1566_v29  ;;  %v1507_v35 = vmul.f32 %v10234_v28, %v1223_v33  ;;  %841 = vperm.xlu0 %9494, %v660_v24   ;;  %v230_v24 = vld [vmem:[#allocation2 + $0x108] sm:$0xff] }
  0xc7   :  { %v1696_v37 = vmax.f32 %v1635_v31, 0.0  ;;  %v1569_v38 = vadd.f32 %v1508_v32, %v1073_v30  ;;  %v231_v30 = vld [vmem:[#allocation2 + $0x110] sm:$0xff] }
  0xc8   :  { %v1695_v40 = vmax.f32 %v1634_v14, 0.0  ;;  %v1568_v42 = vadd.f32 %v1507_v35, %v1072_v34  ;;  %v10297_v43 = vpop.permute.xlu1 %306  ;;  %v664_v14 = vld [vmem:[#allocation2 + $0x109] sm:$0xff]  ;;  %v233_v35 = vld [vmem:[#allocation2 + $0x120] sm:$0xff] }
  0xc9   :  { %1758 = vst.msk [vmem:[#allocation3 + $0x28] sm:$0xff] %vm1752_vm4, %v1696_v37  ;;  %v1637_v44 = vadd.f32 %v10248_v41, %v1569_v38  ;;  %v10301_v45 = vpop.permute.xlu0 %301  ;;  %856 = vperm.xlu1 %9495, %v663_v36   ;;  %v1815_v46 = vld [vmem:[#allocation3] ss:$2 sm:$0xff]  ;;  %v1845_v47 = vld [vmem:[#allocation3 + $0x1] ss:$2 sm:$0xff] }
  0xca   :  { %1757 = vst.msk [vmem:[#allocation3 + $0x20] sm:$0xff] %vm1752_vm4, %v1695_v40  ;;  %v1636_v48 = vadd.f32 %v10248_v41, %v1568_v42  ;;  %851 = vperm.xlu0 %9494, %v662_v39   ;;  %v1874_v50 = vmax.f32 %v1815_v46, %v1845_v47  ;;  %v7964_v39 = vld [vmem:[%s12603_s26 + $0x1c8] sm:$0xff]  ;;  %v666_v42 = vld [vmem:[#allocation2 + $0x119] sm:$0xff]  ;;  %v665_v46 = vld [vmem:[#allocation2 + $0x111] sm:$0xff]  ;;  %v578_v47 = vmul.f32 %v10222_v23, %v10301_v45 }
  0xcb   :  { %v1698_v54 = vmax.f32 %v1637_v44, 0.0  ;;  %194 = vst.msk [vmem:[#allocation2 + $0x1cb] sm:$0xff] %vm134_vm0, %v7964_v39  ;;  %v579_v44 = vmul.f32 %v10222_v23, %v10297_v43  ;;  %v7966_v45 = vld [vmem:[%s12603_s26 + $0x1d8] sm:$0xff] }
  0xcc   :  { %v1697_v56 = vmax.f32 %v1636_v48, 0.0  ;;  %v10313_v57 = vpop.permute.xlu1 %316  ;;  %1967 = vst.msk [vmem:[#allocation4 + $0x1] sm:$0xff] %vm1752_vm4, %v1874_v50 }
  0xcd   :  { %1760 = vst.msk [vmem:[#allocation3 + $0x38] sm:$0xff] %vm1752_vm4, %v1698_v54  ;;  %v10317_v58 = vpop.permute.xlu0 %311  ;;  %1317 = vperm.xlu1 %9495, %v1152_v49   ;;  %v1817_v59 = vld [vmem:[#allocation3 + $0x10] ss:$2 sm:$0xff]  ;;  %v1847_v53 = vld [vmem:[#allocation3 + $0x11] ss:$2 sm:$0xff]  ;;  %v7965_v54 = vld [vmem:[%s12603_s26 + $0x1d0] sm:$0xff] }
  0xce   :  { %1759 = vst.msk [vmem:[#allocation3 + $0x30] sm:$0xff] %vm1752_vm4, %v1697_v56  ;;  %1312 = vperm.xlu0 %9494, %v1151_v55   ;;  %v1875_v61 = vmax.f32 %v1817_v59, %v1847_v53  ;;  %v234_v59 = vld [vmem:[#allocation2 + $0x128] sm:$0xff]  ;;  %v581_v53 = vmul.f32 %v10222_v23, %v10313_v57  ;;  %v580_v62 = vmul.f32 %v10222_v23, %v10317_v58  ;;  %v236_v58 = vld [vmem:[#allocation2 + $0x138] sm:$0xff] }
  0xcf   :  { %195 = vst.msk [vmem:[#allocation2 + $0x1d3] sm:$0xff] %vm134_vm0, %v7965_v54  ;;  %196 = vst.msk [vmem:[#allocation2 + $0x1db] sm:$0xff] %vm134_vm0, %v7966_v45  ;;  %vm4311_vm0 = vcmask 31744  }
  0xd0   :  { %v742_v0 = vpop.permute.xlu1 %741  ;;  %1968 = vst.msk [vmem:[#allocation4 + $0x9] sm:$0xff] %vm1752_vm4, %v1875_v61  ;;  %v667_v61 = vld [vmem:[#allocation2 + $0x121] sm:$0xff] }
  0xd1   :  { %v1819_v1 = vld [vmem:[#allocation3 + $0x20] ss:$2 sm:$0xff]  ;;  %v1849_v2 = vld [vmem:[#allocation3 + $0x21] ss:$2 sm:$0xff]  ;;  %v737_v3 = vpop.permute.xlu0 %736  ;;  %1327 = vperm.xlu1 %9495, %v1154_v60   ;;  %v1014_v37 = vmul.f32 %v10217_v19, %v742_v0 }
  0xd2   :  { %v1876_v4 = vmax.f32 %v1819_v1, %v1849_v2  ;;  %1322 = vperm.xlu0 %9494, %v1153_v63   ;;  %v1013_v40 = vmul.f32 %v10217_v19, %v737_v3 }
  0xd3   :  { %v2047_v17 = vld [vmem:[#allocation4 + $0x1] sm:$0xff]  ;;  %v1075_v49 = vadd.f32 %v1014_v37, %v579_v44 }
  0xd4   :  { %1969 = vst.msk [vmem:[#allocation4 + $0x11] sm:$0xff] %vm1752_vm4, %v1876_v4  ;;  %v752_v8 = vpop.permute.xlu1 %751  ;;  %v1074_v55 = vadd.f32 %v1013_v40, %v578_v47 }
  0xd5   :  { %v1821_v11 = vld [vmem:[#allocation3 + $0x30] ss:$2 sm:$0xff]  ;;  %v1851_v12 = vld [vmem:[#allocation3 + $0x31] ss:$2 sm:$0xff]  ;;  %v747_v15 = vpop.permute.xlu0 %746  ;;  %1337 = vperm.xlu1 %9495, %v1156_v5   ;;  %v1016_v50 = vmul.f32 %v10217_v19, %v752_v8 }
  0xd6   :  { %v1877_v9 = vmax.f32 %v1821_v11, %v1851_v12  ;;  %1332 = vperm.xlu0 %9494, %v1155_v6   ;;  %v1015_v56 = vmul.f32 %v10217_v19, %v747_v15 }
  0xd7   :  { %v2048_v18 = vld [vmem:[#allocation4 + $0x9] sm:$0xff]  ;;  %v1077_v1 = vadd.f32 %v1016_v50, %v581_v53 }
  0xd8   :  { %1970 = vst.msk [vmem:[#allocation4 + $0x19] sm:$0xff] %vm1752_vm4, %v1877_v9  ;;  %v10327_v20 = vpop.permute.xlu1 %326  ;;  %v2078_v21 = vpack.c.bf16 %v2048_v18, %v2047_v17  ;;  %v1076_v6 = vadd.f32 %v1015_v56, %v580_v62  ;;  %v1160_v62 = vld [vmem:[#allocation2 + $0x10a] sm:$0xff] }
  0xd9   :  { %v10329_v22 = vpop.permute.xlu0 %321  ;;  %1347 = vperm.xlu1 %9495, %v1158_v16   ;;  %v583_v12 = vmul.f32 %v10222_v23, %v10327_v20  ;;  %v235_v16 = vld [vmem:[#allocation2 + $0x130] sm:$0xff] }
  0xda   :  { %1342 = vperm.xlu0 %9494, %v1157_v10   ;;  %8661 = vmatprep.mubr.msk.bf16.mxu0 %vm1752_vm4, %v2078_v21  ;;  %v582_v10 = vmul.f32 %v10222_v23, %v10329_v22 }
  0xdb   :  { %v2049_v31 = vld [vmem:[#allocation4 + $0x11] sm:$0xff] }
  0xdc   :  { %v10332_v27 = vpop.permute.xlu1 %336 }
  0xdd   :  { %v10334_v29 = vpop.permute.xlu0 %331  ;;  %426 = vperm.xlu1 %9495, %v230_v24  }
  0xde   :  { %1352 = vperm.xlu0 %9494, %v1159_v26   ;;  %v584_v37 = vmul.f32 %v10222_v23, %v10334_v29  ;;  %v670_v29 = vld [vmem:[#allocation2 + $0x139] sm:$0xff] }
  0xdf   :  { %v2050_v32 = vld [vmem:[#allocation4 + $0x19] sm:$0xff] }
  0xe0   :  { %v762_v33 = vpop.permute.xlu1 %761  ;;  %v2079_v13 = vpack.c.bf16 %v2050_v32, %v2049_v31 }
  0xe1   :  { %v757_v34 = vpop.permute.xlu0 %756  ;;  %436 = vperm.xlu1 %9495, %v232_v25   ;;  %v1018_v2 = vmul.f32 %v10217_v19, %v762_v33 }
  0xe2   :  { %431 = vperm.xlu0 %9494, %v231_v30   ;;  %8662 = vmatmul.mubr.msk.bf16.vlgmr.msra.gmra.mrb[0].mxu0 %vm1752_vm4, %v2079_v13  ;;  %v1017_v57 = vmul.f32 %v10217_v19, %v757_v34  ;;  %v668_v13 = vld [vmem:[#allocation2 + $0x129] sm:$0xff]  ;;  %v585_v34 = vmul.f32 %v10222_v23, %v10332_v27 }
  0xe3   :  { %v1079_v24 = vadd.f32 %v1018_v2, %v583_v12 }
  0xe4   :  { %v772_v36 = vpop.permute.xlu1 %771  ;;  %v1078_v20 = vadd.f32 %v1017_v57, %v582_v10  ;;  %v1162_v57 = vld [vmem:[#allocation2 + $0x11a] sm:$0xff]  ;;  %v1163_v10 = vld [vmem:[#allocation2 + $0x122] sm:$0xff] }
  0xe5   :  { %v767_v38 = vpop.permute.xlu0 %766  ;;  %861 = vperm.xlu1 %9495, %v664_v14   ;;  %v1020_v26 = vmul.f32 %v10217_v19, %v772_v36  ;;  %v237_v36 = vld [vmem:[#allocation2 + $0x140] sm:$0xff] }
  0xe6   :  { %441 = vperm.xlu0 %9494, %v233_v35   ;;  %v1019_v32 = vmul.f32 %v10217_v19, %v767_v38 }
  0xe8   :  { %v1238_v48 = vpop.permute.xlu1 %1237 }
  0xe9   :  { %v1510_v51 = vmul.f32 %v10234_v28, %v1238_v48  ;;  %v1233_v52 = vpop.permute.xlu0 %1232  ;;  %871 = vperm.xlu1 %9495, %v666_v42   ;;  %v1081_v42 = vadd.f32 %v1020_v26, %v585_v34  ;;  %v1080_v48 = vadd.f32 %v1019_v32, %v584_v37  ;;  %v1167_v34 = vld [vmem:[#allocation2 + $0x142] sm:$0xff]  ;;  %v239_v37 = vld [vmem:[#allocation2 + $0x150] sm:$0xff] }
  0xea   :  { %v1509_v43 = vmul.f32 %v10234_v28, %v1233_v52  ;;  %866 = vperm.xlu0 %9494, %v665_v46   ;;  %v669_v52 = vld [vmem:[#allocation2 + $0x131] sm:$0xff] }
  0xeb   :  { %v1571_v60 = vadd.f32 %v1510_v51, %v1075_v49 }
  0xec   :  { %v1570_v63 = vadd.f32 %v1509_v43, %v1074_v55  ;;  %v1248_v0 = vpop.permute.xlu1 %1247 }
  0xed   :  { %v1639_v3 = vadd.f32 %v10248_v41, %v1571_v60  ;;  %v1512_v4 = vmul.f32 %v10234_v28, %v1248_v0  ;;  %v1243_v5 = vpop.permute.xlu0 %1242  ;;  %446 = vperm.xlu1 %9495, %v234_v59   ;;  %v671_v0 = vld [vmem:[#allocation2 + $0x141] sm:$0xff] }
  0xee   :  { %v1638_v8 = vadd.f32 %v10248_v41, %v1570_v63  ;;  %v1511_v11 = vmul.f32 %v10234_v28, %v1243_v5  ;;  %876 = vperm.xlu0 %9494, %v667_v61  }
  0xef   :  { %v1700_v15 = vmax.f32 %v1639_v3, 0.0  ;;  %v1573_v9 = vadd.f32 %v1512_v4, %v1077_v1 }
  0xf0   :  { %v1699_v17 = vmax.f32 %v1638_v8, 0.0  ;;  %v1572_v18 = vadd.f32 %v1511_v11, %v1076_v6  ;;  %v1258_v21 = vpop.permute.xlu1 %1257  ;;  %v1161_v8 = vld [vmem:[#allocation2 + $0x112] sm:$0xff] }
  0xf1   :  { %1762 = vst.msk [vmem:[#allocation3 + $0x48] sm:$0xff] %vm1752_vm4, %v1700_v15  ;;  %v1641_v25 = vadd.f32 %v10248_v41, %v1573_v9  ;;  %v1514_v30 = vmul.f32 %v10234_v28, %v1258_v21  ;;  %v1253_v31 = vpop.permute.xlu0 %1252  ;;  %456 = vperm.xlu1 %9495, %v236_v58  }
  0xf2   :  { %1761 = vst.msk [vmem:[#allocation3 + $0x40] sm:$0xff] %vm1752_vm4, %v1699_v17  ;;  %v1640_v22 = vadd.f32 %v10248_v41, %v1572_v18  ;;  %v1513_v33 = vmul.f32 %v10234_v28, %v1253_v31  ;;  %451 = vperm.xlu0 %9494, %v235_v16   ;;  %v1164_v16 = vld [vmem:[#allocation2 + $0x12a] sm:$0xff] }
  0xf3   :  { %v1702_v14 = vmax.f32 %v1641_v25, 0.0  ;;  %v1575_v35 = vadd.f32 %v1514_v30, %v1079_v24  ;;  %v1166_v25 = vld [vmem:[#allocation2 + $0x13a] sm:$0xff]  ;;  %v1165_v30 = vld [vmem:[#allocation2 + $0x132] sm:$0xff] }
  0xf4   :  { %v1701_v39 = vmax.f32 %v1640_v22, 0.0  ;;  %v1574_v40 = vadd.f32 %v1513_v33, %v1078_v20  ;;  %v1268_v38 = vpop.permute.xlu1 %1267 }
  0xf5   :  { %1764 = vst.msk [vmem:[#allocation3 + $0x58] sm:$0xff] %vm1752_vm4, %v1702_v14  ;;  %v1643_v44 = vadd.f32 %v10248_v41, %v1575_v35  ;;  %v1516_v46 = vmul.f32 %v10234_v28, %v1268_v38  ;;  %v1263_v47 = vpop.permute.xlu0 %1262  ;;  %881 = vperm.xlu1 %9495, %v668_v13   ;;  %v238_v13 = vld [vmem:[#allocation2 + $0x148] sm:$0xff] }
  0xf6   :  { %1763 = vst.msk [vmem:[#allocation3 + $0x50] sm:$0xff] %vm1752_vm4, %v1701_v39  ;;  %v1642_v27 = vadd.f32 %v10248_v41, %v1574_v40  ;;  %v1515_v49 = vmul.f32 %v10234_v28, %v1263_v47  ;;  %461 = vperm.xlu0 %9494, %v237_v36   ;;  %v240_v36 = vld [vmem:[#allocation2 + $0x158] sm:$0xff]  ;;  %v241_v47 = vld [vmem:[#allocation2 + $0x160] sm:$0xff] }
  0xf7   :  { %v1704_v50 = vmax.f32 %v1643_v44, 0.0  ;;  %v1577_v51 = vadd.f32 %v1516_v46, %v1081_v42  ;;  %v672_v46 = vld [vmem:[#allocation2 + $0x149] sm:$0xff] }
  0xf8   :  { %v1703_v54 = vmax.f32 %v1642_v27, 0.0  ;;  %v1576_v55 = vadd.f32 %v1515_v49, %v1080_v48  ;;  %v10391_v56 = vpop.permute.xlu1 %346 }
  0xf9   :  { %v1823_v43 = vld [vmem:[#allocation3 + $0x40] ss:$2 sm:$0xff]  ;;  %v1853_v59 = vld [vmem:[#allocation3 + $0x41] ss:$2 sm:$0xff]  ;;  %1766 = vst.msk [vmem:[#allocation3 + $0x68] sm:$0xff] %vm1752_vm4, %v1704_v50  ;;  %v1645_v45 = vadd.f32 %v10248_v41, %v1577_v51  ;;  %v10395_v53 = vpop.permute.xlu0 %341  ;;  %891 = vperm.xlu1 %9495, %v670_v29   ;;  %v674_v50 = vld [vmem:[#allocation2 + $0x159] sm:$0xff]  ;;  %v587_v51 = vmul.f32 %v10222_v23, %v10391_v56 }
  0xfa   :  { %v1878_v60 = vmax.f32 %v1823_v43, %v1853_v59  ;;  %1765 = vst.msk [vmem:[#allocation3 + $0x60] sm:$0xff] %vm1752_vm4, %v1703_v54  ;;  %v1644_v61 = vadd.f32 %v10248_v41, %v1576_v55  ;;  %886 = vperm.xlu0 %9494, %v669_v52   ;;  %v673_v52 = vld [vmem:[#allocation2 + $0x151] sm:$0xff]  ;;  %v586_v54 = vmul.f32 %v10222_v23, %v10395_v53  ;;  %v675_v53 = vld [vmem:[#allocation2 + $0x161] sm:$0xff] }
  0xfb   :  { %v1706_v63 = vmax.f32 %v1645_v45, 0.0 }
  0xfc   :  { %1971 = vst.msk [vmem:[#allocation4 + $0x21] sm:$0xff] %vm1752_vm4, %v1878_v60  ;;  %v1705_v1 = vmax.f32 %v1644_v61, 0.0  ;;  %v10400_v2 = vpop.permute.xlu1 %356 }
  0xfd   :  { %v1825_v3 = vld [vmem:[#allocation3 + $0x50] ss:$2 sm:$0xff]  ;;  %v1855_v4 = vld [vmem:[#allocation3 + $0x51] ss:$2 sm:$0xff]  ;;  %1768 = vst.msk [vmem:[#allocation3 + $0x78] sm:$0xff] %vm1752_vm4, %v1706_v63  ;;  %v10403_v5 = vpop.permute.xlu0 %351  ;;  %1357 = vperm.xlu1 %9495, %v1160_v62   ;;  %v589_v56 = vmul.f32 %v10222_v23, %v10400_v2 }
  0xfe   :  { %v1879_v6 = vmax.f32 %v1825_v3, %v1855_v4  ;;  %1767 = vst.msk [vmem:[#allocation3 + $0x70] sm:$0xff] %vm1752_vm4, %v1705_v1  ;;  %896 = vperm.xlu0 %9494, %v671_v0   ;;  %v242_v0 = vld [vmem:[#allocation2 + $0x168] sm:$0xff]  ;;  %v588_v3 = vmul.f32 %v10222_v23, %v10403_v5  ;;  %v244_v5 = vld [vmem:[#allocation2 + $0x178] sm:$0xff] }
 0x100   :  { %1972 = vst.msk [vmem:[#allocation4 + $0x29] sm:$0xff] %vm1752_vm4, %v1879_v6  ;;  %v782_v11 = vpop.permute.xlu1 %781 }
 0x101   :  { %v1827_v58 = vld [vmem:[#allocation3 + $0x60] ss:$2 sm:$0xff]  ;;  %v1857_v12 = vld [vmem:[#allocation3 + $0x61] ss:$2 sm:$0xff]  ;;  %v777_v15 = vpop.permute.xlu0 %776  ;;  %1367 = vperm.xlu1 %9495, %v1162_v57   ;;  %v1022_v27 = vmul.f32 %v10217_v19, %v782_v11 }
 0x102   :  { %v1880_v9 = vmax.f32 %v1827_v58, %v1857_v12  ;;  %1362 = vperm.xlu0 %9494, %v1161_v8   ;;  %v1021_v29 = vmul.f32 %v10217_v19, %v777_v15 }
 0x103   :  { %v2051_v31 = vld [vmem:[#allocation4 + $0x21] sm:$0xff]  ;;  %v1083_v43 = vadd.f32 %v1022_v27, %v587_v51 }
 0x104   :  { %1973 = vst.msk [vmem:[#allocation4 + $0x31] sm:$0xff] %vm1752_vm4, %v1880_v9  ;;  %v792_v17 = vpop.permute.xlu1 %791  ;;  %v1082_v61 = vadd.f32 %v1021_v29, %v586_v54 }
 0x105   :  { %v1829_v18 = vld [vmem:[#allocation3 + $0x70] ss:$2 sm:$0xff]  ;;  %v1859_v21 = vld [vmem:[#allocation3 + $0x71] ss:$2 sm:$0xff]  ;;  %v787_v24 = vpop.permute.xlu0 %786  ;;  %1377 = vperm.xlu1 %9495, %v1164_v16   ;;  %v1024_v59 = vmul.f32 %v10217_v19, %v792_v17 }
 0x106   :  { %v1881_v26 = vmax.f32 %v1829_v18, %v1859_v21  ;;  %1372 = vperm.xlu0 %9494, %v1163_v10   ;;  %v1023_v62 = vmul.f32 %v10217_v19, %v787_v24  ;;  %v243_v21 = vld [vmem:[#allocation2 + $0x170] sm:$0xff] }
 0x107   :  { %v2052_v20 = vld [vmem:[#allocation4 + $0x29] sm:$0xff]  ;;  %v1085_v57 = vadd.f32 %v1024_v59, %v589_v56  ;;  %v1168_v56 = vld [vmem:[#allocation2 + $0x14a] sm:$0xff] }
 0x108   :  { %1974 = vst.msk [vmem:[#allocation4 + $0x39] sm:$0xff] %vm1752_vm4, %v1881_v26  ;;  %v10409_v32 = vpop.permute.xlu1 %366  ;;  %v2080_v22 = vpack.c.bf16 %v2052_v20, %v2051_v31  ;;  %v1084_v15 = vadd.f32 %v1023_v62, %v588_v3 }
 0x109   :  { %v10411_v33 = vpop.permute.xlu0 %361  ;;  %1387 = vperm.xlu1 %9495, %v1166_v25   ;;  %v591_v10 = vmul.f32 %v10222_v23, %v10409_v32 }
 0x10a   :  { %1382 = vperm.xlu0 %9494, %v1165_v30   ;;  %8665 = vmatprep.mubr.msk.bf16.mxu0 %vm1752_vm4, %v2080_v22  ;;  %v590_v24 = vmul.f32 %v10222_v23, %v10411_v33 }
 0x10b   :  { %v2053_v39 = vld [vmem:[#allocation4 + $0x31] sm:$0xff] }
 0x10c   :  { %v10414_v14 = vpop.permute.xlu1 %376 }
 0x10d   :  { %v10416_v35 = vpop.permute.xlu0 %371  ;;  %466 = vperm.xlu1 %9495, %v238_v13  }
 0x10e   :  { %1392 = vperm.xlu0 %9494, %v1167_v34  }
 0x10f   :  { %v2054_v40 = vld [vmem:[#allocation4 + $0x39] sm:$0xff] }
 0x110   :  { %v802_v38 = vpop.permute.xlu1 %801  ;;  %v2081_v42 = vpack.c.bf16 %v2054_v40, %v2053_v39  ;;  %v676_v39 = vld [vmem:[#allocation2 + $0x169] sm:$0xff]  ;;  %v593_v40 = vmul.f32 %v10222_v23, %v10414_v14 }
 0x111   :  { %v797_v44 = vpop.permute.xlu0 %796  ;;  %476 = vperm.xlu1 %9495, %v240_v36   ;;  %v1026_v8 = vmul.f32 %v10217_v19, %v802_v38 }
 0x112   :  { %471 = vperm.xlu0 %9494, %v239_v37   ;;  %8666 = vmatmul.mubr.msk.bf16.gmra.mrb[4].mxu0 %vm1752_vm4, %v2081_v42  ;;  %v1025_v9 = vmul.f32 %v10217_v19, %v797_v44  ;;  %v245_v44 = vld [vmem:[#allocation2 + $0x180] sm:$0xff] }
 0x113   :  { %v1087_v31 = vadd.f32 %v1026_v8, %v591_v10  ;;  %v1171_v10 = vld [vmem:[#allocation2 + $0x162] sm:$0xff] }
 0x114   :  { %v812_v48 = vpop.permute.xlu1 %811  ;;  %v1086_v32 = vadd.f32 %v1025_v9, %v590_v24 }
 0x115   :  { %v807_v49 = vpop.permute.xlu0 %806  ;;  %901 = vperm.xlu1 %9495, %v672_v46   ;;  %v1028_v20 = vmul.f32 %v10217_v19, %v812_v48  ;;  %v592_v46 = vmul.f32 %v10222_v23, %v10416_v35  ;;  %v678_v23 = vld [vmem:[#allocation2 + $0x179] sm:$0xff] }
 0x116   :  { %481 = vperm.xlu0 %9494, %v241_v47   ;;  %v1027_v36 = vmul.f32 %v10217_v19, %v807_v49 }
 0x117   :  { %v1089_v27 = vadd.f32 %v1028_v20, %v593_v40  ;;  %v247_v40 = vld [vmem:[#allocation2 + $0x190] sm:$0xff] }
 0x118   :  { %v1278_v55 = vpop.permute.xlu1 %1277  ;;  %v1088_v51 = vadd.f32 %v1027_v36, %v592_v46  ;;  %v1175_v36 = vld [vmem:[#allocation2 + $0x182] sm:$0xff] }
 0x119   :  { %v1518_v45 = vmul.f32 %v10234_v28, %v1278_v55  ;;  %v1273_v60 = vpop.permute.xlu0 %1272  ;;  %911 = vperm.xlu1 %9495, %v674_v50   ;;  %v677_v55 = vld [vmem:[#allocation2 + $0x171] sm:$0xff] }
 0x11a   :  { %v1517_v63 = vmul.f32 %v10234_v28, %v1273_v60  ;;  %906 = vperm.xlu0 %9494, %v673_v52  }
 0x11b   :  { %v1579_v1 = vadd.f32 %v1518_v45, %v1083_v43 }
 0x11c   :  { %v1578_v4 = vadd.f32 %v1517_v63, %v1082_v61  ;;  %v1288_v6 = vpop.permute.xlu1 %1287 }
 0x11d   :  { %v1647_v11 = vadd.f32 %v10248_v41, %v1579_v1  ;;  %v1520_v58 = vmul.f32 %v10234_v28, %v1288_v6  ;;  %v1283_v12 = vpop.permute.xlu0 %1282  ;;  %486 = vperm.xlu1 %9495, %v242_v0  }
 0x11e   :  { %v1646_v2 = vadd.f32 %v10248_v41, %v1578_v4  ;;  %v1519_v16 = vmul.f32 %v10234_v28, %v1283_v12  ;;  %916 = vperm.xlu0 %9494, %v675_v53   ;;  %v679_v53 = vld [vmem:[#allocation2 + $0x181] sm:$0xff] }
 0x11f   :  { %v1708_v17 = vmax.f32 %v1647_v11, 0.0  ;;  %v1581_v18 = vadd.f32 %v1520_v58, %v1085_v57  ;;  %v1169_v58 = vld [vmem:[#allocation2 + $0x152] sm:$0xff] }
 0x120   :  { %v1707_v26 = vmax.f32 %v1646_v2, 0.0  ;;  %v1580_v25 = vadd.f32 %v1519_v16, %v1084_v15  ;;  %v1298_v30 = vpop.permute.xlu1 %1297 }
 0x121   :  { %1770 = vst.msk [vmem:[#allocation3 + $0x88] sm:$0xff] %vm1752_vm4, %v1708_v17  ;;  %v1649_v22 = vadd.f32 %v10248_v41, %v1581_v18  ;;  %v1522_v13 = vmul.f32 %v10234_v28, %v1298_v30  ;;  %v1293_v34 = vpop.permute.xlu0 %1292  ;;  %496 = vperm.xlu1 %9495, %v244_v5   ;;  %v1172_v5 = vld [vmem:[#allocation2 + $0x16a] sm:$0xff]  ;;  %v1173_v30 = vld [vmem:[#allocation2 + $0x172] sm:$0xff] }
 0x122   :  { %1769 = vst.msk [vmem:[#allocation3 + $0x80] sm:$0xff] %vm1752_vm4, %v1707_v26  ;;  %v1648_v33 = vadd.f32 %v10248_v41, %v1580_v25  ;;  %v1521_v37 = vmul.f32 %v10234_v28, %v1293_v34  ;;  %491 = vperm.xlu0 %9494, %v243_v21   ;;  %v1174_v25 = vld [vmem:[#allocation2 + $0x17a] sm:$0xff] }
 0x123   :  { %v1710_v38 = vmax.f32 %v1649_v22, 0.0  ;;  %v1583_v42 = vadd.f32 %v1522_v13, %v1087_v31 }
 0x124   :  { %v1709_v47 = vmax.f32 %v1648_v33, 0.0  ;;  %v1582_v48 = vadd.f32 %v1521_v37, %v1086_v32  ;;  %v1308_v19 = vpop.permute.xlu1 %1307  ;;  %v246_v32 = vld [vmem:[#allocation2 + $0x188] sm:$0xff] }
 0x125   :  { %1772 = vst.msk [vmem:[#allocation3 + $0x98] sm:$0xff] %vm1752_vm4, %v1710_v38  ;;  %v1651_v49 = vadd.f32 %v10248_v41, %v1583_v42  ;;  %v1524_v29 = vmul.f32 %v10234_v28, %v1308_v19  ;;  %v1303_v50 = vpop.permute.xlu0 %1302  ;;  %921 = vperm.xlu1 %9495, %v676_v39   ;;  %v248_v39 = vld [vmem:[#allocation2 + $0x198] sm:$0xff]  ;;  %v249_v19 = vld [vmem:[#allocation2 + $0x1a0] sm:$0xff] }
 0x126   :  { %1771 = vst.msk [vmem:[#allocation3 + $0x90] sm:$0xff] %vm1752_vm4, %v1709_v47  ;;  %v1650_v14 = vadd.f32 %v10248_v41, %v1582_v48  ;;  %v1523_v52 = vmul.f32 %v10234_v28, %v1303_v50  ;;  %501 = vperm.xlu0 %9494, %v245_v44   ;;  %v680_v48 = vld [vmem:[#allocation2 + $0x189] sm:$0xff]  ;;  %v681_v50 = vld [vmem:[#allocation2 + $0x191] sm:$0xff] }
 0x127   :  { %v1712_v35 = vmax.f32 %v1651_v49, 0.0  ;;  %v1585_v54 = vadd.f32 %v1524_v29, %v1089_v27  ;;  %v682_v29 = vld [vmem:[#allocation2 + $0x199] sm:$0xff] }
 0x128   :  { %v1711_v43 = vmax.f32 %v1650_v14, 0.0  ;;  %v1584_v59 = vadd.f32 %v1523_v52, %v1088_v51  ;;  %v10461_v45 = vpop.permute.xlu1 %386  ;;  %v10498_v14 = vld [vmem:[%s12605_s4 + $0x1] ss:$0 sm:$0xff] }
 0x129   :  { %v1831_v60 = vld [vmem:[#allocation3 + $0x80] ss:$2 sm:$0xff]  ;;  %v1861_v61 = vld [vmem:[#allocation3 + $0x81] ss:$2 sm:$0xff]  ;;  %1774 = vst.msk [vmem:[#allocation3 + $0xa8] sm:$0xff] %vm1752_vm4, %v1712_v35  ;;  %v1653_v62 = vadd.f32 %v10248_v41, %v1585_v54  ;;  %v10465_v63 = vpop.permute.xlu0 %381  ;;  %931 = vperm.xlu1 %9495, %v678_v23  }
 0x12a   :  { %v1882_v0 = vmax.f32 %v1831_v60, %v1861_v61  ;;  %1773 = vst.msk [vmem:[#allocation3 + $0xa0] sm:$0xff] %vm1752_vm4, %v1711_v43  ;;  %v1652_v28 = vadd.f32 %v10248_v41, %v1584_v59  ;;  %926 = vperm.xlu0 %9494, %v677_v55   ;;  %v1170_v41 = vld [vmem:[#allocation2 + $0x15a] sm:$0xff]  ;;  %v250_v54 = vld [vmem:[#allocation2 + $0x1a8] sm:$0xff] }
 0x12b   :  { %v1714_v1 = vmax.f32 %v1653_v62, 0.0  ;;  %v10505_v55 = vld [vmem:[%s12605_s4] ss:$0 sm:$0xff]  ;;  %v683_v59 = vld [vmem:[#allocation2 + $0x1a1] sm:$0xff] }
 0x12c   :  { %1975 = vst.msk [vmem:[#allocation4 + $0x41] sm:$0xff] %vm1752_vm4, %v1882_v0  ;;  %v1713_v3 = vmax.f32 %v1652_v28, 0.0  ;;  %v10470_v4 = vpop.permute.xlu1 %396  ;;  %v595_v43 = vmul.f32 %v10505_v55, %v10461_v45  ;;  %v594_v60 = vmul.f32 %v10505_v55, %v10465_v63  ;;  %v10515_v28 = vld [vmem:[%s12605_s4 + $0x2] ss:$0 sm:$0xff]  ;;  %v252_v63 = vld [vmem:[#allocation2 + $0x1b8] sm:$0xff] }
 0x12d   :  { %v1833_v6 = vld [vmem:[#allocation3 + $0x90] ss:$2 sm:$0xff]  ;;  %v1863_v57 = vld [vmem:[#allocation3 + $0x91] ss:$2 sm:$0xff]  ;;  %1776 = vst.msk [vmem:[#allocation3 + $0xb8] sm:$0xff] %vm1752_vm4, %v1714_v1  ;;  %v10473_v8 = vpop.permute.xlu0 %391  ;;  %1397 = vperm.xlu1 %9495, %v1168_v56  }
 0x12e   :  { %v1883_v11 = vmax.f32 %v1833_v6, %v1863_v57  ;;  %1775 = vst.msk [vmem:[#allocation3 + $0xb0] sm:$0xff] %vm1752_vm4, %v1713_v3  ;;  %936 = vperm.xlu0 %9494, %v679_v53   ;;  %v597_v6 = vmul.f32 %v10505_v55, %v10470_v4 }
 0x130   :  { %1976 = vst.msk [vmem:[#allocation4 + $0x49] sm:$0xff] %vm1752_vm4, %v1883_v11  ;;  %v822_v12 = vpop.permute.xlu1 %821  ;;  %v251_v11 = vld [vmem:[#allocation2 + $0x1b0] sm:$0xff] }
 0x131   :  { %v1835_v15 = vld [vmem:[#allocation3 + $0xa0] ss:$2 sm:$0xff]  ;;  %v1865_v9 = vld [vmem:[#allocation3 + $0xa1] ss:$2 sm:$0xff]  ;;  %v817_v2 = vpop.permute.xlu0 %816  ;;  %1407 = vperm.xlu1 %9495, %v1170_v41   ;;  %v1030_v52 = vmul.f32 %v10498_v14, %v822_v12  ;;  %v596_v41 = vmul.f32 %v10505_v55, %v10473_v8 }
 0x132   :  { %v1884_v16 = vmax.f32 %v1835_v15, %v1865_v9  ;;  %1402 = vperm.xlu0 %9494, %v1169_v58   ;;  %v1029_v35 = vmul.f32 %v10498_v14, %v817_v2  ;;  %v10528_v2 = vld [vmem:[%s12606_s29] ss:$0 sm:$0xff] }
 0x133   :  { %v2055_v31 = vld [vmem:[#allocation4 + $0x41] sm:$0xff]  ;;  %v1091_v62 = vadd.f32 %v1030_v52, %v595_v43 }
 0x134   :  { %1977 = vst.msk [vmem:[#allocation4 + $0x51] sm:$0xff] %vm1752_vm4, %v1884_v16  ;;  %v832_v17 = vpop.permute.xlu1 %831  ;;  %v1090_v53 = vadd.f32 %v1029_v35, %v594_v60 }
 0x135   :  { %v1837_v18 = vld [vmem:[#allocation3 + $0xb0] ss:$2 sm:$0xff]  ;;  %v1867_v21 = vld [vmem:[#allocation3 + $0xb1] ss:$2 sm:$0xff]  ;;  %v827_v24 = vpop.permute.xlu0 %826  ;;  %1417 = vperm.xlu1 %9495, %v1172_v5   ;;  %v1032_v0 = vmul.f32 %v10498_v14, %v832_v17 }
 0x136   :  { %v1885_v26 = vmax.f32 %v1837_v18, %v1867_v21  ;;  %1412 = vperm.xlu0 %9494, %v1171_v10   ;;  %v1031_v45 = vmul.f32 %v10498_v14, %v827_v24  ;;  %v684_v21 = vld [vmem:[#allocation2 + $0x1a9] sm:$0xff] }
 0x137   :  { %v2056_v20 = vld [vmem:[#allocation4 + $0x49] sm:$0xff]  ;;  %v1093_v15 = vadd.f32 %v1032_v0, %v597_v6  ;;  %v1176_v0 = vld [vmem:[#allocation2 + $0x18a] sm:$0xff] }
 0x138   :  { %1978 = vst.msk [vmem:[#allocation4 + $0x59] sm:$0xff] %vm1752_vm4, %v1885_v26  ;;  %v10479_v22 = vpop.permute.xlu1 %406  ;;  %v2082_v13 = vpack.c.bf16 %v2056_v20, %v2055_v31  ;;  %v1092_v10 = vadd.f32 %v1031_v45, %v596_v41 }
 0x139   :  { %v10481_v34 = vpop.permute.xlu0 %401  ;;  %1427 = vperm.xlu1 %9495, %v1174_v25   ;;  %v599_v24 = vmul.f32 %v10505_v55, %v10479_v22 }
 0x13a   :  { %1422 = vperm.xlu0 %9494, %v1173_v30   ;;  %8669 = vmatprep.mubr.msk.bf16.mxu0 %vm1752_vm4, %v2082_v13  ;;  %v253_v30 = vld [vmem:[#allocation2 + $0x1c0] sm:$0xff]  ;;  %v598_v31 = vmul.f32 %v10505_v55, %v10481_v34 }
 0x13b   :  { %v2057_v38 = vld [vmem:[#allocation4 + $0x51] sm:$0xff] }
 0x13c   :  { %v10484_v33 = vpop.permute.xlu1 %416 }
 0x13d   :  { %v10486_v37 = vpop.permute.xlu0 %411  ;;  %506 = vperm.xlu1 %9495, %v246_v32  }
 0x13e   :  { %1432 = vperm.xlu0 %9494, %v1175_v36   ;;  %v600_v52 = vmul.f32 %v10505_v55, %v10486_v37 }
 0x13f   :  { %v2058_v42 = vld [vmem:[#allocation4 + $0x59] sm:$0xff] }
 0x140   :  { %v837_v44 = vpop.permute.xlu1 %836  ;;  %v2083_v46 = vpack.c.bf16 %v2058_v42, %v2057_v38 }
 0x141   :  { %v10488_v47 = vpop.permute.xlu0 %421  ;;  %516 = vperm.xlu1 %9495, %v248_v39   ;;  %v1033_v17 = vmul.f32 %v10498_v14, %v837_v44 }
 0x142   :  { %511 = vperm.xlu0 %9494, %v247_v40   ;;  %8670 = vmatmul.mubr.msk.bf16.gmra.mrb[8].mxu0 %vm1752_vm4, %v2083_v46  ;;  %v602_v45 = vmul.f32 %v10505_v55, %v10488_v47 }
 0x143   :  { %v1094_v22 = vadd.f32 %v1033_v17, %v598_v31 }
 0x144   :  { %v10491_v27 = vpop.permute.xlu1 %846 }
 0x145   :  { %v842_v49 = vpop.permute.xlu0 %841  ;;  %941 = vperm.xlu1 %9495, %v680_v48   ;;  %v1035_v44 = vmul.f32 %v10498_v14, %v10491_v27  ;;  %v686_v48 = vld [vmem:[#allocation2 + $0x1b9] sm:$0xff] }
 0x146   :  { %521 = vperm.xlu0 %9494, %v249_v19   ;;  %v1034_v9 = vmul.f32 %v10498_v14, %v842_v49  ;;  %v601_v19 = vmul.f32 %v10505_v55, %v10484_v33 }
 0x148   :  { %v10493_v51 = vpop.permute.xlu1 %856  ;;  %v1095_v36 = vadd.f32 %v1034_v9, %v599_v24  ;;  %v1178_v9 = vld [vmem:[#allocation2 + $0x19a] sm:$0xff] }
 0x149   :  { %v852_v23 = vpop.permute.xlu0 %851  ;;  %951 = vperm.xlu1 %9495, %v682_v29   ;;  %v1037_v33 = vmul.f32 %v10498_v14, %v10493_v51 }
 0x14a   :  { %946 = vperm.xlu0 %9494, %v681_v50   ;;  %v1036_v39 = vmul.f32 %v10498_v14, %v852_v23  ;;  %v685_v50 = vld [vmem:[#allocation2 + $0x1b1] sm:$0xff] }
 0x14c   :  { %v1318_v61 = vpop.permute.xlu1 %1317 }
 0x14d   :  { %v1526_v56 = vmul.f32 %v10515_v28, %v1318_v61  ;;  %v1313_v1 = vpop.permute.xlu0 %1312  ;;  %526 = vperm.xlu1 %9495, %v250_v54   ;;  %v1097_v54 = vadd.f32 %v1036_v39, %v601_v19  ;;  %v1096_v61 = vadd.f32 %v1035_v44, %v600_v52  ;;  %v254_v44 = vld [vmem:[#allocation2 + $0x1c8] sm:$0xff] }
 0x14e   :  { %v1525_v3 = vmul.f32 %v10515_v28, %v1313_v1  ;;  %956 = vperm.xlu0 %9494, %v683_v59  }
 0x14f   :  { %v1587_v57 = vadd.f32 %v1526_v56, %v1091_v62 }
 0x150   :  { %v1586_v58 = vadd.f32 %v1525_v3, %v1090_v53  ;;  %v1328_v12 = vpop.permute.xlu1 %1327  ;;  %v687_v53 = vld [vmem:[#allocation2 + $0x1c1] sm:$0xff] }
 0x151   :  { %v1655_v16 = vadd.f32 %v10528_v2, %v1587_v57  ;;  %v1528_v5 = vmul.f32 %v10515_v28, %v1328_v12  ;;  %v1323_v4 = vpop.permute.xlu0 %1322  ;;  %536 = vperm.xlu1 %9495, %v252_v63  }
 0x152   :  { %v1654_v8 = vadd.f32 %v10528_v2, %v1586_v58  ;;  %v1527_v18 = vmul.f32 %v10515_v28, %v1323_v4  ;;  %531 = vperm.xlu0 %9494, %v251_v11   ;;  %v1098_v58 = vadd.f32 %v1037_v33, %v602_v45 }
 0x153   :  { %v1716_v26 = vmax.f32 %v1655_v16, 0.0  ;;  %v1589_v25 = vadd.f32 %v1528_v5, %v1093_v15  ;;  %v1177_v5 = vld [vmem:[#allocation2 + $0x192] sm:$0xff] }
 0x154   :  { %v1715_v20 = vmax.f32 %v1654_v8, 0.0  ;;  %v1588_v13 = vadd.f32 %v1527_v18, %v1092_v10  ;;  %v1338_v32 = vpop.permute.xlu1 %1337 }
 0x155   :  { %1778 = vst.msk [vmem:[#allocation3 + $0xc8] sm:$0xff] %vm1752_vm4, %v1716_v26  ;;  %v1657_v40 = vadd.f32 %v10528_v2, %v1589_v25  ;;  %v1530_v38 = vmul.f32 %v10515_v28, %v1338_v32  ;;  %v1333_v42 = vpop.permute.xlu0 %1332  ;;  %961 = vperm.xlu1 %9495, %v684_v21   ;;  %v1180_v25 = vld [vmem:[#allocation2 + $0x1aa] sm:$0xff] }
 0x156   :  { %1777 = vst.msk [vmem:[#allocation3 + $0xc0] sm:$0xff] %vm1752_vm4, %v1715_v20  ;;  %v1656_v34 = vadd.f32 %v10528_v2, %v1588_v13  ;;  %v1529_v46 = vmul.f32 %v10515_v28, %v1333_v42  ;;  %541 = vperm.xlu0 %9494, %v253_v30   ;;  %v1179_v30 = vld [vmem:[#allocation2 + $0x1a2] sm:$0xff] }
 0x157   :  { %v1718_v49 = vmax.f32 %v1657_v40, 0.0  ;;  %v1591_v29 = vadd.f32 %v1530_v38, %v1095_v36  ;;  %v1182_v40 = vld [vmem:[#allocation2 + $0x1ba] sm:$0xff]  ;;  %v1181_v38 = vld [vmem:[#allocation2 + $0x1b2] sm:$0xff] }
 0x158   :  { %v1717_v23 = vmax.f32 %v1656_v34, 0.0  ;;  %v1590_v35 = vadd.f32 %v1529_v46, %v1094_v22  ;;  %v1348_v27 = vpop.permute.xlu1 %1347  ;;  %v1183_v34 = vld [vmem:[#allocation2 + $0x1c2] sm:$0xff] }
 0x159   :  { %1780 = vst.msk [vmem:[#allocation3 + $0xd8] sm:$0xff] %vm1752_vm4, %v1718_v49  ;;  %v1659_v43 = vadd.f32 %v10528_v2, %v1591_v29  ;;  %v1532_v59 = vmul.f32 %v10515_v28, %v1348_v27  ;;  %v1343_v60 = vpop.permute.xlu0 %1342  ;;  %971 = vperm.xlu1 %9495, %v686_v48   ;;  %v255_v27 = vld [vmem:[#allocation2 + $0x1d0] sm:$0xff] }
 0x15a   :  { %1779 = vst.msk [vmem:[#allocation3 + $0xd0] sm:$0xff] %vm1752_vm4, %v1717_v23  ;;  %v1658_v37 = vadd.f32 %v10528_v2, %v1590_v35  ;;  %v1531_v62 = vmul.f32 %v10515_v28, %v1343_v60  ;;  %966 = vperm.xlu0 %9494, %v685_v50   ;;  %v256_v35 = vld [vmem:[#allocation2 + $0x1d8] sm:$0xff]  ;;  %v257_v60 = vld [vmem:[#allocation2 + $0x1e0] sm:$0x3] }
 0x15b   :  { %v1720_v56 = vmax.f32 %v1659_v43, 0.0  ;;  %v1593_v1 = vadd.f32 %v1532_v59, %v1097_v54  ;;  %v688_v59 = vld [vmem:[#allocation2 + $0x1c9] sm:$0xff] }
 0x15c   :  { %v1719_v3 = vmax.f32 %v1658_v37, 0.0  ;;  %v1592_v63 = vadd.f32 %v1531_v62, %v1096_v61  ;;  %v10562_v6 = vpop.permute.xlu1 %426  ;;  %v690_v37 = vld [vmem:[#allocation2 + $0x1d9] sm:$0xff]  ;;  %v689_v62 = vld [vmem:[#allocation2 + $0x1d1] sm:$0xff] }
 0x15d   :  { %v1839_v57 = vld [vmem:[#allocation3 + $0xc0] ss:$2 sm:$0xff]  ;;  %v1869_v51 = vld [vmem:[#allocation3 + $0xc1] ss:$2 sm:$0xff]  ;;  %1782 = vst.msk [vmem:[#allocation3 + $0xe8] sm:$0xff] %vm1752_vm4, %v1720_v56  ;;  %v1661_v11 = vadd.f32 %v10528_v2, %v1593_v1  ;;  %v1353_v41 = vpop.permute.xlu0 %1352  ;;  %1437 = vperm.xlu1 %9495, %v1176_v0  }
 0x15e   :  { %v1886_v12 = vmax.f32 %v1839_v57, %v1869_v51  ;;  %1781 = vst.msk [vmem:[#allocation3 + $0xe0] sm:$0xff] %vm1752_vm4, %v1719_v3  ;;  %v1660_v15 = vadd.f32 %v10528_v2, %v1592_v63  ;;  %v1533_v47 = vmul.f32 %v10515_v28, %v1353_v41  ;;  %976 = vperm.xlu0 %9494, %v687_v53   ;;  %v1184_v63 = vld [vmem:[#allocation2 + $0x1ca] sm:$0xff]  ;;  %v691_v51 = vld [vmem:[#allocation2 + $0x1e1] sm:$0x3] }
 0x15f   :  { %v1722_v16 = vmax.f32 %v1661_v11, 0.0  ;;  %v603_v57 = vmul.f32 %v10505_v55, %v10562_v6 }
 0x160   :  { %1979 = vst.msk [vmem:[#allocation4 + $0x61] sm:$0xff] %vm1752_vm4, %v1886_v12  ;;  %v1721_v4 = vmax.f32 %v1660_v15, 0.0  ;;  %v1594_v10 = vadd.f32 %v1533_v47, %v1098_v58  ;;  %v10570_v17 = vpop.permute.xlu1 %436 }
 0x161   :  { %v1841_v8 = vld [vmem:[#allocation3 + $0xd0] ss:$2 sm:$0xff]  ;;  %v1871_v18 = vld [vmem:[#allocation3 + $0xd1] ss:$2 sm:$0xff]  ;;  %1784 = vst.msk [vmem:[#allocation3 + $0xf8] sm:$0xff] %vm1752_vm4, %v1722_v16  ;;  %v10573_v21 = vpop.permute.xlu0 %431  ;;  %1447 = vperm.xlu1 %9495, %v1178_v9   ;;  %v605_v47 = vmul.f32 %v10505_v55, %v10570_v17 }
 0x162   :  { %v1887_v24 = vmax.f32 %v1841_v8, %v1871_v18  ;;  %1783 = vst.msk [vmem:[#allocation3 + $0xf0] sm:$0xff] %vm1752_vm4, %v1721_v4  ;;  %v1662_v26 = vadd.f32 %v10528_v2, %v1594_v10  ;;  %1442 = vperm.xlu0 %9494, %v1177_v5   ;;  %v1186_v16 = vld [vmem:[#allocation2 + $0x1da] sm:$0xff]  ;;  %v1185_v4 = vld [vmem:[#allocation2 + $0x1d2] sm:$0xff]  ;;  %v604_v6 = vmul.f32 %v10505_v55, %v10573_v21 }
 0x163   :  { %v2046_v18 = vld [vmem:[%s12604_s28] sm:$0xf] }
 0x164   :  { %1980 = vst.msk [vmem:[#allocation4 + $0x69] sm:$0xff] %vm1752_vm4, %v1887_v24  ;;  %v1723_v31 = vmax.f32 %v1662_v26, 0.0  ;;  %v862_v20 = vpop.permute.xlu1 %861  ;;  %9448 = vmatprep.subr.msk.bf16.mxu0 %vm2144_vm3, %v2046_v18 }
 0x165   :  { %v1843_v13 = vld [vmem:[#allocation3 + $0xe0] ss:$2 sm:$0xff]  ;;  %v1873_v32 = vld [vmem:[#allocation3 + $0xe1] ss:$2 sm:$0xff]  ;;  %v10578_v36 = vpop.permute.xlu0 %441  ;;  %1457 = vperm.xlu1 %9495, %v1180_v25   ;;  %v1038_v45 = vmul.f32 %v10498_v14, %v862_v20 }
 0x166   :  { %v1888_v39 = vmax.f32 %v1843_v13, %v1873_v32  ;;  %1785 = vst.msk [vmem:[#allocation3 + $0x100] sm:$0xff] %vm1752_vm4, %v1723_v31  ;;  %1452 = vperm.xlu0 %9494, %v1179_v30   ;;  %v2357_v30 = vsel %vm2144_vm3, %v2046_v18, 0 }
 0x167   :  { %v2059_v46 = vld [vmem:[#allocation4 + $0x61] sm:$0xff]  ;;  %v1099_v58 = vadd.f32 %v1038_v45, %v603_v57  ;;  %8694 = vmatpush3.bf16.msra.mxu0 %v2357_v30 }
 0x168   :  { %1981 = vst.msk [vmem:[#allocation4 + $0x71] sm:$0xff] %vm1752_vm4, %v1888_v39  ;;  %v872_v42 = vpop.permute.xlu1 %871 }
 0x169   :  { %v867_v22 = vpop.permute.xlu0 %866  ;;  %1467 = vperm.xlu1 %9495, %v1182_v40   ;;  %v1040_v11 = vmul.f32 %v10498_v14, %v872_v42  ;;  %v1187_v40 = vld [vmem:[#allocation2 + $0x1e2] sm:$0x3] }
 0x16a   :  { %1462 = vperm.xlu0 %9494, %v1181_v38   ;;  %v1039_v9 = vmul.f32 %v10498_v14, %v867_v22  ;;  %v606_v38 = vmul.f32 %v10505_v55, %v10578_v36 }
 0x16b   :  { %v2060_v48 = vld [vmem:[#allocation4 + $0x69] sm:$0xff]  ;;  %v1101_v10 = vadd.f32 %v1040_v11, %v605_v47 }
 0x16c   :  { %v10582_v19 = vpop.permute.xlu1 %446  ;;  %v2084_v49 = vpack.c.bf16 %v2060_v48, %v2059_v46  ;;  %v1100_v31 = vadd.f32 %v1039_v9, %v604_v6 }
 0x16d   :  { %v1890_v29 = vld [vmem:[#allocation3 + $0xf2] ss:$2 sm:$0xff]  ;;  %v1920_v50 = vld [vmem:[#allocation3 + $0xf3] ss:$2 sm:$0xff]  ;;  %v877_v52 = vpop.permute.xlu0 %876  ;;  %546 = vperm.xlu1 %9495, %v254_v44   ;;  %v607_v13 = vmul.f32 %v10505_v55, %v10582_v19 }
 0x16e   :  { %v1949_v23 = vmax.f32 %v1890_v29, %v1920_v50  ;;  %1472 = vperm.xlu0 %9494, %v1183_v34   ;;  %8673 = vmatprep.mubr.msk.bf16.mxu0 %vm1752_vm4, %v2084_v49  ;;  %v1041_v21 = vmul.f32 %v10498_v14, %v877_v52 }
 0x16f   :  { %v2061_v0 = vld [vmem:[#allocation4 + $0x71] sm:$0xff] }
 0x170   :  { %1984 = vst.msk [vmem:[#allocation4 + $0x7b] sm:$0xff] %vm1752_vm4, %v1949_v23  ;;  %v10586_v54 = vpop.permute.xlu1 %456  ;;  %v1102_v29 = vadd.f32 %v1041_v21, %v606_v38 }
 0x171   :  { %v10588_v43 = vpop.permute.xlu0 %451  ;;  %556 = vperm.xlu1 %9495, %v256_v35   ;;  %v609_v36 = vmul.f32 %v10505_v55, %v10586_v54 }
 0x172   :  { %551 = vperm.xlu0 %9494, %v255_v27   ;;  %v608_v27 = vmul.f32 %v10505_v55, %v10588_v43 }
 0x174   :  { %v882_v61 = vpop.permute.xlu1 %881 }
 0x175   :  { %v10590_v33 = vpop.permute.xlu0 %461  ;;  %981 = vperm.xlu1 %9495, %v688_v59   ;;  %v1042_v24 = vmul.f32 %v10498_v14, %v882_v61 }
 0x176   :  { %561 = vperm.xlu0 %9494, %v257_v60  }
 0x177   :  { %v2062_v56 = vld [vmem:[#allocation4 + $0x79] sm:$0xff]  ;;  %v1103_v44 = vadd.f32 %v1042_v24, %v607_v13 }
 0x178   :  { %v892_v1 = vpop.permute.xlu1 %891  ;;  %v2085_v53 = vpack.c.bf16 %v2062_v56, %v2061_v0 }
 0x179   :  { %v887_v3 = vpop.permute.xlu0 %886  ;;  %991 = vperm.xlu1 %9495, %v690_v37   ;;  %v1044_v34 = vmul.f32 %v10498_v14, %v892_v1 }
 0x17a   :  { %986 = vperm.xlu0 %9494, %v689_v62   ;;  %8674 = vmatmul.mubr.msk.bf16.gmra.mrb[12].mxu0 %vm1752_vm4, %v2085_v53  ;;  %v1043_v19 = vmul.f32 %v10498_v14, %v887_v3 }
 0x17b   :  { %v1105_v37 = vadd.f32 %v1044_v34, %v609_v36 }
 0x17c   :  { %v1358_v41 = vpop.permute.xlu1 %1357  ;;  %v1104_v1 = vadd.f32 %v1043_v19, %v608_v27 }
 0x17d   :  { %v1534_v12 = vmul.f32 %v10515_v28, %v1358_v41  ;;  %v897_v15 = vpop.permute.xlu0 %896  ;;  %1477 = vperm.xlu1 %9495, %v1184_v63   ;;  %v610_v63 = vmul.f32 %v10505_v55, %v10590_v33 }
 0x17e   :  { %996 = vperm.xlu0 %9494, %v691_v51   ;;  %v1045_v53 = vmul.f32 %v10498_v14, %v897_v15 }
 0x17f   :  { %v1595_v5 = vadd.f32 %v1534_v12, %v1099_v58 }
 0x180   :  { %v1368_v8 = vpop.permute.xlu1 %1367  ;;  %v1106_v12 = vadd.f32 %v1045_v53, %v610_v63 }
 0x181   :  { %v1663_v26 = vadd.f32 %v10528_v2, %v1595_v5  ;;  %v1536_v17 = vmul.f32 %v10515_v28, %v1368_v8  ;;  %v1363_v25 = vpop.permute.xlu0 %1362  ;;  %1487 = vperm.xlu1 %9495, %v1186_v16  }
 0x182   :  { %v1535_v20 = vmul.f32 %v10515_v28, %v1363_v25  ;;  %1482 = vperm.xlu0 %9494, %v1185_v4  }
 0x183   :  { %v1724_v32 = vmax.f32 %v1663_v26, 0.0  ;;  %v1597_v39 = vadd.f32 %v1536_v17, %v1101_v10 }
 0x184   :  { %v1596_v42 = vadd.f32 %v1535_v20, %v1100_v31  ;;  %v1378_v22 = vpop.permute.xlu1 %1377 }
 0x185   :  { %1786 = vst.msk [vmem:[#allocation3 + $0x108] sm:$0xff] %vm1752_vm4, %v1724_v32  ;;  %v1665_v46 = vadd.f32 %v10528_v2, %v1597_v39  ;;  %v1538_v48 = vmul.f32 %v10515_v28, %v1378_v22  ;;  %v1373_v49 = vpop.permute.xlu0 %1372 }
 0x186   :  { %v1664_v50 = vadd.f32 %v10528_v2, %v1596_v42  ;;  %v1537_v52 = vmul.f32 %v10515_v28, %v1373_v49  ;;  %1492 = vperm.xlu0 %9494, %v1187_v40  }
 0x187   :  { %v1726_v23 = vmax.f32 %v1665_v46, 0.0  ;;  %v1599_v35 = vadd.f32 %v1538_v48, %v1103_v44 }
 0x188   :  { %v1725_v59 = vmax.f32 %v1664_v50, 0.0  ;;  %v1598_v60 = vadd.f32 %v1537_v52, %v1102_v29  ;;  %v1388_v61 = vpop.permute.xlu1 %1387 }
 0x189   :  { %1788 = vst.msk [vmem:[#allocation3 + $0x118] sm:$0xff] %vm1752_vm4, %v1726_v23  ;;  %v1667_v62 = vadd.f32 %v10528_v2, %v1599_v35  ;;  %v1540_v0 = vmul.f32 %v10515_v28, %v1388_v61  ;;  %v1383_v56 = vpop.permute.xlu0 %1382 }
 0x18a   :  { %1787 = vst.msk [vmem:[#allocation3 + $0x110] sm:$0xff] %vm1752_vm4, %v1725_v59  ;;  %v1666_v54 = vadd.f32 %v10528_v2, %v1598_v60  ;;  %v1539_v43 = vmul.f32 %v10515_v28, %v1383_v56 }
 0x18b   :  { %v1728_v45 = vmax.f32 %v1667_v62, 0.0  ;;  %v1601_v3 = vadd.f32 %v1540_v0, %v1105_v37  ;;  %v10659_v37 = vld [vmem:[%s12604_s28 + $0x8] sm:$0xf]  ;;  %s12608_s28 = sld [smem:[#allocation44_spill]] }
 0x18c   :  { %v1727_v57 = vmax.f32 %v1666_v54, 0.0  ;;  %v1600_v51 = vadd.f32 %v1539_v43, %v1104_v1  ;;  %v467_v11 = vpop.permute.xlu1 %466  ;;  %9449 = vmatprep.subr.msk.bf16.mxu0 %vm2144_vm3, %v10659_v37 }
 0x18d   :  { %1790 = vst.msk [vmem:[#allocation3 + $0x128] sm:$0xff] %vm1752_vm4, %v1728_v45  ;;  %v1669_v41 = vadd.f32 %v10528_v2, %v1601_v3  ;;  %v1393_v58 = vpop.permute.xlu0 %1392  ;;  %v611_v60 = vmul.f32 %v10505_v55, %v467_v11 }
 0x18e   :  { %1789 = vst.msk [vmem:[#allocation3 + $0x120] sm:$0xff] %vm1752_vm4, %v1727_v57  ;;  %v1668_v15 = vadd.f32 %v10528_v2, %v1600_v51  ;;  %v1541_v47 = vmul.f32 %v10515_v28, %v1393_v58 }
 0x18f   :  { %v1730_v9 = vmax.f32 %v1669_v41, 0.0 }
 0x190   :  { %v1729_v16 = vmax.f32 %v1668_v15, 0.0  ;;  %v1602_v5 = vadd.f32 %v1541_v47, %v1106_v12  ;;  %v477_v4 = vpop.permute.xlu1 %476 }
 0x191   :  { %v1892_v33 = vld [vmem:[#allocation3 + $0x102] ss:$2 sm:$0xff]  ;;  %v1922_v6 = vld [vmem:[#allocation3 + $0x103] ss:$2 sm:$0xff]  ;;  %1792 = vst.msk [vmem:[#allocation3 + $0x138] sm:$0xff] %vm1752_vm4, %v1730_v9  ;;  %v472_v10 = vpop.permute.xlu0 %471  ;;  %v613_v54 = vmul.f32 %v10505_v55, %v477_v4 }
 0x192   :  { %v1950_v8 = vmax.f32 %v1892_v33, %v1922_v6  ;;  %1791 = vst.msk [vmem:[#allocation3 + $0x130] sm:$0xff] %vm1752_vm4, %v1729_v16  ;;  %v1670_v18 = vadd.f32 %v10528_v2, %v1602_v5  ;;  %v612_v45 = vmul.f32 %v10505_v55, %v472_v10 }
 0x194   :  { %1985 = vst.msk [vmem:[#allocation4 + $0x83] sm:$0xff] %vm1752_vm4, %v1950_v8  ;;  %v1731_v24 = vmax.f32 %v1670_v18, 0.0  ;;  %v902_v26 = vpop.permute.xlu1 %901 }
 0x195   :  { %v1894_v17 = vld [vmem:[#allocation3 + $0x112] ss:$2 sm:$0xff]  ;;  %v1924_v25 = vld [vmem:[#allocation3 + $0x113] ss:$2 sm:$0xff]  ;;  %v482_v30 = vpop.permute.xlu0 %481  ;;  %v1046_v27 = vmul.f32 %v10498_v14, %v902_v26 }
 0x196   :  { %v1951_v31 = vmax.f32 %v1894_v17, %v1924_v25  ;;  %1793 = vst.msk [vmem:[#allocation3 + $0x140] sm:$0xff] %vm1752_vm4, %v1731_v24  ;;  %v614_v5 = vmul.f32 %v10505_v55, %v482_v30 }
 0x197   :  { %v1107_v62 = vadd.f32 %v1046_v27, %v611_v60 }
 0x198   :  { %1986 = vst.msk [vmem:[#allocation4 + $0x8b] sm:$0xff] %vm1752_vm4, %v1951_v31  ;;  %v912_v21 = vpop.permute.xlu1 %911 }
 0x199   :  { %v1896_v20 = vld [vmem:[#allocation3 + $0x122] ss:$2 sm:$0xff]  ;;  %v1926_v13 = vld [vmem:[#allocation3 + $0x123] ss:$2 sm:$0xff]  ;;  %v907_v32 = vpop.permute.xlu0 %906  ;;  %v1048_v0 = vmul.f32 %v10498_v14, %v912_v21 }
 0x19a   :  { %v1952_v39 = vmax.f32 %v1896_v20, %v1926_v13  ;;  %v1047_v53 = vmul.f32 %v10498_v14, %v907_v32 }
 0x19b   :  { %v2063_v34 = vld [vmem:[#allocation4 + $0x81] sm:$0xff]  ;;  %v1109_v63 = vadd.f32 %v1048_v0, %v613_v54 }
 0x19c   :  { %1987 = vst.msk [vmem:[#allocation4 + $0x93] sm:$0xff] %vm1752_vm4, %v1952_v39  ;;  %v487_v40 = vpop.permute.xlu1 %486  ;;  %v1108_v58 = vadd.f32 %v1047_v53, %v612_v45 }
 0x19d   :  { %v1898_v38 = vld [vmem:[#allocation3 + $0x132] ss:$2 sm:$0xff]  ;;  %v1928_v42 = vld [vmem:[#allocation3 + $0x133] ss:$2 sm:$0xff]  ;;  %v917_v22 = vpop.permute.xlu0 %916  ;;  %v615_v47 = vmul.f32 %v10505_v55, %v487_v40 }
 0x19e   :  { %v1953_v44 = vmax.f32 %v1898_v38, %v1928_v42  ;;  %v1049_v12 = vmul.f32 %v10498_v14, %v917_v22 }
 0x19f   :  { %v2064_v46 = vld [vmem:[#allocation4 + $0x89] sm:$0xff] }
 0x1a0   :  { %1988 = vst.msk [vmem:[#allocation4 + $0x9b] sm:$0xff] %vm1752_vm4, %v1953_v44  ;;  %v497_v48 = vpop.permute.xlu1 %496  ;;  %v2086_v49 = vpack.c.bf16 %v2064_v46, %v2063_v34  ;;  %v1110_v26 = vadd.f32 %v1049_v12, %v614_v5 }
 0x1a1   :  { %v492_v29 = vpop.permute.xlu0 %491  ;;  %v617_v30 = vmul.f32 %v10505_v55, %v497_v48 }
 0x1a2   :  { %8677 = vmatprep.mubr.msk.bf16.mxu0 %vm1752_vm4, %v2086_v49  ;;  %v616_v13 = vmul.f32 %v10505_v55, %v492_v29 }
 0x1a3   :  { %v2065_v52 = vld [vmem:[#allocation4 + $0x91] sm:$0xff] }
 0x1a4   :  { %v922_v19 = vpop.permute.xlu1 %921 }
 0x1a5   :  { %v10651_v50 = vpop.permute.xlu0 %501  ;;  %v1050_v57 = vmul.f32 %v10498_v14, %v922_v19 }
 0x1a7   :  { %v2066_v36 = vld [vmem:[#allocation4 + $0x99] sm:$0xff]  ;;  %v1111_v6 = vadd.f32 %v1050_v57, %v615_v47 }
 0x1a8   :  { %v932_v23 = vpop.permute.xlu1 %931  ;;  %v2087_v35 = vpack.c.bf16 %v2066_v36, %v2065_v52  ;;  %v618_v52 = vmul.f32 %v10505_v55, %v10651_v50 }
 0x1a9   :  { %v927_v59 = vpop.permute.xlu0 %926  ;;  %v1052_v10 = vmul.f32 %v10498_v14, %v932_v23 }
 0x1aa   :  { %8678 = vmatmul.mubr.msk.bf16.gmra.mrb[16].mxu0 %vm1752_vm4, %v2087_v35  ;;  %v1051_v17 = vmul.f32 %v10498_v14, %v927_v59 }
 0x1ab   :  { %v1113_v38 = vadd.f32 %v1052_v10, %v617_v30 }
 0x1ac   :  { %v1398_v61 = vpop.permute.xlu1 %1397  ;;  %v1112_v34 = vadd.f32 %v1051_v17, %v616_v13 }
 0x1ad   :  { %v1542_v56 = vmul.f32 %v10515_v28, %v1398_v61  ;;  %v937_v1 = vpop.permute.xlu0 %936 }
 0x1ae   :  { %v1053_v46 = vmul.f32 %v10498_v14, %v937_v1 }
 0x1af   :  { %v1603_v43 = vadd.f32 %v1542_v56, %v1107_v62 }
 0x1b0   :  { %v1408_v3 = vpop.permute.xlu1 %1407  ;;  %v1114_v60 = vadd.f32 %v1053_v46, %v618_v52 }
 0x1b1   :  { %v1671_v51 = vadd.f32 %v10528_v2, %v1603_v43  ;;  %v1544_v11 = vmul.f32 %v10515_v28, %v1408_v3  ;;  %v1403_v41 = vpop.permute.xlu0 %1402 }
 0x1b2   :  { %v1543_v15 = vmul.f32 %v10515_v28, %v1403_v41 }
 0x1b3   :  { %v1732_v9 = vmax.f32 %v1671_v51, 0.0  ;;  %v1605_v16 = vadd.f32 %v1544_v11, %v1109_v63 }
 0x1b4   :  { %v1604_v4 = vadd.f32 %v1543_v15, %v1108_v58  ;;  %v1418_v33 = vpop.permute.xlu1 %1417 }
 0x1b5   :  { %1794 = vst.msk [vmem:[#allocation3 + $0x148] sm:$0xff] %vm1752_vm4, %v1732_v9  ;;  %v1673_v8 = vadd.f32 %v10528_v2, %v1605_v16  ;;  %v1546_v18 = vmul.f32 %v10515_v28, %v1418_v33  ;;  %v1413_v24 = vpop.permute.xlu0 %1412 }
 0x1b6   :  { %v1672_v25 = vadd.f32 %v10528_v2, %v1604_v4  ;;  %v1545_v31 = vmul.f32 %v10515_v28, %v1413_v24 }
 0x1b7   :  { %v1734_v21 = vmax.f32 %v1673_v8, 0.0  ;;  %v1607_v20 = vadd.f32 %v1546_v18, %v1111_v6 }
 0x1b8   :  { %v1733_v32 = vmax.f32 %v1672_v25, 0.0  ;;  %v1606_v39 = vadd.f32 %v1545_v31, %v1110_v26  ;;  %v1428_v40 = vpop.permute.xlu1 %1427 }
 0x1b9   :  { %1796 = vst.msk [vmem:[#allocation3 + $0x158] sm:$0xff] %vm1752_vm4, %v1734_v21  ;;  %v1675_v42 = vadd.f32 %v10528_v2, %v1607_v20  ;;  %v1548_v22 = vmul.f32 %v10515_v28, %v1428_v40  ;;  %v1423_v44 = vpop.permute.xlu0 %1422 }
 0x1ba   :  { %1795 = vst.msk [vmem:[#allocation3 + $0x150] sm:$0xff] %vm1752_vm4, %v1733_v32  ;;  %v1674_v48 = vadd.f32 %v10528_v2, %v1606_v39  ;;  %v1547_v49 = vmul.f32 %v10515_v28, %v1423_v44 }
 0x1bb   :  { %v1736_v29 = vmax.f32 %v1675_v42, 0.0  ;;  %v1609_v19 = vadd.f32 %v1548_v22, %v1113_v38 }
 0x1bc   :  { %v1735_v36 = vmax.f32 %v1674_v48, 0.0  ;;  %v1608_v23 = vadd.f32 %v1547_v49, %v1112_v34  ;;  %v507_v35 = vpop.permute.xlu1 %506 }
 0x1bd   :  { %1798 = vst.msk [vmem:[#allocation3 + $0x168] sm:$0xff] %vm1752_vm4, %v1736_v29  ;;  %v1677_v27 = vadd.f32 %v10528_v2, %v1609_v19  ;;  %v1433_v59 = vpop.permute.xlu0 %1432  ;;  %v619_v40 = vmul.f32 %v10505_v55, %v507_v35 }
 0x1be   :  { %1797 = vst.msk [vmem:[#allocation3 + $0x160] sm:$0xff] %vm1752_vm4, %v1735_v36  ;;  %v1676_v61 = vadd.f32 %v10528_v2, %v1608_v23  ;;  %v1549_v62 = vmul.f32 %v10515_v28, %v1433_v59 }
 0x1bf   :  { %v1738_v0 = vmax.f32 %v1677_v27, 0.0 }
 0x1c0   :  { %v1737_v56 = vmax.f32 %v1676_v61, 0.0  ;;  %v1610_v1 = vadd.f32 %v1549_v62, %v1114_v60  ;;  %v517_v53 = vpop.permute.xlu1 %516 }
 0x1c1   :  { %v1900_v50 = vld [vmem:[#allocation3 + $0x142] ss:$2 sm:$0xff]  ;;  %v1930_v54 = vld [vmem:[#allocation3 + $0x143] ss:$2 sm:$0xff]  ;;  %1800 = vst.msk [vmem:[#allocation3 + $0x178] sm:$0xff] %vm1752_vm4, %v1738_v0  ;;  %v512_v43 = vpop.permute.xlu0 %511  ;;  %v621_v48 = vmul.f32 %v10505_v55, %v517_v53 }
 0x1c2   :  { %v1954_v45 = vmax.f32 %v1900_v50, %v1930_v54  ;;  %1799 = vst.msk [vmem:[#allocation3 + $0x170] sm:$0xff] %vm1752_vm4, %v1737_v56  ;;  %v1678_v3 = vadd.f32 %v10528_v2, %v1610_v1  ;;  %v620_v29 = vmul.f32 %v10505_v55, %v512_v43 }
 0x1c4   :  { %1989 = vst.msk [vmem:[#allocation4 + $0xa3] sm:$0xff] %vm1752_vm4, %v1954_v45  ;;  %v1739_v63 = vmax.f32 %v1678_v3, 0.0  ;;  %v942_v57 = vpop.permute.xlu1 %941 }
 0x1c5   :  { %v1902_v51 = vld [vmem:[#allocation3 + $0x152] ss:$2 sm:$0xff]  ;;  %v1932_v11 = vld [vmem:[#allocation3 + $0x153] ss:$2 sm:$0xff]  ;;  %v522_v41 = vpop.permute.xlu0 %521  ;;  %v1054_v32 = vmul.f32 %v10498_v14, %v942_v57 }
 0x1c6   :  { %v1955_v58 = vmax.f32 %v1902_v51, %v1932_v11  ;;  %1801 = vst.msk [vmem:[#allocation3 + $0x180] sm:$0xff] %vm1752_vm4, %v1739_v63  ;;  %v622_v1 = vmul.f32 %v10505_v55, %v522_v41 }
 0x1c7   :  { %v1115_v42 = vadd.f32 %v1054_v32, %v619_v40 }
 0x1c8   :  { %1990 = vst.msk [vmem:[#allocation4 + $0xab] sm:$0xff] %vm1752_vm4, %v1955_v58  ;;  %v952_v12 = vpop.permute.xlu1 %951 }
 0x1c9   :  { %v1904_v15 = vld [vmem:[#allocation3 + $0x162] ss:$2 sm:$0xff]  ;;  %v1934_v47 = vld [vmem:[#allocation3 + $0x163] ss:$2 sm:$0xff]  ;;  %v947_v9 = vpop.permute.xlu0 %946  ;;  %v1056_v22 = vmul.f32 %v10498_v14, %v952_v12 }
 0x1ca   :  { %v1956_v16 = vmax.f32 %v1904_v15, %v1934_v47  ;;  %v1055_v46 = vmul.f32 %v10498_v14, %v947_v9 }
 0x1cb   :  { %v2067_v8 = vld [vmem:[#allocation4 + $0xa1] sm:$0xff]  ;;  %v1117_v52 = vadd.f32 %v1056_v22, %v621_v48 }
 0x1cc   :  { %1991 = vst.msk [vmem:[#allocation4 + $0xb3] sm:$0xff] %vm1752_vm4, %v1956_v16  ;;  %v527_v5 = vpop.permute.xlu1 %526  ;;  %v1116_v59 = vadd.f32 %v1055_v46, %v620_v29 }
 0x1cd   :  { %v1906_v4 = vld [vmem:[#allocation3 + $0x172] ss:$2 sm:$0xff]  ;;  %v1936_v33 = vld [vmem:[#allocation3 + $0x173] ss:$2 sm:$0xff]  ;;  %v957_v6 = vpop.permute.xlu0 %956  ;;  %v623_v62 = vmul.f32 %v10505_v55, %v527_v5 }
 0x1ce   :  { %v1957_v10 = vmax.f32 %v1906_v4, %v1936_v33  ;;  %v1057_v60 = vmul.f32 %v10498_v14, %v957_v6 }
 0x1cf   :  { %v2068_v18 = vld [vmem:[#allocation4 + $0xa9] sm:$0xff] }
 0x1d0   :  { %1992 = vst.msk [vmem:[#allocation4 + $0xbb] sm:$0xff] %vm1752_vm4, %v1957_v10  ;;  %v537_v24 = vpop.permute.xlu1 %536  ;;  %v2088_v26 = vpack.c.bf16 %v2068_v18, %v2067_v8  ;;  %v1118_v57 = vadd.f32 %v1057_v60, %v622_v1 }
 0x1d1   :  { %v532_v17 = vpop.permute.xlu0 %531  ;;  %v625_v41 = vmul.f32 %v10505_v55, %v537_v24 }
 0x1d2   :  { %8681 = vmatprep.mubr.msk.bf16.mxu0 %vm1752_vm4, %v2088_v26  ;;  %v624_v47 = vmul.f32 %v10505_v55, %v532_v17 }
 0x1d3   :  { %v2069_v30 = vld [vmem:[#allocation4 + $0xb1] sm:$0xff] }
 0x1d4   :  { %v962_v25 = vpop.permute.xlu1 %961 }
 0x1d5   :  { %v542_v31 = vpop.permute.xlu0 %541  ;;  %v1058_v36 = vmul.f32 %v10498_v14, %v962_v25 }
 0x1d7   :  { %v2070_v21 = vld [vmem:[#allocation4 + $0xb9] sm:$0xff]  ;;  %v1119_v54 = vadd.f32 %v1058_v36, %v623_v62 }
 0x1d8   :  { %v972_v20 = vpop.permute.xlu1 %971  ;;  %v2089_v13 = vpack.c.bf16 %v2070_v21, %v2069_v30  ;;  %v626_v30 = vmul.f32 %v10505_v55, %v542_v31 }
 0x1d9   :  { %v967_v39 = vpop.permute.xlu0 %966  ;;  %v1060_v43 = vmul.f32 %v10498_v14, %v972_v20 }
 0x1da   :  { %8682 = vmatmul.mubr.msk.bf16.gmra.mrb[20].mxu0 %vm1752_vm4, %v2089_v13  ;;  %v1059_v51 = vmul.f32 %v10498_v14, %v967_v39 }
 0x1db   :  { %v1121_v4 = vadd.f32 %v1060_v43, %v625_v41 }
 0x1dc   :  { %v1438_v38 = vpop.permute.xlu1 %1437  ;;  %v1120_v8 = vadd.f32 %v1059_v51, %v624_v47 }
 0x1dd   :  { %v1550_v44 = vmul.f32 %v10515_v28, %v1438_v38  ;;  %v977_v34 = vpop.permute.xlu0 %976 }
 0x1de   :  { %v1061_v18 = vmul.f32 %v10498_v14, %v977_v34 }
 0x1df   :  { %v1611_v49 = vadd.f32 %v1550_v44, %v1115_v42 }
 0x1e0   :  { %v1448_v19 = vpop.permute.xlu1 %1447  ;;  %v1122_v40 = vadd.f32 %v1061_v18, %v626_v30 }
 0x1e1   :  { %v1679_v23 = vadd.f32 %v10528_v2, %v1611_v49  ;;  %v1552_v35 = vmul.f32 %v10515_v28, %v1448_v19  ;;  %v1443_v27 = vpop.permute.xlu0 %1442 }
 0x1e2   :  { %v1551_v61 = vmul.f32 %v10515_v28, %v1443_v27 }
 0x1e3   :  { %v1740_v0 = vmax.f32 %v1679_v23, 0.0  ;;  %v1613_v56 = vadd.f32 %v1552_v35, %v1117_v52 }
 0x1e4   :  { %v1612_v53 = vadd.f32 %v1551_v61, %v1116_v59  ;;  %v1458_v50 = vpop.permute.xlu1 %1457 }
 0x1e5   :  { %1802 = vst.msk [vmem:[#allocation3 + $0x188] sm:$0xff] %vm1752_vm4, %v1740_v0  ;;  %v1681_v45 = vadd.f32 %v10528_v2, %v1613_v56  ;;  %v1554_v3 = vmul.f32 %v10515_v28, %v1458_v50  ;;  %v1453_v63 = vpop.permute.xlu0 %1452 }
 0x1e6   :  { %v1680_v11 = vadd.f32 %v10528_v2, %v1612_v53  ;;  %v1553_v58 = vmul.f32 %v10515_v28, %v1453_v63 }
 0x1e7   :  { %v1742_v12 = vmax.f32 %v1681_v45, 0.0  ;;  %v1615_v15 = vadd.f32 %v1554_v3, %v1119_v54 }
 0x1e8   :  { %v1741_v9 = vmax.f32 %v1680_v11, 0.0  ;;  %v1614_v16 = vadd.f32 %v1553_v58, %v1118_v57  ;;  %v1468_v5 = vpop.permute.xlu1 %1467  ;;  %v9843_v11 = vld [vmem:[%s12605_s4 + $0x1] ss:$0 sm:$0xff] }
 0x1e9   :  { %1804 = vst.msk [vmem:[#allocation3 + $0x198] sm:$0xff] %vm1752_vm4, %v1742_v12  ;;  %v1683_v33 = vadd.f32 %v10528_v2, %v1615_v15  ;;  %v1556_v6 = vmul.f32 %v10515_v28, %v1468_v5  ;;  %v1463_v10 = vpop.permute.xlu0 %1462 }
 0x1ea   :  { %1803 = vst.msk [vmem:[#allocation3 + $0x190] sm:$0xff] %vm1752_vm4, %v1741_v9  ;;  %v1682_v24 = vadd.f32 %v10528_v2, %v1614_v16  ;;  %v1555_v26 = vmul.f32 %v10515_v28, %v1463_v10 }
 0x1eb   :  { %v1744_v17 = vmax.f32 %v1683_v33, 0.0  ;;  %v1617_v25 = vadd.f32 %v1556_v6, %v1121_v4  ;;  %v9845_v33 = vld [vmem:[%s12605_s4 + $0x2] ss:$0 sm:$0xff] }
 0x1ec   :  { %v1743_v21 = vmax.f32 %v1682_v24, 0.0  ;;  %v1616_v20 = vadd.f32 %v1555_v26, %v1120_v8  ;;  %v547_v13 = vpop.permute.xlu1 %546 }
 0x1ed   :  { %1806 = vst.msk [vmem:[#allocation3 + $0x1a8] sm:$0xff] %vm1752_vm4, %v1744_v17  ;;  %v1685_v32 = vadd.f32 %v10528_v2, %v1617_v25  ;;  %v1473_v39 = vpop.permute.xlu0 %1472  ;;  %v627_v53 = vmul.f32 %v10505_v55, %v547_v13 }
 0x1ee   :  { %1805 = vst.msk [vmem:[#allocation3 + $0x1a0] sm:$0xff] %vm1752_vm4, %v1743_v21  ;;  %v1684_v38 = vadd.f32 %v10528_v2, %v1616_v20  ;;  %v1557_v42 = vmul.f32 %v10515_v28, %v1473_v39 }
 0x1ef   :  { %v1746_v22 = vmax.f32 %v1685_v32, 0.0 }
 0x1f0   :  { %v1745_v44 = vmax.f32 %v1684_v38, 0.0  ;;  %v1618_v34 = vadd.f32 %v1557_v42, %v1122_v40  ;;  %v557_v46 = vpop.permute.xlu1 %556 }
 0x1f1   :  { %v1908_v31 = vld [vmem:[#allocation3 + $0x182] ss:$2 sm:$0xff]  ;;  %v1938_v48 = vld [vmem:[#allocation3 + $0x183] ss:$2 sm:$0xff]  ;;  %1808 = vst.msk [vmem:[#allocation3 + $0x1b8] sm:$0xff] %vm1752_vm4, %v1746_v22  ;;  %v552_v49 = vpop.permute.xlu0 %551  ;;  %v629_v41 = vmul.f32 %v10505_v55, %v557_v46 }
 0x1f2   :  { %v1958_v29 = vmax.f32 %v1908_v31, %v1938_v48  ;;  %1807 = vst.msk [vmem:[#allocation3 + $0x1b0] sm:$0xff] %vm1752_vm4, %v1745_v44  ;;  %v1686_v19 = vadd.f32 %v10528_v2, %v1618_v34  ;;  %v9846_v34 = vld [vmem:[%s12606_s29] ss:$0 sm:$0xff]  ;;  %s9878_s29 = smov 104  }
 0x1f4   :  { %1993 = vst.msk [vmem:[#allocation4 + $0xc3] sm:$0xff] %vm1752_vm4, %v1958_v29  ;;  %v1747_v52 = vmax.f32 %v1686_v19, 0.0  ;;  %v982_v36 = vpop.permute.xlu1 %981 }
 0x1f5   :  { %v1910_v23 = vld [vmem:[#allocation3 + $0x192] ss:$2 sm:$0xff]  ;;  %v1940_v35 = vld [vmem:[#allocation3 + $0x193] ss:$2 sm:$0xff]  ;;  %v562_v27 = vpop.permute.xlu0 %561  ;;  %v1062_v0 = vmul.f32 %v10498_v14, %v982_v36 }
 0x1f6   :  { %v1959_v59 = vmax.f32 %v1910_v23, %v1940_v35  ;;  %1809 = vst.msk [vmem:[#allocation3 + $0x1c0] sm:$0xff] %vm1752_vm4, %v1747_v52  ;;  %v2000_v36 = vld [vmem:[#allocation4 + $0x8] sm:$0xff] }
 0x1f7   :  { %v1123_v45 = vadd.f32 %v1062_v0, %v627_v53  ;;  %v2002_v0 = vld [vmem:[#allocation4 + $0x18] sm:$0xff] }
 0x1f8   :  { %1994 = vst.msk [vmem:[#allocation4 + $0xcb] sm:$0xff] %vm1752_vm4, %v1959_v59  ;;  %v992_v60 = vpop.permute.xlu1 %991 }
 0x1f9   :  { %v1912_v61 = vld [vmem:[#allocation3 + $0x1a2] ss:$2 sm:$0xff]  ;;  %v1942_v62 = vld [vmem:[#allocation3 + $0x1a3] ss:$2 sm:$0xff]  ;;  %v987_v56 = vpop.permute.xlu0 %986  ;;  %v1064_v3 = vmul.f32 %v10498_v14, %v992_v60  ;;  %v9844_v14 = vld [vmem:[%s12605_s4] ss:$0 sm:$0xff] }
 0x1fa   :  { %v1960_v1 = vmax.f32 %v1912_v61, %v1942_v62  ;;  %v1063_v58 = vmul.f32 %v9843_v11, %v987_v56  ;;  %v628_v9 = vmul.f32 %v9844_v14, %v552_v49  ;;  %v630_v17 = vmul.f32 %v9844_v14, %v562_v27  ;;  %v1999_v61 = vld [vmem:[#allocation4] sm:$0xff]  ;;  %v2004_v56 = vld [vmem:[#allocation4 + $0x28] sm:$0xff]  ;;  %v2014_v14 = vld [vmem:[#allocation4 + $0x78] sm:$0xff] }
 0x1fb   :  { %v2071_v15 = vld [vmem:[#allocation4 + $0xc1] sm:$0xff]  ;;  %v1125_v5 = vadd.f32 %v1064_v3, %v629_v41  ;;  %v2030_v62 = vpack.c.bf16 %v2000_v36, %v1999_v61  ;;  %v2528_v36 = vld [vmem:[#allocation4 + $0x4a] sm:$0xff] }
 0x1fc   :  { %1995 = vst.msk [vmem:[#allocation4 + $0xd3] sm:$0xff] %vm1752_vm4, %v1960_v1  ;;  %v1478_v50 = vpop.permute.xlu1 %1477  ;;  %v1124_v10 = vadd.f32 %v1063_v58, %v628_v9  ;;  %v2001_v1 = vld [vmem:[#allocation4 + $0x10] sm:$0xff]  ;;  %v2008_v3 = vld [vmem:[#allocation4 + $0x48] sm:$0xff]  ;;  %v2010_v58 = vld [vmem:[#allocation4 + $0x58] sm:$0xff] }
 0x1fd   :  { %v1914_v54 = vld [vmem:[#allocation3 + $0x1b2] ss:$2 sm:$0xff]  ;;  %v1944_v43 = vld [vmem:[#allocation3 + $0x1b3] ss:$2 sm:$0xff]  ;;  %v1558_v63 = vmul.f32 %v10515_v28, %v1478_v50  ;;  %v997_v57 = vpop.permute.xlu0 %996  ;;  %v2031_v53 = vpack.c.bf16 %v2002_v0, %v2001_v1  ;;  %v2003_v50 = vld [vmem:[#allocation4 + $0x20] sm:$0xff] }
 0x1fe   :  { %v1961_v51 = vmax.f32 %v1914_v54, %v1944_v43  ;;  %v1065_v8 = vmul.f32 %v9843_v11, %v997_v57  ;;  %v2617_v54 = vsel %vm2144_vm3, %v10659_v37, 0  ;;  %v2032_v43 = vpack.c.bf16 %v2004_v56, %v2003_v50  ;;  %v2012_v41 = vld [vmem:[#allocation4 + $0x68] sm:$0xff] }
 0x1ff   :  { %v1619_v12 = vadd.f32 %v1558_v63, %v1123_v45  ;;  %v2072_v47 = vld [vmem:[#allocation4 + $0xc9] sm:$0xff]  ;;  %v2006_v45 = vld [vmem:[#allocation4 + $0x38] sm:$0xff] }
 0x200   :  { %1996 = vst.msk [vmem:[#allocation4 + $0xdb] sm:$0xff] %vm1752_vm4, %v1961_v51  ;;  %v1488_v28 = vpop.permute.xlu1 %1487  ;;  %v2090_v16 = vpack.c.bf16 %v2072_v47, %v2071_v15  ;;  %v1126_v20 = vadd.f32 %v1065_v8, %v630_v17  ;;  %v2005_v63 = vld [vmem:[#allocation4 + $0x30] sm:$0xff]  ;;  %v2007_v51 = vld [vmem:[#allocation4 + $0x40] sm:$0xff]  ;;  %v2016_v9 = vld [vmem:[#allocation4 + $0x88] sm:$0xff] }
 0x201   :  { %v1687_v4 = vadd.f32 %v10528_v2, %v1619_v12  ;;  %v1560_v55 = vmul.f32 %v9845_v33, %v1488_v28  ;;  %v1483_v6 = vpop.permute.xlu0 %1482  ;;  %v2033_v57 = vpack.c.bf16 %v2006_v45, %v2005_v63  ;;  %v2034_v11 = vpack.c.bf16 %v2008_v3, %v2007_v51  ;;  %v2009_v12 = vld [vmem:[#allocation4 + $0x50] sm:$0xff]  ;;  %v2011_v15 = vld [vmem:[#allocation4 + $0x60] sm:$0xff] }
 0x202   :  { %v1559_v18 = vmul.f32 %v9845_v33, %v1483_v6  ;;  %8685 = vmatprep.mubr.msk.bf16.mxu0 %vm1752_vm4, %v2090_v16  ;;  %v2035_v37 = vpack.c.bf16 %v2010_v58, %v2009_v12  ;;  %v2036_v47 = vpack.c.bf16 %v2012_v41, %v2011_v15  ;;  %v2013_v28 = vld [vmem:[#allocation4 + $0x70] sm:$0xff]  ;;  %v2019_v8 = vld [vmem:[#allocation4 + $0xa0] sm:$0xff] }
 0x203   :  { %v1748_v24 = vmax.f32 %v1687_v4, 0.0  ;;  %v1621_v26 = vadd.f32 %v1560_v55, %v1125_v5  ;;  %v2073_v40 = vld [vmem:[#allocation4 + $0xd1] sm:$0xff]  ;;  %v2037_v16 = vpack.c.bf16 %v2014_v14, %v2013_v28  ;;  %v2015_v5 = vld [vmem:[#allocation4 + $0x80] sm:$0xff]  ;;  %v2020_v55 = vld [vmem:[#allocation4 + $0xa8] sm:$0xff] }
 0x204   :  { %v1620_v25 = vadd.f32 %v1559_v18, %v1124_v10  ;;  %v2038_v4 = vpack.c.bf16 %v2016_v9, %v2015_v5  ;;  %v2017_v6 = vld [vmem:[#allocation4 + $0x90] sm:$0xff]  ;;  %v2040_v18 = vpack.c.bf16 %v2020_v55, %v2019_v8  ;;  %v2531_v56 = vld [vmem:[#allocation4 + $0x62] sm:$0xff]  ;;  %v2538_v63 = vld [vmem:[#allocation4 + $0x9a] sm:$0xff] }
 0x205   :  { %1810 = vst.msk [vmem:[#allocation3 + $0x1c8] sm:$0xff] %vm1752_vm4, %v1748_v24  ;;  %v1689_v30 = vadd.f32 %v10528_v2, %v1621_v26  ;;  %v1493_v21 = vpop.permute.xlu0 %1492  ;;  %v2022_v24 = vld [vmem:[#allocation4 + $0xb8] sm:$0xff]  ;;  %v2024_v26 = vld [vmem:[#allocation4 + $0xc8] sm:$0xff]  ;;  %v2021_v17 = vld [vmem:[#allocation4 + $0xb0] sm:$0xff] }
 0x206   :  { %v1688_v13 = vadd.f32 %v10528_v2, %v1620_v25  ;;  %v1561_v32 = vmul.f32 %v9845_v33, %v1493_v21  ;;  %v2018_v33 = vld [vmem:[#allocation4 + $0x98] sm:$0xff]  ;;  %v2041_v25 = vpack.c.bf16 %v2022_v24, %v2021_v17  ;;  %v2532_v61 = vld [vmem:[#allocation4 + $0x6a] sm:$0xff]  ;;  %v2535_v45 = vld [vmem:[#allocation4 + $0x82] sm:$0xff] }
 0x207   :  { %v1750_v39 = vmax.f32 %v1689_v30, 0.0  ;;  %v2074_v38 = vld [vmem:[#allocation4 + $0xd9] sm:$0xff]  ;;  %v2039_v10 = vpack.c.bf16 %v2018_v33, %v2017_v6  ;;  %v2556_v1 = vpack.c.bf16 %v2532_v61, %v2531_v56  ;;  %v2536_v50 = vld [vmem:[#allocation4 + $0x8a] sm:$0xff]  ;;  %v2539_v58 = vld [vmem:[#allocation4 + $0xa2] sm:$0xff] }
 0x208   :  { %v1749_v42 = vmax.f32 %v1688_v13, 0.0  ;;  %v1622_v22 = vadd.f32 %v1561_v32, %v1126_v20  ;;  %v2091_v44 = vpack.c.bf16 %v2074_v38, %v2073_v40  ;;  %v2023_v30 = vld [vmem:[#allocation4 + $0xc0] sm:$0xff]  ;;  %v2026_v20 = vld [vmem:[#allocation4 + $0xd8] sm:$0xff]  ;;  %v2025_v32 = vld [vmem:[#allocation4 + $0xd0] sm:$0xff]  ;;  %v2558_v3 = vpack.c.bf16 %v2536_v50, %v2535_v45 }
 0x209   :  { %1812 = vst.msk [vmem:[#allocation3 + $0x1d8] sm:$0xff] %vm1752_vm4, %v1750_v39  ;;  %v2042_v21 = vpack.c.bf16 %v2024_v26, %v2023_v30  ;;  %v2043_v39 = vpack.c.bf16 %v2026_v20, %v2025_v32  ;;  %v2537_v51 = vld [vmem:[#allocation4 + $0x92] sm:$0xff]  ;;  %v2542_v12 = vld [vmem:[#allocation4 + $0xba] sm:$0xff]  ;;  %v2543_v14 = vld [vmem:[#allocation4 + $0xc2] sm:$0xff] }
 0x20a   :  { %1811 = vst.msk [vmem:[#allocation3 + $0x1d0] sm:$0xff] %vm1752_vm4, %v1749_v42  ;;  %v1690_v46 = vadd.f32 %v9846_v34, %v1622_v22  ;;  %8686 = vmatmul.mubr.msk.bf16.gmra.mrb[24].mxu0 %vm1752_vm4, %v2091_v44  ;;  %v2520_v22 = vld [vmem:[#allocation4 + $0xa] sm:$0xff]  ;;  %v2519_v34 = vld [vmem:[#allocation4 + $0x2] sm:$0xff]  ;;  %v2541_v15 = vld [vmem:[#allocation4 + $0xb2] sm:$0xff] }
 0x20b   :  { %v2546_v28 = vld [vmem:[#allocation4 + $0xda] sm:$0xff]  ;;  %v2545_v5 = vld [vmem:[#allocation4 + $0xd2] sm:$0xff] }
 0x20c   :  { %v1751_v2 = vmax.f32 %v1690_v46, 0.0  ;;  %v2550_v46 = vpack.c.bf16 %v2520_v22, %v2519_v34  ;;  %v9496_v8 = vld [vmem:[%s12607_s5 + $0x8] sm:$0xff]  }
 0x20d   :  { %8761 = vmatprep.subr.bf16.mxu1 %v9496_v8 }
 0x20e   :  { %1814 = vst.msk [vmem:[#allocation3 + $0x1e0] sm:$0x3] %vm1813_vm5, %v1751_v2  ;;  %v2522_v2 = vld [vmem:[#allocation4 + $0x1a] sm:$0xff]  ;;  %8762 = vmatpush3.bf16.msra.mxu1 %v9496_v8 }
 0x211   :  { %v1916_v31 = vld [vmem:[#allocation3 + $0x1c2] ss:$2 sm:$0xff]  ;;  %v1946_v48 = vld [vmem:[#allocation3 + $0x1c3] ss:$2 sm:$0xff] }
 0x212   :  { %v1962_v49 = vmax.f32 %v1916_v31, %v1946_v48  ;;  %v2524_v31 = vld [vmem:[#allocation4 + $0x2a] sm:$0xff]  ;;  %v2521_v48 = vld [vmem:[#allocation4 + $0x12] sm:$0xff] }
 0x214   :  { %1997 = vst.msk [vmem:[#allocation4 + $0xe3] sm:$0xff] %vm1752_vm4, %v1962_v49  ;;  %v2551_v49 = vpack.c.bf16 %v2522_v2, %v2521_v48 }
 0x215   :  { %v1918_v29 = vld [vmem:[#allocation3 + $0x1d2] ss:$2 sm:$0xff]  ;;  %v1948_v19 = vld [vmem:[#allocation3 + $0x1d3] ss:$2 sm:$0xff] }
 0x216   :  { %v1963_v52 = vmax.f32 %v1918_v29, %v1948_v19  ;;  %v2523_v29 = vld [vmem:[#allocation4 + $0x22] sm:$0xff] }
 0x217   :  { %v2552_v19 = vpack.c.bf16 %v2524_v31, %v2523_v29 }
 0x218   :  { %1998 = vst.msk [vmem:[#allocation4 + $0xeb] sm:$0xff] %vm1752_vm4, %v1963_v52  ;;  %v2526_v52 = vld [vmem:[#allocation4 + $0x3a] sm:$0xff] }
 0x21b   :  { %v2075_v23 = vld [vmem:[#allocation4 + $0xe1] sm:$0xff] }
 0x21c   :  { %v2027_v40 = vld [vmem:[#allocation4 + $0xe0] sm:$0xff] }
 0x21d   :  { %v2547_v33 = vld [vmem:[#allocation4 + $0xe2] sm:$0xff] }
 0x21f   :  { %v2076_v35 = vld [vmem:[#allocation4 + $0xe9] sm:$0xff]  ;;  %v2077_v27 = vld [vmem:[#allocation4 + $0xf1] sm:$0x3] }
 0x220   :  { %v2092_v59 = vpack.c.bf16 %v2076_v35, %v2075_v23  ;;  %v2093_v60 = vpack.c.bf16 %v2077_v27, %v2077_v27  ;;  %v2028_v13 = vld [vmem:[#allocation4 + $0xe8] sm:$0xff]  ;;  %v2029_v42 = vld [vmem:[#allocation4 + $0xf0] sm:$0x3]  ;;  %v2525_v23 = vld [vmem:[#allocation4 + $0x32] sm:$0xff] }
 0x221   :  { %v2044_v38 = vpack.c.bf16 %v2028_v13, %v2027_v40  ;;  %v2045_v44 = vpack.c.bf16 %v2029_v42, %v2029_v42  ;;  %v2553_v35 = vpack.c.bf16 %v2526_v52, %v2525_v23  ;;  %v2527_v27 = vld [vmem:[#allocation4 + $0x42] sm:$0xff]  ;;  %v2549_v6 = vld [vmem:[#allocation4 + $0xf2] sm:$0x3] }
 0x222   :  { %8689 = vmatprep.mubr.msk.bf16.mxu0 %vm1752_vm4, %v2092_v59  ;;  %v2554_v59 = vpack.c.bf16 %v2528_v36, %v2527_v27 }
 0x223   :  { %8690 = vmatmul.mubr.msk.bf16.gmra.mrb[28].mxu0 %vm1752_vm4, %v2093_v60  ;;  %v2530_v60 = vld [vmem:[#allocation4 + $0x5a] sm:$0xff] }
 0x224   :  { %8695 = vmatprep.mubr.msk.bf16.mxu0 %vm1752_vm4, %v2030_v62  ;;  %v2529_v62 = vld [vmem:[#allocation4 + $0x52] sm:$0xff] }
 0x225   :  { %v2555_v0 = vpack.c.bf16 %v2530_v60, %v2529_v62 }
 0x22b   :  { %8696 = vmatmul.mubr.msk.bf16.vlgmr.msra.gmra.mrb[0].mxu0 %vm1752_vm4, %v2031_v53  ;;  %v2534_v53 = vld [vmem:[#allocation4 + $0x7a] sm:$0xff] }
 0x22c   :  { %8699 = vmatprep.mubr.msk.bf16.mxu0 %vm1752_vm4, %v2032_v43  ;;  %8728 = vmatpush3.bf16.msra.mxu0 %v2617_v54  ;;  %v2533_v54 = vld [vmem:[#allocation4 + $0x72] sm:$0xff] }
 0x22d   :  { %v2557_v43 = vpack.c.bf16 %v2534_v53, %v2533_v54 }
 0x233   :  { %8700 = vmatmul.mubr.msk.bf16.gmra.mrb[4].mxu0 %vm1752_vm4, %v2033_v57  ;;  %v2540_v57 = vld [vmem:[#allocation4 + $0xaa] sm:$0xff] }
 0x234   :  { %8703 = vmatprep.mubr.msk.bf16.mxu0 %vm1752_vm4, %v2034_v11  ;;  %v2559_v11 = vpack.c.bf16 %v2538_v63, %v2537_v51  ;;  %v2560_v41 = vpack.c.bf16 %v2540_v57, %v2539_v58 }
 0x23b   :  { %8704 = vmatmul.mubr.msk.bf16.gmra.mrb[8].mxu0 %vm1752_vm4, %v2035_v37  ;;  %v2544_v37 = vld [vmem:[#allocation4 + $0xca] sm:$0xff] }
 0x23c   :  { %8707 = vmatprep.mubr.msk.bf16.mxu0 %vm1752_vm4, %v2036_v47  ;;  %v2561_v47 = vpack.c.bf16 %v2542_v12, %v2541_v15  ;;  %v2562_v9 = vpack.c.bf16 %v2544_v37, %v2543_v14 }
 0x243   :  { %8708 = vmatmul.mubr.msk.bf16.gmra.mrb[12].mxu0 %vm1752_vm4, %v2037_v16  ;;  %v2548_v16 = vld [vmem:[#allocation4 + $0xea] sm:$0xff] }
 0x244   :  { %8711 = vmatprep.mubr.msk.bf16.mxu0 %vm1752_vm4, %v2038_v4  ;;  %v2563_v4 = vpack.c.bf16 %v2546_v28, %v2545_v5  ;;  %v2564_v55 = vpack.c.bf16 %v2548_v16, %v2547_v33 }
 0x24b   :  { %8712 = vmatmul.mubr.msk.bf16.gmra.mrb[16].mxu0 %vm1752_vm4, %v2039_v10  ;;  %v2565_v10 = vpack.c.bf16 %v2549_v6, %v2549_v6 }
 0x24c   :  { %8715 = vmatprep.mubr.msk.bf16.mxu0 %vm1752_vm4, %v2040_v18 }
 0x253   :  { %8716 = vmatmul.mubr.msk.bf16.gmra.mrb[20].mxu0 %vm1752_vm4, %v2041_v25  ;;  %v10825_v25 = vld [vmem:[%s12607_s5] sm:$0xff]  }
 0x254   :  { %8719 = vmatprep.mubr.msk.bf16.mxu0 %vm1752_vm4, %v2042_v21  ;;  %8779 = vmatprep.subr.bf16.mxu1 %v10825_v25 }
 0x25b   :  { %8720 = vmatmul.mubr.msk.bf16.gmra.mrb[24].mxu0 %vm1752_vm4, %v2043_v39 }
 0x25c   :  { %8723 = vmatprep.mubr.msk.bf16.mxu0 %vm1752_vm4, %v2044_v38  ;;  %v10837_v38 = vld [vmem:[%s12608_s28] ss:$0 sm:$0xff] }
 0x263   :  { %8724 = vmatmul.mubr.msk.bf16.gmra.mrb[32].mxu0 %vm1752_vm4, %v2045_v44 }
 0x264   :  { %8729 = vmatprep.mubr.msk.bf16.mxu0 %vm1752_vm4, %v2550_v46 }
 0x26b   :  { %8730 = vmatmul.mubr.msk.bf16.vlgmr.msra.gmra.mrb[0].mxu0 %vm1752_vm4, %v2551_v49 }
 0x26c   :  { %8733 = vmatprep.mubr.msk.bf16.mxu0 %vm1752_vm4, %v2552_v19 }
 0x273   :  { %8734 = vmatmul.mubr.msk.bf16.gmra.mrb[4].mxu0 %vm1752_vm4, %v2553_v35 }
 0x274   :  { %8737 = vmatprep.mubr.msk.bf16.mxu0 %vm1752_vm4, %v2554_v59 }
 0x27b   :  { %8738 = vmatmul.mubr.msk.bf16.gmra.mrb[8].mxu0 %vm1752_vm4, %v2555_v0 }
 0x27c   :  { %8741 = vmatprep.mubr.msk.bf16.mxu0 %vm1752_vm4, %v2556_v1 }
 0x283   :  { %8742 = vmatmul.mubr.msk.bf16.gmra.mrb[12].mxu0 %vm1752_vm4, %v2557_v43 }
 0x284   :  { %8745 = vmatprep.mubr.msk.bf16.mxu0 %vm1752_vm4, %v2558_v3 }
 0x28b   :  { %8746 = vmatmul.mubr.msk.bf16.gmra.mrb[16].mxu0 %vm1752_vm4, %v2559_v11 }
 0x28c   :  { %8749 = vmatprep.mubr.msk.bf16.mxu0 %vm1752_vm4, %v2560_v41 }
 0x293   :  { %8750 = vmatmul.mubr.msk.bf16.gmra.mrb[20].mxu0 %vm1752_vm4, %v2561_v47 }
 0x294   :  { %8753 = vmatprep.mubr.msk.bf16.mxu0 %vm1752_vm4, %v2562_v9 }
 0x29b   :  { %8754 = vmatmul.mubr.msk.bf16.gmra.mrb[24].mxu0 %vm1752_vm4, %v2563_v4 }
 0x29c   :  { %8757 = vmatprep.mubr.msk.bf16.mxu0 %vm1752_vm4, %v2564_v55 }
 0x2a3   :  { %8758 = vmatmul.mubr.msk.bf16.gmra.mrb[36].mxu0 %vm1752_vm4, %v2565_v10 }
 0x2f6   :  { %v8691_v18 = vpop.f32.mrb[28].mxu0 }
 0x2f7   :  { %v2294_v24 = vpop.f32.mrb[29].mxu0 }
 0x2f8   :  { %v8692_v26 = vpop.f32.mrb[30].mxu0 }
 0x2f9   :  { %v2297_v17 = vpop.f32.mrb[31].mxu0 }
 0x336   :  { %v8725_v30 = vpop.f32.mrb[32].mxu0 }
 0x337   :  { %v10828_v21 = vadd.f32 %v8725_v30, %v8691_v18  ;;  %v2505_v20 = vpop.f32.mrb[33].mxu0 }
 0x338   :  { %v10830_v13 = vadd.f32 %v2505_v20, %v2294_v24  ;;  %v8726_v32 = vpop.f32.mrb[34].mxu0 }
 0x339   :  { %v2508_v39 = vpop.f32.mrb[35].mxu0 }
 0x33a   :  { %v10832_v40 = vadd.f32 %v2508_v39, %v2297_v17 }
 0x33e   :  { %v8731_v42 = vpop.f32.mrb[0].mxu0 }
 0x33f   :  { %v2819_v22 = vadd.f32 %v8731_v42, %v10837_v38  ;;  %v2653_v44 = vpop.f32.mrb[1].mxu0 }
 0x340   :  { %v2817_v34 = vadd.f32 %v10837_v38, %v2653_v44  ;;  %v8732_v46 = vpop.f32.mrb[2].mxu0 }
 0x341   :  { %v2850_v2 = vmax.f32 %v2819_v22, 0.0  ;;  %v2820_v31 = vadd.f32 %v8732_v46, %v10837_v38  ;;  %v2656_v48 = vpop.f32.mrb[3].mxu0 }
 0x342   :  { %v2848_v49 = vmax.f32 %v2817_v34, 0.0  ;;  %v2818_v29 = vadd.f32 %v10837_v38, %v2656_v48 }
 0x343   :  { %2882 = vst.msk [vmem:[#allocation5 + $0x10] sm:$0xff] %vm2879_vm7, %v2850_v2  ;;  %v2851_v19 = vmax.f32 %v2820_v31, 0.0 }
 0x344   :  { %2880 = vst.msk [vmem:[#allocation5] sm:$0xff] %vm2879_vm7, %v2848_v49  ;;  %v2849_v52 = vmax.f32 %v2818_v29, 0.0 }
 0x345   :  { %2883 = vst.msk [vmem:[#allocation5 + $0x18] sm:$0xff] %vm2879_vm7, %v2851_v19 }
 0x346   :  { %2881 = vst.msk [vmem:[#allocation5 + $0x8] sm:$0xff] %vm2879_vm7, %v2849_v52  ;;  %v8735_v36 = vpop.f32.mrb[4].mxu0 }
 0x347   :  { %v2823_v23 = vadd.f32 %v8735_v36, %v10837_v38  ;;  %v2669_v35 = vpop.f32.mrb[5].mxu0 }
 0x348   :  { %v2821_v27 = vadd.f32 %v10837_v38, %v2669_v35  ;;  %v8736_v59 = vpop.f32.mrb[6].mxu0 }
 0x349   :  { %v2854_v60 = vmax.f32 %v2823_v23, 0.0  ;;  %v2824_v61 = vadd.f32 %v8736_v59, %v10837_v38  ;;  %v2672_v62 = vpop.f32.mrb[7].mxu0 }
 0x34a   :  { %v2852_v0 = vmax.f32 %v2821_v27, 0.0  ;;  %v2822_v56 = vadd.f32 %v10837_v38, %v2672_v62  ;;  %v10883_v62 = vld [vmem:[%s12607_s5 + $0x10] sm:$0xff]   ;;  %s9881_s5 = smov 124  }
 0x34b   :  { %2886 = vst.msk [vmem:[#allocation5 + $0x30] sm:$0xff] %vm2879_vm7, %v2854_v60  ;;  %v2855_v1 = vmax.f32 %v2824_v61, 0.0 }
 0x34c   :  { %v2914_v53 = vld [vmem:[#allocation5 + $0x10] ss:$2 sm:$0xff]  ;;  %v2930_v50 = vld [vmem:[#allocation5 + $0x11] ss:$2 sm:$0xff]  ;;  %2884 = vst.msk [vmem:[#allocation5 + $0x20] sm:$0xff] %vm2879_vm7, %v2852_v0  ;;  %v2853_v54 = vmax.f32 %v2822_v56, 0.0 }
 0x34d   :  { %v2944_v43 = vmax.f32 %v2914_v53, %v2930_v50  ;;  %v2912_v45 = vld [vmem:[#allocation5] ss:$2 sm:$0xff]  ;;  %v2928_v3 = vld [vmem:[#allocation5 + $0x1] ss:$2 sm:$0xff]  ;;  %2887 = vst.msk [vmem:[#allocation5 + $0x38] sm:$0xff] %vm2879_vm7, %v2855_v1 }
 0x34e   :  { %v2943_v63 = vmax.f32 %v2912_v45, %v2928_v3  ;;  %2885 = vst.msk [vmem:[#allocation5 + $0x28] sm:$0xff] %vm2879_vm7, %v2853_v54  ;;  %v8739_v57 = vpop.f32.mrb[8].mxu0 }
 0x34f   :  { %2995 = vst.msk [vmem:[#allocation6 + $0x9] sm:$0xff] %vm2879_vm7, %v2944_v43  ;;  %v2827_v51 = vadd.f32 %v8739_v57, %v10837_v38  ;;  %v2685_v11 = vpop.f32.mrb[9].mxu0 }
 0x350   :  { %2994 = vst.msk [vmem:[#allocation6 + $0x1] sm:$0xff] %vm2879_vm7, %v2943_v63  ;;  %v2825_v58 = vadd.f32 %v10837_v38, %v2685_v11  ;;  %v8740_v41 = vpop.f32.mrb[10].mxu0 }
 0x351   :  { %v2858_v12 = vmax.f32 %v2827_v51, 0.0  ;;  %v2828_v37 = vadd.f32 %v8740_v41, %v10837_v38  ;;  %v2688_v15 = vpop.f32.mrb[11].mxu0 }
 0x352   :  { %v2856_v47 = vmax.f32 %v2825_v58, 0.0  ;;  %v2826_v14 = vadd.f32 %v10837_v38, %v2688_v15 }
 0x353   :  { %2890 = vst.msk [vmem:[#allocation5 + $0x50] sm:$0xff] %vm2879_vm7, %v2858_v12  ;;  %v2859_v9 = vmax.f32 %v2828_v37, 0.0 }
 0x354   :  { %v2918_v28 = vld [vmem:[#allocation5 + $0x30] ss:$2 sm:$0xff]  ;;  %v2934_v16 = vld [vmem:[#allocation5 + $0x31] ss:$2 sm:$0xff]  ;;  %2888 = vst.msk [vmem:[#allocation5 + $0x40] sm:$0xff] %vm2879_vm7, %v2856_v47  ;;  %v2857_v5 = vmax.f32 %v2826_v14, 0.0 }
 0x355   :  { %v2946_v4 = vmax.f32 %v2918_v28, %v2934_v16  ;;  %v2916_v33 = vld [vmem:[#allocation5 + $0x20] ss:$2 sm:$0xff]  ;;  %v2932_v55 = vld [vmem:[#allocation5 + $0x21] ss:$2 sm:$0xff]  ;;  %2891 = vst.msk [vmem:[#allocation5 + $0x58] sm:$0xff] %vm2879_vm7, %v2859_v9 }
 0x356   :  { %v2945_v6 = vmax.f32 %v2916_v33, %v2932_v55  ;;  %2889 = vst.msk [vmem:[#allocation5 + $0x48] sm:$0xff] %vm2879_vm7, %v2857_v5  ;;  %v8743_v10 = vpop.f32.mrb[12].mxu0  ;;  %v3040_v8 = vld [vmem:[#allocation6 + $0x9] sm:$0xff] }
 0x357   :  { %2997 = vst.msk [vmem:[#allocation6 + $0x19] sm:$0xff] %vm2879_vm7, %v2946_v4  ;;  %v2831_v18 = vadd.f32 %v8743_v10, %v10837_v38  ;;  %v2701_v24 = vpop.f32.mrb[13].mxu0  ;;  %v3039_v26 = vld [vmem:[#allocation6 + $0x1] sm:$0xff] }
 0x358   :  { %2996 = vst.msk [vmem:[#allocation6 + $0x11] sm:$0xff] %vm2879_vm7, %v2945_v6  ;;  %v2829_v17 = vadd.f32 %v10837_v38, %v2701_v24  ;;  %v8744_v30 = vpop.f32.mrb[14].mxu0  ;;  %v3055_v20 = vpack.c.bf16 %v3040_v8, %v3039_v26 }
 0x359   :  { %v2862_v32 = vmax.f32 %v2831_v18, 0.0  ;;  %v2832_v39 = vadd.f32 %v8744_v30, %v10837_v38  ;;  %v2704_v42 = vpop.f32.mrb[15].mxu0 }
 0x35a   :  { %v2860_v22 = vmax.f32 %v2829_v17, 0.0  ;;  %v2830_v44 = vadd.f32 %v10837_v38, %v2704_v42  ;;  %8763 = vmatprep.mubr.msk.bf16.mxu1 %vm2879_vm7, %v3055_v20 }
 0x35b   :  { %2894 = vst.msk [vmem:[#allocation5 + $0x70] sm:$0xff] %vm2879_vm7, %v2862_v32  ;;  %v2863_v34 = vmax.f32 %v2832_v39, 0.0 }
 0x35c   :  { %v2922_v46 = vld [vmem:[#allocation5 + $0x50] ss:$2 sm:$0xff]  ;;  %v2938_v2 = vld [vmem:[#allocation5 + $0x51] ss:$2 sm:$0xff]  ;;  %2892 = vst.msk [vmem:[#allocation5 + $0x60] sm:$0xff] %vm2879_vm7, %v2860_v22  ;;  %v2861_v31 = vmax.f32 %v2830_v44, 0.0 }
 0x35d   :  { %v2948_v48 = vmax.f32 %v2922_v46, %v2938_v2  ;;  %v2920_v49 = vld [vmem:[#allocation5 + $0x40] ss:$2 sm:$0xff]  ;;  %v2936_v29 = vld [vmem:[#allocation5 + $0x41] ss:$2 sm:$0xff]  ;;  %2895 = vst.msk [vmem:[#allocation5 + $0x78] sm:$0xff] %vm2879_vm7, %v2863_v34 }
 0x35e   :  { %v2947_v19 = vmax.f32 %v2920_v49, %v2936_v29  ;;  %2893 = vst.msk [vmem:[#allocation5 + $0x68] sm:$0xff] %vm2879_vm7, %v2861_v31  ;;  %v8747_v52 = vpop.f32.mrb[16].mxu0  ;;  %v3042_v36 = vld [vmem:[#allocation6 + $0x19] sm:$0xff] }
 0x35f   :  { %2999 = vst.msk [vmem:[#allocation6 + $0x29] sm:$0xff] %vm2879_vm7, %v2948_v48  ;;  %v2835_v23 = vadd.f32 %v8747_v52, %v10837_v38  ;;  %v2717_v35 = vpop.f32.mrb[17].mxu0  ;;  %v3041_v27 = vld [vmem:[#allocation6 + $0x11] sm:$0xff] }
 0x360   :  { %2998 = vst.msk [vmem:[#allocation6 + $0x21] sm:$0xff] %vm2879_vm7, %v2947_v19  ;;  %v2833_v59 = vadd.f32 %v10837_v38, %v2717_v35  ;;  %v8748_v60 = vpop.f32.mrb[18].mxu0  ;;  %v3056_v61 = vpack.c.bf16 %v3042_v36, %v3041_v27 }
 0x361   :  { %v2866_v0 = vmax.f32 %v2835_v23, 0.0  ;;  %v2836_v56 = vadd.f32 %v8748_v60, %v10837_v38  ;;  %v2720_v1 = vpop.f32.mrb[19].mxu0 }
 0x362   :  { %v2926_v53 = vld [vmem:[#allocation5 + $0x70] ss:$2 sm:$0xf]  ;;  %v2942_v50 = vld [vmem:[#allocation5 + $0x71] ss:$2 sm:$0xf]  ;;  %v2834_v54 = vadd.f32 %v10837_v38, %v2720_v1  ;;  %8764 = vmatmul.mubr.msk.bf16.vlgmr.msra.gmra.mrb[0].mxu1 %vm2879_vm7, %v3056_v61 }
 0x363   :  { %v2950_v43 = vmax.f32 %v2926_v53, %v2942_v50  ;;  %2898 = vst.msk [vmem:[#allocation5 + $0x90] sm:$0xff] %vm2879_vm7, %v2866_v0  ;;  %v2864_v45 = vmax.f32 %v2833_v59, 0.0  ;;  %v2867_v3 = vmax.f32 %v2836_v56, 0.0  ;;  %8780 = vmatpush3.bf16.msra.mxu1 %v10825_v25 }
 0x364   :  { %v2865_v63 = vmax.f32 %v2834_v54, 0.0  ;;  %8797 = vmatprep.subr.bf16.mxu1 %v10883_v62 }
 0x365   :  { %3002 = vst.msk [vmem:[#allocation6 + $0x39] sm:$0xf] %vm3001_vm8, %v2950_v43  ;;  %v2924_v57 = vld [vmem:[#allocation5 + $0x60] ss:$2 sm:$0xff]  ;;  %v2940_v51 = vld [vmem:[#allocation5 + $0x61] ss:$2 sm:$0xff] }
 0x366   :  { %2896 = vst.msk [vmem:[#allocation5 + $0x80] sm:$0xff] %vm2879_vm7, %v2864_v45  ;;  %2899 = vst.msk [vmem:[#allocation5 + $0x98] sm:$0xff] %vm2879_vm7, %v2867_v3  ;;  %v2949_v11 = vmax.f32 %v2924_v57, %v2940_v51  ;;  %v8751_v58 = vpop.f32.mrb[20].mxu0  ;;  %v3044_v41 = vld [vmem:[#allocation6 + $0x29] sm:$0xff] }
 0x367   :  { %2897 = vst.msk [vmem:[#allocation5 + $0x88] sm:$0xff] %vm2879_vm7, %v2865_v63  ;;  %v2839_v12 = vadd.f32 %v8751_v58, %v10837_v38  ;;  %v2733_v37 = vpop.f32.mrb[21].mxu0  ;;  %v3043_v25 = vld [vmem:[#allocation6 + $0x21] sm:$0xff] }
 0x368   :  { %3000 = vst.msk [vmem:[#allocation6 + $0x31] sm:$0xff] %vm2879_vm7, %v2949_v11  ;;  %v2837_v15 = vadd.f32 %v10837_v38, %v2733_v37  ;;  %v8752_v47 = vpop.f32.mrb[22].mxu0  ;;  %v3057_v14 = vpack.c.bf16 %v3044_v41, %v3043_v25 }
 0x369   :  { %v2870_v9 = vmax.f32 %v2839_v12, 0.0  ;;  %v2840_v28 = vadd.f32 %v8752_v47, %v10837_v38  ;;  %v2736_v16 = vpop.f32.mrb[23].mxu0 }
 0x36a   :  { %v2868_v5 = vmax.f32 %v2837_v15, 0.0  ;;  %v2838_v4 = vadd.f32 %v10837_v38, %v2736_v16  ;;  %8767 = vmatprep.mubr.msk.bf16.mxu1 %vm2879_vm7, %v3057_v14 }
 0x36b   :  { %2902 = vst.msk [vmem:[#allocation5 + $0xb0] sm:$0xff] %vm2879_vm7, %v2870_v9  ;;  %v2871_v33 = vmax.f32 %v2840_v28, 0.0 }
 0x36c   :  { %2900 = vst.msk [vmem:[#allocation5 + $0xa0] sm:$0xff] %vm2879_vm7, %v2868_v5  ;;  %v2869_v55 = vmax.f32 %v2838_v4, 0.0  ;;  %v3013_v4 = vld [vmem:[#allocation6] sm:$0xff] }
 0x36d   :  { %2903 = vst.msk [vmem:[#allocation5 + $0xb8] sm:$0xff] %vm2879_vm7, %v2871_v33  ;;  %v3014_v33 = vld [vmem:[#allocation6 + $0x8] sm:$0xff] }
 0x36e   :  { %v2952_v6 = vld [vmem:[#allocation5 + $0x7a] ss:$2 sm:$0xff]  ;;  %v2954_v10 = vld [vmem:[#allocation5 + $0x8a] ss:$2 sm:$0xff]  ;;  %v2968_v8 = vld [vmem:[#allocation5 + $0x7b] ss:$2 sm:$0xff] }
 0x36f   :  { %v2970_v18 = vld [vmem:[#allocation5 + $0x8b] ss:$2 sm:$0xff]  ;;  %v2983_v24 = vmax.f32 %v2952_v6, %v2968_v8  ;;  %2901 = vst.msk [vmem:[#allocation5 + $0xa8] sm:$0xff] %vm2879_vm7, %v2869_v55  ;;  %v8755_v26 = vpop.f32.mrb[24].mxu0 }
 0x370   :  { %v2984_v17 = vmax.f32 %v2954_v10, %v2970_v18  ;;  %v2843_v30 = vadd.f32 %v8755_v26, %v10837_v38  ;;  %v2749_v20 = vpop.f32.mrb[25].mxu0  ;;  %v3045_v59 = vld [vmem:[#allocation6 + $0x31] sm:$0xff] }
 0x371   :  { %3005 = vst.msk [vmem:[#allocation6 + $0x3f] sm:$0xff] %vm2879_vm7, %v2983_v24  ;;  %v2841_v32 = vadd.f32 %v10837_v38, %v2749_v20  ;;  %v8756_v39 = vpop.f32.mrb[26].mxu0  ;;  %v3029_v24 = vpack.c.bf16 %v3014_v33, %v3013_v4  ;;  %v3015_v26 = vld [vmem:[#allocation6 + $0x10] sm:$0xff]  ;;  %v3018_v20 = vld [vmem:[#allocation6 + $0x28] sm:$0xff] }
 0x372   :  { %3006 = vst.msk [vmem:[#allocation6 + $0x47] sm:$0xff] %vm2879_vm7, %v2984_v17  ;;  %v2874_v42 = vmax.f32 %v2843_v30, 0.0  ;;  %v2844_v22 = vadd.f32 %v8756_v39, %v10837_v38  ;;  %v2752_v44 = vpop.f32.mrb[27].mxu0  ;;  %v3016_v17 = vld [vmem:[#allocation6 + $0x18] sm:$0xff]  ;;  %v3017_v30 = vld [vmem:[#allocation6 + $0x20] sm:$0xff] }
 0x373   :  { %v2872_v34 = vmax.f32 %v2841_v32, 0.0  ;;  %v2842_v46 = vadd.f32 %v10837_v38, %v2752_v44  ;;  %v3030_v32 = vpack.c.bf16 %v3016_v17, %v3015_v26  ;;  %v3031_v39 = vpack.c.bf16 %v3018_v20, %v3017_v30  ;;  %v3019_v44 = vld [vmem:[#allocation6 + $0x30] sm:$0xff] }
 0x374   :  { %2906 = vst.msk [vmem:[#allocation5 + $0xd0] sm:$0xff] %vm2879_vm7, %v2874_v42  ;;  %v2875_v2 = vmax.f32 %v2844_v22, 0.0 }
 0x375   :  { %2904 = vst.msk [vmem:[#allocation5 + $0xc0] sm:$0xff] %vm2879_vm7, %v2872_v34  ;;  %v2873_v31 = vmax.f32 %v2842_v46, 0.0 }
 0x376   :  { %v2956_v48 = vld [vmem:[#allocation5 + $0x9a] ss:$2 sm:$0xff]  ;;  %v2958_v49 = vld [vmem:[#allocation5 + $0xaa] ss:$2 sm:$0xff]  ;;  %v2972_v29 = vld [vmem:[#allocation5 + $0x9b] ss:$2 sm:$0xff] }
 0x377   :  { %2907 = vst.msk [vmem:[#allocation5 + $0xd8] sm:$0xff] %vm2879_vm7, %v2875_v2  ;;  %v2974_v19 = vld [vmem:[#allocation5 + $0xab] ss:$2 sm:$0xff]  ;;  %v2985_v52 = vmax.f32 %v2956_v48, %v2972_v29  ;;  %2905 = vst.msk [vmem:[#allocation5 + $0xc8] sm:$0xff] %vm2879_vm7, %v2873_v31  ;;  %v8759_v36 = vpop.f32.mrb[36].mxu0 }
 0x378   :  { %v2986_v23 = vmax.f32 %v2958_v49, %v2974_v19  ;;  %v2809_v35 = vadd.f32 %v8759_v36, %v10828_v21  ;;  %v2765_v27 = vpop.f32.mrb[37].mxu0  ;;  %v3046_v60 = vld [vmem:[#allocation6 + $0x39] sm:$0xff] }
 0x379   :  { %3007 = vst.msk [vmem:[#allocation6 + $0x4f] sm:$0xff] %vm2879_vm7, %v2985_v52  ;;  %v2807_v61 = vadd.f32 %v2765_v27, %v10830_v13  ;;  %v8760_v0 = vpop.f32.mrb[38].mxu0  ;;  %v3058_v56 = vpack.c.bf16 %v3046_v60, %v3045_v59  ;;  %v3047_v41 = vld [vmem:[#allocation6 + $0x41] sm:$0xff]  ;;  %v3020_v42 = vld [vmem:[#allocation6 + $0x38] sm:$0xff] }
 0x37a   :  { %3008 = vst.msk [vmem:[#allocation6 + $0x57] sm:$0xff] %vm2879_vm7, %v2986_v23  ;;  %v2847_v1 = vadd.f32 %v10837_v38, %v2809_v35  ;;  %v2768_v53 = vpop.f32.mrb[39].mxu0  ;;  %v3032_v34 = vpack.c.bf16 %v3020_v42, %v3019_v44  ;;  %v3021_v46 = vld [vmem:[#allocation6 + $0x40] sm:$0xff]  ;;  %v3321_v23 = vld [vmem:[#allocation6 + $0xa] sm:$0xff]  ;;  %v3322_v0 = vld [vmem:[#allocation6 + $0x12] sm:$0xff] }
 0x37b   :  { %v2845_v50 = vadd.f32 %v10837_v38, %v2807_v61  ;;  %v2808_v54 = vadd.f32 %v2768_v53, %v10832_v40  ;;  %8768 = vmatmul.mubr.msk.bf16.gmra.mrb[4].mxu1 %vm2879_vm7, %v3058_v56  ;;  %v3320_v27 = vld [vmem:[#allocation6 + $0x2] sm:$0xff]  ;;  %v3323_v60 = vld [vmem:[#allocation6 + $0x1a] sm:$0xff]  ;;  %v3325_v61 = vld [vmem:[#allocation6 + $0x2a] sm:$0xff] }
 0x37c   :  { %v2878_v21 = vmax.f32 %v2847_v1, 0.0  ;;  %v3336_v59 = vpack.c.bf16 %v3321_v23, %v3320_v27  ;;  %v3337_v56 = vpack.c.bf16 %v3323_v60, %v3322_v0  ;;  %v3324_v1 = vld [vmem:[#allocation6 + $0x22] sm:$0xff] }
 0x37d   :  { %v2876_v43 = vmax.f32 %v2845_v50, 0.0  ;;  %v2846_v45 = vadd.f32 %v10837_v38, %v2808_v54  ;;  %v3338_v53 = vpack.c.bf16 %v3325_v61, %v3324_v1  ;;  %v3327_v50 = vld [vmem:[#allocation6 + $0x3a] sm:$0xff] }
 0x37e   :  { %v2960_v3 = vld [vmem:[#allocation5 + $0xba] ss:$2 sm:$0xff]  ;;  %v2962_v13 = vld [vmem:[#allocation5 + $0xca] ss:$2 sm:$0xff]  ;;  %v2976_v63 = vld [vmem:[#allocation5 + $0xbb] ss:$2 sm:$0xff] }
 0x37f   :  { %2911 = vst.msk [vmem:[#allocation5 + $0xf0] sm:$0x3] %vm2910_vm9, %v2878_v21  ;;  %v2978_v57 = vld [vmem:[#allocation5 + $0xcb] ss:$2 sm:$0xff]  ;;  %v2987_v51 = vmax.f32 %v2960_v3, %v2976_v63  ;;  %v2877_v11 = vmax.f32 %v2846_v45, 0.0  ;;  %v3328_v45 = vld [vmem:[#allocation6 + $0x42] sm:$0xff] }
 0x380   :  { %2908 = vst.msk [vmem:[#allocation5 + $0xe0] sm:$0xff] %vm2879_vm7, %v2876_v43  ;;  %v2988_v58 = vmax.f32 %v2962_v13, %v2978_v57  ;;  %v3048_v12 = vld [vmem:[#allocation6 + $0x49] sm:$0xff]  ;;  %v3326_v21 = vld [vmem:[#allocation6 + $0x32] sm:$0xff] }
 0x381   :  { %3009 = vst.msk [vmem:[#allocation6 + $0x5f] sm:$0xff] %vm2879_vm7, %v2987_v51  ;;  %2909 = vst.msk [vmem:[#allocation5 + $0xe8] sm:$0xff] %vm2879_vm7, %v2877_v11  ;;  %v3059_v40 = vpack.c.bf16 %v3048_v12, %v3047_v41  ;;  %v3049_v38 = vld [vmem:[#allocation6 + $0x51] sm:$0xff]  ;;  %v3022_v22 = vld [vmem:[#allocation6 + $0x48] sm:$0xff]  ;;  %v3339_v43 = vpack.c.bf16 %v3327_v50, %v3326_v21 }
 0x382   :  { %3010 = vst.msk [vmem:[#allocation6 + $0x67] sm:$0xff] %vm2879_vm7, %v2988_v58  ;;  %v3033_v2 = vpack.c.bf16 %v3022_v22, %v3021_v46  ;;  %v3023_v49 = vld [vmem:[#allocation6 + $0x50] sm:$0xff] }
 0x383   :  { %8771 = vmatprep.mubr.msk.bf16.mxu1 %vm2879_vm7, %v3059_v40  ;;  %v3329_v54 = vld [vmem:[#allocation6 + $0x4a] sm:$0xff]  ;;  %v3330_v57 = vld [vmem:[#allocation6 + $0x52] sm:$0xff] }
 0x384   :  { %v3340_v3 = vpack.c.bf16 %v3329_v54, %v3328_v45 }
 0x388   :  { %v2964_v37 = vld [vmem:[#allocation5 + $0xda] ss:$2 sm:$0xff]  ;;  %v2966_v25 = vld [vmem:[#allocation5 + $0xea] ss:$2 sm:$0xf]  ;;  %v3050_v15 = vld [vmem:[#allocation6 + $0x59] sm:$0xff] }
 0x389   :  { %v2980_v47 = vld [vmem:[#allocation5 + $0xdb] ss:$2 sm:$0xff]  ;;  %v2982_v14 = vld [vmem:[#allocation5 + $0xeb] ss:$2 sm:$0xf]  ;;  %v3060_v9 = vpack.c.bf16 %v3050_v15, %v3049_v38  ;;  %v3331_v13 = vld [vmem:[#allocation6 + $0x5a] sm:$0xff] }
 0x38a   :  { %v2989_v28 = vmax.f32 %v2964_v37, %v2980_v47  ;;  %v2990_v16 = vmax.f32 %v2966_v25, %v2982_v14  ;;  %v3051_v5 = vld [vmem:[#allocation6 + $0x61] sm:$0xff]  ;;  %v3024_v31 = vld [vmem:[#allocation6 + $0x58] sm:$0xff]  ;;  %v3341_v51 = vpack.c.bf16 %v3331_v13, %v3330_v57  ;;  %v9499_v38 = vld [vmem:[%s12550_s7 + $0x10] sm:$0xff]  }
 0x38b   :  { %8772 = vmatmul.mubr.msk.bf16.gmra.mrb[8].mxu1 %vm2879_vm7, %v3060_v9  ;;  %v3034_v29 = vpack.c.bf16 %v3024_v31, %v3023_v49  ;;  %v3025_v19 = vld [vmem:[#allocation6 + $0x60] sm:$0xff]  ;;  %v9500_v37 = vld [vmem:[%s12550_s7 + $0x18] sm:$0xff]  }
 0x38c   :  { %3011 = vst.msk [vmem:[#allocation6 + $0x6f] sm:$0xff] %vm2879_vm7, %v2989_v28  ;;  %v3332_v11 = vld [vmem:[#allocation6 + $0x62] sm:$0xff]  ;;  %v10973_v25 = vld [vmem:[%s12549_s6] ss:$0 sm:$0xff]  ;;  %s9879_s6 = smov 100  }
 0x38d   :  { %3012 = vst.msk [vmem:[#allocation6 + $0x77] sm:$0xf] %vm3001_vm8, %v2990_v16  ;;  %v9501_v57 = vld [vmem:[%s12550_s7] sm:$0xff]  }
 0x393   :  { %v3052_v55 = vld [vmem:[#allocation6 + $0x69] sm:$0xff] }
 0x394   :  { %v3053_v6 = vld [vmem:[#allocation6 + $0x71] sm:$0xff]  ;;  %v3054_v10 = vld [vmem:[#allocation6 + $0x79] sm:$0x3]  ;;  %v3061_v8 = vpack.c.bf16 %v3052_v55, %v3051_v5  ;;  %v3026_v48 = vld [vmem:[#allocation6 + $0x68] sm:$0xff] }
 0x395   :  { %v3062_v18 = vpack.c.bf16 %v3054_v10, %v3053_v6  ;;  %v3035_v52 = vpack.c.bf16 %v3026_v48, %v3025_v19  ;;  %v3028_v36 = vld [vmem:[#allocation6 + $0x78] sm:$0x3]  ;;  %v3333_v63 = vld [vmem:[#allocation6 + $0x6a] sm:$0xff]  ;;  %v3335_v12 = vld [vmem:[#allocation6 + $0x7a] sm:$0x3] }
 0x396   :  { %8775 = vmatprep.mubr.msk.bf16.mxu1 %vm2879_vm7, %v3061_v8  ;;  %v3342_v58 = vpack.c.bf16 %v3333_v63, %v3332_v11  ;;  %v3334_v41 = vld [vmem:[#allocation6 + $0x72] sm:$0xff] }
 0x397   :  { %8776 = vmatmul.mubr.msk.bf16.gmra.mrb[12].mxu1 %vm2879_vm7, %v3062_v18  ;;  %v3343_v40 = vpack.c.bf16 %v3335_v12, %v3334_v41 }
 0x398   :  { %8781 = vmatprep.mubr.msk.bf16.mxu1 %vm2879_vm7, %v3029_v24 }
 0x39f   :  { %8782 = vmatmul.mubr.msk.bf16.vlgmr.msra.gmra.mrb[0].mxu1 %vm2879_vm7, %v3030_v32 }
 0x3a0   :  { %8785 = vmatprep.mubr.msk.bf16.mxu1 %vm2879_vm7, %v3031_v39  ;;  %8798 = vmatpush3.bf16.msra.mxu1 %v10883_v62  ;;  %v3027_v62 = vld [vmem:[#allocation6 + $0x70] sm:$0xff] }
 0x3a1   :  { %8815 = vmatprep.subr.bf16.mxu1 %v12570_v7  ;;  %v3036_v35 = vpack.c.bf16 %v3028_v36, %v3027_v62 }
 0x3a7   :  { %8786 = vmatmul.mubr.msk.bf16.gmra.mrb[4].mxu1 %vm2879_vm7, %v3032_v34 }
 0x3a8   :  { %8789 = vmatprep.mubr.msk.bf16.mxu1 %vm2879_vm7, %v3033_v2 }
 0x3af   :  { %8790 = vmatmul.mubr.msk.bf16.gmra.mrb[8].mxu1 %vm2879_vm7, %v3034_v29 }
 0x3b0   :  { %8793 = vmatprep.mubr.msk.bf16.mxu1 %vm2879_vm7, %v3035_v52 }
 0x3b7   :  { %8794 = vmatmul.mubr.msk.bf16.gmra.mrb[12].mxu1 %vm2879_vm7, %v3036_v35 }
 0x3b8   :  { %8799 = vmatprep.mubr.msk.bf16.mxu1 %vm2879_vm7, %v3336_v59 }
 0x3bf   :  { %8800 = vmatmul.mubr.msk.bf16.vlgmr.msra.gmra.mrb[0].mxu1 %vm2879_vm7, %v3337_v56 }
 0x3c0   :  { %8803 = vmatprep.mubr.msk.bf16.mxu1 %vm2879_vm7, %v3338_v53  ;;  %8816 = vmatpush3.bf16.msra.mxu1 %v9499_v38 }
 0x3c1   :  { %8817 = vmatprep.subr.bf16.mxu1 %v12570_v7 }
 0x3c4   :  { %8818 = vmatpush3.bf16.msra.mxu1 %v9500_v37 }
 0x3c5   :  { %8839 = vmatprep.subr.bf16.mxu1 %v12570_v7 }
 0x3c7   :  { %8804 = vmatmul.mubr.msk.bf16.gmra.mrb[4].mxu1 %vm2879_vm7, %v3339_v43 }
 0x3c8   :  { %8807 = vmatprep.mubr.msk.bf16.mxu1 %vm2879_vm7, %v3340_v3 }
 0x3cf   :  { %8808 = vmatmul.mubr.msk.bf16.gmra.mrb[8].mxu1 %vm2879_vm7, %v3341_v51 }
 0x3d0   :  { %8811 = vmatprep.mubr.msk.bf16.mxu1 %vm2879_vm7, %v3342_v58 }
 0x3d7   :  { %8812 = vmatmul.mubr.msk.bf16.gmra.mrb[12].mxu1 %vm2879_vm7, %v3343_v40 }
 0x3d8   :  { %8819 = vmatprep.mubr.msk.bf16.mxu1 %vm9873_vm11, %v12570_v7 }
 0x492   :  { %v8801_v15 = vpop.f32.mrb[0].mxu1 }
 0x493   :  { %v3499_v47 = vadd.f32 %v8801_v15, %v10973_v25  ;;  %v3411_v14 = vpop.f32.mrb[1].mxu1 }
 0x494   :  { %v3497_v9 = vadd.f32 %v10973_v25, %v3411_v14  ;;  %v8802_v28 = vpop.f32.mrb[2].mxu1 }
 0x495   :  { %v3515_v16 = vmax.f32 %v3499_v47, 0.0  ;;  %v3500_v5 = vadd.f32 %v8802_v28, %v10973_v25  ;;  %v3414_v4 = vpop.f32.mrb[3].mxu1  ;;  %v9502_v47 = vld [vmem:[%s12550_s7 + $0x8] sm:$0xff]  }
 0x496   :  { %v3513_v33 = vmax.f32 %v3497_v9, 0.0  ;;  %v3498_v55 = vadd.f32 %v10973_v25, %v3414_v4 }
 0x497   :  { %3532 = vst.msk [vmem:[#allocation7 + $0x10] sm:$0xff] %vm3529_vm12, %v3515_v16  ;;  %v3516_v6 = vmax.f32 %v3500_v5, 0.0 }
 0x498   :  { %3530 = vst.msk [vmem:[#allocation7] sm:$0xff] %vm3529_vm12, %v3513_v33  ;;  %v3514_v10 = vmax.f32 %v3498_v55, 0.0 }
 0x499   :  { %3533 = vst.msk [vmem:[#allocation7 + $0x18] sm:$0xff] %vm3529_vm12, %v3516_v6 }
 0x49a   :  { %3531 = vst.msk [vmem:[#allocation7 + $0x8] sm:$0xff] %vm3529_vm12, %v3514_v10  ;;  %v8805_v8 = vpop.f32.mrb[4].mxu1 }
 0x49b   :  { %v3503_v18 = vadd.f32 %v8805_v8, %v10973_v25  ;;  %v3427_v24 = vpop.f32.mrb[5].mxu1 }
 0x49c   :  { %v3501_v26 = vadd.f32 %v10973_v25, %v3427_v24  ;;  %v8806_v17 = vpop.f32.mrb[6].mxu1 }
 0x49d   :  { %v3519_v30 = vmax.f32 %v3503_v18, 0.0  ;;  %v3504_v20 = vadd.f32 %v8806_v17, %v10973_v25  ;;  %v3430_v32 = vpop.f32.mrb[7].mxu1 }
 0x49e   :  { %v3517_v39 = vmax.f32 %v3501_v26, 0.0  ;;  %v3502_v42 = vadd.f32 %v10973_v25, %v3430_v32 }
 0x49f   :  { %3536 = vst.msk [vmem:[#allocation7 + $0x30] sm:$0xff] %vm3529_vm12, %v3519_v30  ;;  %v3520_v22 = vmax.f32 %v3504_v20, 0.0 }
 0x4a0   :  { %v3549_v44 = vld [vmem:[#allocation7 + $0x10] ss:$2 sm:$0xff]  ;;  %v3557_v34 = vld [vmem:[#allocation7 + $0x11] ss:$2 sm:$0xff]  ;;  %3534 = vst.msk [vmem:[#allocation7 + $0x20] sm:$0xff] %vm3529_vm12, %v3517_v39  ;;  %v3518_v46 = vmax.f32 %v3502_v42, 0.0 }
 0x4a1   :  { %v3563_v2 = vmax.f32 %v3549_v44, %v3557_v34  ;;  %v3547_v31 = vld [vmem:[#allocation7] ss:$2 sm:$0xff]  ;;  %v3555_v48 = vld [vmem:[#allocation7 + $0x1] ss:$2 sm:$0xff]  ;;  %3537 = vst.msk [vmem:[#allocation7 + $0x38] sm:$0xff] %vm3529_vm12, %v3520_v22 }
 0x4a2   :  { %v3562_v49 = vmax.f32 %v3547_v31, %v3555_v48  ;;  %3535 = vst.msk [vmem:[#allocation7 + $0x28] sm:$0xff] %vm3529_vm12, %v3518_v46  ;;  %v8809_v29 = vpop.f32.mrb[8].mxu1  ;;  %v9503_v31 = vld [vmem:[%s12550_s7 + $0x20] sm:$0xff]  }
 0x4a3   :  { %3589 = vst.msk [vmem:[#allocation8 + $0xa] sm:$0xff] %vm3529_vm12, %v3563_v2  ;;  %v3507_v19 = vadd.f32 %v8809_v29, %v10973_v25  ;;  %v3443_v52 = vpop.f32.mrb[9].mxu1 }
 0x4a4   :  { %3588 = vst.msk [vmem:[#allocation8 + $0x2] sm:$0xff] %vm3529_vm12, %v3562_v49  ;;  %v3505_v62 = vadd.f32 %v10973_v25, %v3443_v52  ;;  %v8810_v36 = vpop.f32.mrb[10].mxu1  ;;  %v9504_v49 = vld [vmem:[%s12550_s7 + $0x28] sm:$0xff]  }
 0x4a5   :  { %v3523_v23 = vmax.f32 %v3507_v19, 0.0  ;;  %v3508_v35 = vadd.f32 %v8810_v36, %v10973_v25  ;;  %v3446_v27 = vpop.f32.mrb[11].mxu1 }
 0x4a6   :  { %v3521_v59 = vmax.f32 %v3505_v62, 0.0  ;;  %v3506_v60 = vadd.f32 %v10973_v25, %v3446_v27 }
 0x4a7   :  { %3540 = vst.msk [vmem:[#allocation7 + $0x50] sm:$0xff] %vm3529_vm12, %v3523_v23  ;;  %v3524_v61 = vmax.f32 %v3508_v35, 0.0 }
 0x4a8   :  { %v3553_v0 = vld [vmem:[#allocation7 + $0x30] ss:$2 sm:$0x3f]  ;;  %v3561_v56 = vld [vmem:[#allocation7 + $0x31] ss:$2 sm:$0x3f] }
 0x4a9   :  { %3538 = vst.msk [vmem:[#allocation7 + $0x40] sm:$0xff] %vm3529_vm12, %v3521_v59  ;;  %v3565_v1 = vmax.f32 %v3553_v0, %v3561_v56  ;;  %v3551_v53 = vld [vmem:[#allocation7 + $0x20] ss:$2 sm:$0xff]  ;;  %v3559_v50 = vld [vmem:[#allocation7 + $0x21] ss:$2 sm:$0xff]  ;;  %3541 = vst.msk [vmem:[#allocation7 + $0x58] sm:$0xff] %vm3529_vm12, %v3524_v61 }
 0x4aa   :  { %v3522_v54 = vmax.f32 %v3506_v60, 0.0  ;;  %v3564_v21 = vmax.f32 %v3551_v53, %v3559_v50  ;;  %v8813_v43 = vpop.f32.mrb[12].mxu1  ;;  %v3835_v56 = vld [vmem:[#allocation8 + $0xa] sm:$0xff] }
 0x4ab   :  { %3592 = vst.msk [vmem:[#allocation8 + $0x1a] sm:$0x3f] %vm3591_vm13, %v3565_v1  ;;  %v3511_v45 = vadd.f32 %v8813_v43, %v10973_v25  ;;  %v3459_v3 = vpop.f32.mrb[13].mxu1  ;;  %v3617_v13 = vld [vmem:[#allocation8 + $0x1] sm:$0xff]  ;;  %v3618_v63 = vld [vmem:[#allocation8 + $0x9] sm:$0xff] }
 0x4ac   :  { %3539 = vst.msk [vmem:[#allocation7 + $0x48] sm:$0xff] %vm3529_vm12, %v3522_v54  ;;  %3590 = vst.msk [vmem:[#allocation8 + $0x12] sm:$0xff] %vm3529_vm12, %v3564_v21  ;;  %v3509_v51 = vadd.f32 %v10973_v25, %v3459_v3  ;;  %v8814_v11 = vpop.f32.mrb[14].mxu1  ;;  %v3626_v58 = vpack.c.bf16 %v3618_v63, %v3617_v13  ;;  %v3599_v46 = vld [vmem:[#allocation8] sm:$0xff]  ;;  %v3600_v2 = vld [vmem:[#allocation8 + $0x8] sm:$0xff] }
 0x4ad   :  { %v3527_v41 = vmax.f32 %v3511_v45, 0.0  ;;  %v3512_v12 = vadd.f32 %v8814_v11, %v10973_v25  ;;  %v3462_v40 = vpop.f32.mrb[15].mxu1  ;;  %v3608_v48 = vpack.c.bf16 %v3600_v2, %v3599_v46  ;;  %v3834_v0 = vld [vmem:[#allocation8 + $0x2] sm:$0xff] }
 0x4ae   :  { %v3525_v38 = vmax.f32 %v3509_v51, 0.0  ;;  %v3510_v37 = vadd.f32 %v10973_v25, %v3462_v40  ;;  %8820 = vmatmul.mubr.msk.bf16.vlgmr.msra.gmra.mrb[16].mxu1 %vm3529_vm12, %v3626_v58  ;;  %v3843_v1 = vpack.c.bf16 %v3835_v56, %v3834_v0  ;;  %v8085_v56 = vld [vmem:[%s12551_s8] ss:$0 sm:$0xff] }
 0x4af   :  { %3544 = vst.msk [vmem:[#allocation7 + $0x70] sm:$0xff] %vm3529_vm12, %v3527_v41  ;;  %v3528_v15 = vmax.f32 %v3512_v12, 0.0  ;;  %8840 = vmatpush3.bf16.msra.mxu1 %v9501_v57  ;;  %8823 = vmatprep.mubr.msk.bf16.mxu1 %vm9873_vm11, %v12570_v7  ;;  %v3842_v57 = vld [vmem:[#allocation8 + $0x42] sm:$0x3] }
 0x4b0   :  { %3542 = vst.msk [vmem:[#allocation7 + $0x60] sm:$0xff] %vm3529_vm12, %v3525_v38  ;;  %v3526_v14 = vmax.f32 %v3510_v37, 0.0  ;;  %8841 = vmatprep.subr.bf16.mxu1 %v12570_v7  ;;  %v3847_v51 = vpack.c.bf16 %v3842_v57, %v3842_v57 }
 0x4b1   :  { %3546 = vst.msk [vmem:[#allocation7 + $0x78] sm:$0x3] %vm3545_vm10, %v3528_v15 }
 0x4b2   :  { %3543 = vst.msk [vmem:[#allocation7 + $0x68] sm:$0xff] %vm3529_vm12, %v3526_v14  ;;  %v3837_v50 = vld [vmem:[#allocation8 + $0x1a] sm:$0xff] }
 0x4b3   :  { %v3567_v25 = vld [vmem:[#allocation7 + $0x3e] ss:$2 sm:$0xff]  ;;  %v3569_v9 = vld [vmem:[#allocation7 + $0x4e] ss:$2 sm:$0xff]  ;;  %v3575_v28 = vld [vmem:[#allocation7 + $0x3f] ss:$2 sm:$0xff]  ;;  %8842 = vmatpush3.bf16.msra.mxu1 %v9502_v47 }
 0x4b4   :  { %v3577_v16 = vld [vmem:[#allocation7 + $0x4f] ss:$2 sm:$0xff]  ;;  %v3582_v5 = vmax.f32 %v3567_v25, %v3575_v28  ;;  %8863 = vmatprep.subr.bf16.mxu1 %v12570_v7 }
 0x4b5   :  { %v3619_v4 = vld [vmem:[#allocation8 + $0x11] sm:$0xff]  ;;  %v3620_v33 = vld [vmem:[#allocation8 + $0x19] sm:$0xff]  ;;  %v3583_v55 = vmax.f32 %v3569_v9, %v3577_v16 }
 0x4b6   :  { %v3627_v6 = vpack.c.bf16 %v3620_v33, %v3619_v4  ;;  %3595 = vst.msk [vmem:[#allocation8 + $0x24] sm:$0xff] %vm3529_vm12, %v3582_v5  ;;  %v3601_v29 = vld [vmem:[#allocation8 + $0x10] sm:$0xff]  ;;  %v3602_v19 = vld [vmem:[#allocation8 + $0x18] sm:$0xff] }
 0x4b7   :  { %3596 = vst.msk [vmem:[#allocation8 + $0x2c] sm:$0xff] %vm3529_vm12, %v3583_v55  ;;  %v3609_v52 = vpack.c.bf16 %v3602_v19, %v3601_v29  ;;  %v3836_v53 = vld [vmem:[#allocation8 + $0x12] sm:$0xff] }
 0x4b8   :  { %8824 = vmatmul.mubr.msk.bf16.gmra.mrb[20].mxu1 %vm3529_vm12, %v3627_v6  ;;  %v3844_v54 = vpack.c.bf16 %v3837_v50, %v3836_v53 }
 0x4b9   :  { %8827 = vmatprep.mubr.msk.bf16.mxu1 %vm9873_vm11, %v12570_v7  ;;  %v3571_v10 = vld [vmem:[#allocation7 + $0x5e] ss:$2 sm:$0xff]  ;;  %v3573_v8 = vld [vmem:[#allocation7 + $0x6e] ss:$2 sm:$0x3f] }
 0x4ba   :  { %v3579_v18 = vld [vmem:[#allocation7 + $0x5f] ss:$2 sm:$0xff]  ;;  %v3581_v24 = vld [vmem:[#allocation7 + $0x6f] ss:$2 sm:$0x3f] }
 0x4bb   :  { %v3584_v26 = vmax.f32 %v3571_v10, %v3579_v18  ;;  %v3585_v17 = vmax.f32 %v3573_v8, %v3581_v24 }
 0x4bd   :  { %v3621_v30 = vld [vmem:[#allocation8 + $0x21] sm:$0xff]  ;;  %3597 = vst.msk [vmem:[#allocation8 + $0x34] sm:$0xff] %vm3529_vm12, %v3584_v26 }
 0x4be   :  { %3598 = vst.msk [vmem:[#allocation8 + $0x3c] sm:$0x3f] %vm3591_vm13, %v3585_v17  ;;  %v3622_v20 = vld [vmem:[#allocation8 + $0x29] sm:$0xff]  ;;  %v3603_v62 = vld [vmem:[#allocation8 + $0x20] sm:$0xff] }
 0x4bf   :  { %v3628_v32 = vpack.c.bf16 %v3622_v20, %v3621_v30  ;;  %v3604_v36 = vld [vmem:[#allocation8 + $0x28] sm:$0xff] }
 0x4c0   :  { %v3610_v23 = vpack.c.bf16 %v3604_v36, %v3603_v62  ;;  %v3838_v21 = vld [vmem:[#allocation8 + $0x22] sm:$0xff]  ;;  %v3839_v43 = vld [vmem:[#allocation8 + $0x2a] sm:$0xff] }
 0x4c1   :  { %8828 = vmatmul.mubr.msk.bf16.gmra.mrb[24].mxu1 %vm3529_vm12, %v3628_v32  ;;  %v3845_v45 = vpack.c.bf16 %v3839_v43, %v3838_v21 }
 0x4c2   :  { %8831 = vmatprep.mubr.msk.bf16.mxu1 %vm9873_vm11, %v12570_v7 }
 0x4c4   :  { %v3623_v39 = vld [vmem:[#allocation8 + $0x31] sm:$0xff] }
 0x4c5   :  { %v3624_v42 = vld [vmem:[#allocation8 + $0x39] sm:$0xff]  ;;  %v3625_v44 = vld [vmem:[#allocation8 + $0x41] sm:$0x3]  ;;  %v3605_v35 = vld [vmem:[#allocation8 + $0x30] sm:$0xff] }
 0x4c6   :  { %v3629_v22 = vpack.c.bf16 %v3624_v42, %v3623_v39  ;;  %v3630_v34 = vpack.c.bf16 %v3625_v44, %v3625_v44  ;;  %v3606_v27 = vld [vmem:[#allocation8 + $0x38] sm:$0xff]  ;;  %v3607_v60 = vld [vmem:[#allocation8 + $0x40] sm:$0x3] }
 0x4c7   :  { %v3611_v59 = vpack.c.bf16 %v3606_v27, %v3605_v35  ;;  %v3612_v61 = vpack.c.bf16 %v3607_v60, %v3607_v60  ;;  %v3840_v3 = vld [vmem:[#allocation8 + $0x32] sm:$0xff]  ;;  %v3841_v13 = vld [vmem:[#allocation8 + $0x3a] sm:$0xff] }
 0x4c8   :  { %v3846_v63 = vpack.c.bf16 %v3841_v13, %v3840_v3 }
 0x4c9   :  { %8832 = vmatmul.mubr.msk.bf16.gmra.mrb[28].mxu1 %vm3529_vm12, %v3629_v22 }
 0x4ca   :  { %8835 = vmatprep.mubr.msk.bf16.mxu1 %vm9873_vm11, %v12570_v7 }
 0x4d1   :  { %8836 = vmatmul.mubr.msk.bf16.gmra.mrb[32].mxu1 %vm3529_vm12, %v3630_v34 }
 0x4d2   :  { %8843 = vmatprep.mubr.msk.bf16.mxu1 %vm9873_vm11, %v12570_v7 }
 0x4d9   :  { %8844 = vmatmul.mubr.msk.bf16.vlgmr.msra.gmra.mrb[36].mxu1 %vm3529_vm12, %v3608_v48 }
 0x4da   :  { %8864 = vmatpush3.bf16.msra.mxu1 %v9503_v31  ;;  %8847 = vmatprep.mubr.msk.bf16.mxu1 %vm9873_vm11, %v12570_v7 }
 0x4db   :  { %8865 = vmatprep.subr.bf16.mxu1 %v12570_v7 }
 0x4de   :  { %8866 = vmatpush3.bf16.msra.mxu1 %v9504_v49 }
 0x4df   :  { %8905 = vmatprep.subr.bf16.mxu1 %v12570_v7 }
 0x4e1   :  { %8848 = vmatmul.mubr.msk.bf16.gmra.mrb[40].mxu1 %vm3529_vm12, %v3609_v52 }
 0x4e2   :  { %8851 = vmatprep.mubr.msk.bf16.mxu1 %vm9873_vm11, %v12570_v7 }
 0x4e9   :  { %8852 = vmatmul.mubr.msk.bf16.gmra.mrb[44].mxu1 %vm3529_vm12, %v3610_v23 }
 0x4ea   :  { %8855 = vmatprep.mubr.msk.bf16.mxu1 %vm9873_vm11, %v12570_v7 }
 0x4f1   :  { %8856 = vmatmul.mubr.msk.bf16.gmra.mrb[48].mxu1 %vm3529_vm12, %v3611_v59 }
 0x4f2   :  { %8859 = vmatprep.mubr.msk.bf16.mxu1 %vm9873_vm11, %v12570_v7 }
 0x4f9   :  { %8860 = vmatmul.mubr.msk.bf16.gmra.mrb[52].mxu1 %vm3529_vm12, %v3612_v61 }
 0x4fa   :  { %8867 = vmatprep.mubr.msk.bf16.mxu1 %vm9873_vm11, %v12570_v7 }
 0x501   :  { %8868 = vmatmul.mubr.msk.bf16.vlgmr.msra.gmra.mrb[56].mxu1 %vm3529_vm12, %v3843_v1 }
 0x502   :  { %8871 = vmatprep.mubr.msk.bf16.mxu1 %vm9873_vm11, %v12570_v7 }
 0x509   :  { %8872 = vmatmul.mubr.msk.bf16.gmra.mrb[60].mxu1 %vm3529_vm12, %v3844_v54 }
 0x50a   :  { %8875 = vmatprep.mubr.msk.bf16.mxu1 %vm9873_vm11, %v12570_v7 }
 0x511   :  { %8876 = vmatmul.mubr.msk.bf16.gmra.mrb[64].mxu1 %vm3529_vm12, %v3845_v45 }
 0x512   :  { %8879 = vmatprep.mubr.msk.bf16.mxu1 %vm9873_vm11, %v12570_v7 }
 0x519   :  { %8880 = vmatmul.mubr.msk.bf16.gmra.mrb[68].mxu1 %vm3529_vm12, %v3846_v63 }
 0x51a   :  { %8883 = vmatprep.mubr.msk.bf16.mxu1 %vm9873_vm11, %v12570_v7 }
 0x521   :  { %8884 = vmatmul.mubr.msk.bf16.gmra.mrb[72].mxu1 %vm3529_vm12, %v3847_v51 }
 0x522   :  { %8907 = vmatprep.mubr.msk.bf16.mxu1 %vm9873_vm11, %v12570_v7 }
 0x581   :  { %v3697_v11 = vpop.f32.mrb[16].mxu1 }
 0x582   :  { %v8821_v58 = vpop.f32.mrb[17].mxu1 }
 0x583   :  { %v3700_v41 = vpop.f32.mrb[18].mxu1 }
 0x584   :  { %v8822_v12 = vpop.f32.mrb[19].mxu1 }
 0x58b   :  { %v3705_v40 = vpop.f32.mrb[20].mxu1 }
 0x58c   :  { %v8825_v38 = vpop.f32.mrb[21].mxu1 }
 0x58d   :  { %v3708_v37 = vpop.f32.mrb[22].mxu1 }
 0x58e   :  { %v8826_v15 = vpop.f32.mrb[23].mxu1 }
 0x594   :  { %v3713_v47 = vpop.f32.mrb[24].mxu1 }
 0x595   :  { %v8829_v14 = vpop.f32.mrb[25].mxu1 }
 0x596   :  { %v3716_v25 = vpop.f32.mrb[26].mxu1 }
 0x597   :  { %v8830_v9 = vpop.f32.mrb[27].mxu1 }
 0x59c   :  { %v3721_v28 = vpop.f32.mrb[28].mxu1 }
 0x59d   :  { %v8833_v16 = vpop.f32.mrb[29].mxu1 }
 0x59e   :  { %v3724_v5 = vpop.f32.mrb[30].mxu1 }
 0x59f   :  { %v8834_v4 = vpop.f32.mrb[31].mxu1 }
 0x5a4   :  { %v3729_v33 = vpop.f32.mrb[32].mxu1 }
 0x5a5   :  { %v8837_v55 = vpop.f32.mrb[33].mxu1 }
 0x5a6   :  { %v3732_v6 = vpop.f32.mrb[34].mxu1 }
 0x5a7   :  { %v8838_v10 = vpop.f32.mrb[35].mxu1 }
 0x5ac   :  { %v3796_v8 = vpop.f32.mrb[36].mxu1 }
 0x5ad   :  { %v3797_v18 = vadd.f32 %v3796_v8, %v3697_v11  ;;  %v8845_v24 = vpop.f32.mrb[37].mxu1 }
 0x5ae   :  { %v3799_v26 = vpop.f32.mrb[38].mxu1 }
 0x5af   :  { %v3800_v17 = vadd.f32 %v3799_v26, %v3700_v41  ;;  %v8846_v30 = vpop.f32.mrb[39].mxu1 }
 0x5b4   :  { %v3804_v20 = vpop.f32.mrb[40].mxu1 }
 0x5b5   :  { %v3805_v32 = vadd.f32 %v3804_v20, %v3705_v40  ;;  %v8849_v39 = vpop.f32.mrb[41].mxu1 }
 0x5b6   :  { %v3807_v42 = vpop.f32.mrb[42].mxu1 }
 0x5b7   :  { %v3808_v22 = vadd.f32 %v3807_v42, %v3708_v37  ;;  %v8850_v44 = vpop.f32.mrb[43].mxu1 }
 0x5bc   :  { %v3812_v34 = vpop.f32.mrb[44].mxu1 }
 0x5bd   :  { %v3813_v46 = vadd.f32 %v3812_v34, %v3713_v47  ;;  %v8853_v2 = vpop.f32.mrb[45].mxu1 }
 0x5be   :  { %v3815_v31 = vpop.f32.mrb[46].mxu1 }
 0x5bf   :  { %v3816_v48 = vadd.f32 %v3815_v31, %v3716_v25  ;;  %v8854_v49 = vpop.f32.mrb[47].mxu1 }
 0x5c0   :  { %v9505_v49 = vld [vmem:[%s12552_s9] sm:$0xff]  }
 0x5c1   :  { %8887 = vmatprep.subr.bf16.mxu0 %v9505_v49 }
 0x5c2   :  { %8888 = vmatpush3.bf16.msra.mxu0 %v9505_v49 }
 0x5c4   :  { %v3820_v29 = vpop.f32.mrb[48].mxu1 }
 0x5c5   :  { %v3821_v19 = vadd.f32 %v3820_v29, %v3721_v28  ;;  %v8857_v52 = vpop.f32.mrb[49].mxu1 }
 0x5c6   :  { %v3823_v62 = vpop.f32.mrb[50].mxu1 }
 0x5c7   :  { %v3824_v36 = vadd.f32 %v3823_v62, %v3724_v5  ;;  %v8858_v23 = vpop.f32.mrb[51].mxu1 }
 0x5cc   :  { %v3828_v35 = vpop.f32.mrb[52].mxu1 }
 0x5cd   :  { %v3829_v27 = vadd.f32 %v3828_v35, %v3729_v33  ;;  %v8861_v59 = vpop.f32.mrb[53].mxu1 }
 0x5ce   :  { %v3831_v60 = vpop.f32.mrb[54].mxu1 }
 0x5cf   :  { %v8862_v61 = vpop.f32.mrb[55].mxu1 }
 0x5d4   :  { %v3914_v0 = vpop.f32.mrb[56].mxu1 }
 0x5d5   :  { %v3952_v1 = vadd.f32 %v3914_v0, %v3797_v18  ;;  %v8869_v53 = vpop.f32.mrb[57].mxu1 }
 0x5d6   :  { %v3917_v50 = vpop.f32.mrb[58].mxu1 }
 0x5d7   :  { %v3968_v54 = vadd.f32 %v8085_v56, %v3952_v1  ;;  %v3953_v21 = vadd.f32 %v3917_v50, %v3800_v17  ;;  %v8870_v43 = vpop.f32.mrb[59].mxu1 }
 0x5d9   :  { %v3977_v45 = vmax.f32 %v3968_v54, 0.0  ;;  %v3969_v3 = vadd.f32 %v8085_v56, %v3953_v21 }
 0x5db   :  { %3987 = vst.msk [vmem:[#allocation9] sm:$0xff] %vm3986_vm14, %v3977_v45  ;;  %v3978_v13 = vmax.f32 %v3969_v3, 0.0 }
 0x5dc   :  { %v3922_v63 = vpop.f32.mrb[60].mxu1 }
 0x5dd   :  { %3988 = vst.msk [vmem:[#allocation9 + $0x8] sm:$0xff] %vm3986_vm14, %v3978_v13  ;;  %v3954_v57 = vadd.f32 %v3922_v63, %v3805_v32  ;;  %v8873_v51 = vpop.f32.mrb[61].mxu1 }
 0x5de   :  { %v3925_v11 = vpop.f32.mrb[62].mxu1 }
 0x5df   :  { %v3970_v58 = vadd.f32 %v8085_v56, %v3954_v57  ;;  %v3955_v41 = vadd.f32 %v3925_v11, %v3808_v22  ;;  %v8874_v12 = vpop.f32.mrb[63].mxu1 }
 0x5e1   :  { %v3979_v40 = vmax.f32 %v3970_v58, 0.0  ;;  %v3971_v38 = vadd.f32 %v8085_v56, %v3955_v41 }
 0x5e3   :  { %3989 = vst.msk [vmem:[#allocation9 + $0x10] sm:$0xff] %vm3986_vm14, %v3979_v40  ;;  %v3980_v37 = vmax.f32 %v3971_v38, 0.0 }
 0x5e4   :  { %v3930_v15 = vpop.f32.mrb[64].mxu1  ;;  %v3997_v62 = vld [vmem:[#allocation9] ss:$2 sm:$0xff] }
 0x5e5   :  { %3990 = vst.msk [vmem:[#allocation9 + $0x18] sm:$0xff] %vm3986_vm14, %v3980_v37  ;;  %v3956_v47 = vadd.f32 %v3930_v15, %v3813_v46  ;;  %v8877_v14 = vpop.f32.mrb[65].mxu1 }
 0x5e6   :  { %v3933_v25 = vpop.f32.mrb[66].mxu1 }
 0x5e7   :  { %v3972_v9 = vadd.f32 %v8085_v56, %v3956_v47  ;;  %v3957_v28 = vadd.f32 %v3933_v25, %v3816_v48  ;;  %v8878_v16 = vpop.f32.mrb[67].mxu1 }
 0x5e8   :  { %v9506_v16 = vld [vmem:[%s12554_s11] sm:$0xff]   ;;  %s9876_s11 = smov 108  }
 0x5e9   :  { %v3981_v5 = vmax.f32 %v3972_v9, 0.0  ;;  %v3973_v4 = vadd.f32 %v8085_v56, %v3957_v28 }
 0x5eb   :  { %3991 = vst.msk [vmem:[#allocation9 + $0x20] sm:$0xff] %vm3986_vm14, %v3981_v5  ;;  %v3982_v33 = vmax.f32 %v3973_v4, 0.0  ;;  %v11112_v5 = vld [vmem:[%s12553_s10] ss:$0 sm:$0xff]  ;;  %s9875_s10 = smov 112  }
 0x5ec   :  { %v3938_v55 = vpop.f32.mrb[68].mxu1  ;;  %v3999_v59 = vld [vmem:[#allocation9 + $0x10] ss:$2 sm:$0xff]  ;;  %v4003_v60 = vld [vmem:[#allocation9 + $0x11] ss:$2 sm:$0xff] }
 0x5ed   :  { %3992 = vst.msk [vmem:[#allocation9 + $0x28] sm:$0xff] %vm3986_vm14, %v3982_v33  ;;  %v3958_v6 = vadd.f32 %v3938_v55, %v3821_v19  ;;  %v8881_v10 = vpop.f32.mrb[69].mxu1  ;;  %v4005_v61 = vmax.f32 %v3999_v59, %v4003_v60 }
 0x5ee   :  { %v3941_v8 = vpop.f32.mrb[70].mxu1 }
 0x5ef   :  { %v3974_v18 = vadd.f32 %v8085_v56, %v3958_v6  ;;  %v3959_v24 = vadd.f32 %v3941_v8, %v3824_v36  ;;  %v8882_v26 = vpop.f32.mrb[71].mxu1  ;;  %v4001_v36 = vld [vmem:[#allocation9 + $0x1] ss:$2 sm:$0xff] }
 0x5f0   :  { %v4004_v23 = vmax.f32 %v3997_v62, %v4001_v36 }
 0x5f1   :  { %v3983_v17 = vmax.f32 %v3974_v18, 0.0  ;;  %v3975_v30 = vadd.f32 %v8085_v56, %v3959_v24 }
 0x5f3   :  { %3993 = vst.msk [vmem:[#allocation9 + $0x30] sm:$0xff] %vm3986_vm14, %v3983_v17  ;;  %v3984_v20 = vmax.f32 %v3975_v30, 0.0 }
 0x5f4   :  { %v3946_v32 = vpop.f32.mrb[72].mxu1 }
 0x5f5   :  { %3994 = vst.msk [vmem:[#allocation9 + $0x38] sm:$0xff] %vm3986_vm14, %v3984_v20  ;;  %v3960_v39 = vadd.f32 %v3946_v32, %v3829_v27  ;;  %v8885_v42 = vpop.f32.mrb[73].mxu1 }
 0x5f6   :  { %v3949_v22 = vpop.f32.mrb[74].mxu1 }
 0x5f7   :  { %v3976_v44 = vadd.f32 %v8085_v56, %v3960_v39  ;;  %v8886_v34 = vpop.f32.mrb[75].mxu1 }
 0x5f9   :  { %v3985_v46 = vmax.f32 %v3976_v44, 0.0 }
 0x5fa   :  { %v4007_v2 = vld [vmem:[#allocation9 + $0x22] ss:$2 sm:$0xff]  ;;  %v4011_v31 = vld [vmem:[#allocation9 + $0x23] ss:$2 sm:$0xff] }
 0x5fb   :  { %3996 = vst.msk [vmem:[#allocation9 + $0x40] sm:$0x3] %vm3995_vm15, %v3985_v46  ;;  %v4014_v48 = vmax.f32 %v4007_v2, %v4011_v31 }
 0x5fd   :  { %4018 = vrot.lane.b32.xlu1 %v4014_v48, %s9874_s25 }
 0x602   :  { %v4009_v29 = vld [vmem:[#allocation9 + $0x32] ss:$2 sm:$0xff]  ;;  %v4013_v19 = vld [vmem:[#allocation9 + $0x33] ss:$2 sm:$0xff] }
 0x603   :  { %v4015_v52 = vmax.f32 %v4009_v29, %v4013_v19 }
 0x605   :  { %4020 = vrot.lane.b32.xlu0 %v4015_v52, %s9874_s25 }
 0x66f   :  { %v4019_v35 = vpop.permute.xlu1 %4018 }
 0x670   :  { %v4024_v27 = vsel %vm3986_vm14, %v4004_v23, %v4019_v35 }
 0x671   :  { %4026 = vxpose.xlu1.b32.start [1/2] (short) %v4024_v27, 128 }
 0x677   :  { %v4021_v0 = vpop.permute.xlu0 %4020 }
 0x678   :  { %v4025_v56 = vsel %vm3986_vm14, %v4005_v61, %v4021_v0 }
 0x679   :  { %v4204_v1 = vpack.c.bf16 %v4025_v56, %v4024_v27  ;;  %4027 = vxpose.xlu1.b32.end [2/2] (short) %v4025_v56, 128 }
 0x67b   :  { %8906 = vmatpush3.bf16.msra.mxu1 %v4204_v1 }
 0x67c   :  { %8927 = vmatprep.subr.bf16.mxu1 %v12570_v7 }
 0x67e   :  { %8908 = vmatmul.mubr.msk.bf16.vlgmr.msra.gmra.mrb[76].mxu1 %vm2879_vm7, %v9506_v16 }
 0x67f   :  { %8935 = vmatprep.mubr.msk.bf16.mxu1 %vm9873_vm11, %v12570_v7 }
 0x6f5   :  { %v4042_v53 = vpop.trf.xlu1 }
 0x6f9   :  { %v4043_v50 = vpop.trf.xlu1 }
 0x6fa   :  { %v4058_v54 = vpack.c.bf16 %v4043_v50, %v4042_v53 }
 0x6fc   :  { %8889 = vmatprep.mubr.msk.bf16.mxu0 %vm2879_vm7, %v4058_v54 }
 0x6fd   :  { %v4044_v21 = vpop.trf.xlu1 }
 0x701   :  { %v4045_v43 = vpop.trf.xlu1 }
 0x702   :  { %v4059_v45 = vpack.c.bf16 %v4045_v43, %v4044_v21 }
 0x704   :  { %8890 = vmatmul.mubr.msk.bf16.vlgmr.msra.gmra.mrb[40].mxu0 %vm2879_vm7, %v4059_v45 }
 0x705   :  { %v4046_v3 = vpop.trf.xlu1 }
 0x709   :  { %v4047_v13 = vpop.trf.xlu1 }
 0x70a   :  { %v4060_v63 = vpack.c.bf16 %v4047_v13, %v4046_v3 }
 0x70c   :  { %8893 = vmatprep.mubr.msk.bf16.mxu0 %vm2879_vm7, %v4060_v63 }
 0x70d   :  { %v4048_v57 = vpop.trf.xlu1 }
 0x711   :  { %v4049_v51 = vpop.trf.xlu1 }
 0x712   :  { %v4061_v11 = vpack.c.bf16 %v4049_v51, %v4048_v57 }
 0x714   :  { %8894 = vmatmul.mubr.msk.bf16.gmra.mrb[44].mxu0 %vm2879_vm7, %v4061_v11 }
 0x715   :  { %v4050_v58 = vpop.trf.xlu1 }
 0x719   :  { %v4051_v41 = vpop.trf.xlu1 }
 0x71a   :  { %v4062_v12 = vpack.c.bf16 %v4051_v41, %v4050_v58 }
 0x71c   :  { %8897 = vmatprep.mubr.msk.bf16.mxu0 %vm2879_vm7, %v4062_v12 }
 0x71d   :  { %v4052_v40 = vpop.trf.xlu1 }
 0x721   :  { %v4053_v38 = vpop.trf.xlu1 }
 0x722   :  { %v4063_v37 = vpack.c.bf16 %v4053_v38, %v4052_v40 }
 0x724   :  { %8898 = vmatmul.mubr.msk.bf16.gmra.mrb[48].mxu0 %vm2879_vm7, %v4063_v37 }
 0x725   :  { %v4054_v15 = vpop.trf.xlu1 }
 0x729   :  { %v4055_v47 = vpop.trf.xlu1 }
 0x72a   :  { %v4064_v14 = vpack.c.bf16 %v4055_v47, %v4054_v15 }
 0x72c   :  { %8901 = vmatprep.mubr.msk.bf16.mxu0 %vm2879_vm7, %v4064_v14 }
 0x72d   :  { %v4056_v25 = vpop.trf.xlu1 }
 0x731   :  { %v4057_v9 = vpop.trf.xlu1 }
 0x732   :  { %v4065_v28 = vpack.c.bf16 %v4057_v9, %v4056_v25 }
 0x734   :  { %8902 = vmatmul.mubr.msk.bf16.gmra.mrb[52].mxu0 %vm2879_vm7, %v4065_v28 }
 0x7d7   :  { %v8891_v4 = vpop.f32.mrb[40].mxu0 }
 0x7d8   :  { %v4148_v33 = vadd.f32 %v8891_v4, %v11112_v5  ;;  %v4139_v55 = vpop.f32.mrb[41].mxu0 }
 0x7d9   :  { %v4140_v6 = vadd.f32 %v11112_v5, %v4139_v55  ;;  %v8892_v10 = vpop.f32.mrb[42].mxu0 }
 0x7da   :  { %v4151_v8 = vadd.f32 %v8892_v10, %v11112_v5  ;;  %v4142_v18 = vpop.f32.mrb[43].mxu0  ;;  %v4268_v26 = vmul.f32 0.5, %v4148_v33 }
 0x7db   :  { %v4143_v24 = vadd.f32 %v11112_v5, %v4142_v18  ;;  %v4266_v20 = vmul.f32 0.5, %v4140_v6 }
 0x7dc   :  { %v4269_v17 = vmul.f32 0.5, %v4151_v8  ;;  %v11118_v30 = vpack.c.bf16 %v4151_v8, %v4148_v33 }
 0x7dd   :  { %v4267_v32 = vmul.f32 0.5, %v4143_v24  ;;  %v11120_v39 = vpack.c.bf16 %v4143_v24, %v4140_v6 }
 0x7de   :  { %v11122_v42 = vpack.c.bf16 %v4269_v17, %v4268_v26 }
 0x7df   :  { %v11124_v22 = vpack.c.bf16 %v4267_v32, %v4266_v20  ;;  %4303 = vrot.lane.b32.xlu0 %v11120_v39, %s9875_s10 }
 0x7e1   :  { %8919 = vmatprep.mubr.msk.bf16.mxu0 %vm4311_vm0, %v11124_v22 }
 0x7e3   :  { %4305 = vrot.lane.b32.xlu0 %v11118_v30, %s9875_s10 }
 0x7e7   :  { %v8895_v44 = vpop.f32.mrb[44].mxu0 }
 0x7e8   :  { %v4164_v34 = vadd.f32 %v8895_v44, %v11112_v5  ;;  %v4155_v46 = vpop.f32.mrb[45].mxu0 }
 0x7e9   :  { %v4156_v2 = vadd.f32 %v11112_v5, %v4155_v46  ;;  %v8896_v31 = vpop.f32.mrb[46].mxu0 }
 0x7ea   :  { %v4167_v48 = vadd.f32 %v8896_v31, %v11112_v5  ;;  %v4158_v49 = vpop.f32.mrb[47].mxu0  ;;  %v4272_v19 = vmul.f32 0.5, %v4164_v34 }
 0x7eb   :  { %v4159_v29 = vadd.f32 %v11112_v5, %v4158_v49  ;;  %v4270_v36 = vmul.f32 0.5, %v4156_v2 }
 0x7ec   :  { %v4273_v52 = vmul.f32 0.5, %v4167_v48  ;;  %v11136_v62 = vpack.c.bf16 %v4167_v48, %v4164_v34 }
 0x7ed   :  { %v4271_v23 = vmul.f32 0.5, %v4159_v29  ;;  %v11138_v35 = vpack.c.bf16 %v4159_v29, %v4156_v2 }
 0x7ee   :  { %v11140_v27 = vpack.c.bf16 %v4273_v52, %v4272_v19  ;;  %4820 = vrot.lane.b32.xlu1 %v11136_v62, %s9876_s11  ;;  %v4205_v52 = vld [vmem:[%s12555_s12] sm:$0xff] }
 0x7ef   :  { %v11144_v59 = vpack.c.bf16 %v4271_v23, %v4270_v36  ;;  %4307 = vrot.lane.b32.xlu0 %v11138_v35, %s9875_s10 }
 0x7f2   :  { %5326 = vrot.lane.b32.xlu1 %v11140_v27, %s9877_s0 }
 0x7f3   :  { %4309 = vrot.lane.b32.xlu0 %v11136_v62, %s9875_s10 }
 0x7f7   :  { %v8899_v60 = vpop.f32.mrb[48].mxu0 }
 0x7f8   :  { %v4180_v61 = vadd.f32 %v8899_v60, %v11112_v5  ;;  %v4171_v0 = vpop.f32.mrb[49].mxu0 }
 0x7f9   :  { %v4172_v56 = vadd.f32 %v11112_v5, %v4171_v0  ;;  %v8900_v1 = vpop.f32.mrb[50].mxu0 }
 0x7fa   :  { %v4183_v53 = vadd.f32 %v8900_v1, %v11112_v5  ;;  %v4174_v50 = vpop.f32.mrb[51].mxu0  ;;  %v4276_v21 = vmul.f32 0.5, %v4180_v61 }
 0x7fb   :  { %v4175_v54 = vadd.f32 %v11112_v5, %v4174_v50  ;;  %v4274_v3 = vmul.f32 0.5, %v4172_v56 }
 0x7fc   :  { %v4277_v43 = vmul.f32 0.5, %v4183_v53  ;;  %v11156_v45 = vpack.c.bf16 %v4183_v53, %v4180_v61 }
 0x7fd   :  { %v4275_v13 = vmul.f32 0.5, %v4175_v54  ;;  %v11158_v63 = vpack.c.bf16 %v4175_v54, %v4172_v56 }
 0x7fe   :  { %v11160_v57 = vpack.c.bf16 %v4277_v43, %v4276_v21 }
 0x7ff   :  { %v11162_v51 = vpack.c.bf16 %v4275_v13, %v4274_v3  ;;  %4554 = vrot.lane.b32.xlu0 %v11158_v63, %s9875_s10 }
 0x803   :  { %4556 = vrot.lane.b32.xlu0 %v11156_v45, %s9875_s10 }
 0x807   :  { %v8903_v11 = vpop.f32.mrb[52].mxu0 }
 0x808   :  { %v4196_v58 = vadd.f32 %v8903_v11, %v11112_v5  ;;  %v4187_v41 = vpop.f32.mrb[53].mxu0 }
 0x809   :  { %v4188_v12 = vadd.f32 %v11112_v5, %v4187_v41  ;;  %v8904_v40 = vpop.f32.mrb[54].mxu0 }
 0x80a   :  { %v4199_v38 = vadd.f32 %v8904_v40, %v11112_v5  ;;  %v4190_v37 = vpop.f32.mrb[55].mxu0  ;;  %v4280_v47 = vmul.f32 0.5, %v4196_v58 }
 0x80b   :  { %v4191_v15 = vadd.f32 %v11112_v5, %v4190_v37  ;;  %v4278_v9 = vmul.f32 0.5, %v4188_v12 }
 0x80c   :  { %v4281_v14 = vmul.f32 0.5, %v4199_v38  ;;  %v4297_v25 = vpack.c.bf16 %v4199_v38, %v4196_v58 }
 0x80d   :  { %v4279_v28 = vmul.f32 0.5, %v4191_v15  ;;  %v11172_v16 = vpack.c.bf16 %v4191_v15, %v4188_v12 }
 0x80e   :  { %v11174_v4 = vpack.c.bf16 %v4281_v14, %v4280_v47  ;;  %5587 = vrot.lane.b32.xlu1 %v4297_v25, %s9878_s29 }
 0x80f   :  { %v11177_v33 = vpack.c.bf16 %v4279_v28, %v4278_v9  ;;  %4558 = vrot.lane.b32.xlu0 %v11172_v16, %s9875_s10 }
 0x812   :  { %5575 = vrot.lane.b32.xlu1 %v11160_v57, %s9877_s0 }
 0x813   :  { %4560 = vrot.lane.b32.xlu0 %v4297_v25, %s9875_s10 }
 0x816   :  { %5839 = vrot.lane.b32.xlu1 %v11118_v30, %s9879_s6 }
 0x817   :  { %4814 = vrot.lane.b32.xlu0 %v11120_v39, %s9876_s11 }
 0x81a   :  { %5579 = vrot.lane.b32.xlu1 %v11174_v4, %s9877_s0 }
 0x81b   :  { %4816 = vrot.lane.b32.xlu0 %v11118_v30, %s9876_s11 }
 0x81e   :  { %5843 = vrot.lane.b32.xlu1 %v11136_v62, %s9879_s6 }
 0x81f   :  { %4818 = vrot.lane.b32.xlu0 %v11138_v35, %s9876_s11 }
 0x822   :  { %5831 = vrot.lane.b32.xlu1 %v11122_v42, %s9880_s30 }
 0x823   :  { %4806 = vrot.lane.b32.xlu0 %v11124_v22, %s9881_s5 }
 0x826   :  { %6093 = vrot.lane.b32.xlu1 %v11156_v45, %s9879_s6 }
 0x827   :  { %4808 = vrot.lane.b32.xlu0 %v11122_v42, %s9881_s5 }
 0x82a   :  { %5835 = vrot.lane.b32.xlu1 %v11140_v27, %s9880_s30 }
 0x82b   :  { %5072 = vrot.lane.b32.xlu0 %v11158_v63, %s9876_s11 }
 0x82e   :  { %6097 = vrot.lane.b32.xlu1 %v4297_v25, %s9879_s6 }
 0x82f   :  { %5074 = vrot.lane.b32.xlu0 %v11156_v45, %s9876_s11 }
 0x832   :  { %6085 = vrot.lane.b32.xlu1 %v11160_v57, %s9880_s30 }
 0x833   :  { %4810 = vrot.lane.b32.xlu0 %v11144_v59, %s9881_s5 }
 0x836   :  { %6089 = vrot.lane.b32.xlu1 %v11174_v4, %s9880_s30 }
 0x837   :  { %4812 = vrot.lane.b32.xlu0 %v11140_v27, %s9881_s5 }
 0x83b   :  { %5076 = vrot.lane.b32.xlu0 %v11172_v16, %s9876_s11 }
 0x83f   :  { %5078 = vrot.lane.b32.xlu0 %v4297_v25, %s9876_s11 }
 0x843   :  { %5064 = vrot.lane.b32.xlu0 %v11162_v51, %s9881_s5 }
 0x847   :  { %5066 = vrot.lane.b32.xlu0 %v11160_v57, %s9881_s5 }
 0x84b   :  { %5328 = vrot.lane.b32.xlu0 %v11120_v39, %s9878_s29 }
 0x84f   :  { %5330 = vrot.lane.b32.xlu0 %v11118_v30, %s9878_s29 }
 0x851   :  { %v4304_v5 = vpop.permute.xlu0 %4303 }
 0x852   :  { %9450 = vmatprep.subr.msk.bf16.mxu0 %vm4311_vm0, %v4304_v5  ;;  %v4325_v55 = vsel %vm4311_vm0, %v4304_v5, 0 }
 0x853   :  { %8912 = vmatpush3.bf16.xpose.msra.mxu0 %v4325_v55  ;;  %5070 = vrot.lane.b32.xlu0 %v11174_v4, %s9881_s5 }
 0x855   :  { %v4306_v6 = vpop.permute.xlu0 %4305 }
 0x856   :  { %9451 = vmatprep.subr.msk.bf16.mxu0 %vm4311_vm0, %v4306_v6  ;;  %v4328_v10 = vsel %vm4311_vm0, %v4306_v6, 0 }
 0x857   :  { %5068 = vrot.lane.b32.xlu0 %v11177_v33, %s9881_s5 }
 0x85b   :  { %8914 = vmatpush3.bf16.xpose.msra.mxu0 %v4328_v10  ;;  %5332 = vrot.lane.b32.xlu0 %v11138_v35, %s9878_s29 }
 0x85f   :  { %5334 = vrot.lane.b32.xlu0 %v11136_v62, %s9878_s29  ;;  %v11299_v62 = vpop.f32.mrb[76].mxu1 }
 0x860   :  { %v8909_v36 = vpop.f32.mrb[77].mxu1 }
 0x861   :  { %v4308_v8 = vpop.permute.xlu0 %4307  ;;  %v11315_v21 = vpop.f32.mrb[78].mxu1 }
 0x862   :  { %9452 = vmatprep.subr.msk.bf16.mxu0 %vm4311_vm0, %v4308_v8  ;;  %v4331_v18 = vsel %vm4311_vm0, %v4308_v8, 0  ;;  %12609 = vst [vmem:[#allocation14_spill] sm:$0xff] %v11315_v21 }
 0x863   :  { %8916 = vmatpush3.bf16.xpose.msra.mxu0 %v4331_v18  ;;  %5320 = vrot.lane.b32.xlu0 %v11124_v22, %s9877_s0 }
 0x865   :  { %v4310_v24 = vpop.permute.xlu0 %4309 }
 0x866   :  { %9453 = vmatprep.subr.msk.bf16.mxu0 %vm4311_vm0, %v4310_v24  ;;  %v4334_v26 = vsel %vm4311_vm0, %v4310_v24, 0 }
 0x867   :  { %5322 = vrot.lane.b32.xlu0 %v11122_v42, %s9877_s0 }
 0x86b   :  { %8918 = vmatpush3.bf16.xpose.msra.mxu0 %v4334_v26  ;;  %5581 = vrot.lane.b32.xlu0 %v11158_v63, %s9878_s29 }
 0x86f   :  { %5583 = vrot.lane.b32.xlu0 %v11156_v45, %s9878_s29  ;;  %v8910_v45 = vpop.f32.mrb[79].mxu1 }
 0x871   :  { %v4555_v17 = vpop.permute.xlu0 %4554 }
 0x872   :  { %8920 = vmatmul.mubr.msk.bf16.vlgmr.msra.gmra.mrb[56].mxu0 %vm4311_vm0, %v11122_v42  ;;  %9454 = vmatprep.subr.msk.bf16.mxu0 %vm4311_vm0, %v4555_v17  ;;  %v4575_v30 = vsel %vm4311_vm0, %v4555_v17, 0 }
 0x873   :  { %8923 = vmatprep.mubr.msk.bf16.mxu0 %vm4311_vm0, %v11144_v59  ;;  %8940 = vmatpush3.bf16.xpose.msra.mxu0 %v4575_v30 }
 0x874   :  { %5324 = vrot.lane.b32.xlu0 %v11144_v59, %s9877_s0 }
 0x875   :  { %v4557_v20 = vpop.permute.xlu0 %4556 }
 0x876   :  { %9455 = vmatprep.subr.msk.bf16.mxu0 %vm4311_vm0, %v4557_v20  ;;  %v4578_v32 = vsel %vm4311_vm0, %v4557_v20, 0 }
 0x878   :  { %5585 = vrot.lane.b32.xlu0 %v11172_v16, %s9878_s29 }
 0x87a   :  { %8924 = vmatmul.mubr.msk.bf16.gmra.mrb[60].mxu0 %vm4311_vm0, %v11140_v27  ;;  %v4821_v27 = vpop.permute.xlu1 %4820 }
 0x87b   :  { %8942 = vmatpush3.bf16.xpose.msra.mxu0 %v4578_v32  ;;  %8947 = vmatprep.mubr.msk.bf16.mxu0 %vm4311_vm0, %v11162_v51  ;;  %v4844_v61 = vsel %vm4311_vm0, %v4821_v27, 0 }
 0x87c   :  { %5573 = vrot.lane.b32.xlu0 %v11162_v51, %s9877_s0 }
 0x87e   :  { %v5327_v5 = vpop.permute.xlu1 %5326 }
 0x880   :  { %5837 = vrot.lane.b32.xlu0 %v11120_v39, %s9879_s6 }
 0x881   :  { %v4559_v42 = vpop.permute.xlu0 %4558 }
 0x882   :  { %9456 = vmatprep.subr.msk.bf16.mxu0 %vm4311_vm0, %v4559_v42  ;;  %v4581_v44 = vsel %vm4311_vm0, %v4559_v42, 0  ;;  %v5588_v8 = vpop.permute.xlu1 %5587 }
 0x883   :  { %8944 = vmatpush3.bf16.xpose.msra.mxu0 %v4581_v44  ;;  %v5611_v26 = vsel %vm4311_vm0, %v5588_v8, 0 }
 0x884   :  { %5577 = vrot.lane.b32.xlu0 %v11177_v33, %s9877_s0 }
 0x885   :  { %v4561_v34 = vpop.permute.xlu0 %4560 }
 0x886   :  { %9457 = vmatprep.subr.msk.bf16.mxu0 %vm4311_vm0, %v4561_v34  ;;  %v4584_v2 = vsel %vm4311_vm0, %v4561_v34, 0  ;;  %v5576_v17 = vpop.permute.xlu1 %5575 }
 0x888   :  { %5841 = vrot.lane.b32.xlu0 %v11138_v35, %s9879_s6 }
 0x889   :  { %v4815_v46 = vpop.permute.xlu0 %4814 }
 0x88a   :  { %v4835_v48 = vsel %vm4311_vm0, %v4815_v46, 0  ;;  %v5840_v32 = vpop.permute.xlu1 %5839 }
 0x88b   :  { %8946 = vmatpush3.bf16.xpose.msra.mxu0 %v4584_v2  ;;  %v5861_v34 = vsel %vm4311_vm0, %v5840_v32, 0 }
 0x88c   :  { %5829 = vrot.lane.b32.xlu0 %v11124_v22, %s9880_s30  ;;  %9458 = vmatprep.subr.msk.bf16.mxu0 %vm4311_vm0, %v4815_v46 }
 0x88d   :  { %v4817_v39 = vpop.permute.xlu0 %4816 }
 0x88e   :  { %v4838_v29 = vsel %vm4311_vm0, %v4817_v39, 0  ;;  %v5580_v44 = vpop.permute.xlu1 %5579 }
 0x890   :  { %6091 = vrot.lane.b32.xlu0 %v11158_v63, %s9879_s6 }
 0x891   :  { %v4819_v31 = vpop.permute.xlu0 %4818 }
 0x892   :  { %8948 = vmatmul.mubr.msk.bf16.vlgmr.msra.gmra.mrb[64].mxu0 %vm4311_vm0, %v11160_v57  ;;  %v4841_v35 = vsel %vm4311_vm0, %v4819_v31, 0 }
 0x893   :  { %8968 = vmatpush3.bf16.xpose.msra.mxu0 %v4835_v48  ;;  %8951 = vmatprep.mubr.msk.bf16.mxu0 %vm4311_vm0, %v11177_v33 }
 0x894   :  { %5833 = vrot.lane.b32.xlu0 %v11144_v59, %s9880_s30  ;;  %9459 = vmatprep.subr.msk.bf16.mxu0 %vm4311_vm0, %v4817_v39 }
 0x895   :  { %v4807_v22 = vpop.permute.xlu0 %4806 }
 0x898   :  { %6095 = vrot.lane.b32.xlu0 %v11172_v16, %s9879_s6 }
 0x899   :  { %v4809_v49 = vpop.permute.xlu0 %4808 }
 0x89a   :  { %8952 = vmatmul.mubr.msk.bf16.gmra.mrb[68].mxu0 %vm4311_vm0, %v11174_v4 }
 0x89b   :  { %8970 = vmatpush3.bf16.xpose.msra.mxu0 %v4838_v29  ;;  %8975 = vmatprep.mubr.msk.bf16.mxu0 %vm4311_vm0, %v4807_v22  ;;  %v5844_v22 = vpop.permute.xlu1 %5843 }
 0x89c   :  { %6083 = vrot.lane.b32.xlu0 %v11162_v51, %s9880_s30  ;;  %9460 = vmatprep.subr.msk.bf16.mxu0 %vm4311_vm0, %v4819_v31 }
 0x89d   :  { %v5073_v19 = vpop.permute.xlu0 %5072 }
 0x89e   :  { %v5093_v1 = vsel %vm4311_vm0, %v5073_v19, 0 }
 0x89f   :  { %v5832_v29 = vpop.permute.xlu1 %5831 }
 0x8a0   :  { %4209 = vperm.xlu0 %9494, %v4205_v52  }
 0x8a1   :  { %v5075_v23 = vpop.permute.xlu0 %5074 }
 0x8a2   :  { %v5096_v54 = vsel %vm4311_vm0, %v5075_v23, 0 }
 0x8a3   :  { %8972 = vmatpush3.bf16.xpose.msra.mxu0 %v4841_v35  ;;  %v6094_v52 = vpop.permute.xlu1 %6093 }
 0x8a4   :  { %6087 = vrot.lane.b32.xlu0 %v11177_v33, %s9880_s30  ;;  %9461 = vmatprep.subr.msk.bf16.mxu0 %vm4311_vm0, %v4821_v27  ;;  %v6115_v36 = vsel %vm4311_vm0, %v6094_v52, 0 }
 0x8a5   :  { %v4811_v59 = vpop.permute.xlu0 %4810 }
 0x8a9   :  { %v4813_v60 = vpop.permute.xlu0 %4812 }
 0x8ab   :  { %8974 = vmatpush3.bf16.xpose.msra.mxu0 %v4844_v61 }
 0x8ac   :  { %9462 = vmatprep.subr.msk.bf16.mxu0 %vm4311_vm0, %v5073_v19 }
 0x8ad   :  { %v5077_v0 = vpop.permute.xlu0 %5076 }
 0x8ae   :  { %v5099_v13 = vsel %vm4311_vm0, %v5077_v0, 0 }
 0x8b1   :  { %v5079_v56 = vpop.permute.xlu0 %5078 }
 0x8b2   :  { %8976 = vmatmul.mubr.msk.bf16.vlgmr.msra.gmra.mrb[72].mxu0 %vm4311_vm0, %v4809_v49  ;;  %v5102_v51 = vsel %vm4311_vm0, %v5079_v56, 0  ;;  %v5867_v49 = vsel %vm4311_vm0, %v5844_v22, 0 }
 0x8b3   :  { %8979 = vmatprep.mubr.msk.bf16.mxu0 %vm4311_vm0, %v4811_v59  ;;  %8996 = vmatpush3.bf16.xpose.msra.mxu0 %v5093_v1 }
 0x8b4   :  { %9463 = vmatprep.subr.msk.bf16.mxu0 %vm4311_vm0, %v5075_v23 }
 0x8b5   :  { %v5065_v53 = vpop.permute.xlu0 %5064 }
 0x8b9   :  { %v5067_v50 = vpop.permute.xlu0 %5066 }
 0x8ba   :  { %8980 = vmatmul.mubr.msk.bf16.gmra.mrb[76].mxu0 %vm4311_vm0, %v4813_v60 }
 0x8bb   :  { %8998 = vmatpush3.bf16.xpose.msra.mxu0 %v5096_v54  ;;  %9003 = vmatprep.mubr.msk.bf16.mxu0 %vm4311_vm0, %v5065_v53 }
 0x8bc   :  { %9464 = vmatprep.subr.msk.bf16.mxu0 %vm4311_vm0, %v5077_v0 }
 0x8bd   :  { %v5329_v43 = vpop.permute.xlu0 %5328 }
 0x8be   :  { %v5349_v41 = vsel %vm4311_vm0, %v5329_v43, 0 }
 0x8c1   :  { %v5331_v3 = vpop.permute.xlu0 %5330 }
 0x8c2   :  { %v5352_v38 = vsel %vm4311_vm0, %v5331_v3, 0 }
 0x8c3   :  { %9000 = vmatpush3.bf16.xpose.msra.mxu0 %v5099_v13 }
 0x8c4   :  { %9465 = vmatprep.subr.msk.bf16.mxu0 %vm4311_vm0, %v5079_v56 }
 0x8c5   :  { %v5071_v63 = vpop.permute.xlu0 %5070 }
 0x8c9   :  { %v5069_v57 = vpop.permute.xlu0 %5068 }
 0x8cb   :  { %9002 = vmatpush3.bf16.xpose.msra.mxu0 %v5102_v51 }
 0x8cc   :  { %9466 = vmatprep.subr.msk.bf16.mxu0 %vm4311_vm0, %v5329_v43 }
 0x8cd   :  { %v5333_v11 = vpop.permute.xlu0 %5332 }
 0x8ce   :  { %v5355_v47 = vsel %vm4311_vm0, %v5333_v11, 0 }
 0x8d1   :  { %v5335_v58 = vpop.permute.xlu0 %5334 }
 0x8d2   :  { %9004 = vmatmul.mubr.msk.bf16.vlgmr.msra.gmra.mrb[80].mxu0 %vm4311_vm0, %v5067_v50  ;;  %v5358_v9 = vsel %vm4311_vm0, %v5335_v58, 0 }
 0x8d3   :  { %9007 = vmatprep.mubr.msk.bf16.mxu0 %vm4311_vm0, %v5069_v57  ;;  %9024 = vmatpush3.bf16.xpose.msra.mxu0 %v5349_v41 }
 0x8d4   :  { %9467 = vmatprep.subr.msk.bf16.mxu0 %vm4311_vm0, %v5331_v3 }
 0x8d5   :  { %v5321_v12 = vpop.permute.xlu0 %5320 }
 0x8d9   :  { %v5323_v40 = vpop.permute.xlu0 %5322 }
 0x8da   :  { %9008 = vmatmul.mubr.msk.bf16.gmra.mrb[84].mxu0 %vm4311_vm0, %v5071_v63 }
 0x8db   :  { %9026 = vmatpush3.bf16.xpose.msra.mxu0 %v5352_v38  ;;  %9031 = vmatprep.mubr.msk.bf16.mxu0 %vm4311_vm0, %v5321_v12 }
 0x8dc   :  { %9468 = vmatprep.subr.msk.bf16.mxu0 %vm4311_vm0, %v5333_v11 }
 0x8dd   :  { %v5582_v37 = vpop.permute.xlu0 %5581 }
 0x8de   :  { %v5602_v4 = vsel %vm4311_vm0, %v5582_v37, 0 }
 0x8e1   :  { %v5584_v15 = vpop.permute.xlu0 %5583 }
 0x8e2   :  { %v5605_v55 = vsel %vm4311_vm0, %v5584_v15, 0 }
 0x8e3   :  { %9028 = vmatpush3.bf16.xpose.msra.mxu0 %v5355_v47 }
 0x8e4   :  { %9469 = vmatprep.subr.msk.bf16.mxu0 %vm4311_vm0, %v5335_v58 }
 0x8e6   :  { %v5325_v14 = vpop.permute.xlu0 %5324 }
 0x8ea   :  { %v5586_v25 = vpop.permute.xlu0 %5585 }
 0x8eb   :  { %9030 = vmatpush3.bf16.xpose.msra.mxu0 %v5358_v9  ;;  %v5608_v10 = vsel %vm4311_vm0, %v5586_v25, 0 }
 0x8ec   :  { %9470 = vmatprep.subr.msk.bf16.mxu0 %vm4311_vm0, %v5582_v37 }
 0x8ee   :  { %v5574_v28 = vpop.permute.xlu0 %5573 }
 0x8f2   :  { %v5838_v16 = vpop.permute.xlu0 %5837  ;;  %9032 = vmatmul.mubr.msk.bf16.vlgmr.msra.gmra.mrb[88].mxu0 %vm4311_vm0, %v5323_v40 }
 0x8f3   :  { %9035 = vmatprep.mubr.msk.bf16.mxu0 %vm4311_vm0, %v5325_v14  ;;  %9052 = vmatpush3.bf16.xpose.msra.mxu0 %v5602_v4  ;;  %v5858_v20 = vsel %vm4311_vm0, %v5838_v16, 0 }
 0x8f4   :  { %9471 = vmatprep.subr.msk.bf16.mxu0 %vm4311_vm0, %v5584_v15 }
 0x8f6   :  { %v5578_v33 = vpop.permute.xlu0 %5577 }
 0x8fa   :  { %9036 = vmatmul.mubr.msk.bf16.gmra.mrb[92].mxu0 %vm4311_vm0, %v5327_v5  ;;  %v5842_v6 = vpop.permute.xlu0 %5841 }
 0x8fb   :  { %9054 = vmatpush3.bf16.xpose.msra.mxu0 %v5605_v55  ;;  %9059 = vmatprep.mubr.msk.bf16.mxu0 %vm4311_vm0, %v5574_v28  ;;  %v5864_v48 = vsel %vm4311_vm0, %v5842_v6, 0 }
 0x8fc   :  { %9472 = vmatprep.subr.msk.bf16.mxu0 %vm4311_vm0, %v5586_v25 }
 0x8fe   :  { %v5830_v18 = vpop.permute.xlu0 %5829 }
 0x902   :  { %v6092_v24 = vpop.permute.xlu0 %6091 }
 0x903   :  { %9056 = vmatpush3.bf16.xpose.msra.mxu0 %v5608_v10  ;;  %v6112_v19 = vsel %vm4311_vm0, %v6092_v24, 0 }
 0x904   :  { %9473 = vmatprep.subr.msk.bf16.mxu0 %vm4311_vm0, %v5588_v8 }
 0x906   :  { %v5834_v30 = vpop.permute.xlu0 %5833 }
 0x90a   :  { %v6096_v42 = vpop.permute.xlu0 %6095 }
 0x90b   :  { %9058 = vmatpush3.bf16.xpose.msra.mxu0 %v5611_v26  ;;  %v6118_v23 = vsel %vm4311_vm0, %v6096_v42, 0 }
 0x90c   :  { %9474 = vmatprep.subr.msk.bf16.mxu0 %vm4311_vm0, %v5838_v16 }
 0x90e   :  { %v6084_v46 = vpop.permute.xlu0 %6083 }
 0x912   :  { %9060 = vmatmul.mubr.msk.bf16.vlgmr.msra.gmra.mrb[96].mxu0 %vm4311_vm0, %v5576_v17 }
 0x913   :  { %9063 = vmatprep.mubr.msk.bf16.mxu0 %vm4311_vm0, %v5578_v33  ;;  %9080 = vmatpush3.bf16.xpose.msra.mxu0 %v5858_v20 }
 0x914   :  { %9475 = vmatprep.subr.msk.bf16.mxu0 %vm4311_vm0, %v5840_v32 }
 0x91a   :  { %9064 = vmatmul.mubr.msk.bf16.gmra.mrb[100].mxu0 %vm4311_vm0, %v5580_v44 }
 0x91b   :  { %9082 = vmatpush3.bf16.xpose.msra.mxu0 %v5861_v34  ;;  %9087 = vmatprep.mubr.msk.bf16.mxu0 %vm4311_vm0, %v5830_v18 }
 0x91c   :  { %9476 = vmatprep.subr.msk.bf16.mxu0 %vm4311_vm0, %v5842_v6 }
 0x91f   :  { %v4210_v2 = vpop.permute.xlu0 %4209 }
 0x920   :  { %v4260_v39 = vadd.f32 %v11299_v62, %v4210_v2  ;;  %v5836_v62 = vpop.permute.xlu1 %5835 }
 0x922   :  { %v11354_v31 = vpack.c.bf16 %v4260_v39, %v4260_v39 }
 0x923   :  { %9084 = vmatpush3.bf16.xpose.msra.mxu0 %v5864_v48  ;;  %v6088_v57 = vpop.permute.xlu0 %6087 }
 0x924   :  { %4744 = vrot.lane.b32.xlu1 %v11354_v31, %s9874_s25  ;;  %9477 = vmatprep.subr.msk.bf16.mxu0 %vm4311_vm0, %v5844_v22  ;;  %v6098_v35 = vpop.permute.xlu1 %6097 }
 0x925   :  { %v6121_v53 = vsel %vm4311_vm0, %v6098_v35, 0 }
 0x928   :  { %v6086_v63 = vpop.permute.xlu1 %6085 }
 0x92b   :  { %9086 = vmatpush3.bf16.xpose.msra.mxu0 %v5867_v49 }
 0x92c   :  { %9478 = vmatprep.subr.msk.bf16.mxu0 %vm4311_vm0, %v6092_v24  ;;  %v6090_v41 = vpop.permute.xlu1 %6089 }
 0x932   :  { %9088 = vmatmul.mubr.msk.bf16.vlgmr.msra.gmra.mrb[104].mxu0 %vm4311_vm0, %v5832_v29 }
 0x933   :  { %9091 = vmatprep.mubr.msk.bf16.mxu0 %vm4311_vm0, %v5834_v30  ;;  %9108 = vmatpush3.bf16.xpose.msra.mxu0 %v6112_v19 }
 0x934   :  { %9479 = vmatprep.subr.msk.bf16.mxu0 %vm4311_vm0, %v6094_v52 }
 0x93a   :  { %9092 = vmatmul.mubr.msk.bf16.gmra.mrb[108].mxu0 %vm4311_vm0, %v5836_v62 }
 0x93b   :  { %9110 = vmatpush3.bf16.xpose.msra.mxu0 %v6115_v36  ;;  %9115 = vmatprep.mubr.msk.bf16.mxu0 %vm4311_vm0, %v6084_v46 }
 0x93c   :  { %9480 = vmatprep.subr.msk.bf16.mxu0 %vm4311_vm0, %v6096_v42 }
 0x943   :  { %9112 = vmatpush3.bf16.xpose.msra.mxu0 %v6118_v23 }
 0x944   :  { %9481 = vmatprep.subr.msk.bf16.mxu0 %vm4311_vm0, %v6098_v35 }
 0x945   :  { %v11372_v27 = vpop.f32.mrb[56].mxu0 }
 0x946   :  { %v11374_v59 = vpop.f32.mrb[57].mxu0  ;;  %v4407_v60 = vsel %vm3986_vm14, %v11372_v27, -inf }
 0x947   :  { %v11378_v61 = vpop.f32.mrb[58].mxu0  ;;  %4408 = vmax.xlane.f32.xlu0 %v4407_v60  ;;  %v4401_v1 = vsel %vm3986_vm14, %v11374_v59, -inf }
 0x948   :  { %v11380_v0 = vpop.f32.mrb[59].mxu0  ;;  %v4410_v43 = vsel %vm3986_vm14, %v11378_v61, -inf }
 0x949   :  { %v4404_v56 = vsel %vm3986_vm14, %v11380_v0, -inf }
 0x94a   :  { %4405 = vmax.xlane.f32.xlu1 %v4404_v56 }
 0x94b   :  { %4402 = vmax.xlane.f32.xlu0 %v4401_v1  ;;  %9114 = vmatpush3.bf16.xpose.msra.mxu0 %v6121_v53 }
 0x94c   :  { %9135 = vmatprep.subr.bf16.mxu0 %v12570_v7 }
 0x94d   :  { %v11388_v50 = vpop.f32.mrb[60].mxu0 }
 0x94e   :  { %v11390_v54 = vpop.f32.mrb[61].mxu0  ;;  %v4419_v51 = vsel %vm3986_vm14, %v11388_v50, -inf }
 0x94f   :  { %v11394_v45 = vpop.f32.mrb[62].mxu0  ;;  %4411 = vmax.xlane.f32.xlu0 %v4410_v43  ;;  %v4413_v58 = vsel %vm3986_vm14, %v11390_v54, -inf }
 0x950   :  { %v11396_v3 = vpop.f32.mrb[63].mxu0  ;;  %v4422_v13 = vsel %vm3986_vm14, %v11394_v45, -inf }
 0x951   :  { %4423 = vmax.xlane.f32.xlu1 %v4422_v13  ;;  %v4416_v11 = vsel %vm3986_vm14, %v11396_v3, -inf }
 0x952   :  { %9116 = vmatmul.mubr.msk.bf16.vlgmr.msra.gmra.mrb[112].mxu0 %vm4311_vm0, %v6086_v63 }
 0x953   :  { %4420 = vmax.xlane.f32.xlu0 %v4419_v51  ;;  %9119 = vmatprep.mubr.msk.bf16.mxu0 %vm4311_vm0, %v6088_v57 }
 0x955   :  { %4417 = vmax.xlane.f32.xlu1 %v4416_v11 }
 0x957   :  { %4414 = vmax.xlane.f32.xlu0 %v4413_v58 }
 0x95a   :  { %9120 = vmatmul.mubr.msk.bf16.gmra.mrb[116].mxu0 %vm4311_vm0, %v6090_v41 }
 0x95b   :  { %9137 = vmatprep.mubr.msk.bf16.mxu0 %vm9873_vm11, %v12570_v7 }
 0x965   :  { %v11411_v12 = vpop.f32.mrb[64].mxu0 }
 0x966   :  { %v11413_v40 = vpop.f32.mrb[65].mxu0  ;;  %v4657_v38 = vsel %vm3986_vm14, %v11411_v12, -inf }
 0x967   :  { %v11417_v37 = vpop.f32.mrb[66].mxu0  ;;  %4658 = vmax.xlane.f32.xlu0 %v4657_v38  ;;  %v4651_v14 = vsel %vm3986_vm14, %v11413_v40, -inf }
 0x968   :  { %v11419_v15 = vpop.f32.mrb[67].mxu0  ;;  %v4660_v47 = vsel %vm3986_vm14, %v11417_v37, -inf }
 0x969   :  { %4661 = vmax.xlane.f32.xlu1 %v4660_v47  ;;  %v4654_v25 = vsel %vm3986_vm14, %v11419_v15, -inf }
 0x96b   :  { %4652 = vmax.xlane.f32.xlu0 %v4651_v14 }
 0x96d   :  { %v11427_v9 = vpop.f32.mrb[68].mxu0  ;;  %4655 = vmax.xlane.f32.xlu1 %v4654_v25 }
 0x96e   :  { %v11429_v28 = vpop.f32.mrb[69].mxu0  ;;  %v4669_v16 = vsel %vm3986_vm14, %v11427_v9, -inf }
 0x96f   :  { %4670 = vmax.xlane.f32.xlu0 %v4669_v16  ;;  %v11433_v4 = vpop.f32.mrb[70].mxu0  ;;  %v4663_v55 = vsel %vm3986_vm14, %v11429_v28, -inf }
 0x970   :  { %v11435_v33 = vpop.f32.mrb[71].mxu0  ;;  %v4672_v5 = vsel %vm3986_vm14, %v11433_v4, -inf }
 0x971   :  { %4673 = vmax.xlane.f32.xlu1 %v4672_v5  ;;  %v4666_v6 = vsel %vm3986_vm14, %v11435_v33, -inf }
 0x973   :  { %4664 = vmax.xlane.f32.xlu0 %v4663_v55 }
 0x975   :  { %4667 = vmax.xlane.f32.xlu1 %v4666_v6 }
 0x985   :  { %v11443_v10 = vpop.f32.mrb[72].mxu0 }
 0x986   :  { %v11445_v8 = vpop.f32.mrb[73].mxu0  ;;  %v4917_v18 = vsel %vm3986_vm14, %v11443_v10, -inf }
 0x987   :  { %4918 = vmax.xlane.f32.xlu0 %v4917_v18  ;;  %v11449_v24 = vpop.f32.mrb[74].mxu0  ;;  %v4911_v30 = vsel %vm3986_vm14, %v11445_v8, -inf }
 0x988   :  { %v11451_v26 = vpop.f32.mrb[75].mxu0  ;;  %v4920_v17 = vsel %vm3986_vm14, %v11449_v24, -inf }
 0x989   :  { %4921 = vmax.xlane.f32.xlu1 %v4920_v17  ;;  %v4914_v20 = vsel %vm3986_vm14, %v11451_v26, -inf }
 0x98b   :  { %4912 = vmax.xlane.f32.xlu0 %v4911_v30 }
 0x98d   :  { %v11459_v32 = vpop.f32.mrb[76].mxu0  ;;  %4915 = vmax.xlane.f32.xlu1 %v4914_v20 }
 0x98e   :  { %v11461_v42 = vpop.f32.mrb[77].mxu0  ;;  %v4929_v44 = vsel %vm3986_vm14, %v11459_v32, -inf }
 0x98f   :  { %4930 = vmax.xlane.f32.xlu0 %v4929_v44  ;;  %v11465_v34 = vpop.f32.mrb[78].mxu0  ;;  %v4923_v39 = vsel %vm3986_vm14, %v11461_v42, -inf }
 0x990   :  { %v11467_v46 = vpop.f32.mrb[79].mxu0  ;;  %v4932_v2 = vsel %vm3986_vm14, %v11465_v34, -inf }
 0x991   :  { %4933 = vmax.xlane.f32.xlu1 %v4932_v2  ;;  %v4926_v48 = vsel %vm3986_vm14, %v11467_v46, -inf }
 0x993   :  { %4924 = vmax.xlane.f32.xlu0 %v4923_v39 }
 0x995   :  { %4927 = vmax.xlane.f32.xlu1 %v4926_v48 }
 0x996   :  { %v11540_v2 = vpop.permute.xlu1 %4744 }
 0x997   :  { %12610 = vst [vmem:[#allocation15_spill] sm:$0xff] %v11540_v2 }
 0x9a5   :  { %v11475_v22 = vpop.f32.mrb[80].mxu0 }
 0x9a6   :  { %v11477_v49 = vpop.f32.mrb[81].mxu0  ;;  %v5175_v29 = vsel %vm3986_vm14, %v11475_v22, -inf }
 0x9a7   :  { %5176 = vmax.xlane.f32.xlu0 %v5175_v29  ;;  %v11481_v19 = vpop.f32.mrb[82].mxu0  ;;  %v5169_v36 = vsel %vm3986_vm14, %v11477_v49, -inf }
 0x9a8   :  { %v11483_v52 = vpop.f32.mrb[83].mxu0  ;;  %v5178_v62 = vsel %vm3986_vm14, %v11481_v19, -inf }
 0x9a9   :  { %5179 = vmax.xlane.f32.xlu1 %v5178_v62  ;;  %v5172_v23 = vsel %vm3986_vm14, %v11483_v52, -inf }
 0x9ab   :  { %5170 = vmax.xlane.f32.xlu0 %v5169_v36 }
 0x9ad   :  { %v11491_v35 = vpop.f32.mrb[84].mxu0  ;;  %5173 = vmax.xlane.f32.xlu1 %v5172_v23 }
 0x9ae   :  { %v11493_v60 = vpop.f32.mrb[85].mxu0  ;;  %v5187_v43 = vsel %vm3986_vm14, %v11491_v35, -inf }
 0x9af   :  { %v11495_v56 = vpop.f32.mrb[86].mxu0  ;;  %v5181_v1 = vsel %vm3986_vm14, %v11493_v60, -inf }
 0x9b0   :  { %5182 = vmax.xlane.f32.xlu0 %v5181_v1  ;;  %v11499_v53 = vpop.f32.mrb[87].mxu0  ;;  %v5190_v13 = vsel %vm3986_vm14, %v11495_v56, -inf }
 0x9b1   :  { %5188 = vmax.xlane.f32.xlu1 %v5187_v43  ;;  %v5184_v63 = vsel %vm3986_vm14, %v11499_v53, -inf }
 0x9b5   :  { %5191 = vmax.xlane.f32.xlu1 %v5190_v13 }
 0x9b9   :  { %5185 = vmax.xlane.f32.xlu1 %v5184_v63 }
 0x9c5   :  { %v11507_v57 = vpop.f32.mrb[88].mxu0 }
 0x9c6   :  { %v11509_v51 = vpop.f32.mrb[89].mxu0  ;;  %v5431_v11 = vsel %vm3986_vm14, %v11507_v57, -inf }
 0x9c7   :  { %v11513_v58 = vpop.f32.mrb[90].mxu0  ;;  %5432 = vmax.xlane.f32.xlu1 %v5431_v11  ;;  %v5425_v41 = vsel %vm3986_vm14, %v11509_v51, -inf }
 0x9c8   :  { %5426 = vmax.xlane.f32.xlu0 %v5425_v41  ;;  %v11517_v38 = vpop.f32.mrb[91].mxu0  ;;  %v5434_v47 = vsel %vm3986_vm14, %v11513_v58, -inf }
 0x9c9   :  { %v5428_v16 = vsel %vm3986_vm14, %v11517_v38, -inf }
 0x9cb   :  { %5435 = vmax.xlane.f32.xlu1 %v5434_v47 }
 0x9cd   :  { %v11521_v14 = vpop.f32.mrb[92].mxu0 }
 0x9ce   :  { %v11523_v25 = vpop.f32.mrb[93].mxu0  ;;  %v5443_v18 = vsel %vm3986_vm14, %v11521_v14, -inf }
 0x9cf   :  { %v11527_v5 = vpop.f32.mrb[94].mxu0  ;;  %5429 = vmax.xlane.f32.xlu1 %v5428_v16  ;;  %v5437_v44 = vsel %vm3986_vm14, %v11523_v25, -inf }
 0x9d0   :  { %v11529_v55 = vpop.f32.mrb[95].mxu0  ;;  %v5446_v6 = vsel %vm3986_vm14, %v11527_v5, -inf }
 0x9d1   :  { %5447 = vmax.xlane.f32.xlu0 %v5446_v6  ;;  %v5440_v30 = vsel %vm3986_vm14, %v11529_v55, -inf }
 0x9d3   :  { %5444 = vmax.xlane.f32.xlu1 %v5443_v18 }
 0x9d4   :  { %v4409_v17 = vpop.xlane.xlu0 %4408 }
 0x9d5   :  { %v4427_v20 = vsub.f32 %v11372_v27, %v4409_v17  ;;  %5441 = vmax.xlane.f32.xlu0 %v5440_v30 }
 0x9d7   :  { %v4437_v39 = vmul.f32 1.442695, %v4427_v20  ;;  %5438 = vmax.xlane.f32.xlu1 %v5437_v44  ;;  %v4406_v62 = vpop.xlane.xlu1 %4405 }
 0x9d8   :  { %v4403_v48 = vpop.xlane.xlu0 %4402  ;;  %v4426_v27 = vsub.f32 %v11380_v0, %v4406_v62 }
 0x9d9   :  { %9579 = vpow2.f32 %v4437_v39  ;;  %v4425_v29 = vsub.f32 %v11374_v59, %v4403_v48 }
 0x9da   :  { %v4435_v11 = vmul.f32 1.442695, %v4426_v27 }
 0x9db   :  { %v4433_v36 = vmul.f32 1.442695, %v4425_v29 }
 0x9dc   :  { %v4412_v23 = vpop.xlane.xlu0 %4411 }
 0x9dd   :  { %9581 = vpow2.f32 %v4433_v36  ;;  %v4428_v1 = vsub.f32 %v11378_v61, %v4412_v23 }
 0x9de   :  { %v4424_v41 = vpop.xlane.xlu1 %4423 }
 0x9df   :  { %v4439_v43 = vmul.f32 1.442695, %v4428_v1 }
 0x9e0   :  { %v4421_v13 = vpop.xlane.xlu0 %4420 }
 0x9e1   :  { %9583 = vpow2.f32 %v4439_v43  ;;  %v4431_v63 = vsub.f32 %v11388_v50, %v4421_v13  ;;  %v4432_v50 = vsub.f32 %v11394_v45, %v4424_v41 }
 0x9e2   :  { %9585 = vpow2.f32 %v4435_v11  ;;  %v4418_v44 = vpop.xlane.xlu1 %4417 }
 0x9e3   :  { %v11546_v47 = vpop.eup %9579  ;;  %v4445_v16 = vmul.f32 1.442695, %v4431_v63  ;;  %v4447_v29 = vmul.f32 1.442695, %v4432_v50  ;;  %v4430_v62 = vsub.f32 %v11396_v3, %v4418_v44 }
 0x9e4   :  { %v4415_v6 = vpop.xlane.xlu0 %4414  ;;  %v4455_v59 = vsel %vm3986_vm14, %v11546_v47, 0.0 }
 0x9e5   :  { %v4429_v18 = vsub.f32 %v11390_v54, %v4415_v6  ;;  %4456 = vadd.xlane.f32.xlu0 %v4455_v59  ;;  %v11551_v61 = vpop.f32.mrb[96].mxu0  ;;  %9587 = vpow2.f32 %v4445_v16  ;;  %v4443_v27 = vmul.f32 1.442695, %v4430_v62 }
 0x9e6   :  { %v11553_v0 = vpop.f32.mrb[97].mxu0  ;;  %v5684_v11 = vsel %vm3986_vm14, %v11551_v61, -inf }
 0x9e7   :  { %v11555_v17 = vpop.eup %9581  ;;  %v4441_v30 = vmul.f32 1.442695, %v4429_v18  ;;  %v11558_v20 = vpop.f32.mrb[98].mxu0  ;;  %v5678_v62 = vsel %vm3986_vm14, %v11553_v0, -inf }
 0x9e8   :  { %v11560_v39 = vpop.f32.mrb[99].mxu0  ;;  %v4449_v54 = vsel %vm3986_vm14, %v11555_v17, 0.0  ;;  %v5687_v45 = vsel %vm3986_vm14, %v11558_v20, -inf }
 0x9e9   :  { %4450 = vadd.xlane.f32.xlu0 %v4449_v54  ;;  %9589 = vpow2.f32 %v4441_v30  ;;  %v5681_v63 = vsel %vm3986_vm14, %v11560_v39, -inf }
 0x9ea   :  { %9591 = vpow2.f32 %v4447_v29 }
 0x9eb   :  { %v11564_v48 = vpop.eup %9583  ;;  %9593 = vpow2.f32 %v4443_v27 }
 0x9ec   :  { %v4458_v36 = vsel %vm3986_vm14, %v11564_v48, 0.0  ;;  %v11577_v13 = vpop.eup %9585 }
 0x9ed   :  { %5688 = vmax.xlane.f32.xlu0 %v5687_v45  ;;  %v11571_v23 = vpop.f32.mrb[100].mxu0  ;;  %4459 = vadd.xlane.f32.xlu1 %v4458_v36  ;;  %v4452_v59 = vsel %vm3986_vm14, %v11577_v13, 0.0 }
 0x9ee   :  { %v11573_v1 = vpop.f32.mrb[101].mxu0 }
 0x9ef   :  { %v11575_v43 = vpop.f32.mrb[102].mxu0  ;;  %v11585_v41 = vpop.eup %9587 }
 0x9f0   :  { %v11579_v3 = vpop.f32.mrb[103].mxu0  ;;  %v4467_v6 = vsel %vm3986_vm14, %v11585_v41, 0.0 }
 0x9f1   :  { %5682 = vmax.xlane.f32.xlu0 %v5681_v63  ;;  %5685 = vmax.xlane.f32.xlu1 %v5684_v11  ;;  %v5696_v11 = vsel %vm3986_vm14, %v11571_v23, -inf }
 0x9f3   :  { %v11591_v18 = vpop.eup %9589 }
 0x9f4   :  { %v4659_v16 = vpop.xlane.xlu0 %4658  ;;  %v4461_v29 = vsel %vm3986_vm14, %v11591_v18, 0.0  ;;  %v11598_v45 = vpop.eup %9591 }
 0x9f5   :  { %v4677_v50 = vsub.f32 %v11411_v12, %v4659_v16  ;;  %4468 = vadd.xlane.f32.xlu0 %v4467_v6  ;;  %4453 = vadd.xlane.f32.xlu1 %v4452_v59  ;;  %v4470_v16 = vsel %vm3986_vm14, %v11598_v45, 0.0  ;;  %v11606_v6 = vpop.eup %9593 }
 0x9f6   :  { %v4662_v30 = vpop.xlane.xlu1 %4661 }
 0x9f7   :  { %v4687_v44 = vmul.f32 1.442695, %v4677_v50  ;;  %v4678_v12 = vsub.f32 %v11417_v37, %v4662_v30  ;;  %v5699_v37 = vsel %vm3986_vm14, %v11575_v43, -inf  ;;  %v4464_v30 = vsel %vm3986_vm14, %v11606_v6, 0.0 }
 0x9f8   :  { %v4653_v54 = vpop.xlane.xlu0 %4652 }
 0x9f9   :  { %v4675_v36 = vsub.f32 %v11413_v40, %v4653_v54  ;;  %4462 = vadd.xlane.f32.xlu0 %v4461_v29  ;;  %5679 = vmax.xlane.f32.xlu1 %v5678_v62  ;;  %9595 = vpow2.f32 %v4687_v44  ;;  %v4689_v50 = vmul.f32 1.442695, %v4678_v12  ;;  %v5693_v62 = vsel %vm3986_vm14, %v11579_v3, -inf }
 0x9fa   :  { %v4656_v63 = vpop.xlane.xlu1 %4655 }
 0x9fb   :  { %v4683_v27 = vmul.f32 1.442695, %v4675_v36  ;;  %v4676_v40 = vsub.f32 %v11419_v15, %v4656_v63  ;;  %v5690_v36 = vsel %vm3986_vm14, %v11573_v1, -inf }
 0x9fc   :  { %v4671_v59 = vpop.xlane.xlu0 %4670 }
 0x9fd   :  { %5697 = vmax.xlane.f32.xlu0 %v5696_v11  ;;  %4471 = vadd.xlane.f32.xlu1 %v4470_v16  ;;  %9597 = vpow2.f32 %v4683_v27  ;;  %v4685_v44 = vmul.f32 1.442695, %v4676_v40  ;;  %v4681_v54 = vsub.f32 %v11427_v9, %v4671_v59 }
 0x9fe   :  { %9599 = vpow2.f32 %v4689_v50  ;;  %v4674_v27 = vpop.xlane.xlu1 %4673 }
 0x9ff   :  { %9601 = vpow2.f32 %v4685_v44  ;;  %v4695_v11 = vmul.f32 1.442695, %v4681_v54 }
 0xa00   :  { %v4665_v29 = vpop.xlane.xlu0 %4664 }
 0xa01   :  { %5700 = vmax.xlane.f32.xlu0 %v5699_v37  ;;  %4465 = vadd.xlane.f32.xlu1 %v4464_v30  ;;  %v4679_v9 = vsub.f32 %v11429_v28, %v4665_v29  ;;  %9603 = vpow2.f32 %v4695_v11  ;;  %v4682_v30 = vsub.f32 %v11433_v4, %v4674_v27 }
 0xa02   :  { %v4668_v54 = vpop.xlane.xlu1 %4667 }
 0xa03   :  { %v11618_v15 = vpop.eup %9595  ;;  %v4691_v44 = vmul.f32 1.442695, %v4679_v9  ;;  %v4680_v4 = vsub.f32 %v11435_v33, %v4668_v54 }
 0xa04   :  { %12611 = vst [vmem:[#allocation16_spill] sm:$0xff] %v11618_v15  ;;  %v4705_v40 = vsel %vm3986_vm14, %v11618_v15, 0.0 }
 0xa05   :  { %5694 = vmax.xlane.f32.xlu0 %v5693_v62  ;;  %v11620_v12 = vpop.f32.mrb[104].mxu0  ;;  %5691 = vmax.xlane.f32.xlu1 %v5690_v36  ;;  %9605 = vpow2.f32 %v4691_v44 }
 0xa06   :  { %v11622_v63 = vpop.f32.mrb[105].mxu0  ;;  %v5940_v50 = vsel %vm3986_vm14, %v11620_v12, -inf }
 0xa07   :  { %v11625_v16 = vpop.f32.mrb[106].mxu0  ;;  %v11633_v37 = vpop.eup %9597  ;;  %v5934_v28 = vsel %vm3986_vm14, %v11622_v63, -inf }
 0xa08   :  { %v11627_v59 = vpop.f32.mrb[107].mxu0  ;;  %v4699_v29 = vsel %vm3986_vm14, %v11633_v37, 0.0  ;;  %v11640_v62 = vpop.eup %9599  ;;  %v5943_v9 = vsel %vm3986_vm14, %v11625_v16, -inf }
 0xa09   :  { %5941 = vmax.xlane.f32.xlu0 %v5940_v50  ;;  %4706 = vadd.xlane.f32.xlu1 %v4705_v40  ;;  %12612 = vst [vmem:[#allocation17_spill] sm:$0xff] %v11640_v62  ;;  %v4697_v50 = vmul.f32 1.442695, %v4682_v30  ;;  %v4708_v40 = vsel %vm3986_vm14, %v11640_v62, 0.0  ;;  %v5937_v30 = vsel %vm3986_vm14, %v11627_v59, -inf }
 0xa0b   :  { %9607 = vpow2.f32 %v4697_v50 }
 0xa0d   :  { %5935 = vmax.xlane.f32.xlu0 %v5934_v28  ;;  %v11642_v36 = vpop.f32.mrb[108].mxu0  ;;  %4700 = vadd.xlane.f32.xlu1 %v4699_v29  ;;  %v11655_v28 = vpop.eup %9601  ;;  %v4693_v29 = vmul.f32 1.442695, %v4680_v4 }
 0xa0e   :  { %v11644_v7 = vpop.f32.mrb[109].mxu0  ;;  %v4702_v33 = vsel %vm3986_vm14, %v11655_v28, 0.0  ;;  %v11661_v44 = vpop.eup %9603 }
 0xa0f   :  { %v11647_v27 = vpop.f32.mrb[110].mxu0  ;;  %12613 = vst [vmem:[#allocation18_spill] sm:$0xff] %v11661_v44  ;;  %9609 = vpow2.f32 %v4693_v29  ;;  %v4717_v50 = vsel %vm3986_vm14, %v11661_v44, 0.0  ;;  %v11668_v4 = vpop.eup %9605 }
 0xa10   :  { %v11649_v11 = vpop.f32.mrb[111].mxu0 }
 0xa11   :  { %5944 = vmax.xlane.f32.xlu0 %v5943_v9  ;;  %4709 = vadd.xlane.f32.xlu1 %v4708_v40  ;;  %v5952_v9 = vsel %vm3986_vm14, %v11642_v36, -inf }
 0xa14   :  { %v4919_v54 = vpop.xlane.xlu0 %4918 }
 0xa15   :  { %5938 = vmax.xlane.f32.xlu0 %v5937_v30  ;;  %4703 = vadd.xlane.f32.xlu1 %v4702_v33  ;;  %v4937_v30 = vsub.f32 %v11443_v10, %v4919_v54  ;;  %v11676_v62 = vpop.eup %9607 }
 0xa16   :  { %v4922_v21 = vpop.xlane.xlu1 %4921  ;;  %12614 = vst [vmem:[#allocation19_spill] sm:$0xff] %v11676_v62  ;;  %v4720_v10 = vsel %vm3986_vm14, %v11676_v62, 0.0 }
 0xa17   :  { %v4938_v2 = vsub.f32 %v11449_v24, %v4922_v21  ;;  %v5946_v21 = vsel %vm3986_vm14, %v11644_v7, -inf  ;;  %v4711_v24 = vsel %vm3986_vm14, %v11668_v4, 0.0 }
 0xa18   :  { %v4913_v29 = vpop.xlane.xlu0 %4912 }
 0xa19   :  { %v4949_v40 = vmul.f32 1.442695, %v4938_v2  ;;  %5953 = vmax.xlane.f32.xlu0 %v5952_v9  ;;  %4718 = vadd.xlane.f32.xlu1 %v4717_v50  ;;  %v4947_v9 = vmul.f32 1.442695, %v4937_v30  ;;  %v4935_v50 = vsub.f32 %v11445_v8, %v4913_v29 }
 0xa1a   :  { %v4916_v15 = vpop.xlane.xlu1 %4915 }
 0xa1b   :  { %9611 = vpow2.f32 %v4949_v40  ;;  %v4936_v33 = vsub.f32 %v11451_v26, %v4916_v15  ;;  %v11681_v26 = vpop.eup %9609  ;;  %v4943_v40 = vmul.f32 1.442695, %v4935_v50 }
 0xa1c   :  { %12615 = vst [vmem:[#allocation20_spill] sm:$0xff] %v11681_v26 }
 0xa1d   :  { %v4945_v44 = vmul.f32 1.442695, %v4936_v33  ;;  %5947 = vmax.xlane.f32.xlu0 %v5946_v21  ;;  %4712 = vadd.xlane.f32.xlu1 %v4711_v24  ;;  %v4714_v33 = vsel %vm3986_vm14, %v11681_v26, 0.0  ;;  %v4931_v24 = vpop.xlane.xlu0 %4930 }
 0xa1e   :  { %v4934_v2 = vpop.xlane.xlu1 %4933 }
 0xa1f   :  { %9613 = vpow2.f32 %v4945_v44  ;;  %v4942_v15 = vsub.f32 %v11465_v34, %v4934_v2 }
 0xa20   :  { %9615 = vpow2.f32 %v4947_v9  ;;  %v5955_v9 = vsel %vm3986_vm14, %v11647_v27, -inf }
 0xa21   :  { %4721 = vadd.xlane.f32.xlu1 %v4720_v10  ;;  %v4957_v30 = vmul.f32 1.442695, %v4942_v15  ;;  %9617 = vpow2.f32 %v4943_v40  ;;  %v4941_v15 = vsub.f32 %v11459_v32, %v4931_v24  ;;  %v5949_v40 = vsel %vm3986_vm14, %v11649_v11, -inf }
 0xa22   :  { %v4928_v54 = vpop.xlane.xlu1 %4927 }
 0xa23   :  { %v4940_v8 = vsub.f32 %v11467_v46, %v4928_v54  ;;  %9619 = vpow2.f32 %v4957_v30  ;;  %v4925_v54 = vpop.xlane.xlu0 %4924 }
 0xa25   :  { %v11686_v21 = vpop.eup %9611  ;;  %v11689_v29 = vpop.f32.mrb[112].mxu0  ;;  %4715 = vadd.xlane.f32.xlu1 %v4714_v33  ;;  %v4953_v46 = vmul.f32 1.442695, %v4940_v8 }
 0xa26   :  { %12616 = vst [vmem:[#allocation21_spill] sm:$0xff] %v11686_v21  ;;  %12617 = vst [vmem:[#allocation22_spill] sm:$0xff] %v11689_v29  ;;  %v11691_v62 = vpop.f32.mrb[113].mxu0  ;;  %v4968_v34 = vsel %vm3986_vm14, %v11686_v21, 0.0  ;;  %v6194_v50 = vsel %vm3986_vm14, %v11689_v29, -inf  ;;  %v4939_v21 = vsub.f32 %v11461_v42, %v4925_v54 }
 0xa27   :  { %12618 = vst [vmem:[#allocation23_spill] sm:$0xff] %v11691_v62  ;;  %v11695_v44 = vpop.f32.mrb[114].mxu0  ;;  %4969 = vadd.xlane.f32.xlu0 %v4968_v34  ;;  %9621 = vpow2.f32 %v4953_v46 }
 0xa28   :  { %v11697_v2 = vpop.f32.mrb[115].mxu0 }
 0xa29   :  { %5956 = vmax.xlane.f32.xlu1 %v5955_v9  ;;  %v11703_v10 = vpop.eup %9613  ;;  %v4955_v9 = vmul.f32 1.442695, %v4941_v15  ;;  %v4951_v15 = vmul.f32 1.442695, %v4939_v21 }
 0xa2a   :  { %12619 = vst [vmem:[#allocation24_spill] sm:$0xff] %v11703_v10  ;;  %v11708_v33 = vpop.eup %9615  ;;  %v4962_v8 = vsel %vm3986_vm14, %v11703_v10, 0.0 }
 0xa2b   :  { %6195 = vmax.xlane.f32.xlu0 %v6194_v50  ;;  %12620 = vst [vmem:[#allocation25_spill] sm:$0xff] %v11708_v33  ;;  %v4965_v50 = vsel %vm3986_vm14, %v11708_v33, 0.0  ;;  %v11723_v46 = vpop.eup %9617  ;;  %9623 = vpow2.f32 %v4955_v9  ;;  %v6197_v9 = vsel %vm3986_vm14, %v11695_v44, -inf }
 0xa2c   :  { %v4959_v54 = vsel %vm3986_vm14, %v11723_v46, 0.0  ;;  %9625 = vpow2.f32 %v4951_v15 }
 0xa2d   :  { %v11710_v34 = vpop.f32.mrb[116].mxu0  ;;  %5950 = vmax.xlane.f32.xlu1 %v5949_v40  ;;  %v6188_v40 = vsel %vm3986_vm14, %v11691_v62, -inf  ;;  %v11727_v29 = vpop.eup %9619 }
 0xa2e   :  { %v11712_v30 = vpop.f32.mrb[117].mxu0  ;;  %12621 = vst [vmem:[#allocation26_spill] sm:$0xff] %v11727_v29  ;;  %v4980_v33 = vsel %vm3986_vm14, %v11727_v29, 0.0 }
 0xa2f   :  { %v11717_v32 = vpop.f32.mrb[118].mxu0  ;;  %4963 = vadd.xlane.f32.xlu0 %v4962_v8 }
 0xa30   :  { %v11719_v24 = vpop.f32.mrb[119].mxu0 }
 0xa31   :  { %4966 = vadd.xlane.f32.xlu1 %v4965_v50  ;;  %v11734_v50 = vpop.eup %9621 }
 0xa33   :  { %6189 = vmax.xlane.f32.xlu0 %v6188_v40 }
 0xa34   :  { %v5177_v42 = vpop.xlane.xlu0 %5176 }
 0xa35   :  { %v5195_v8 = vsub.f32 %v11475_v22, %v5177_v42  ;;  %4960 = vadd.xlane.f32.xlu1 %v4959_v54  ;;  %v4974_v54 = vsel %vm3986_vm14, %v11734_v50, 0.0 }
 0xa36   :  { %v5180_v10 = vpop.xlane.xlu1 %5179 }
 0xa37   :  { %v5205_v62 = vmul.f32 1.442695, %v5195_v8  ;;  %v5196_v26 = vsub.f32 %v11481_v19, %v5180_v10  ;;  %4981 = vadd.xlane.f32.xlu0 %v4980_v33  ;;  %v6191_v19 = vsel %vm3986_vm14, %v11697_v2, -inf  ;;  %v11745_v10 = vpop.eup %9623 }
 0xa38   :  { %v5171_v21 = vpop.xlane.xlu0 %5170 }
 0xa39   :  { %9627 = vpow2.f32 %v5205_v62  ;;  %v5193_v40 = vsub.f32 %v11477_v49, %v5171_v21  ;;  %6198 = vmax.xlane.f32.xlu1 %v6197_v9  ;;  %v5207_v22 = vmul.f32 1.442695, %v5196_v26  ;;  %v6200_v26 = vsel %vm3986_vm14, %v11712_v30, -inf  ;;  %v11753_v9 = vpop.eup %9625 }
 0xa3a   :  { %v5174_v42 = vpop.xlane.xlu1 %5173  ;;  %v4977_v21 = vsel %vm3986_vm14, %v11745_v10, 0.0 }
 0xa3b   :  { %v5201_v29 = vmul.f32 1.442695, %v5193_v40  ;;  %v5194_v15 = vsub.f32 %v11483_v52, %v5174_v42  ;;  %4975 = vadd.xlane.f32.xlu0 %v4974_v54 }
 0xa3d   :  { %9629 = vpow2.f32 %v5201_v29  ;;  %v5203_v33 = vmul.f32 1.442695, %v5194_v15  ;;  %v5183_v62 = vpop.xlane.xlu0 %5182  ;;  %6192 = vmax.xlane.f32.xlu1 %v6191_v19 }
 0xa3e   :  { %9631 = vpow2.f32 %v5207_v22  ;;  %v5189_v49 = vpop.xlane.xlu1 %5188  ;;  %v5197_v8 = vsub.f32 %v11493_v60, %v5183_v62  ;;  %v4971_v60 = vsel %vm3986_vm14, %v11753_v9, 0.0 }
 0xa3f   :  { %9633 = vpow2.f32 %v5203_v33  ;;  %v5199_v52 = vsub.f32 %v11491_v35, %v5189_v49  ;;  %6201 = vmax.xlane.f32.xlu0 %v6200_v26 }
 0xa40   :  { %v5209_v22 = vmul.f32 1.442695, %v5197_v8 }
 0xa41   :  { %v5213_v29 = vmul.f32 1.442695, %v5199_v52  ;;  %4978 = vadd.xlane.f32.xlu1 %v4977_v21 }
 0xa42   :  { %v5192_v40 = vpop.xlane.xlu1 %5191 }
 0xa43   :  { %v11755_v42 = vpop.eup %9627  ;;  %9635 = vpow2.f32 %v5213_v29  ;;  %v5200_v54 = vsub.f32 %v11495_v56, %v5192_v40  ;;  %v6203_v56 = vsel %vm3986_vm14, %v11719_v24, -inf }
 0xa44   :  { %12622 = vst [vmem:[#allocation27_spill] sm:$0xff] %v11755_v42  ;;  %v5223_v35 = vsel %vm3986_vm14, %v11755_v42, 0.0  ;;  %9637 = vpow2.f32 %v5209_v22 }
 0xa45   :  { %4972 = vadd.xlane.f32.xlu1 %v4971_v60  ;;  %5224 = vadd.xlane.f32.xlu0 %v5223_v35  ;;  %v5215_v33 = vmul.f32 1.442695, %v5200_v54 }
 0xa46   :  { %v5186_v15 = vpop.xlane.xlu1 %5185 }
 0xa47   :  { %v11762_v19 = vpop.eup %9629  ;;  %v5198_v62 = vsub.f32 %v11499_v53, %v5186_v15  ;;  %9639 = vpow2.f32 %v5215_v33 }
 0xa48   :  { %v11765_v49 = vpop.eup %9631  ;;  %v5217_v26 = vsel %vm3986_vm14, %v11762_v19, 0.0 }
 0xa49   :  { %v11771_v8 = vpop.eup %9633  ;;  %6204 = vmax.xlane.f32.xlu1 %v6203_v56  ;;  %5218 = vadd.xlane.f32.xlu0 %v5217_v26  ;;  %v5211_v52 = vmul.f32 1.442695, %v5198_v62  ;;  %v5226_v21 = vsel %vm3986_vm14, %v11765_v49, 0.0 }
 0xa4a   :  { %v5220_v53 = vsel %vm3986_vm14, %v11771_v8, 0.0 }
 0xa4b   :  { %9641 = vpow2.f32 %v5211_v52 }
 0xa4d   :  { %v11777_v29 = vpop.eup %9635  ;;  %5227 = vadd.xlane.f32.xlu1 %v5226_v21  ;;  %5221 = vadd.xlane.f32.xlu0 %v5220_v53 }
 0xa4e   :  { %12623 = vst [vmem:[#allocation28_spill] sm:$0xff] %v11777_v29  ;;  %v5235_v40 = vsel %vm3986_vm14, %v11777_v29, 0.0  ;;  %v11781_v22 = vpop.eup %9637 }
 0xa4f   :  { %12624 = vst [vmem:[#allocation29_spill] sm:$0xff] %v11781_v22  ;;  %v5229_v60 = vsel %vm3986_vm14, %v11781_v22, 0.0 }
 0xa51   :  { %5236 = vadd.xlane.f32.xlu0 %v5235_v40  ;;  %v11785_v35 = vpop.eup %9639 }
 0xa52   :  { %12625 = vst [vmem:[#allocation30_spill] sm:$0xff] %v11785_v35  ;;  %v5238_v21 = vsel %vm3986_vm14, %v11785_v35, 0.0 }
 0xa54   :  { %v5433_v54 = vpop.xlane.xlu1 %5432 }
 0xa55   :  { %v5451_v15 = vsub.f32 %v11507_v57, %v5433_v54  ;;  %v5427_v33 = vpop.xlane.xlu0 %5426  ;;  %5230 = vadd.xlane.f32.xlu0 %v5229_v60  ;;  %v11791_v53 = vpop.eup %9641 }
 0xa56   :  { %v5449_v62 = vsub.f32 %v11509_v51, %v5427_v33  ;;  %12626 = vst [vmem:[#allocation31_spill] sm:$0xff] %v11791_v53  ;;  %v5232_v57 = vsel %vm3986_vm14, %v11791_v53, 0.0 }
 0xa57   :  { %v5461_v56 = vmul.f32 1.442695, %v5451_v15 }
 0xa58   :  { %v5457_v26 = vmul.f32 1.442695, %v5449_v62  ;;  %v5436_v52 = vpop.xlane.xlu1 %5435 }
 0xa59   :  { %9643 = vpow2.f32 %v5461_v56  ;;  %v5452_v40 = vsub.f32 %v11513_v58, %v5436_v52  ;;  %5239 = vadd.xlane.f32.xlu0 %v5238_v21 }
 0xa5a   :  { %9645 = vpow2.f32 %v5457_v26 }
 0xa5b   :  { %v5463_v29 = vmul.f32 1.442695, %v5452_v40 }
 0xa5c   :  { %v5430_v22 = vpop.xlane.xlu1 %5429 }
 0xa5d   :  { %9647 = vpow2.f32 %v5463_v29  ;;  %v5450_v51 = vsub.f32 %v11517_v38, %v5430_v22  ;;  %5233 = vadd.xlane.f32.xlu0 %v5232_v57 }
 0xa5e   :  { %v5448_v54 = vpop.xlane.xlu0 %5447 }
 0xa5f   :  { %v5459_v60 = vmul.f32 1.442695, %v5450_v51  ;;  %v5456_v15 = vsub.f32 %v11527_v5, %v5448_v54 }
 0xa60   :  { %v5445_v33 = vpop.xlane.xlu1 %5444 }
 0xa61   :  { %9649 = vpow2.f32 %v5459_v60  ;;  %v5471_v62 = vmul.f32 1.442695, %v5456_v15  ;;  %v5455_v58 = vsub.f32 %v11521_v14, %v5445_v33 }
 0xa62   :  { %v5442_v56 = vpop.xlane.xlu0 %5441 }
 0xa63   :  { %v11799_v26 = vpop.eup %9643  ;;  %9651 = vpow2.f32 %v5471_v62  ;;  %v5469_v52 = vmul.f32 1.442695, %v5455_v58  ;;  %v5454_v21 = vsub.f32 %v11529_v55, %v5442_v56 }
 0xa64   :  { %12627 = vst [vmem:[#allocation32_spill] sm:$0xff] %v11799_v26  ;;  %v5439_v29 = vpop.xlane.xlu1 %5438  ;;  %v5479_v38 = vsel %vm3986_vm14, %v11799_v26, 0.0  ;;  %v11804_v22 = vpop.eup %9645 }
 0xa65   :  { %12628 = vst [vmem:[#allocation33_spill] sm:$0xff] %v11804_v22  ;;  %9653 = vpow2.f32 %v5469_v52  ;;  %v5467_v5 = vmul.f32 1.442695, %v5454_v21  ;;  %v5453_v40 = vsub.f32 %v11523_v25, %v5439_v29  ;;  %5480 = vadd.xlane.f32.xlu0 %v5479_v38  ;;  %v5473_v51 = vsel %vm3986_vm14, %v11804_v22, 0.0 }
 0xa67   :  { %v11807_v57 = vpop.eup %9647  ;;  %9655 = vpow2.f32 %v5467_v5  ;;  %v5465_v14 = vmul.f32 1.442695, %v5453_v40 }
 0xa68   :  { %12629 = vst [vmem:[#allocation34_spill] sm:$0xff] %v11807_v57  ;;  %v5482_v55 = vsel %vm3986_vm14, %v11807_v57, 0.0 }
 0xa69   :  { %9657 = vpow2.f32 %v5465_v14  ;;  %5474 = vadd.xlane.f32.xlu0 %v5473_v51  ;;  %5483 = vadd.xlane.f32.xlu1 %v5482_v55 }
 0xa6b   :  { %v11813_v54 = vpop.eup %9649 }
 0xa6c   :  { %12630 = vst [vmem:[#allocation35_spill] sm:$0xff] %v11813_v54  ;;  %v5476_v60 = vsel %vm3986_vm14, %v11813_v54, 0.0 }
 0xa6d   :  { %v11817_v25 = vpop.eup %9651  ;;  %5477 = vadd.xlane.f32.xlu1 %v5476_v60 }
 0xa6e   :  { %12631 = vst [vmem:[#allocation36_spill] sm:$0xff] %v11817_v25  ;;  %v5494_v33 = vsel %vm3986_vm14, %v11817_v25, 0.0 }
 0xa6f   :  { %v11819_v15 = vpop.eup %9653 }
 0xa70   :  { %12632 = vst [vmem:[#allocation37_spill] sm:$0xff] %v11819_v15  ;;  %v5491_v62 = vsel %vm3986_vm14, %v11819_v15, 0.0 }
 0xa71   :  { %v11825_v58 = vpop.eup %9655  ;;  %5495 = vadd.xlane.f32.xlu1 %v5494_v33  ;;  %5492 = vadd.xlane.f32.xlu0 %v5491_v62  ;;  %v12590_v33 = vrot.slane %v11354_v31, 2 }
 0xa72   :  { %12633 = vst [vmem:[#allocation38_spill] sm:$0xff] %v11825_v58  ;;  %v4457_v56 = vpop.xlane.xlu0 %4456  ;;  %v5488_v21 = vsel %vm3986_vm14, %v11825_v58, 0.0 }
 0xa73   :  { %v11827_v52 = vpop.eup %9657 }
 0xa74   :  { %12634 = vst [vmem:[#allocation39_spill] sm:$0xff] %v11827_v52  ;;  %v5485_v29 = vsel %vm3986_vm14, %v11827_v52, 0.0 }
 0xa75   :  { %5489 = vadd.xlane.f32.xlu1 %v5488_v21  ;;  %5486 = vadd.xlane.f32.xlu0 %v5485_v29  ;;  %v4206_v21 = vld [vmem:[%s12555_s12 + $0x8] sm:$0xff] }
 0xa76   :  { %v4451_v38 = vpop.xlane.xlu0 %4450 }
 0xa77   :  { %9659 = vrcp.f32 %v4451_v38 }
 0xa7a   :  { %v5689_v5 = vpop.xlane.xlu0 %5688  ;;  %v4460_v40 = vpop.xlane.xlu1 %4459 }
 0xa7e   :  { %v5683_v14 = vpop.xlane.xlu0 %5682  ;;  %v5686_v51 = vpop.xlane.xlu1 %5685 }
 0xa81   :  { %v9660_v58 = vpop.eup %9659 }
 0xa82   :  { %v4469_v55 = vpop.xlane.xlu0 %4468  ;;  %v4454_v60 = vpop.xlane.xlu1 %4453  ;;  %v4481_v26 = vmul.f32 %v9660_v58, %v11555_v17 }
 0xa83   :  { %9661 = vrcp.f32 %v4454_v60 }
 0xa84   :  { %9663 = vrcp.f32 %v4460_v40 }
 0xa85   :  { %9665 = vrcp.f32 %v4457_v56  ;;  %v5703_v56 = vsub.f32 %v11560_v39, %v5683_v14  ;;  %v5705_v39 = vsub.f32 %v11558_v20, %v5689_v5 }
 0xa86   :  { %v4463_v62 = vpop.xlane.xlu0 %4462  ;;  %v5680_v25 = vpop.xlane.xlu1 %5679  ;;  %5261 = vrot.lane.b32.xlu1 %v12590_v33, %s9874_s25 }
 0xa87   :  { %v5712_v58 = vmul.f32 1.442695, %v5703_v56 }
 0xa8a   :  { %v11840_v29 = vpop.xlane.xlu0 %5697  ;;  %v4472_v15 = vpop.xlane.xlu1 %4471 }
 0xa8b   :  { %4214 = vperm.xlu0 %9494, %v4206_v21   ;;  %v5702_v21 = vsub.f32 %v11553_v0, %v5680_v25  ;;  %v5716_v25 = vmul.f32 1.442695, %v5705_v39 }
 0xa8d   :  { %v9662_v60 = vpop.eup %9661 }
 0xa8e   :  { %v11842_v52 = vpop.xlane.xlu0 %5700  ;;  %v4466_v38 = vpop.xlane.xlu1 %4465  ;;  %v4482_v33 = vmul.f32 %v9662_v60, %v11577_v13  ;;  %v12635_v13 = vmov 0.0   ;;  %v5710_v60 = vmul.f32 1.442695, %v5702_v21 }
 0xa8f   :  { %9667 = vrcp.f32 %v4466_v38  ;;  %v9664_v40 = vpop.eup %9663 }
 0xa90   :  { %9669 = vrcp.f32 %v4463_v62  ;;  %v4489_v54 = vpack.c.bf16 %v4482_v33, %v4481_v26  ;;  %v9666_v35 = vpop.eup %9665  ;;  %v4484_v42 = vmul.f32 %v9664_v40, %v11564_v48  ;;  %v5704_v48 = vsub.f32 %v11551_v61, %v5686_v51 }
 0xa91   :  { %v4483_v62 = vmul.f32 %v9666_v35, %v11546_v47  ;;  %9671 = vrcp.f32 %v4472_v15 }
 0xa92   :  { %v5695_v57 = vpop.xlane.xlu0 %5694  ;;  %v5692_v22 = vpop.xlane.xlu1 %5691  ;;  %v4497_v53 = vsel %vm3986_vm14, %v4489_v54, 0  ;;  %9673 = vrcp.f32 %v4469_v55  ;;  %v5714_v20 = vmul.f32 1.442695, %v5704_v48 }
 0xa93   :  { %8928 = vmatpush3.bf16.xpose.msra.mxu1 %v4497_v53  ;;  %v4490_v26 = vpack.c.bf16 %v4484_v42, %v4483_v62  ;;  %9675 = vpow2.f32 %v5712_v58  ;;  %v5706_v42 = vsub.f32 %v11573_v1, %v5692_v22  ;;  %v5707_v61 = vsub.f32 %v11579_v3, %v5695_v57 }
 0xa94   :  { %8929 = vmatprep.subr.bf16.mxu1 %v12635_v13  ;;  %9677 = vpow2.f32 %v5710_v60  ;;  %v5708_v58 = vsub.f32 %v11571_v23, %v11840_v29 }
 0xa95   :  { %v4500_v33 = vsel %vm3986_vm14, %v4490_v26, 0  ;;  %9679 = vpow2.f32 %v5716_v25  ;;  %v5720_v22 = vmul.f32 1.442695, %v5707_v61 }
 0xa96   :  { %v11850_v38 = vpop.xlane.xlu0 %5941  ;;  %v4707_v17 = vpop.xlane.xlu1 %4706 }
 0xa99   :  { %v9668_v14 = vpop.eup %9667 }
 0xa9a   :  { %v5936_v0 = vpop.xlane.xlu0 %5935  ;;  %v4701_v54 = vpop.xlane.xlu1 %4700  ;;  %v4486_v40 = vmul.f32 %v9668_v14, %v11606_v6  ;;  %v5718_v6 = vmul.f32 1.442695, %v5706_v42 }
 0xa9b   :  { %v9670_v53 = vpop.eup %9669  ;;  %8930 = vmatpush3.bf16.xpose.msra.mxu1 %v4500_v33  ;;  %9681 = vrcp.f32 %v4701_v54  ;;  %v5958_v23 = vsub.f32 %v11622_v63, %v5936_v0 }
 0xa9c   :  { %8931 = vmatprep.subr.bf16.mxu1 %v12635_v13  ;;  %v4485_v15 = vmul.f32 %v9670_v53, %v11591_v18  ;;  %v9672_v51 = vpop.eup %9671  ;;  %9683 = vpow2.f32 %v5714_v20  ;;  %v5709_v18 = vsub.f32 %v11575_v43, %v11842_v52  ;;  %v5722_v43 = vmul.f32 1.442695, %v5708_v58 }
 0xa9d   :  { %v9674_v21 = vpop.eup %9673  ;;  %v4488_v57 = vmul.f32 %v9672_v51, %v11598_v45 }
 0xa9e   :  { %v11858_v47 = vpop.xlane.xlu0 %5944  ;;  %v4710_v35 = vpop.xlane.xlu1 %4709  ;;  %v4491_v5 = vpack.c.bf16 %v4486_v40, %v4485_v15  ;;  %v4487_v29 = vmul.f32 %v9674_v21, %v11585_v41  ;;  %v5724_v26 = vmul.f32 1.442695, %v5709_v18  ;;  %v5966_v41 = vmul.f32 1.442695, %v5958_v23 }
 0xa9f   :  { %v11866_v1 = vpop.eup %9675  ;;  %v5961_v40 = vsub.f32 %v11625_v16, %v11858_v47 }
 0xaa0   :  { %v4503_v3 = vsel %vm3986_vm14, %v4491_v5, 0  ;;  %v11872_v62 = vpop.eup %9677  ;;  %v5729_v45 = vsel %vm3986_vm14, %v11866_v1, 0.0  ;;  %v4492_v54 = vpack.c.bf16 %v4488_v57, %v4487_v29  ;;  %v12636_v57 = vld [vmem:[#allocation17_spill] sm:$0xff] }
 0xaa1   :  { %v5726_v14 = vsel %vm3986_vm14, %v11872_v62, 0.0  ;;  %v11886_v0 = vpop.eup %9679  ;;  %v5972_v5 = vmul.f32 1.442695, %v5961_v40 }
 0xaa2   :  { %v5939_v55 = vpop.xlane.xlu0 %5938  ;;  %v4704_v56 = vpop.xlane.xlu1 %4703 }
 0xaa3   :  { %9685 = vrcp.f32 %v4704_v56  ;;  %8932 = vmatpush3.bf16.xpose.msra.mxu1 %v4503_v3  ;;  %v5959_v52 = vsub.f32 %v11627_v59, %v5939_v55  ;;  %v5960_v59 = vsub.f32 %v11620_v12, %v11850_v38  ;;  %v6209_v12 = vsel %vm3986_vm14, %v11717_v32, -inf }
 0xaa4   :  { %9687 = vpow2.f32 %v5718_v6  ;;  %8933 = vmatprep.subr.bf16.mxu1 %v12635_v13  ;;  %v5735_v6 = vsel %vm3986_vm14, %v11886_v0, 0.0 }
 0xaa5   :  { %9689 = vrcp.f32 %v4710_v35  ;;  %v9682_v48 = vpop.eup %9681  ;;  %v5968_v53 = vmul.f32 1.442695, %v5959_v52  ;;  %v6206_v35 = vsel %vm3986_vm14, %v11710_v34, -inf  ;;  %v5970_v15 = vmul.f32 1.442695, %v5960_v59 }
 0xaa6   :  { %v11874_v60 = vpop.xlane.xlu0 %5953  ;;  %v11876_v39 = vpop.xlane.xlu1 %4718  ;;  %9691 = vpow2.f32 %v5720_v22  ;;  %v4731_v16 = vmul.f32 %v9682_v48, %v11633_v37 }
 0xaa7   :  { %9693 = vrcp.f32 %v4707_v17  ;;  %v11890_v33 = vpop.eup %9683  ;;  %v4506_v17 = vsel %vm3986_vm14, %v4492_v54, 0  ;;  %v5964_v18 = vsub.f32 %v11642_v36, %v11874_v60  ;;  %v12637_v60 = vld [vmem:[#allocation16_spill] sm:$0xff] }
 0xaa8   :  { %9695 = vpow2.f32 %v5722_v43  ;;  %v5732_v51 = vsel %vm3986_vm14, %v11890_v33, 0.0 }
 0xaa9   :  { %9697 = vpow2.f32 %v5724_v26  ;;  %v5978_v26 = vmul.f32 1.442695, %v5964_v18 }
 0xaaa   :  { %5730 = vadd.xlane.f32.xlu0 %v5729_v45  ;;  %v4713_v63 = vpop.xlane.xlu1 %4712  ;;  %5727 = vadd.xlane.f32.xlu1 %v5726_v14  ;;  %v5948_v25 = vpop.xlane.xlu0 %5947  ;;  %9699 = vpow2.f32 %v5966_v41 }
 0xaab   :  { %8934 = vmatpush3.bf16.xpose.msra.mxu1 %v4506_v17  ;;  %v5962_v38 = vsub.f32 %v11644_v7, %v5948_v25  ;;  %9701 = vpow2.f32 %v5968_v53 }
 0xaac   :  { %8955 = vmatprep.subr.bf16.mxu1 %v12635_v13  ;;  %9703 = vrcp.f32 %v4713_v63 }
 0xaad   :  { %v9686_v20 = vpop.eup %9685  ;;  %v5974_v37 = vmul.f32 1.442695, %v5962_v38 }
 0xaae   :  { %6207 = vmax.xlane.f32.xlu0 %v6206_v35  ;;  %v4722_v42 = vpop.xlane.xlu1 %4721  ;;  %6210 = vmax.xlane.f32.xlu1 %v6209_v12  ;;  %v4732_v47 = vmul.f32 %v9686_v20, %v11655_v28  ;;  %v11903_v61 = vpop.eup %9687 }
 0xaaf   :  { %v9690_v56 = vpop.eup %9689  ;;  %v5738_v3 = vsel %vm3986_vm14, %v11903_v61, 0.0 }
 0xab0   :  { %v4739_v55 = vpack.c.bf16 %v4732_v47, %v4731_v16  ;;  %v11909_v21 = vpop.eup %9691  ;;  %v4734_v23 = vmul.f32 %v9690_v56, %v12636_v57 }
 0xab1   :  { %v9694_v58 = vpop.eup %9693  ;;  %v5741_v52 = vsel %vm3986_vm14, %v11909_v21, 0.0 }
 0xab2   :  { %5733 = vadd.xlane.f32.xlu0 %v5732_v51  ;;  %v4716_v7 = vpop.xlane.xlu1 %4715  ;;  %5736 = vadd.xlane.f32.xlu1 %v5735_v6  ;;  %v4750_v28 = vsel %vm3986_vm14, %v4739_v55, 0  ;;  %v11921_v29 = vpop.eup %9695  ;;  %v4733_v45 = vmul.f32 %v9694_v58, %v12637_v60  ;;  %v12639_v6 = vld [vmem:[#allocation23_spill] sm:$0xff] }
 0xab3   :  { %9705 = vrcp.f32 %v4716_v7  ;;  %8936 = vmatmul.mubr.msk.bf16.vlgmr.msra.gmra.mrb[80].mxu1 %vm3986_vm14, %v11354_v31  ;;  %v11925_v36 = vpop.eup %9697  ;;  %v5744_v41 = vsel %vm3986_vm14, %v11921_v29, 0.0  ;;  %v12640_v60 = vld [vmem:[#allocation19_spill] sm:$0xff] }
 0xab4   :  { %9707 = vpow2.f32 %v5970_v15  ;;  %v11914_v22 = vpop.xlane.xlu0 %4969  ;;  %8956 = vmatpush3.bf16.xpose.msra.mxu1 %v4750_v28  ;;  %8963 = vmatprep.mubr.msk.bf16.mxu1 %vm9873_vm11, %v12635_v13  ;;  %v11934_v63 = vpop.eup %9699  ;;  %v4740_v48 = vpack.c.bf16 %v4734_v23, %v4733_v45  ;;  %v12638_v15 = vld [vmem:[#allocation20_spill] sm:$0xff] }
 0xab5   :  { %9709 = vpow2.f32 %v5972_v5  ;;  %8957 = vmatprep.subr.bf16.mxu1 %v12635_v13  ;;  %v11938_v59 = vpop.eup %9701  ;;  %v5982_v38 = vsel %vm3986_vm14, %v11934_v63, 0.0 }
 0xab6   :  { %5739 = vadd.xlane.f32.xlu0 %v5738_v3  ;;  %v5957_v43 = vpop.xlane.xlu1 %5956  ;;  %9711 = vpow2.f32 %v5974_v37  ;;  %5742 = vadd.xlane.f32.xlu1 %v5741_v52  ;;  %v9704_v25 = vpop.eup %9703  ;;  %v4753_v12 = vsel %vm3986_vm14, %v4740_v48, 0  ;;  %v5985_v47 = vsel %vm3986_vm14, %v11938_v59, 0.0 }
 0xab7   :  { %9713 = vrcp.f32 %v4722_v42  ;;  %v5965_v14 = vsub.f32 %v11647_v27, %v5957_v43  ;;  %v5747_v27 = vsel %vm3986_vm14, %v11925_v36, 0.0 }
 0xab8   :  { %v11930_v54 = vpop.xlane.xlu0 %6195  ;;  %9715 = vrcp.f32 %v11876_v39 }
 0xab9   :  { %9717 = vpow2.f32 %v5978_v26  ;;  %v5980_v17 = vmul.f32 1.442695, %v5965_v14 }
 0xaba   :  { %5745 = vadd.xlane.f32.xlu0 %v5744_v41  ;;  %v5951_v53 = vpop.xlane.xlu1 %5950  ;;  %5748 = vadd.xlane.f32.xlu1 %v5747_v27  ;;  %v12641_v41 = vld [vmem:[#allocation18_spill] sm:$0xff] }
 0xabb   :  { %v5963_v40 = vsub.f32 %v11649_v11, %v5951_v53  ;;  %v4735_v11 = vmul.f32 %v9704_v25, %v11668_v4  ;;  %v12642_v25 = vld [vmem:[#allocation22_spill] sm:$0xff] }
 0xabc   :  { %v4964_v35 = vpop.xlane.xlu0 %4963  ;;  %8958 = vmatpush3.bf16.xpose.msra.mxu1 %v4753_v12 }
 0xabd   :  { %v9706_v20 = vpop.eup %9705  ;;  %v5976_v42 = vmul.f32 1.442695, %v5963_v40  ;;  %8959 = vmatprep.subr.bf16.mxu1 %v12635_v13  ;;  %v6214_v40 = vsub.f32 %v12642_v25, %v11930_v54  ;;  %v12646_v25 = vld [vmem:[#allocation21_spill] sm:$0xff] }
 0xabe   :  { %v11947_v39 = vpop.eup %9707  ;;  %5983 = vadd.xlane.f32.xlu0 %v5982_v38  ;;  %v4967_v16 = vpop.xlane.xlu1 %4966  ;;  %v4736_v5 = vmul.f32 %v9706_v20, %v12638_v15  ;;  %5986 = vadd.xlane.f32.xlu1 %v5985_v47 }
 0xabf   :  { %v11953_v51 = vpop.eup %9709  ;;  %9719 = vpow2.f32 %v5976_v42  ;;  %v5988_v28 = vsel %vm3986_vm14, %v11947_v39, 0.0 }
 0xac0   :  { %9721 = vpow2.f32 %v5980_v17  ;;  %v6190_v55 = vpop.xlane.xlu0 %6189  ;;  %v4741_v56 = vpack.c.bf16 %v4736_v5, %v4735_v11  ;;  %v11956_v7 = vpop.eup %9711  ;;  %v5991_v18 = vsel %vm3986_vm14, %v11953_v51, 0.0  ;;  %v6224_v11 = vmul.f32 1.442695, %v6214_v40 }
 0xac1   :  { %9723 = vrcp.f32 %v4964_v35  ;;  %v6212_v37 = vsub.f32 %v12639_v6, %v6190_v55  ;;  %v9714_v4 = vpop.eup %9713  ;;  %v5994_v52 = vsel %vm3986_vm14, %v11956_v7, 0.0 }
 0xac2   :  { %5989 = vadd.xlane.f32.xlu0 %v5988_v28  ;;  %v4961_v58 = vpop.xlane.xlu1 %4960  ;;  %5992 = vadd.xlane.f32.xlu1 %v5991_v18  ;;  %v4756_v57 = vsel %vm3986_vm14, %v4741_v56, 0  ;;  %v9716_v23 = vpop.eup %9715  ;;  %v4738_v45 = vmul.f32 %v9714_v4, %v12640_v60 }
 0xac3   :  { %v6220_v3 = vmul.f32 1.442695, %v6212_v37  ;;  %9725 = vrcp.f32 %v4961_v58  ;;  %v11969_v26 = vpop.eup %9717  ;;  %v4737_v48 = vmul.f32 %v9716_v23, %v12641_v41  ;;  %v12643_v37 = vld [vmem:[#allocation24_spill] sm:$0xff] }
 0xac4   :  { %v11964_v43 = vpop.xlane.xlu0 %4981  ;;  %8960 = vmatpush3.bf16.xpose.msra.mxu1 %v4756_v57  ;;  %v6000_v17 = vsel %vm3986_vm14, %v11969_v26, 0.0 }
 0xac5   :  { %9727 = vpow2.f32 %v6220_v3  ;;  %8961 = vmatprep.subr.bf16.mxu1 %v12635_v13  ;;  %v4742_v35 = vpack.c.bf16 %v4738_v45, %v4737_v48  ;;  %v12644_v45 = vld [vmem:[#allocation15_spill] sm:$0xff] }
 0xac6   :  { %5995 = vadd.xlane.f32.xlu0 %v5994_v52  ;;  %v6199_v14 = vpop.xlane.xlu1 %6198  ;;  %9729 = vrcp.f32 %v4967_v16 }
 0xac7   :  { %9731 = vrcp.f32 %v11914_v22  ;;  %v6215_v54 = vsub.f32 %v11695_v44, %v6199_v14  ;;  %v4759_v5 = vsel %vm3986_vm14, %v4742_v35, 0  ;;  %v12645_v14 = vld [vmem:[#allocation25_spill] sm:$0xff] }
 0xac8   :  { %v4976_v53 = vpop.xlane.xlu0 %4975 }
 0xac9   :  { %v11973_v27 = vpop.eup %9719 }
 0xaca   :  { %v11979_v20 = vpop.eup %9721  ;;  %6001 = vadd.xlane.f32.xlu0 %v6000_v17  ;;  %v6193_v42 = vpop.xlane.xlu1 %6192  ;;  %v5997_v12 = vsel %vm3986_vm14, %v11973_v27, 0.0 }
 0xacb   :  { %v9724_v38 = vpop.eup %9723  ;;  %v6213_v16 = vsub.f32 %v11697_v2, %v6193_v42  ;;  %5998 = vadd.xlane.f32.xlu1 %v5997_v12  ;;  %v6003_v22 = vsel %vm3986_vm14, %v11979_v20, 0.0  ;;  %v6226_v2 = vmul.f32 1.442695, %v6215_v54 }
 0xacc   :  { %8962 = vmatpush3.bf16.xpose.msra.mxu1 %v4759_v5  ;;  %v6202_v55 = vpop.xlane.xlu0 %6201  ;;  %v4992_v28 = vmul.f32 %v9724_v38, %v12643_v37 }
 0xacd   :  { %v9726_v47 = vpop.eup %9725  ;;  %v6222_v15 = vmul.f32 1.442695, %v6213_v16  ;;  %8983 = vmatprep.subr.bf16.mxu1 %v12635_v13  ;;  %v6216_v58 = vsub.f32 %v11712_v30, %v6202_v55 }
 0xace   :  { %v4979_v56 = vpop.xlane.xlu1 %4978  ;;  %v4991_v6 = vmul.f32 %v9726_v47, %v11723_v46 }
 0xacf   :  { %v11991_v4 = vpop.eup %9727  ;;  %9733 = vpow2.f32 %v6222_v15  ;;  %6004 = vadd.xlane.f32.xlu1 %v6003_v22  ;;  %v6228_v60 = vmul.f32 1.442695, %v6216_v58 }
 0xad0   :  { %v4999_v44 = vpack.c.bf16 %v4992_v28, %v4991_v6  ;;  %9735 = vpow2.f32 %v6224_v11  ;;  %v9730_v18 = vpop.eup %9729  ;;  %v6236_v46 = vsel %vm3986_vm14, %v11991_v4, 0.0 }
 0xad1   :  { %9737 = vrcp.f32 %v4976_v53  ;;  %v9732_v52 = vpop.eup %9731  ;;  %v4993_v41 = vmul.f32 %v9730_v18, %v12645_v14 }
 0xad2   :  { %v5225_v3 = vpop.xlane.xlu0 %5224  ;;  %v4973_v57 = vpop.xlane.xlu1 %4972  ;;  %v5008_v23 = vsel %vm3986_vm14, %v4999_v44, 0  ;;  %v4994_v40 = vmul.f32 %v9732_v52, %v12646_v25 }
 0xad3   :  { %6237 = vadd.xlane.f32.xlu1 %v6236_v46  ;;  %9739 = vrcp.f32 %v4973_v57  ;;  %8964 = vmatmul.mubr.msk.bf16.vlgmr.msra.gmra.mrb[84].mxu1 %vm3986_vm14, %v12644_v45  ;;  %v12647_v46 = vld [vmem:[#allocation26_spill] sm:$0xff] }
 0xad4   :  { %9741 = vpow2.f32 %v6226_v2  ;;  %8984 = vmatpush3.bf16.xpose.msra.mxu1 %v5008_v23  ;;  %8991 = vmatprep.mubr.msk.bf16.mxu1 %vm9873_vm11, %v12635_v13  ;;  %v5000_v42 = vpack.c.bf16 %v4994_v40, %v4993_v41  ;;  %v12648_v40 = vrot.slane %v11354_v31, 2 }
 0xad5   :  { %8985 = vmatprep.subr.bf16.mxu1 %v12635_v13  ;;  %9743 = vrcp.f32 %v4979_v56 }
 0xad6   :  { %v5219_v30 = vpop.xlane.xlu0 %5218  ;;  %v6205_v48 = vpop.xlane.xlu1 %6204  ;;  %9745 = vpow2.f32 %v6228_v60  ;;  %v5011_v47 = vsel %vm3986_vm14, %v5000_v42, 0 }
 0xad7   :  { %v6217_v53 = vsub.f32 %v11719_v24, %v6205_v48  ;;  %9747 = vrcp.f32 %v11964_v43 }
 0xad9   :  { %v12006_v17 = vpop.eup %9733  ;;  %v6230_v35 = vmul.f32 1.442695, %v6217_v53 }
 0xada   :  { %v5222_v12 = vpop.xlane.xlu0 %5221  ;;  %v6239_v38 = vsel %vm3986_vm14, %v12006_v17, 0.0  ;;  %v12011_v16 = vpop.eup %9735 }
 0xadb   :  { %6240 = vadd.xlane.f32.xlu1 %v6239_v38  ;;  %v9738_v24 = vpop.eup %9737  ;;  %9749 = vpow2.f32 %v6230_v35  ;;  %v6242_v15 = vsel %vm3986_vm14, %v12011_v16, 0.0  ;;  %v5228_v58 = vpop.xlane.xlu1 %5227 }
 0xadc   :  { %8986 = vmatpush3.bf16.xpose.msra.mxu1 %v5011_v47  ;;  %v4996_v55 = vmul.f32 %v9738_v24, %v11734_v50  ;;  %9751 = vrcp.f32 %v5222_v12 }
 0xadd   :  { %v9740_v11 = vpop.eup %9739  ;;  %8987 = vmatprep.subr.bf16.mxu1 %v12635_v13  ;;  %9753 = vrcp.f32 %v5219_v30 }
 0xade   :  { %v5237_v54 = vpop.xlane.xlu0 %5236  ;;  %v12016_v5 = vpop.eup %9741  ;;  %v4995_v43 = vmul.f32 %v9740_v11, %v11753_v9  ;;  %9755 = vrcp.f32 %v5228_v58  ;;  %v12652_v58 = vld [vmem:[#allocation30_spill] sm:$0xff] }
 0xadf   :  { %6243 = vadd.xlane.f32.xlu1 %v6242_v15  ;;  %v9744_v22 = vpop.eup %9743  ;;  %v6245_v37 = vsel %vm3986_vm14, %v12016_v5, 0.0  ;;  %9757 = vrcp.f32 %v5225_v3 }
 0xae0   :  { %v5001_v56 = vpack.c.bf16 %v4996_v55, %v4995_v43  ;;  %v12023_v28 = vpop.eup %9745  ;;  %v4997_v18 = vmul.f32 %v9744_v22, %v11745_v10 }
 0xae1   :  { %v9748_v2 = vpop.eup %9747  ;;  %v6248_v50 = vsel %vm3986_vm14, %v12023_v28, 0.0 }
 0xae2   :  { %v5231_v6 = vpop.xlane.xlu0 %5230  ;;  %v5014_v44 = vsel %vm3986_vm14, %v5001_v56, 0  ;;  %v4998_v23 = vmul.f32 %v9748_v2, %v12647_v46  ;;  %v12651_v56 = vld [vmem:[#allocation29_spill] sm:$0xff]  ;;  %v12653_v46 = vld [vmem:[#allocation28_spill] sm:$0xff] }
 0xae3   :  { %6246 = vadd.xlane.f32.xlu1 %v6245_v37 }
 0xae4   :  { %8988 = vmatpush3.bf16.xpose.msra.mxu1 %v5014_v44  ;;  %v5002_v52 = vpack.c.bf16 %v4998_v23, %v4997_v18 }
 0xae5   :  { %v12029_v9 = vpop.eup %9749  ;;  %8989 = vmatprep.subr.bf16.mxu1 %v12635_v13 }
 0xae6   :  { %v5240_v57 = vpop.xlane.xlu0 %5239  ;;  %v9752_v60 = vpop.eup %9751  ;;  %v6251_v45 = vsel %vm3986_vm14, %v12029_v9, 0.0  ;;  %v5017_v41 = vsel %vm3986_vm14, %v5002_v52, 0 }
 0xae7   :  { %6249 = vadd.xlane.f32.xlu1 %v6248_v50  ;;  %v9754_v10 = vpop.eup %9753  ;;  %v5250_v30 = vmul.f32 %v9752_v60, %v11771_v8 }
 0xae8   :  { %v5249_v48 = vmul.f32 %v9754_v10, %v11762_v19  ;;  %v9756_v25 = vpop.eup %9755  ;;  %v12649_v19 = vld [vmem:[#allocation27_spill] sm:$0xff]  ;;  %v12654_v10 = vld [vmem:[#allocation14_spill] sm:$0xff] }
 0xae9   :  { %v9758_v3 = vpop.eup %9757  ;;  %v5252_v42 = vmul.f32 %v9756_v25, %v11765_v49  ;;  %v12650_v49 = vld [vmem:[#allocation31_spill] sm:$0xff] }
 0xaea   :  { %v5234_v14 = vpop.xlane.xlu0 %5233  ;;  %v5257_v53 = vpack.c.bf16 %v5250_v30, %v5249_v48  ;;  %v5251_v38 = vmul.f32 %v9758_v3, %v12649_v19  ;;  %v12655_v25 = vld [vmem:[#allocation35_spill] sm:$0xff] }
 0xaeb   :  { %6252 = vadd.xlane.f32.xlu1 %v6251_v45  ;;  %9759 = vrcp.f32 %v5234_v14 }
 0xaec   :  { %8990 = vmatpush3.bf16.xpose.msra.mxu1 %v5017_v41  ;;  %9761 = vrcp.f32 %v5231_v6  ;;  %v5267_v35 = vsel %vm3986_vm14, %v5257_v53, 0  ;;  %v5258_v24 = vpack.c.bf16 %v5252_v42, %v5251_v38 }
 0xaed   :  { %9011 = vmatprep.subr.bf16.mxu1 %v12635_v13  ;;  %9763 = vrcp.f32 %v5240_v57 }
 0xaee   :  { %9765 = vrcp.f32 %v5237_v54  ;;  %v5270_v43 = vsel %vm3986_vm14, %v5258_v24, 0  ;;  %v12657_v24 = vld [vmem:[#allocation34_spill] sm:$0xff] }
 0xaf2   :  { %v5481_v12 = vpop.xlane.xlu0 %5480 }
 0xaf3   :  { %8992 = vmatmul.mubr.msk.bf16.vlgmr.msra.gmra.mrb[88].mxu1 %vm3986_vm14, %v12648_v40  ;;  %v12656_v40 = vld [vmem:[#allocation33_spill] sm:$0xff] }
 0xaf4   :  { %9012 = vmatpush3.bf16.xpose.msra.mxu1 %v5267_v35  ;;  %9019 = vmatprep.mubr.msk.bf16.mxu1 %vm9873_vm11, %v12635_v13 }
 0xaf5   :  { %9013 = vmatprep.subr.bf16.mxu1 %v12635_v13  ;;  %v9760_v47 = vpop.eup %9759 }
 0xaf6   :  { %v5484_v8 = vpop.xlane.xlu1 %5483  ;;  %v9762_v31 = vpop.eup %9761  ;;  %v5254_v55 = vmul.f32 %v9760_v47, %v12650_v49 }
 0xaf7   :  { %v5475_v11 = vpop.xlane.xlu0 %5474  ;;  %v5253_v22 = vmul.f32 %v9762_v31, %v12651_v56  ;;  %v9764_v44 = vpop.eup %9763  ;;  %v12658_v31 = vld [vmem:[#allocation32_spill] sm:$0xff]  ;;  %v12659_v56 = vld [vmem:[#allocation39_spill] sm:$0xff] }
 0xaf8   :  { %v9766_v2 = vpop.eup %9765  ;;  %v5256_v18 = vmul.f32 %v9764_v44, %v12652_v58 }
 0xaf9   :  { %v5259_v37 = vpack.c.bf16 %v5254_v55, %v5253_v22  ;;  %v5255_v23 = vmul.f32 %v9766_v2, %v12653_v46 }
 0xafa   :  { %v5478_v15 = vpop.xlane.xlu1 %5477 }
 0xafb   :  { %9767 = vrcp.f32 %v5478_v15  ;;  %v5273_v54 = vsel %vm3986_vm14, %v5259_v37, 0  ;;  %v5260_v52 = vpack.c.bf16 %v5256_v18, %v5255_v23  ;;  %v12660_v37 = vld [vmem:[#allocation38_spill] sm:$0xff]  ;;  %v12661_v18 = vld [vmem:[#allocation37_spill] sm:$0xff] }
 0xafc   :  { %9014 = vmatpush3.bf16.xpose.msra.mxu1 %v5270_v43  ;;  %9769 = vrcp.f32 %v5475_v11 }
 0xafd   :  { %9015 = vmatprep.subr.bf16.mxu1 %v12635_v13  ;;  %9771 = vrcp.f32 %v5484_v8  ;;  %v5276_v53 = vsel %vm3986_vm14, %v5260_v52, 0 }
 0xafe   :  { %v5493_v6 = vpop.xlane.xlu0 %5492  ;;  %v5496_v57 = vpop.xlane.xlu1 %5495  ;;  %9773 = vrcp.f32 %v5481_v12 }
 0xb02   :  { %v5487_v50 = vpop.xlane.xlu0 %5486  ;;  %v5490_v30 = vpop.xlane.xlu1 %5489 }
 0xb03   :  { %9775 = vrcp.f32 %v5487_v50 }
 0xb04   :  { %9016 = vmatpush3.bf16.xpose.msra.mxu1 %v5273_v54  ;;  %9777 = vrcp.f32 %v5490_v30 }
 0xb05   :  { %9017 = vmatprep.subr.bf16.mxu1 %v12635_v13  ;;  %v9768_v60 = vpop.eup %9767  ;;  %9779 = vrcp.f32 %v5493_v6 }
 0xb06   :  { %v9770_v41 = vpop.eup %9769  ;;  %v5506_v3 = vmul.f32 %v9768_v60, %v12655_v25  ;;  %v5262_v19 = vpop.permute.xlu1 %5261  ;;  %9781 = vrcp.f32 %v5496_v57  ;;  %v12662_v57 = vld [vmem:[#allocation36_spill] sm:$0xff] }
 0xb07   :  { %v5505_v35 = vmul.f32 %v9770_v41, %v12656_v40  ;;  %v9772_v12 = vpop.eup %9771 }
 0xb08   :  { %v9774_v8 = vpop.eup %9773  ;;  %v5508_v47 = vmul.f32 %v9772_v12, %v12657_v24 }
 0xb09   :  { %v5513_v42 = vpack.c.bf16 %v5506_v3, %v5505_v35  ;;  %v5507_v11 = vmul.f32 %v9774_v8, %v12658_v31 }
 0xb0a   :  { %v4215_v45 = vpop.permute.xlu0 %4214 }
 0xb0b   :  { %v4263_v14 = vadd.f32 %v12654_v10, %v4215_v45  ;;  %v5521_v38 = vsel %vm3986_vm14, %v5513_v42, 0  ;;  %v5514_v43 = vpack.c.bf16 %v5508_v47, %v5507_v11 }
 0xb0c   :  { %9018 = vmatpush3.bf16.xpose.msra.mxu1 %v5276_v53 }
 0xb0d   :  { %v12057_v48 = vpack.c.bf16 %v4263_v14, %v4263_v14  ;;  %9039 = vmatprep.subr.bf16.mxu1 %v12635_v13  ;;  %v9776_v15 = vpop.eup %9775  ;;  %v5524_v55 = vsel %vm3986_vm14, %v5514_v43, 0 }
 0xb0e   :  { %v9778_v49 = vpop.eup %9777  ;;  %v5509_v22 = vmul.f32 %v9776_v15, %v12659_v56 }
 0xb0f   :  { %5771 = vrot.lane.b32.xlu0 %v12057_v48, %s9874_s25  ;;  %v5510_v44 = vmul.f32 %v9778_v49, %v12660_v37  ;;  %v9780_v2 = vpop.eup %9779 }
 0xb10   :  { %v9782_v6 = vpop.eup %9781  ;;  %v5511_v50 = vmul.f32 %v9780_v2, %v12661_v18 }
 0xb11   :  { %v5515_v54 = vpack.c.bf16 %v5510_v44, %v5509_v22  ;;  %v5512_v46 = vmul.f32 %v9782_v6, %v12662_v57  ;;  %v6026_v57 = vrot.slane %v12057_v48, 2 }
 0xb13   :  { %9020 = vmatmul.mubr.msk.bf16.vlgmr.msra.gmra.mrb[92].mxu1 %vm3986_vm14, %v5262_v19  ;;  %v5527_v58 = vsel %vm3986_vm14, %v5515_v54, 0  ;;  %v5516_v23 = vpack.c.bf16 %v5512_v46, %v5511_v50 }
 0xb14   :  { %9040 = vmatpush3.bf16.xpose.msra.mxu1 %v5521_v38  ;;  %9047 = vmatprep.mubr.msk.bf16.mxu1 %vm9873_vm11, %v12635_v13 }
 0xb15   :  { %9041 = vmatprep.subr.bf16.mxu1 %v12635_v13  ;;  %v5530_v52 = vsel %vm3986_vm14, %v5516_v23, 0 }
 0xb1c   :  { %9042 = vmatpush3.bf16.xpose.msra.mxu1 %v5524_v55 }
 0xb1d   :  { %9043 = vmatprep.subr.bf16.mxu1 %v12635_v13 }
 0xb24   :  { %9044 = vmatpush3.bf16.xpose.msra.mxu1 %v5527_v58 }
 0xb25   :  { %9045 = vmatprep.subr.bf16.mxu1 %v12635_v13 }
 0xb2c   :  { %9046 = vmatpush3.bf16.xpose.msra.mxu1 %v5530_v52 }
 0xb2d   :  { %9067 = vmatprep.subr.bf16.mxu1 %v12635_v13 }
 0xb33   :  { %9048 = vmatmul.mubr.msk.bf16.vlgmr.msra.gmra.mrb[96].mxu1 %vm3986_vm14, %v12057_v48 }
 0xb34   :  { %9075 = vmatprep.mubr.msk.bf16.mxu1 %vm9873_vm11, %v12635_v13 }
 0xb37   :  { %v5731_v60 = vpop.xlane.xlu0 %5730  ;;  %v5728_v45 = vpop.xlane.xlu1 %5727 }
 0xb38   :  { %9783 = vrcp.f32 %v5731_v60 }
 0xb39   :  { %9785 = vrcp.f32 %v5728_v45 }
 0xb3b   :  { %v6208_v10 = vpop.xlane.xlu0 %6207  ;;  %v6211_v41 = vpop.xlane.xlu1 %6210 }
 0xb3c   :  { %v6218_v14 = vsub.f32 %v11710_v34, %v6208_v10  ;;  %v6219_v30 = vsub.f32 %v11717_v32, %v6211_v41 }
 0xb3e   :  { %v6232_v53 = vmul.f32 1.442695, %v6218_v14  ;;  %v6234_v25 = vmul.f32 1.442695, %v6219_v30 }
 0xb3f   :  { %v5734_v3 = vpop.xlane.xlu0 %5733  ;;  %v5737_v40 = vpop.xlane.xlu1 %5736 }
 0xb40   :  { %9787 = vpow2.f32 %v6232_v53 }
 0xb41   :  { %9789 = vpow2.f32 %v6234_v25 }
 0xb42   :  { %v9784_v35 = vpop.eup %9783  ;;  %9791 = vrcp.f32 %v5734_v3 }
 0xb43   :  { %v9786_v42 = vpop.eup %9785  ;;  %9793 = vrcp.f32 %v5737_v40  ;;  %v5740_v12 = vpop.xlane.xlu0 %5739  ;;  %v5759_v8 = vmul.f32 %v9784_v35, %v11866_v1 }
 0xb44   :  { %9795 = vrcp.f32 %v5740_v12  ;;  %v5743_v19 = vpop.xlane.xlu1 %5742  ;;  %v5758_v34 = vmul.f32 %v9786_v42, %v11872_v62 }
 0xb45   :  { %9797 = vrcp.f32 %v5743_v19 }
 0xb46   :  { %v5766_v38 = vpack.c.bf16 %v5759_v8, %v5758_v34 }
 0xb47   :  { %v5746_v24 = vpop.xlane.xlu0 %5745 }
 0xb48   :  { %v5777_v32 = vsel %vm3986_vm14, %v5766_v38, 0  ;;  %v5749_v31 = vpop.xlane.xlu1 %5748  ;;  %9799 = vrcp.f32 %v5746_v24 }
 0xb49   :  { %9068 = vmatpush3.bf16.xpose.msra.mxu1 %v5777_v32  ;;  %9801 = vrcp.f32 %v5749_v31 }
 0xb4a   :  { %v12091_v47 = vpop.eup %9787  ;;  %9069 = vmatprep.subr.bf16.mxu1 %v12635_v13 }
 0xb4b   :  { %v12094_v11 = vpop.eup %9789  ;;  %v6254_v1 = vsel %vm3986_vm14, %v12091_v47, 0.0  ;;  %v5984_v23 = vpop.xlane.xlu0 %5983 }
 0xb4c   :  { %v9792_v15 = vpop.eup %9791  ;;  %v6257_v62 = vsel %vm3986_vm14, %v12094_v11, 0.0  ;;  %6255 = vadd.xlane.f32.xlu0 %v6254_v1  ;;  %v5987_v46 = vpop.xlane.xlu1 %5986  ;;  %9803 = vrcp.f32 %v5984_v23 }
 0xb4d   :  { %v9794_v43 = vpop.eup %9793  ;;  %6258 = vadd.xlane.f32.xlu1 %v6257_v62  ;;  %v5760_v49 = vmul.f32 %v9792_v15, %v11890_v33  ;;  %9805 = vrcp.f32 %v5987_v46 }
 0xb4e   :  { %v9796_v55 = vpop.eup %9795  ;;  %v5761_v56 = vmul.f32 %v9794_v43, %v11886_v0 }
 0xb4f   :  { %v9798_v22 = vpop.eup %9797  ;;  %v5762_v2 = vmul.f32 %v9796_v55, %v11903_v61  ;;  %v5990_v60 = vpop.xlane.xlu0 %5989 }
 0xb50   :  { %v5767_v37 = vpack.c.bf16 %v5761_v56, %v5760_v49  ;;  %v5763_v54 = vmul.f32 %v9798_v22, %v11909_v21  ;;  %v6343_v21 = vld [vmem:[%s12557_s14] sm:$0xff]  ;;  %v5993_v52 = vpop.xlane.xlu1 %5992  ;;  %9807 = vrcp.f32 %v5990_v60 }
 0xb51   :  { %9809 = vrcp.f32 %v5993_v52 }
 0xb52   :  { %v5780_v44 = vsel %vm3986_vm14, %v5767_v37, 0  ;;  %v9800_v6 = vpop.eup %9799  ;;  %v5768_v58 = vpack.c.bf16 %v5763_v54, %v5762_v2 }
 0xb53   :  { %9070 = vmatpush3.bf16.xpose.msra.mxu1 %v5780_v44  ;;  %v9802_v18 = vpop.eup %9801  ;;  %v5764_v33 = vmul.f32 %v9800_v6, %v11921_v29  ;;  %v6344_v29 = vld [vmem:[%s12557_s14 + $0x8] sm:$0xff]  ;;  %v5996_v41 = vpop.xlane.xlu0 %5995 }
 0xb54   :  { %9071 = vmatprep.subr.bf16.mxu1 %v12635_v13  ;;  %v5783_v50 = vsel %vm3986_vm14, %v5768_v58, 0  ;;  %v5765_v0 = vmul.f32 %v9802_v18, %v11925_v36 }
 0xb56   :  { %v5769_v61 = vpack.c.bf16 %v5765_v0, %v5764_v33  ;;  %v9804_v10 = vpop.eup %9803 }
 0xb57   :  { %v9806_v14 = vpop.eup %9805  ;;  %v6014_v53 = vmul.f32 %v9804_v10, %v11934_v63  ;;  %v6002_v3 = vpop.xlane.xlu0 %6001 }
 0xb58   :  { %v5786_v36 = vsel %vm3986_vm14, %v5769_v61, 0  ;;  %v5999_v45 = vpop.xlane.xlu1 %5998  ;;  %v6015_v25 = vmul.f32 %v9806_v14, %v11938_v59 }
 0xb59   :  { %9811 = vrcp.f32 %v5999_v45 }
 0xb5a   :  { %v9808_v40 = vpop.eup %9807  ;;  %v6022_v42 = vpack.c.bf16 %v6015_v25, %v6014_v53  ;;  %9813 = vrcp.f32 %v5996_v41 }
 0xb5b   :  { %9072 = vmatpush3.bf16.xpose.msra.mxu1 %v5783_v50  ;;  %v9810_v12 = vpop.eup %9809  ;;  %v6016_v38 = vmul.f32 %v9808_v40, %v11947_v39 }
 0xb5c   :  { %9073 = vmatprep.subr.bf16.mxu1 %v12635_v13  ;;  %v6005_v30 = vpop.xlane.xlu1 %6004  ;;  %v6031_v34 = vsel %vm3986_vm14, %v6022_v42, 0  ;;  %v6017_v32 = vmul.f32 %v9810_v12, %v11953_v51 }
 0xb5d   :  { %9815 = vrcp.f32 %v6005_v30 }
 0xb5e   :  { %6280 = vrot.lane.b32.xlu1 %v6026_v57, %s9874_s25  ;;  %v6023_v63 = vpack.c.bf16 %v6017_v32, %v6016_v38  ;;  %9817 = vrcp.f32 %v6002_v3 }
 0xb60   :  { %v6238_v35 = vpop.xlane.xlu1 %6237  ;;  %v6034_v51 = vsel %vm3986_vm14, %v6023_v63, 0 }
 0xb62   :  { %6347 = vperm.xlu1 %9495, %v6343_v21   ;;  %6352 = vperm.xlu0 %9494, %v6344_v29  }
 0xb63   :  { %9074 = vmatpush3.bf16.xpose.msra.mxu1 %v5786_v36  ;;  %v9812_v59 = vpop.eup %9811 }
 0xb64   :  { %9095 = vmatprep.subr.bf16.mxu1 %v12635_v13  ;;  %v9814_v1 = vpop.eup %9813  ;;  %v6019_v62 = vmul.f32 %v9812_v59, %v11973_v27 }
 0xb65   :  { %v6018_v49 = vmul.f32 %v9814_v1, %v11956_v7 }
 0xb66   :  { %6415 = vperm.xlu1 %9495, %v6343_v21  }
 0xb67   :  { %v6024_v56 = vpack.c.bf16 %v6019_v62, %v6018_v49  ;;  %v9816_v22 = vpop.eup %9815 }
 0xb68   :  { %v6241_v19 = vpop.xlane.xlu1 %6240  ;;  %v9818_v37 = vpop.eup %9817  ;;  %v6021_v2 = vmul.f32 %v9816_v22, %v11979_v20  ;;  %v9507_v22 = vld [vmem:[%s12556_s13] sm:$0xff]  }
 0xb69   :  { %9819 = vrcp.f32 %v6241_v19  ;;  %v6037_v44 = vsel %vm3986_vm14, %v6024_v56, 0  ;;  %v6020_v27 = vmul.f32 %v9818_v37, %v11969_v26 }
 0xb6a   :  { %6420 = vperm.xlu1 %9495, %v6344_v29   ;;  %9821 = vrcp.f32 %v6238_v35 }
 0xb6b   :  { %v6025_v6 = vpack.c.bf16 %v6021_v2, %v6020_v27 }
 0xb6c   :  { %v6244_v24 = vpop.xlane.xlu1 %6243 }
 0xb6d   :  { %v6040_v50 = vsel %vm3986_vm14, %v6025_v6, 0 }
 0xb70   :  { %v6247_v55 = vpop.xlane.xlu1 %6246 }
 0xb71   :  { %9823 = vrcp.f32 %v6247_v55 }
 0xb72   :  { %9825 = vrcp.f32 %v6244_v24 }
 0xb73   :  { %v9820_v58 = vpop.eup %9819 }
 0xb74   :  { %v6250_v54 = vpop.xlane.xlu1 %6249  ;;  %v9822_v7 = vpop.eup %9821  ;;  %v6269_v33 = vmul.f32 %v9820_v58, %v12006_v17 }
 0xb75   :  { %v6268_v20 = vmul.f32 %v9822_v7, %v11991_v4  ;;  %v9508_v7 = vld [vmem:[%s12556_s13] sm:$0xff]  }
 0xb77   :  { %v6276_v0 = vpack.c.bf16 %v6269_v33, %v6268_v20  ;;  %v9511_v33 = vld [vmem:[%s12558_s15 + $0x28] sm:$0xff]  }
 0xb78   :  { %v6253_v18 = vpop.xlane.xlu1 %6252  ;;  %v9512_v20 = vld [vmem:[%s12558_s15 + $0x8] sm:$0xff]  }
 0xb79   :  { %9827 = vrcp.f32 %v6253_v18  ;;  %v6286_v21 = vsel %vm3986_vm14, %v6276_v0, 0  ;;  %v9509_v18 = vld [vmem:[%s12558_s15 + $0x20] sm:$0xff]   ;;  %v9513_v0 = vld [vmem:[%s12558_s15 + $0x30] sm:$0xff]  }
 0xb7a   :  { %9829 = vrcp.f32 %v6250_v54 }
 0xb7b   :  { %v9824_v61 = vpop.eup %9823 }
 0xb7c   :  { %v9826_v26 = vpop.eup %9825  ;;  %v6271_v29 = vmul.f32 %v9824_v61, %v12016_v5  ;;  %v9514_v61 = vld [vmem:[%s12558_s15 + $0x10] sm:$0xff]  }
 0xb7d   :  { %v6270_v4 = vmul.f32 %v9826_v26, %v12011_v16  ;;  %v9515_v26 = vld [vmem:[%s12558_s15 + $0x38] sm:$0xff]  }
 0xb7f   :  { %v6277_v17 = vpack.c.bf16 %v6271_v29, %v6270_v4 }
 0xb81   :  { %v5772_v8 = vpop.permute.xlu0 %5771  ;;  %v6289_v52 = vsel %vm3986_vm14, %v6277_v17, 0 }
 0xb82   :  { %9076 = vmatmul.mubr.msk.bf16.vlgmr.msra.gmra.mrb[100].mxu1 %vm3986_vm14, %v5772_v8 }
 0xb83   :  { %9096 = vmatpush3.bf16.xpose.msra.mxu1 %v6031_v34  ;;  %9103 = vmatprep.mubr.msk.bf16.mxu1 %vm9873_vm11, %v12635_v13  ;;  %v9828_v36 = vpop.eup %9827 }
 0xb84   :  { %9097 = vmatprep.subr.bf16.mxu1 %v12635_v13  ;;  %v9830_v23 = vpop.eup %9829  ;;  %v6273_v5 = vmul.f32 %v9828_v36, %v12029_v9 }
 0xb85   :  { %v6272_v45 = vmul.f32 %v9830_v23, %v12023_v28 }
 0xb86   :  { %v4542_v31 = vpop.f32.mrb[80].mxu1 }
 0xb87   :  { %4549 = vst.msk [vmem:[#allocation10] sm:$0xf] %vm4548_vm1, %v4542_v31  ;;  %v8937_v15 = vpop.f32.mrb[81].mxu1  ;;  %v6278_v10 = vpack.c.bf16 %v6273_v5, %v6272_v45 }
 0xb88   :  { %v4545_v39 = vpop.f32.mrb[82].mxu1 }
 0xb89   :  { %v8938_v43 = vpop.f32.mrb[83].mxu1  ;;  %v6292_v16 = vsel %vm3986_vm14, %v6278_v10, 0 }
 0xb8b   :  { %9098 = vmatpush3.bf16.xpose.msra.mxu1 %v6034_v51 }
 0xb8c   :  { %9099 = vmatprep.subr.bf16.mxu1 %v12635_v13 }
 0xb93   :  { %9100 = vmatpush3.bf16.xpose.msra.mxu1 %v6037_v44 }
 0xb94   :  { %9101 = vmatprep.subr.bf16.mxu1 %v12635_v13 }
 0xb9b   :  { %9102 = vmatpush3.bf16.xpose.msra.mxu1 %v6040_v50  ;;  %v9510_v50 = vld [vmem:[%s12558_s15] sm:$0xff]  }
 0xb9c   :  { %9123 = vmatprep.subr.bf16.mxu1 %v12635_v13 }
 0xba2   :  { %9104 = vmatmul.mubr.msk.bf16.vlgmr.msra.gmra.mrb[104].mxu1 %vm3986_vm14, %v6026_v57 }
 0xba3   :  { %9124 = vmatpush3.bf16.xpose.msra.mxu1 %v6286_v21  ;;  %9131 = vmatprep.mubr.msk.bf16.mxu1 %vm9873_vm11, %v12635_v13  ;;  %v9516_v21 = vld [vmem:[%s12558_s15 + $0x18] sm:$0xff]  }
 0xba4   :  { %9125 = vmatprep.subr.bf16.mxu1 %v12635_v13 }
 0xba6   :  { %v4795_v46 = vpop.f32.mrb[84].mxu1 }
 0xba7   :  { %4801 = vst.msk [vmem:[#allocation10 + $0x10] sm:$0xf] %vm4548_vm1, %v4795_v46  ;;  %v8965_v48 = vpop.f32.mrb[85].mxu1 }
 0xba8   :  { %v4798_v57 = vpop.f32.mrb[86].mxu1 }
 0xba9   :  { %v8966_v60 = vpop.f32.mrb[87].mxu1 }
 0xbab   :  { %9126 = vmatpush3.bf16.xpose.msra.mxu1 %v6289_v52 }
 0xbac   :  { %9127 = vmatprep.subr.bf16.mxu1 %v12635_v13 }
 0xbb3   :  { %9128 = vmatpush3.bf16.xpose.msra.mxu1 %v6292_v16 }
 0xbb4   :  { %9129 = vmatprep.subr.bf16.mxu1 %v12635_v13 }
 0xbc6   :  { %v5053_v14 = vpop.f32.mrb[88].mxu1 }
 0xbc7   :  { %5059 = vst.msk [vmem:[#allocation10 + $0x4] sm:$0xf] %vm4548_vm1, %v5053_v14  ;;  %v8993_v41 = vpop.f32.mrb[89].mxu1 }
 0xbc8   :  { %v5056_v30 = vpop.f32.mrb[90].mxu1 }
 0xbc9   :  { %v8994_v53 = vpop.f32.mrb[91].mxu1  ;;  %v9517_v30 = vld [vmem:[%s12558_s15 + $0x40] sm:$0xff]  }
 0xbca   :  { %v9518_v53 = vld [vmem:[%s12558_s15 + $0x60] sm:$0xff]  }
 0xbce   :  { %v6338_v49 = vld [vmem:[#allocation10] sm:$0xff] }
 0xbd9   :  { %v6256_v25 = vpop.xlane.xlu0 %6255 }
 0xbda   :  { %v6259_v9 = vpop.xlane.xlu1 %6258  ;;  %9831 = vrcp.f32 %v6256_v25 }
 0xbdb   :  { %9833 = vrcp.f32 %v6259_v9 }
 0xbde   :  { %v6281_v32 = vpop.permute.xlu1 %6280 }
 0xbe1   :  { %v6353_v46 = vpop.permute.xlu0 %6352 }
 0xbe2   :  { %v6348_v29 = vpop.permute.xlu1 %6347 }
 0xbe4   :  { %v9832_v3 = vpop.eup %9831 }
 0xbe5   :  { %v9834_v40 = vpop.eup %9833  ;;  %v6274_v28 = vmul.f32 %v9832_v3, %v12091_v47 }
 0xbe6   :  { %v6275_v35 = vmul.f32 %v9834_v40, %v12094_v11  ;;  %v5312_v42 = vpop.f32.mrb[92].mxu1  ;;  %v6416_v52 = vpop.permute.xlu1 %6415 }
 0xbe7   :  { %5318 = vst.msk [vmem:[#allocation10 + $0x14] sm:$0xf] %vm4548_vm1, %v5312_v42  ;;  %v9021_v8 = vpop.f32.mrb[93].mxu1  ;;  %v9521_v42 = vld [vmem:[%s12558_s15 + $0x50] sm:$0xff]  }
 0xbe8   :  { %v6279_v12 = vpack.c.bf16 %v6275_v35, %v6274_v28  ;;  %v5315_v19 = vpop.f32.mrb[94].mxu1  ;;  %v9519_v28 = vld [vmem:[%s12558_s15 + $0x48] sm:$0xff]   ;;  %v9523_v8 = vld [vmem:[%s12558_s15 + $0x58] sm:$0xff]  }
 0xbe9   :  { %v9022_v38 = vpop.f32.mrb[95].mxu1  ;;  %v9520_v35 = vld [vmem:[%s12558_s15 + $0x68] sm:$0xff]   ;;  %v9524_v19 = vld [vmem:[%s12558_s15 + $0x78] sm:$0xff]  }
 0xbea   :  { %v6295_v34 = vsel %vm3986_vm14, %v6279_v12, 0  ;;  %v6421_v10 = vpop.permute.xlu1 %6420  ;;  %v9522_v12 = vld [vmem:[%s12558_s15 + $0x70] sm:$0xff]  }
 0xbeb   :  { %9130 = vmatpush3.bf16.xpose.msra.mxu1 %v6295_v34 }
 0xbec   :  { %9159 = vmatprep.subr.bf16.mxu1 %v12635_v13 }
 0xbee   :  { %v6406_v27 = vld [vmem:[#allocation10 + $0x10] sm:$0xff] }
 0xbf2   :  { %9132 = vmatmul.mubr.msk.bf16.vlgmr.msra.gmra.mrb[108].mxu1 %vm3986_vm14, %v6281_v32  ;;  %v9525_v32 = vld [vmem:[%s12558_s15 + $0x80] sm:$0xff]  }
 0xbf3   :  { %9167 = vmatprep.mubr.msk.bf16.mxu1 %vm9873_vm11, %v12635_v13  ;;  %9160 = vmatpush3.bf16.msra.mxu1 %v9510_v50 }
 0xbf4   :  { %9161 = vmatprep.subr.bf16.mxu1 %v12635_v13 }
 0xbf7   :  { %9162 = vmatpush3.bf16.msra.mxu1 %v9512_v20  ;;  %v9543_v20 = vld [vmem:[%s12558_s15 + $0x108] sm:$0xff]  }
 0xbf8   :  { %9163 = vmatprep.subr.bf16.mxu1 %v12635_v13 }
 0xbfb   :  { %9164 = vmatpush3.bf16.msra.mxu1 %v9514_v61  ;;  %v9545_v61 = vld [vmem:[%s12558_s15 + $0x110] sm:$0xff]  }
 0xbfc   :  { %9165 = vmatprep.subr.bf16.mxu1 %v12635_v13 }
 0xbff   :  { %9166 = vmatpush3.bf16.msra.mxu1 %v9516_v21  ;;  %v9547_v21 = vld [vmem:[%s12558_s15 + $0x118] sm:$0xff]  }
 0xc00   :  { %9183 = vmatprep.subr.bf16.mxu1 %v12635_v13 }
 0xc06   :  { %v5566_v47 = vpop.f32.mrb[96].mxu1 }
 0xc07   :  { %5572 = vst.msk [vmem:[#allocation10 + $0x8] sm:$0xf] %vm4548_vm1, %v5566_v47  ;;  %v9049_v11 = vpop.f32.mrb[97].mxu1  ;;  %v9526_v47 = vld [vmem:[%s12558_s15 + $0xa0] sm:$0xff]  }
 0xc08   :  { %v5569_v63 = vpop.f32.mrb[98].mxu1 }
 0xc09   :  { %v9050_v59 = vpop.f32.mrb[99].mxu1 }
 0xc0a   :  { %v9527_v59 = vld [vmem:[%s12558_s15 + $0x88] sm:$0xff]  }
 0xc55   :  { %v5822_v24 = vpop.f32.mrb[100].mxu1 }
 0xc56   :  { %5828 = vst.msk [vmem:[#allocation10 + $0x18] sm:$0xf] %vm4548_vm1, %v5822_v24  ;;  %v9077_v31 = vpop.f32.mrb[101].mxu1  ;;  %v9528_v24 = vld [vmem:[%s12558_s15 + $0xa8] sm:$0xff]  }
 0xc57   :  { %v5825_v1 = vpop.f32.mrb[102].mxu1  ;;  %v9529_v31 = vld [vmem:[%s12558_s15 + $0x90] sm:$0xff]  }
 0xc58   :  { %v9078_v15 = vpop.f32.mrb[103].mxu1  ;;  %v9530_v1 = vld [vmem:[%s12558_s15 + $0xb0] sm:$0xff]  }
 0xc59   :  { %v9531_v15 = vld [vmem:[%s12558_s15 + $0x98] sm:$0xff]  }
 0xc75   :  { %v6076_v39 = vpop.f32.mrb[104].mxu1 }
 0xc76   :  { %6082 = vst.msk [vmem:[#allocation10 + $0xc] sm:$0xf] %vm4548_vm1, %v6076_v39  ;;  %v9105_v51 = vpop.f32.mrb[105].mxu1  ;;  %v9532_v39 = vld [vmem:[%s12558_s15 + $0xb8] sm:$0xff]  }
 0xc77   :  { %v6079_v62 = vpop.f32.mrb[106].mxu1 }
 0xc78   :  { %v9106_v43 = vpop.f32.mrb[107].mxu1 }
 0xc79   :  { %v9533_v43 = vld [vmem:[%s12558_s15 + $0xc0] sm:$0xff]  }
 0xc7d   :  { %v6339_v55 = vld [vmem:[#allocation10 + $0x8] sm:$0xff] }
 0xc7e   :  { %v6342_v56 = vpack.c.bf16 %v6339_v55, %v6338_v49  ;;  %v9534_v49 = vld [vmem:[%s12558_s15 + $0xe0] sm:$0xff]  }
 0xc80   :  { %9136 = vmatpush3.bf16.msra.mxu0 %v6342_v56 }
 0xc81   :  { %9141 = vmatprep.subr.bf16.mxu0 %v12635_v13 }
 0xc83   :  { %9138 = vmatmul.mubr.msk.bf16.vlgmr.msra.gmra.mrb[120].mxu0 %vm2879_vm7, %v9507_v22  ;;  %v9535_v22 = vld [vmem:[%s12558_s15 + $0xc8] sm:$0xff]  }
 0xc84   :  { %9143 = vmatprep.mubr.msk.bf16.mxu0 %vm9873_vm11, %v12635_v13 }
 0xcc5   :  { %v6331_v37 = vpop.f32.mrb[108].mxu1 }
 0xcc6   :  { %6337 = vst.msk [vmem:[#allocation10 + $0x1c] sm:$0xf] %vm4548_vm1, %v6331_v37  ;;  %v9133_v44 = vpop.f32.mrb[109].mxu1  ;;  %v9536_v37 = vld [vmem:[%s12558_s15 + $0xe8] sm:$0xff]  }
 0xcc7   :  { %v6334_v2 = vpop.f32.mrb[110].mxu1  ;;  %v9537_v44 = vld [vmem:[%s12558_s15 + $0xd0] sm:$0xff]  }
 0xcc8   :  { %v9134_v54 = vpop.f32.mrb[111].mxu1  ;;  %v9538_v2 = vld [vmem:[%s12558_s15 + $0xf0] sm:$0xff]  }
 0xcc9   :  { %v9539_v54 = vld [vmem:[%s12558_s15 + $0xd8] sm:$0xff]  }
 0xccd   :  { %v6407_v6 = vld [vmem:[#allocation10 + $0x18] sm:$0xff] }
 0xcce   :  { %v6410_v58 = vpack.c.bf16 %v6407_v6, %v6406_v27  ;;  %v9540_v27 = vld [vmem:[%s12558_s15 + $0xf8] sm:$0xff]  }
 0xcd0   :  { %9142 = vmatpush3.bf16.msra.mxu0 %v6410_v58 }
 0xcd1   :  { %9147 = vmatprep.subr.bf16.mxu0 %v12635_v13 }
 0xcd3   :  { %9144 = vmatmul.mubr.msk.bf16.vlgmr.msra.gmra.mrb[124].mxu0 %vm2879_vm7, %v9508_v7  ;;  %v9541_v7 = vld [vmem:[%s12558_s15 + $0x100] sm:$0xff]  }
 0xcd4   :  { %9155 = vmatprep.mubr.msk.bf16.mxu0 %vm9873_vm11, %v12635_v13  ;;  %9148 = vmatpush3.bf16.msra.mxu0 %v9509_v18  ;;  %v9542_v18 = vld [vmem:[%s12558_s15 + $0x120] sm:$0xff]  }
 0xcd5   :  { %9149 = vmatprep.subr.bf16.mxu0 %v12635_v13 }
 0xcd8   :  { %9150 = vmatpush3.bf16.msra.mxu0 %v9511_v33 }
 0xcd9   :  { %9151 = vmatprep.subr.bf16.mxu0 %v12635_v13 }
 0xcdc   :  { %9152 = vmatpush3.bf16.msra.mxu0 %v9513_v0  ;;  %v9544_v0 = vld [vmem:[%s12558_s15 + $0x128] sm:$0xff]  }
 0xcdd   :  { %9153 = vmatprep.subr.bf16.mxu0 %v12635_v13 }
 0xce0   :  { %9154 = vmatpush3.bf16.msra.mxu0 %v9515_v26  ;;  %v9546_v26 = vld [vmem:[%s12558_s15 + $0x130] sm:$0xff]  }
 0xce1   :  { %9171 = vmatprep.subr.bf16.mxu0 %v12635_v13 }
 0xd56   :  { %v6397_v4 = vpop.f32.mrb[120].mxu0 }
 0xd57   :  { %v6398_v17 = vadd.f32 %v6397_v4, %v6348_v29  ;;  %v9139_v36 = vpop.f32.mrb[121].mxu0  ;;  %v9548_v29 = vld [vmem:[%s12558_s15 + $0x138] sm:$0xff]  }
 0xd58   :  { %v6400_v23 = vpop.f32.mrb[122].mxu0  ;;  %v9549_v36 = vld [vmem:[%s12558_s15 + $0x140] sm:$0xff]  }
 0xd59   :  { %6404 = vst.msk [vmem:[#allocation10] sm:$0xff] %vm3986_vm14, %v6398_v17  ;;  %v6401_v48 = vadd.f32 %v6400_v23, %v6353_v46  ;;  %v9140_v57 = vpop.f32.mrb[123].mxu0  ;;  %v9550_v46 = vld [vmem:[%s12558_s15 + $0x160] sm:$0xff]  }
 0xd5a   :  { %v9551_v57 = vld [vmem:[%s12558_s15 + $0x148] sm:$0xff]  }
 0xd5b   :  { %6405 = vst.msk [vmem:[#allocation10 + $0x8] sm:$0xff] %vm3986_vm14, %v6401_v48 }
 0xda6   :  { %v6465_v5 = vpop.f32.mrb[124].mxu0 }
 0xda7   :  { %v6466_v60 = vadd.f32 %v6465_v5, %v6416_v52  ;;  %v9145_v45 = vpop.f32.mrb[125].mxu0  ;;  %v9552_v52 = vld [vmem:[%s12558_s15 + $0x168] sm:$0xff]   ;;  %v9553_v5 = vld [vmem:[%s12558_s15 + $0x150] sm:$0xff]  }
 0xda8   :  { %v6468_v16 = vpop.f32.mrb[126].mxu0  ;;  %v9555_v45 = vld [vmem:[%s12558_s15 + $0x158] sm:$0xff]  }
 0xda9   :  { %6472 = vst.msk [vmem:[#allocation10 + $0x10] sm:$0xff] %vm3986_vm14, %v6466_v60  ;;  %v6469_v14 = vadd.f32 %v6468_v16, %v6421_v10  ;;  %v9146_v41 = vpop.f32.mrb[127].mxu0  ;;  %v9554_v60 = vld [vmem:[%s12558_s15 + $0x170] sm:$0xff]   ;;  %v9556_v10 = vld [vmem:[%s12558_s15 + $0x178] sm:$0xff]  }
 0xdaa   :  { %v9557_v41 = vld [vmem:[%s12558_s15 + $0x180] sm:$0xff]  }
 0xdab   :  { %6473 = vst.msk [vmem:[#allocation10 + $0x18] sm:$0xff] %vm3986_vm14, %v6469_v14 }
 0xdb0   :  { %v6485_v25 = vld [vmem:[#allocation10 + $0x1] ss:$16 sm:$0x3]  ;;  %v6474_v9 = vld [vmem:[#allocation10] ss:$16 sm:$0x3] }
 0xdb1   :  { %v6486_v3 = vpack.c.bf16 %v6485_v25, %v6485_v25  ;;  %v6475_v40 = vpack.c.bf16 %v6474_v9, %v6474_v9  ;;  %v6631_v34 = vld [vmem:[#allocation10 + $0x2] ss:$16 sm:$0x3]  ;;  %v6711_v38 = vld [vmem:[#allocation10 + $0x3] ss:$16 sm:$0x3] }
 0xdb2   :  { %v6632_v11 = vpack.c.bf16 %v6631_v34, %v6631_v34  ;;  %v6712_v63 = vpack.c.bf16 %v6711_v38, %v6711_v38  ;;  %v6791_v51 = vld [vmem:[#allocation10 + $0x4] ss:$16 sm:$0x3]  ;;  %v6871_v62 = vld [vmem:[#allocation10 + $0x5] ss:$16 sm:$0x3] }
 0xdb3   :  { %9156 = vmatmul.mubr.msk.bf16.vlgmr.msra.gmra.mrb[128].mxu0 %vm3986_vm14, %v6486_v3  ;;  %9168 = vmatmul.mubr.msk.bf16.vlgmr.msra.gmra.mrb[112].mxu1 %vm3986_vm14, %v6475_v40  ;;  %v6792_v55 = vpack.c.bf16 %v6791_v51, %v6791_v51  ;;  %v6872_v56 = vpack.c.bf16 %v6871_v62, %v6871_v62  ;;  %v6951_v6 = vld [vmem:[#allocation10 + $0x6] ss:$16 sm:$0x3]  ;;  %v7031_v58 = vld [vmem:[#allocation10 + $0x7] ss:$16 sm:$0x3] }
 0xdb4   :  { %9172 = vmatpush3.bf16.msra.mxu0 %v9517_v30  ;;  %9184 = vmatpush3.bf16.msra.mxu1 %v9518_v53  ;;  %v6952_v50 = vpack.c.bf16 %v6951_v6, %v6951_v6  ;;  %v7032_v33 = vpack.c.bf16 %v7031_v58, %v7031_v58  ;;  %v7111_v4 = vld [vmem:[#allocation10 + $0x8] ss:$16 sm:$0x3]  ;;  %v7191_v17 = vld [vmem:[#allocation10 + $0x9] ss:$16 sm:$0x3] }
 0xdb5   :  { %9173 = vmatprep.subr.bf16.mxu0 %v12635_v13  ;;  %9185 = vmatprep.subr.bf16.mxu1 %v12635_v13  ;;  %v7112_v23 = vpack.c.bf16 %v7111_v4, %v7111_v4  ;;  %v7192_v48 = vpack.c.bf16 %v7191_v17, %v7191_v17  ;;  %v7271_v16 = vld [vmem:[#allocation10 + $0xa] ss:$16 sm:$0x3]  ;;  %v7351_v14 = vld [vmem:[#allocation10 + $0xb] ss:$16 sm:$0x3] }
 0xdb6   :  { %9179 = vmatprep.mubr.msk.bf16.mxu0 %vm9873_vm11, %v12635_v13  ;;  %9191 = vmatprep.mubr.msk.bf16.mxu1 %vm9873_vm11, %v12635_v13  ;;  %v9558_v30 = vld [vmem:[%s12558_s15 + $0x1a0] sm:$0xff]   ;;  %v7272_v53 = vpack.c.bf16 %v7271_v16, %v7271_v16  ;;  %v7352_v25 = vpack.c.bf16 %v7351_v14, %v7351_v14  ;;  %v9559_v9 = vld [vmem:[%s12558_s15 + $0x188] sm:$0xff]   ;;  %v9561_v40 = vld [vmem:[%s12558_s15 + $0x190] sm:$0xff]  }
 0xdb7   :  { %v9560_v3 = vld [vmem:[%s12558_s15 + $0x1a8] sm:$0xff]   ;;  %v9566_v34 = vld [vmem:[%s12558_s15 + $0x1e0] sm:$0xff]  }
 0xdb8   :  { %9174 = vmatpush3.bf16.msra.mxu0 %v9519_v28  ;;  %9186 = vmatpush3.bf16.msra.mxu1 %v9520_v35  ;;  %v9562_v28 = vld [vmem:[%s12558_s15 + $0x1b0] sm:$0xff]   ;;  %v9563_v35 = vld [vmem:[%s12558_s15 + $0x198] sm:$0xff]   ;;  %v9573_v62 = vld [vmem:[%s12560_s17] sm:$0xff]  }
 0xdb9   :  { %9175 = vmatprep.subr.bf16.mxu0 %v12635_v13  ;;  %9187 = vmatprep.subr.bf16.mxu1 %v12635_v13 }
 0xdbc   :  { %9176 = vmatpush3.bf16.msra.mxu0 %v9521_v42  ;;  %9188 = vmatpush3.bf16.msra.mxu1 %v9522_v12  ;;  %v9564_v42 = vld [vmem:[%s12558_s15 + $0x1b8] sm:$0xff]  }
 0xdbd   :  { %9177 = vmatprep.subr.bf16.mxu0 %v12635_v13  ;;  %9189 = vmatprep.subr.bf16.mxu1 %v12635_v13  ;;  %v7431_v12 = vld [vmem:[#allocation10 + $0xc] ss:$16 sm:$0x3] }
 0xdbe   :  { %v7432_v38 = vpack.c.bf16 %v7431_v12, %v7431_v12 }
 0xdc0   :  { %9178 = vmatpush3.bf16.msra.mxu0 %v9523_v8  ;;  %9190 = vmatpush3.bf16.msra.mxu1 %v9524_v19  ;;  %v7511_v8 = vld [vmem:[#allocation10 + $0xd] ss:$16 sm:$0x3]  ;;  %v9565_v19 = vld [vmem:[%s12558_s15 + $0x1c0] sm:$0xff]  }
 0xdc1   :  { %9195 = vmatprep.subr.bf16.mxu0 %v12635_v13  ;;  %9207 = vmatprep.subr.bf16.mxu1 %v12635_v13 }
 0xdc3   :  { %9180 = vmatmul.mubr.msk.bf16.vlgmr.msra.gmra.mrb[132].mxu0 %vm3986_vm14, %v6632_v11  ;;  %9192 = vmatmul.mubr.msk.bf16.vlgmr.msra.gmra.mrb[116].mxu1 %vm3986_vm14, %v6712_v63  ;;  %v9568_v11 = vld [vmem:[%s12558_s15 + $0x1e8] sm:$0xff]   ;;  %v9569_v63 = vld [vmem:[%s12558_s15 + $0x1d0] sm:$0xff]  }
 0xdc4   :  { %9196 = vmatpush3.bf16.msra.mxu0 %v9525_v32  ;;  %9208 = vmatpush3.bf16.msra.mxu1 %v9526_v47  ;;  %v7512_v32 = vpack.c.bf16 %v7511_v8, %v7511_v8  ;;  %v9567_v47 = vld [vmem:[%s12558_s15 + $0x1c8] sm:$0xff]  }
 0xdc5   :  { %9197 = vmatprep.subr.bf16.mxu0 %v12635_v13  ;;  %9209 = vmatprep.subr.bf16.mxu1 %v12635_v13 }
 0xdc6   :  { %9203 = vmatprep.mubr.msk.bf16.mxu0 %vm9873_vm11, %v12635_v13  ;;  %9215 = vmatprep.mubr.msk.bf16.mxu1 %vm9873_vm11, %v12635_v13 }
 0xdc8   :  { %9198 = vmatpush3.bf16.msra.mxu0 %v9527_v59  ;;  %9210 = vmatpush3.bf16.msra.mxu1 %v9528_v24  ;;  %v9570_v59 = vld [vmem:[%s12558_s15 + $0x1f0] sm:$0xff]   ;;  %v9571_v24 = vld [vmem:[%s12558_s15 + $0x1d8] sm:$0xff]  }
 0xdc9   :  { %9199 = vmatprep.subr.bf16.mxu0 %v12635_v13  ;;  %9211 = vmatprep.subr.bf16.mxu1 %v12635_v13 }
 0xdcc   :  { %9200 = vmatpush3.bf16.msra.mxu0 %v9529_v31  ;;  %9212 = vmatpush3.bf16.msra.mxu1 %v9530_v1  ;;  %v9572_v31 = vld [vmem:[%s12558_s15 + $0x1f8] sm:$0xff]  }
 0xdcd   :  { %9201 = vmatprep.subr.bf16.mxu0 %v12635_v13  ;;  %9213 = vmatprep.subr.bf16.mxu1 %v12635_v13  ;;  %v7591_v1 = vld [vmem:[#allocation10 + $0xe] ss:$16 sm:$0x3] }
 0xdd0   :  { %9202 = vmatpush3.bf16.msra.mxu0 %v9531_v15  ;;  %9214 = vmatpush3.bf16.msra.mxu1 %v9532_v39  ;;  %v7671_v15 = vld [vmem:[#allocation10 + $0xf] ss:$16 sm:$0x3]  ;;  %v7592_v39 = vpack.c.bf16 %v7591_v1, %v7591_v1 }
 0xdd1   :  { %9219 = vmatprep.subr.bf16.mxu0 %v12635_v13  ;;  %9231 = vmatprep.subr.bf16.mxu1 %v12635_v13  ;;  %v7672_v51 = vpack.c.bf16 %v7671_v15, %v7671_v15 }
 0xdd3   :  { %9204 = vmatmul.mubr.msk.bf16.vlgmr.msra.gmra.mrb[136].mxu0 %vm3986_vm14, %v6792_v55  ;;  %9216 = vmatmul.mubr.msk.bf16.vlgmr.msra.gmra.mrb[120].mxu1 %vm3986_vm14, %v6872_v56  ;;  %v9576_v55 = vld [vmem:[%s12560_s17 + $0x18] sm:$0xff]  }
 0xdd4   :  { %9220 = vmatpush3.bf16.msra.mxu0 %v9533_v43  ;;  %9232 = vmatpush3.bf16.msra.mxu1 %v9534_v49  ;;  %v9574_v43 = vld [vmem:[%s12560_s17 + $0x8] sm:$0xff]   ;;  %v9575_v49 = vld [vmem:[%s12560_s17 + $0x10] sm:$0xff]  }
 0xdd5   :  { %9221 = vmatprep.subr.bf16.mxu0 %v12635_v13  ;;  %9233 = vmatprep.subr.bf16.mxu1 %v12635_v13 }
 0xdd6   :  { %9227 = vmatprep.mubr.msk.bf16.mxu0 %vm9873_vm11, %v12635_v13  ;;  %9239 = vmatprep.mubr.msk.bf16.mxu1 %vm9873_vm11, %v12635_v13 }
 0xdd8   :  { %9222 = vmatpush3.bf16.msra.mxu0 %v9535_v22  ;;  %9234 = vmatpush3.bf16.msra.mxu1 %v9536_v37 }
 0xdd9   :  { %9223 = vmatprep.subr.bf16.mxu0 %v12635_v13  ;;  %9235 = vmatprep.subr.bf16.mxu1 %v12635_v13 }
 0xddc   :  { %9224 = vmatpush3.bf16.msra.mxu0 %v9537_v44  ;;  %9236 = vmatpush3.bf16.msra.mxu1 %v9538_v2 }
 0xddd   :  { %9225 = vmatprep.subr.bf16.mxu0 %v12635_v13  ;;  %9237 = vmatprep.subr.bf16.mxu1 %v12635_v13 }
 0xde0   :  { %9226 = vmatpush3.bf16.msra.mxu0 %v9539_v54  ;;  %9238 = vmatpush3.bf16.msra.mxu1 %v9540_v27 }
 0xde1   :  { %9243 = vmatprep.subr.bf16.mxu0 %v12635_v13  ;;  %9255 = vmatprep.subr.bf16.mxu1 %v12635_v13 }
 0xde3   :  { %9228 = vmatmul.mubr.msk.bf16.vlgmr.msra.gmra.mrb[140].mxu0 %vm3986_vm14, %v6952_v50  ;;  %9240 = vmatmul.mubr.msk.bf16.vlgmr.msra.gmra.mrb[124].mxu1 %vm3986_vm14, %v7032_v33 }
 0xde4   :  { %9244 = vmatpush3.bf16.msra.mxu0 %v9541_v7  ;;  %9256 = vmatpush3.bf16.msra.mxu1 %v9542_v18 }
 0xde5   :  { %9245 = vmatprep.subr.bf16.mxu0 %v12635_v13  ;;  %9257 = vmatprep.subr.bf16.mxu1 %v12635_v13 }
 0xde6   :  { %9251 = vmatprep.mubr.msk.bf16.mxu0 %vm9873_vm11, %v12635_v13  ;;  %9263 = vmatprep.mubr.msk.bf16.mxu1 %vm9873_vm11, %v12635_v13 }
 0xde8   :  { %9246 = vmatpush3.bf16.msra.mxu0 %v9543_v20  ;;  %9258 = vmatpush3.bf16.msra.mxu1 %v9544_v0 }
 0xde9   :  { %9247 = vmatprep.subr.bf16.mxu0 %v12635_v13  ;;  %9259 = vmatprep.subr.bf16.mxu1 %v12635_v13 }
 0xdec   :  { %9248 = vmatpush3.bf16.msra.mxu0 %v9545_v61  ;;  %9260 = vmatpush3.bf16.msra.mxu1 %v9546_v26 }
 0xded   :  { %9249 = vmatprep.subr.bf16.mxu0 %v12635_v13  ;;  %9261 = vmatprep.subr.bf16.mxu1 %v12635_v13 }
 0xdf0   :  { %9250 = vmatpush3.bf16.msra.mxu0 %v9547_v21  ;;  %9262 = vmatpush3.bf16.msra.mxu1 %v9548_v29 }
 0xdf1   :  { %9267 = vmatprep.subr.bf16.mxu0 %v12635_v13  ;;  %9279 = vmatprep.subr.bf16.mxu1 %v12635_v13 }
 0xdf3   :  { %9252 = vmatmul.mubr.msk.bf16.vlgmr.msra.gmra.mrb[144].mxu0 %vm3986_vm14, %v7112_v23  ;;  %9264 = vmatmul.mubr.msk.bf16.vlgmr.msra.gmra.mrb[128].mxu1 %vm3986_vm14, %v7192_v48 }
 0xdf4   :  { %9268 = vmatpush3.bf16.msra.mxu0 %v9549_v36  ;;  %9280 = vmatpush3.bf16.msra.mxu1 %v9550_v46 }
 0xdf5   :  { %9269 = vmatprep.subr.bf16.mxu0 %v12635_v13  ;;  %9281 = vmatprep.subr.bf16.mxu1 %v12635_v13 }
 0xdf6   :  { %9275 = vmatprep.mubr.msk.bf16.mxu0 %vm9873_vm11, %v12635_v13  ;;  %9287 = vmatprep.mubr.msk.bf16.mxu1 %vm9873_vm11, %v12635_v13 }
 0xdf8   :  { %9270 = vmatpush3.bf16.msra.mxu0 %v9551_v57  ;;  %9282 = vmatpush3.bf16.msra.mxu1 %v9552_v52 }
 0xdf9   :  { %9271 = vmatprep.subr.bf16.mxu0 %v12635_v13  ;;  %9283 = vmatprep.subr.bf16.mxu1 %v12635_v13 }
 0xdfc   :  { %9272 = vmatpush3.bf16.msra.mxu0 %v9553_v5  ;;  %9284 = vmatpush3.bf16.msra.mxu1 %v9554_v60 }
 0xdfd   :  { %9273 = vmatprep.subr.bf16.mxu0 %v12635_v13  ;;  %9285 = vmatprep.subr.bf16.mxu1 %v12635_v13 }
 0xe00   :  { %9274 = vmatpush3.bf16.msra.mxu0 %v9555_v45  ;;  %9286 = vmatpush3.bf16.msra.mxu1 %v9556_v10 }
 0xe01   :  { %9291 = vmatprep.subr.bf16.mxu0 %v12635_v13  ;;  %9303 = vmatprep.subr.bf16.mxu1 %v12635_v13 }
 0xe03   :  { %9276 = vmatmul.mubr.msk.bf16.vlgmr.msra.gmra.mrb[148].mxu0 %vm3986_vm14, %v7272_v53  ;;  %9288 = vmatmul.mubr.msk.bf16.vlgmr.msra.gmra.mrb[132].mxu1 %vm3986_vm14, %v7352_v25 }
 0xe04   :  { %9292 = vmatpush3.bf16.msra.mxu0 %v9557_v41  ;;  %9304 = vmatpush3.bf16.msra.mxu1 %v9558_v30 }
 0xe05   :  { %9293 = vmatprep.subr.bf16.mxu0 %v12635_v13  ;;  %9305 = vmatprep.subr.bf16.mxu1 %v12635_v13 }
 0xe06   :  { %9299 = vmatprep.mubr.msk.bf16.mxu0 %vm9873_vm11, %v12635_v13  ;;  %9311 = vmatprep.mubr.msk.bf16.mxu1 %vm9873_vm11, %v12635_v13 }
 0xe08   :  { %9294 = vmatpush3.bf16.msra.mxu0 %v9559_v9  ;;  %9306 = vmatpush3.bf16.msra.mxu1 %v9560_v3 }
 0xe09   :  { %9295 = vmatprep.subr.bf16.mxu0 %v12635_v13  ;;  %9307 = vmatprep.subr.bf16.mxu1 %v12635_v13 }
 0xe0c   :  { %9296 = vmatpush3.bf16.msra.mxu0 %v9561_v40  ;;  %9308 = vmatpush3.bf16.msra.mxu1 %v9562_v28 }
 0xe0d   :  { %9297 = vmatprep.subr.bf16.mxu0 %v12635_v13  ;;  %9309 = vmatprep.subr.bf16.mxu1 %v12635_v13 }
 0xe10   :  { %9298 = vmatpush3.bf16.msra.mxu0 %v9563_v35  ;;  %9310 = vmatpush3.bf16.msra.mxu1 %v9564_v42 }
 0xe11   :  { %9315 = vmatprep.subr.bf16.mxu0 %v12635_v13  ;;  %9327 = vmatprep.subr.bf16.mxu1 %v12635_v13 }
 0xe13   :  { %9300 = vmatmul.mubr.msk.bf16.vlgmr.msra.gmra.mrb[152].mxu0 %vm3986_vm14, %v7432_v38  ;;  %9312 = vmatmul.mubr.msk.bf16.vlgmr.msra.gmra.mrb[136].mxu1 %vm3986_vm14, %v7512_v32 }
 0xe14   :  { %9316 = vmatpush3.bf16.msra.mxu0 %v9565_v19  ;;  %9328 = vmatpush3.bf16.msra.mxu1 %v9566_v34 }
 0xe15   :  { %9317 = vmatprep.subr.bf16.mxu0 %v12635_v13  ;;  %9329 = vmatprep.subr.bf16.mxu1 %v12635_v13 }
 0xe16   :  { %9323 = vmatprep.mubr.msk.bf16.mxu0 %vm9873_vm11, %v12635_v13  ;;  %9335 = vmatprep.mubr.msk.bf16.mxu1 %vm9873_vm11, %v12635_v13 }
 0xe18   :  { %9318 = vmatpush3.bf16.msra.mxu0 %v9567_v47  ;;  %9330 = vmatpush3.bf16.msra.mxu1 %v9568_v11 }
 0xe19   :  { %9319 = vmatprep.subr.bf16.mxu0 %v12635_v13  ;;  %9331 = vmatprep.subr.bf16.mxu1 %v12635_v13 }
 0xe1c   :  { %9320 = vmatpush3.bf16.msra.mxu0 %v9569_v63  ;;  %9332 = vmatpush3.bf16.msra.mxu1 %v9570_v59 }
 0xe1d   :  { %9321 = vmatprep.subr.bf16.mxu0 %v12635_v13  ;;  %9333 = vmatprep.subr.bf16.mxu1 %v12635_v13 }
 0xe20   :  { %9322 = vmatpush3.bf16.msra.mxu0 %v9571_v24  ;;  %9334 = vmatpush3.bf16.msra.mxu1 %v9572_v31 }
 0xe21   :  { %9339 = vmatprep.subr.bf16.mxu0 %v12635_v13  ;;  %9351 = vmatprep.subr.bf16.mxu1 %v12635_v13 }
 0xe23   :  { %9324 = vmatmul.mubr.msk.bf16.vlgmr.msra.gmra.mrb[156].mxu0 %vm3986_vm14, %v7592_v39  ;;  %9336 = vmatmul.mubr.msk.bf16.vlgmr.msra.gmra.mrb[140].mxu1 %vm3986_vm14, %v7672_v51 }
 0xe24   :  { %9347 = vmatprep.mubr.msk.bf16.mxu0 %vm9873_vm11, %v12635_v13  ;;  %9355 = vmatprep.mubr.msk.bf16.mxu1 %vm9873_vm11, %v12635_v13 }
 0xe25   :  { %9340 = vmatpush3.bf16.msra.mxu0 %v9573_v62 }
 0xe26   :  { %9341 = vmatprep.subr.bf16.mxu0 %v12635_v13 }
 0xe29   :  { %9342 = vmatpush3.bf16.msra.mxu0 %v9574_v43 }
 0xe2a   :  { %9343 = vmatprep.subr.bf16.mxu0 %v12635_v13 }
 0xe2d   :  { %9344 = vmatpush3.bf16.msra.mxu0 %v9575_v49 }
 0xe2e   :  { %9345 = vmatprep.subr.bf16.mxu0 %v12635_v13 }
 0xe31   :  { %9346 = vmatpush3.bf16.msra.mxu0 %v9576_v55 }
 0xe86   :  { %v6557_v56 = vpop.f32.mrb[128].mxu0  ;;  %v6624_v22 = vpop.f32.mrb[112].mxu1 }
 0xe87   :  { %v6625_v37 = vadd.f32 %v6624_v22, %v6557_v56  ;;  %v9157_v44 = vpop.f32.mrb[129].mxu0  ;;  %v9169_v2 = vpop.f32.mrb[113].mxu1 }
 0xe88   :  { %v6560_v54 = vpop.f32.mrb[130].mxu0  ;;  %v6627_v27 = vpop.f32.mrb[114].mxu1 }
 0xe89   :  { %v9158_v6 = vpop.f32.mrb[131].mxu0  ;;  %v9170_v58 = vpop.f32.mrb[115].mxu1 }
 0xe96   :  { %v6703_v7 = vpop.f32.mrb[132].mxu0  ;;  %v6783_v18 = vpop.f32.mrb[116].mxu1 }
 0xe97   :  { %v6709_v50 = vadd.f32 %v6703_v7, %v6625_v37  ;;  %v9181_v33 = vpop.f32.mrb[133].mxu0  ;;  %v9193_v20 = vpop.f32.mrb[117].mxu1 }
 0xe98   :  { %v6706_v0 = vpop.f32.mrb[134].mxu0  ;;  %v6786_v61 = vpop.f32.mrb[118].mxu1 }
 0xe99   :  { %v6789_v26 = vadd.f32 %v6783_v18, %v6709_v50  ;;  %v9182_v21 = vpop.f32.mrb[135].mxu0  ;;  %v9194_v29 = vpop.f32.mrb[119].mxu1  ;;  %v8342_v50 = vld [vmem:[%s12559_s16] ss:$0 sm:$0xff] }
 0xea6   :  { %v6863_v4 = vpop.f32.mrb[136].mxu0  ;;  %v6943_v17 = vpop.f32.mrb[120].mxu1 }
 0xea7   :  { %v6869_v36 = vadd.f32 %v6863_v4, %v6789_v26  ;;  %v9205_v46 = vpop.f32.mrb[137].mxu0  ;;  %v9217_v23 = vpop.f32.mrb[121].mxu1 }
 0xea8   :  { %v6866_v48 = vpop.f32.mrb[138].mxu0  ;;  %v6946_v57 = vpop.f32.mrb[122].mxu1  ;;  %v8343_v46 = vld [vmem:[%s12561_s18] ss:$0 sm:$0xff]  ;;  %s9882_s18 = smov [#allocation11]  }
 0xea9   :  { %v6949_v52 = vadd.f32 %v6943_v17, %v6869_v36  ;;  %v9206_v5 = vpop.f32.mrb[139].mxu0  ;;  %v9218_v60 = vpop.f32.mrb[123].mxu1  ;;  %v9577_v17 = vld [vmem:[%s12562_s19] sm:$0xff]   ;;  %v9578_v36 = vld [vmem:[%s12562_s19 + $0x8] sm:$0xff]   ;;  %s7929_s19 = sshll.u32 %s9882_s18, 4  ;;  %s7930_s19 = int_to_ptr.vmem [resolvable:$true] %s7929_s19 }
 0xeaa   :  { %9352 = vmatpush3.bf16.msra.mxu1 %v9577_v17  ;;  %p9852_p1 = scmp.lt.s32.totalorder %s7930_s19, %s7930_s19 }
 0xeab   :  { %9353 = vmatprep.subr.bf16.mxu1 %v12635_v13  ;;  %v8349_v13 = vld [vmem:[%s12563_s20] ss:$0 sm:$0xff]  ;;  %s9847_s20 = scalar_lea.vmem %s7930_s19, 32 }
 0xeac   :  { %p9848_p0 = scmp.ne.s32.totalorder %s7930_s19, %s9847_s20  ;;  %p9853_p2 = scmp.lt.s32.totalorder %s9847_s20, %s9847_s20 }
 0xeae   :  { %9354 = vmatpush3.bf16.msra.mxu1 %v9578_v36  ;;  %p9854_p3 = por %p9853_p2, %p9852_p1 }
 0xeb0   :  { %p9855_p4 = pnand %p9854_p3, %p9848_p0 }
 0xeb6   :  { %v7023_v45 = vpop.f32.mrb[140].mxu0  ;;  %v7103_v10 = vpop.f32.mrb[124].mxu1 }
 0xeb7   :  { %v7029_v16 = vadd.f32 %v7023_v45, %v6949_v52  ;;  %v9229_v14 = vpop.f32.mrb[141].mxu0  ;;  %v9241_v41 = vpop.f32.mrb[125].mxu1 }
 0xeb8   :  { %v7026_v30 = vpop.f32.mrb[142].mxu0  ;;  %v7106_v53 = vpop.f32.mrb[126].mxu1 }
 0xeb9   :  { %v7109_v25 = vadd.f32 %v7103_v10, %v7029_v16  ;;  %v9230_v9 = vpop.f32.mrb[143].mxu0  ;;  %v9242_v3 = vpop.f32.mrb[127].mxu1 }
 0xec6   :  { %v7183_v40 = vpop.f32.mrb[144].mxu0  ;;  %v7263_v28 = vpop.f32.mrb[128].mxu1 }
 0xec7   :  { %v7189_v35 = vadd.f32 %v7183_v40, %v7109_v25  ;;  %v9253_v42 = vpop.f32.mrb[145].mxu0  ;;  %v9265_v12 = vpop.f32.mrb[129].mxu1 }
 0xec8   :  { %v7186_v8 = vpop.f32.mrb[146].mxu0  ;;  %v7266_v19 = vpop.f32.mrb[130].mxu1 }
 0xec9   :  { %v7269_v34 = vadd.f32 %v7263_v28, %v7189_v35  ;;  %v9254_v38 = vpop.f32.mrb[147].mxu0  ;;  %v9266_v32 = vpop.f32.mrb[131].mxu1 }
 0xed6   :  { %v7343_v47 = vpop.f32.mrb[148].mxu0  ;;  %v7423_v11 = vpop.f32.mrb[132].mxu1 }
 0xed7   :  { %v7349_v63 = vadd.f32 %v7343_v47, %v7269_v34  ;;  %v9277_v59 = vpop.f32.mrb[149].mxu0  ;;  %v9289_v24 = vpop.f32.mrb[133].mxu1 }
 0xed8   :  { %v7346_v31 = vpop.f32.mrb[150].mxu0  ;;  %v7426_v1 = vpop.f32.mrb[134].mxu1 }
 0xed9   :  { %v7429_v15 = vadd.f32 %v7423_v11, %v7349_v63  ;;  %v9278_v39 = vpop.f32.mrb[151].mxu0  ;;  %v9290_v51 = vpop.f32.mrb[135].mxu1 }
 0xee6   :  { %v7503_v62 = vpop.f32.mrb[152].mxu0  ;;  %v7583_v43 = vpop.f32.mrb[136].mxu1 }
 0xee7   :  { %v7509_v49 = vadd.f32 %v7503_v62, %v7429_v15  ;;  %v9301_v55 = vpop.f32.mrb[153].mxu0  ;;  %v9313_v56 = vpop.f32.mrb[137].mxu1 }
 0xee8   :  { %v7506_v22 = vpop.f32.mrb[154].mxu0  ;;  %v7586_v37 = vpop.f32.mrb[138].mxu1 }
 0xee9   :  { %v7589_v44 = vadd.f32 %v7583_v43, %v7509_v49  ;;  %v9302_v2 = vpop.f32.mrb[155].mxu0  ;;  %v9314_v54 = vpop.f32.mrb[139].mxu1 }
 0xef6   :  { %v7663_v27 = vpop.f32.mrb[156].mxu0  ;;  %v7743_v6 = vpop.f32.mrb[140].mxu1 }
 0xef7   :  { %v7669_v58 = vadd.f32 %v7663_v27, %v7589_v44  ;;  %v9325_v7 = vpop.f32.mrb[157].mxu0  ;;  %v9337_v18 = vpop.f32.mrb[141].mxu1 }
 0xef8   :  { %v7666_v33 = vpop.f32.mrb[158].mxu0  ;;  %v7746_v20 = vpop.f32.mrb[142].mxu1 }
 0xef9   :  { %v7749_v0 = vadd.f32 %v7743_v6, %v7669_v58  ;;  %v9326_v61 = vpop.f32.mrb[159].mxu0  ;;  %v9338_v26 = vpop.f32.mrb[143].mxu1 }
 0xefb   :  { %v7757_v21 = vadd.f32 %v8342_v50, %v7749_v0 }
 0xefd   :  { %v7758_v29 = vmax.f32 %v7757_v21, 0.0 }
 0xeff   :  { %v7759_v4 = vpack.c.bf16 %v7758_v29, %v7758_v29 }
 0xf01   :  { %9348 = vmatmul.mubr.msk.bf16.vlgmr.msra.gmra.mrb[160].mxu0 %vm3986_vm14, %v7759_v4 }
 0xfd4   :  { %v7836_v23 = vpop.f32.mrb[160].mxu0 }
 0xfd5   :  { %v7837_v48 = vadd.f32 %v8343_v46, %v7836_v23  ;;  %v9349_v57 = vpop.f32.mrb[161].mxu0 }
 0xfd6   :  { %v7839_v52 = vpop.f32.mrb[162].mxu0 }
 0xfd7   :  { %v7842_v5 = vmax.f32 %v7837_v48, 0.0  ;;  %v9350_v60 = vpop.f32.mrb[163].mxu0 }
 0xfd9   :  { %v7843_v45 = vpack.c.bf16 %v7842_v5, %v7842_v5 }
 0xfdb   :  { %9356 = vmatmul.mubr.msk.bf16.vlgmr.msra.gmra.mrb[144].mxu1 %vm3529_vm12, %v7843_v45 }
0x10ae   :  { %v7904_v10 = vpop.f32.mrb[144].mxu1 }
0x10af   :  { %v7905_v16 = vadd.f32 %v8349_v13, %v7904_v10  ;;  %v9357_v14 = vpop.f32.mrb[145].mxu1 }
0x10b0   :  { %v7907_v41 = vpop.f32.mrb[146].mxu1 }
0x10b1   :  { %v9358_v30 = vpop.f32.mrb[147].mxu1  ;;  %v7911_v53 = vsel %vm7910_vm2, %v7905_v16, -inf }
0x10b2   :  { %7912 = vmax.xlane.f32.xlu1 %v7911_v53 }
0x113f   :  { %v7913_v25 = vpop.xlane.xlu1 %7912 }
0x1140   :  { %v7914_v9 = vsub.f32 %v7905_v16, %v7913_v25 }
0x1142   :  { %v7915_v3 = vmul.f32 1.442695, %v7914_v9 }
0x1144   :  { %9835 = vpow2.f32 %v7915_v3 }
0x114e   :  { %v9836_v40 = vpop.eup %9835 }
0x114f   :  { %v7917_v28 = vsel %vm7910_vm2, %v9836_v40, 0.0 }
0x1150   :  { %7918 = vadd.xlane.f32.xlu0 %v7917_v28 }
0x11dd   :  { %v7919_v35 = vpop.xlane.xlu0 %7918 }
0x11de   :  { %9837 = vrcp.f32 %v7919_v35 }
0x11e8   :  { %v9838_v42 = vpop.eup %9837 }
0x11e9   :  { %v7921_v12 = vmul.f32 %v9838_v42, %v9836_v40 }
0x11eb   :  { %7922 = vst.msk [vmem:[#allocation11] sm:$0x3] %vm7910_vm2, %v7921_v12 }
0x11ec   :  { %9858 = shalt.err (!%p9855_p4)
}
0x11ed   :  { %s9859_s27 = scalar_lea.hbm %s12564_s21, 32 }
0x11ee   :  { %p9860_p5 = scmp.ne.s32.totalorder %s12564_s21, %s9859_s27  ;;  %p9863_p6 = scmp.lt.u32.totalorder %s9859_s27, %s12564_s21 }
0x11f0   :  { %p9865_p7 = pnand %p9863_p6, %p9860_p5 }
0x11f2   :  { %9868 = shalt.err (!%p9865_p7)
}
0x11f3   :  { %7932 = dma.vmem_to_hbm [thread:$0]  %s7930_s19, 32, %s12564_s21, [#allocation12]  }
0x11f4   :  { %9869 = dma.done.wait [#allocation12], 32  }
0x11f5   :  { %9870 = vsyncadd [#allocation12], 4294967264 }
0x11f6   :  { %7936 = vsyncpa [#allocation12], 1 }

</bundles_post_ra>
